<compile_context>
chip_gen: v5e
topology: v5e:2x2
jax: 0.10.0
libtpu: 0.0.40
codegen_flags: <defaults>
</compile_context>

<pallas_src>
import functools

import jax
import jax.numpy as jnp
from jax.experimental import pallas as pl
from jax.experimental.pallas import tpu as pltpu

HIDDEN = 128          # LSTMCell hidden size
FC_DIM = 32           # fc1/fc2 width
CONV_OUT = 6          # conv out_channels
AUX_DIM = 3           # last_action, last_extrinsic_reward, last_intrinsic_reward
KH = KW = 3           # conv kernel
POLICY_PAD = 128      # lane-dense policy output width
TB_MAX = 128          # batch block (keeps the 36 hoisted tap slabs <= ~4.6 MiB of VMEM spill;
                      # safe on all of v5e/v6e/v7x default scoped-VMEM limits)


def _round_up(x, m):
    return ((x + m - 1) // m) * m


# ----------------------------------------------------------------------------- kernel
def agent_kernel(x_ref, aux_ref, hx_ref, cx_ref,
                 convw_ref, convb_ref, w1_ref, b1_ref, w2_ref, b2_ref,
                 wihx_ref, wiha_ref, bihh_ref, whh_ref, wp_ref, bp_ref,
                 policy_ref, hxo_ref, cxo_ref, *, img_w):
    f32 = jnp.float32
    C = x_ref.shape[0]
    HW = w1_ref.shape[1]          # H*W output frame (fc1 weights are zero at invalid positions)
    NTAP = C * KH * KW

    # conv(3x3, stride 1, VALID) + ReLU, fused with fc1.
    # Slice each shifted tap slab once (XLU lane-shift relayout happens 36x, not 216x); every
    # output channel then accumulates NTAP scalar*vreg MACs on the VPU, followed by a single
    # (TB, HW) @ (HW, 32) MXU matmul against zero-padded frame-layout fc1 weights.
    taps = []
    for c in range(C):
        xc = x_ref[c]                                      # (TB, HW + pad), loaded once per channel
        for kh in range(KH):
            base = kh * img_w
            for kw in range(KW):
                d = base + kw                              # static lane shift
                taps.append(xc[:, d:d + HW])               # (TB, HW)

    h1 = b1_ref[...]                                       # (1, 32)
    for o in range(CONV_OUT):
        acc = convw_ref[o, 0] * taps[0]                    # SMEM scalar * vreg slab
        for t in range(1, NTAP):
            acc = acc + convw_ref[o, t] * taps[t]
        conv_o = jnp.maximum(acc + convb_ref[o], 0.0)      # (TB, HW)
        h1 = h1 + jnp.dot(conv_o, w1_ref[o], preferred_element_type=f32)
    h1 = jnp.maximum(h1, 0.0)                              # (TB, 32)

    # fc2 + ReLU
    h2 = jnp.maximum(
        jnp.dot(h1, w2_ref[...], preferred_element_type=f32) + b2_ref[...], 0.0)

    # LSTMCell: gates = [h2, aux] @ W_ih^T + b_ih + hx @ W_hh^T + b_hh  (i, f, g, o order).
    # Biases are pre-added on the host; the 3-wide aux block uses VPU broadcast MACs.
    gates = (jnp.dot(h2, wihx_ref[...], preferred_element_type=f32)
             + jnp.dot(hx_ref[...], whh_ref[...], preferred_element_type=f32)
             + bihh_ref[...])                              # (TB, 4*HIDDEN)
    aux = aux_ref[...]                                     # (TB, 3)
    wiha = wiha_ref[...]                                   # (3, 4*HIDDEN)
    for k in range(AUX_DIM):
        gates = gates + aux[:, k:k + 1] * wiha[k:k + 1, :]

    i_g = jax.nn.sigmoid(gates[:, 0 * HIDDEN:1 * HIDDEN])
    f_g = jax.nn.sigmoid(gates[:, 1 * HIDDEN:2 * HIDDEN])
    g_g = jnp.tanh(gates[:, 2 * HIDDEN:3 * HIDDEN])
    o_g = jax.nn.sigmoid(gates[:, 3 * HIDDEN:4 * HIDDEN])

    cx_new = f_g * cx_ref[...] + i_g * g_g
    hx_new = o_g * jnp.tanh(cx_new)

    policy_ref[...] = (jnp.dot(hx_new, wp_ref[...], preferred_element_type=f32)
                       + bp_ref[...])                      # (TB, 128) lane-dense
    hxo_ref[...] = hx_new
    cxo_ref[...] = cx_new


# ----------------------------------------------------------------------------- wrapper
@jax.jit
def agent_forward_pallas(x, last_action, last_er, last_ir, hx, cx, params):
    f32 = jnp.float32
    B, C, H, W = x.shape
    OH, OW = H - 2, W - 2
    HW = H * W
    HWP = HW + 2 * W + 2                       # lane pad so every tap is a plain static slice
    nA = params["policy_b"].shape[0]
    NP = max(POLICY_PAD, _round_up(nA, 128))

    TB = min(TB_MAX, _round_up(B, 8))          # batch block
    Bp = _round_up(B, TB)
    grid = (Bp // TB,)

    # --- per-step inputs (layout only, no compute) ---
    x_flat = jnp.transpose(x.astype(f32), (1, 0, 2, 3)).reshape(C, B, HW)
    x_cb = jnp.zeros((C, Bp, HWP), f32).at[:, :B, :HW].set(x_flat)          # (C, Bp, HWP)

    aux = jnp.stack([last_action.reshape(-1), last_er.reshape(-1),
                     last_ir.reshape(-1)], axis=1).astype(f32)              # (B, 3)
    aux = jnp.pad(aux, ((0, Bp - B), (0, 0)))
    hx_p = jnp.pad(hx.astype(f32), ((0, Bp - B), (0, 0)))
    cx_p = jnp.pad(cx.astype(f32), ((0, Bp - B), (0, 0)))

    # --- weights (pre-packed on host) ---
    convw = params["conv_w"].reshape(CONV_OUT, C * KH * KW).astype(f32)     # (6, C*9)  SMEM
    convb = params["conv_b"].astype(f32)                                    # (6,)      SMEM
    # fc1 weights re-indexed onto the padded HxW frame: (o, h*W + w, f), zero at invalid positions.
    w1 = params["fc1_w"].reshape(FC_DIM, CONV_OUT, OH, OW).transpose(1, 2, 3, 0)
    w1p = (jnp.zeros((CONV_OUT, H, W, FC_DIM), f32)
           .at[:, :OH, :OW, :].set(w1.astype(f32))
           .reshape(CONV_OUT, HW, FC_DIM))                                  # (6, HW, 32)
    b1 = params["fc1_b"].reshape(1, FC_DIM).astype(f32)
    w2t = params["fc2_w"].T.astype(f32)                                     # (32, 32)
    b2 = params["fc2_b"].reshape(1, FC_DIM).astype(f32)
    wih_t = params["w_ih"].T.astype(f32)                                    # (35, 512)
    wihx = wih_t[:FC_DIM]                                                   # (32, 512)
    wiha = wih_t[FC_DIM:]                                                   # (3, 512)
    bihh = (params["b_ih"] + params["b_hh"]).reshape(1, 4 * HIDDEN).astype(f32)
    whht = params["w_hh"].T.astype(f32)                                     # (128, 512)
    wp = jnp.zeros((HIDDEN, NP), f32).at[:, :nA].set(params["policy_w"].T.astype(f32))
    bp = jnp.zeros((1, NP), f32).at[:, :nA].set(params["policy_b"].reshape(1, nA).astype(f32))

    inputs = [x_cb, aux, hx_p, cx_p,
              convw, convb, w1p, b1, w2t, b2,
              wihx, wiha, bihh, whht, wp, bp]

    def full_vmem(a):
        nd = a.ndim
        return pl.BlockSpec(tuple(a.shape), lambda i, _nd=nd: (0,) * _nd)

    def full_smem(a):
        nd = a.ndim
        return pl.BlockSpec(tuple(a.shape), lambda i, _nd=nd: (0,) * _nd,
                            memory_space=pltpu.MemorySpace.SMEM)

    in_specs = [pl.BlockSpec((C, TB, HWP), lambda i: (0, i, 0)),
                pl.BlockSpec((TB, AUX_DIM), lambda i: (i, 0)),
                pl.BlockSpec((TB, HIDDEN), lambda i: (i, 0)),
                pl.BlockSpec((TB, HIDDEN), lambda i: (i, 0)),
                full_smem(convw), full_smem(convb),
                full_vmem(w1p), full_vmem(b1), full_vmem(w2t), full_vmem(b2),
                full_vmem(wihx), full_vmem(wiha), full_vmem(bihh), full_vmem(whht),
                full_vmem(wp), full_vmem(bp)]
    out_specs = [pl.BlockSpec((TB, NP), lambda i: (i, 0)),
                 pl.BlockSpec((TB, HIDDEN), lambda i: (i, 0)),
                 pl.BlockSpec((TB, HIDDEN), lambda i: (i, 0))]
    out_shape = (jax.ShapeDtypeStruct((Bp, NP), f32),
                 jax.ShapeDtypeStruct((Bp, HIDDEN), f32),
                 jax.ShapeDtypeStruct((Bp, HIDDEN), f32))

    kernel = functools.partial(agent_kernel, img_w=W)

    policy_pad, hx_new, cx_new = pl.pallas_call(
        kernel,
        out_shape=out_shape,
        grid_spec=pltpu.PrefetchScalarGridSpec(
            num_scalar_prefetch=0,
            grid=grid,
            in_specs=in_specs,
            out_specs=out_specs),
        input_output_aliases={2: 1, 3: 2},     # hx, cx updated in place
        compiler_params=pltpu.CompilerParams(dimension_semantics=("parallel",)),
    )(*inputs)

    return policy_pad[:B, :nA], hx_new[:B], cx_new[:B]


# ----------------------------------------------------------------------------- reference
def agent_forward_reference(x, last_action, last_er, last_ir, hx, cx, params):
    """Pure-JAX replica of the PyTorch forward (NCHW) for correctness checking."""
    hi = jax.lax.Precision.HIGHEST
    conv = jax.lax.conv_general_dilated(
        x, params["conv_w"], window_strides=(1, 1), padding="VALID",
        dimension_numbers=("NCHW", "OIHW", "NCHW"), precision=hi)
    conv = jax.nn.relu(conv + params["conv_b"][None, :, None, None])
    flat = conv.reshape(conv.shape[0], -1)                          # (B, 6*OH*OW), (c,h,w) order
    h1 = jax.nn.relu(jnp.dot(flat, params["fc1_w"].T, precision=hi) + params["fc1_b"])
    h2 = jax.nn.relu(jnp.dot(h1, params["fc2_w"].T, precision=hi) + params["fc2_b"])
    lstm_in = jnp.concatenate(
        [h2, last_action.reshape(-1, 1), last_er.reshape(-1, 1), last_ir.reshape(-1, 1)],
        axis=1)
    gates = (jnp.dot(lstm_in, params["w_ih"].T, precision=hi) + params["b_ih"]
             + jnp.dot(hx, params["w_hh"].T, precision=hi) + params["b_hh"])
    i_g, f_g, g_g, o_g = jnp.split(gates, 4, axis=1)
    cx_new = jax.nn.sigmoid(f_g) * cx + jax.nn.sigmoid(i_g) * jnp.tanh(g_g)
    hx_new = jax.nn.sigmoid(o_g) * jnp.tanh(cx_new)
    policy = jnp.dot(hx_new, params["policy_w"].T, precision=hi) + params["policy_b"]
    return policy, hx_new, cx_new


# ----------------------------------------------------------------------------- params
def init_params(key, input_shape, num_actions):
    C, H, W = input_shape
    flat = CONV_OUT * (H - 2) * (W - 2)
    ks = jax.random.split(key, 12)

    def unif(k, shape, fan_in):
        b = 1.0 / (fan_in ** 0.5)
        return jax.random.uniform(k, shape, jnp.float32, -b, b)

    return {
        "conv_w": unif(ks[0], (CONV_OUT, C, 3, 3), C * 9),
        "conv_b": unif(ks[1], (CONV_OUT,), C * 9),
        "fc1_w": unif(ks[2], (FC_DIM, flat), flat),
        "fc1_b": unif(ks[3], (FC_DIM,), flat),
        "fc2_w": unif(ks[4], (FC_DIM, FC_DIM), FC_DIM),
        "fc2_b": unif(ks[5], (FC_DIM,), FC_DIM),
        "w_ih": unif(ks[6], (4 * HIDDEN, FC_DIM + AUX_DIM), HIDDEN),
        "w_hh": unif(ks[7], (4 * HIDDEN, HIDDEN), HIDDEN),
        "b_ih": unif(ks[8], (4 * HIDDEN,), HIDDEN),
        "b_hh": unif(ks[9], (4 * HIDDEN,), HIDDEN),
        "policy_w": unif(ks[10], (num_actions, HIDDEN), HIDDEN),
        "policy_b": unif(ks[11], (num_actions,), HIDDEN),
    }


# ----------------------------------------------------------------------------- main
if __name__ == "__main__":
    B, C, H, W = 2, 4, 16, 16
    num_actions = 6

    key = jax.random.PRNGKey(0)
    kp, kx, ka, ke, ki, kh, kc = jax.random.split(key, 7)

    params = init_params(kp, (C, H, W), num_actions)
    x = jax.random.normal(kx, (B, C, H, W), jnp.float32)
    last_action = jax.random.randint(ka, (B,), 0, num_actions).astype(jnp.float32)
    last_er = jax.random.normal(ke, (B,), jnp.float32)
    last_ir = jax.random.normal(ki, (B,), jnp.float32)
    hx = 0.1 * jax.random.normal(kh, (B, HIDDEN), jnp.float32)
    cx = 0.1 * jax.random.normal(kc, (B, HIDDEN), jnp.float32)

    policy, hx_new, cx_new = agent_forward_pallas(
        x, last_action, last_er, last_ir, hx, cx, params)
    jax.block_until_ready((policy, hx_new, cx_new))

    ref_p, ref_h, ref_c = agent_forward_reference(
        x, last_action, last_er, last_ir, hx, cx, params)

    assert policy.shape == (B, num_actions)
    assert hx_new.shape == (B, HIDDEN) and cx_new.shape == (B, HIDDEN)
    assert jnp.allclose(policy, ref_p, atol=2e-3, rtol=2e-3)
    assert jnp.allclose(hx_new, ref_h, atol=2e-3, rtol=2e-3)
    assert jnp.allclose(cx_new, ref_c, atol=2e-3, rtol=2e-3)

    print("KERNEL_OK")
</pallas_src>

<mosaic_0001>
module attributes {stable_mosaic.version = 11 : i64} {
  func.func @agent_kernel(%arg0: i32, %arg1: memref<4x8x290xf32, #tpu.memory_space<vmem>>, %arg2: memref<8x3xf32, #tpu.memory_space<vmem>>, %arg3: memref<8x128xf32, #tpu.memory_space<vmem>>, %arg4: memref<8x128xf32, #tpu.memory_space<vmem>>, %arg5: memref<6x36xf32, #tpu.memory_space<smem>>, %arg6: memref<6xf32, #tpu.memory_space<smem>>, %arg7: memref<6x256x32xf32, #tpu.memory_space<vmem>>, %arg8: memref<1x32xf32, #tpu.memory_space<vmem>>, %arg9: memref<32x32xf32, #tpu.memory_space<vmem>>, %arg10: memref<1x32xf32, #tpu.memory_space<vmem>>, %arg11: memref<32x512xf32, #tpu.memory_space<vmem>>, %arg12: memref<3x512xf32, #tpu.memory_space<vmem>>, %arg13: memref<1x512xf32, #tpu.memory_space<vmem>>, %arg14: memref<128x512xf32, #tpu.memory_space<vmem>>, %arg15: memref<128x128xf32, #tpu.memory_space<vmem>>, %arg16: memref<1x128xf32, #tpu.memory_space<vmem>>, %arg17: memref<8x128xf32, #tpu.memory_space<vmem>>, %arg18: memref<8x128xf32, #tpu.memory_space<vmem>>, %arg19: memref<8x128xf32, #tpu.memory_space<vmem>>) attributes {dimension_semantics = [#tpu.dimension_semantics<parallel>], iteration_bounds = array<i64: 1>, scalar_prefetch = 0 : i64, scratch_operands = 0 : i64, tpu.core_type = #tpu.core_type<tc>, window_params = [{transform_indices = @transform_0, window_bounds = array<i64: 4, 8, 290>}, {transform_indices = @transform_1, window_bounds = array<i64: 8, 3>}, {transform_indices = @transform_2, window_bounds = array<i64: 8, 128>}, {transform_indices = @transform_3, window_bounds = array<i64: 8, 128>}, {transform_indices = @transform_4, window_bounds = array<i64: 6, 36>}, {transform_indices = @transform_5, window_bounds = array<i64: 6>}, {pipeline_mode = #tpu.pipeline_mode<synchronous>, transform_indices = @transform_6, window_bounds = array<i64: 6, 256, 32>}, {pipeline_mode = #tpu.pipeline_mode<synchronous>, transform_indices = @transform_7, window_bounds = array<i64: 1, 32>}, {pipeline_mode = #tpu.pipeline_mode<synchronous>, transform_indices = @transform_8, window_bounds = array<i64: 32, 32>}, {pipeline_mode = #tpu.pipeline_mode<synchronous>, transform_indices = @transform_9, window_bounds = array<i64: 1, 32>}, {pipeline_mode = #tpu.pipeline_mode<synchronous>, transform_indices = @transform_10, window_bounds = array<i64: 32, 512>}, {pipeline_mode = #tpu.pipeline_mode<synchronous>, transform_indices = @transform_11, window_bounds = array<i64: 3, 512>}, {pipeline_mode = #tpu.pipeline_mode<synchronous>, transform_indices = @transform_12, window_bounds = array<i64: 1, 512>}, {pipeline_mode = #tpu.pipeline_mode<synchronous>, transform_indices = @transform_13, window_bounds = array<i64: 128, 512>}, {pipeline_mode = #tpu.pipeline_mode<synchronous>, transform_indices = @transform_14, window_bounds = array<i64: 128, 128>}, {pipeline_mode = #tpu.pipeline_mode<synchronous>, transform_indices = @transform_15, window_bounds = array<i64: 1, 128>}, {transform_indices = @transform_16, window_bounds = array<i64: 8, 128>}, {transform_indices = @transform_17, window_bounds = array<i64: 8, 128>}, {transform_indices = @transform_18, window_bounds = array<i64: 8, 128>}]} {
    %c0 = arith.constant 0 : index
    %c0_0 = arith.constant 0 : index
    %c0_1 = arith.constant 0 : index
    %0 = vector.load %arg1[%c0, %c0_0, %c0_1] : memref<4x8x290xf32, #tpu.memory_space<vmem>>, vector<1x8x290xf32>
    %1 = vector.shape_cast %0 : vector<1x8x290xf32> to vector<8x290xf32>
    %2 = vector.extract_strided_slice %1 {offsets = [0, 0], sizes = [8, 256], strides = [1, 1]} : vector<8x290xf32> to vector<8x256xf32>
    %3 = vector.extract_strided_slice %1 {offsets = [0, 1], sizes = [8, 256], strides = [1, 1]} : vector<8x290xf32> to vector<8x256xf32>
    %4 = vector.extract_strided_slice %1 {offsets = [0, 2], sizes = [8, 256], strides = [1, 1]} : vector<8x290xf32> to vector<8x256xf32>
    %5 = vector.extract_strided_slice %1 {offsets = [0, 16], sizes = [8, 256], strides = [1, 1]} : vector<8x290xf32> to vector<8x256xf32>
    %6 = vector.extract_strided_slice %1 {offsets = [0, 17], sizes = [8, 256], strides = [1, 1]} : vector<8x290xf32> to vector<8x256xf32>
    %7 = vector.extract_strided_slice %1 {offsets = [0, 18], sizes = [8, 256], strides = [1, 1]} : vector<8x290xf32> to vector<8x256xf32>
    %8 = vector.extract_strided_slice %1 {offsets = [0, 32], sizes = [8, 256], strides = [1, 1]} : vector<8x290xf32> to vector<8x256xf32>
    %9 = vector.extract_strided_slice %1 {offsets = [0, 33], sizes = [8, 256], strides = [1, 1]} : vector<8x290xf32> to vector<8x256xf32>
    %10 = vector.extract_strided_slice %1 {offsets = [0, 34], sizes = [8, 256], strides = [1, 1]} : vector<8x290xf32> to vector<8x256xf32>
    %c1 = arith.constant 1 : index
    %c0_2 = arith.constant 0 : index
    %c0_3 = arith.constant 0 : index
    %11 = vector.load %arg1[%c1, %c0_2, %c0_3] : memref<4x8x290xf32, #tpu.memory_space<vmem>>, vector<1x8x290xf32>
    %12 = vector.shape_cast %11 : vector<1x8x290xf32> to vector<8x290xf32>
    %13 = vector.extract_strided_slice %12 {offsets = [0, 0], sizes = [8, 256], strides = [1, 1]} : vector<8x290xf32> to vector<8x256xf32>
    %14 = vector.extract_strided_slice %12 {offsets = [0, 1], sizes = [8, 256], strides = [1, 1]} : vector<8x290xf32> to vector<8x256xf32>
    %15 = vector.extract_strided_slice %12 {offsets = [0, 2], sizes = [8, 256], strides = [1, 1]} : vector<8x290xf32> to vector<8x256xf32>
    %16 = vector.extract_strided_slice %12 {offsets = [0, 16], sizes = [8, 256], strides = [1, 1]} : vector<8x290xf32> to vector<8x256xf32>
    %17 = vector.extract_strided_slice %12 {offsets = [0, 17], sizes = [8, 256], strides = [1, 1]} : vector<8x290xf32> to vector<8x256xf32>
    %18 = vector.extract_strided_slice %12 {offsets = [0, 18], sizes = [8, 256], strides = [1, 1]} : vector<8x290xf32> to vector<8x256xf32>
    %19 = vector.extract_strided_slice %12 {offsets = [0, 32], sizes = [8, 256], strides = [1, 1]} : vector<8x290xf32> to vector<8x256xf32>
    %20 = vector.extract_strided_slice %12 {offsets = [0, 33], sizes = [8, 256], strides = [1, 1]} : vector<8x290xf32> to vector<8x256xf32>
    %21 = vector.extract_strided_slice %12 {offsets = [0, 34], sizes = [8, 256], strides = [1, 1]} : vector<8x290xf32> to vector<8x256xf32>
    %c2 = arith.constant 2 : index
    %c0_4 = arith.constant 0 : index
    %c0_5 = arith.constant 0 : index
    %22 = vector.load %arg1[%c2, %c0_4, %c0_5] : memref<4x8x290xf32, #tpu.memory_space<vmem>>, vector<1x8x290xf32>
    %23 = vector.shape_cast %22 : vector<1x8x290xf32> to vector<8x290xf32>
    %24 = vector.extract_strided_slice %23 {offsets = [0, 0], sizes = [8, 256], strides = [1, 1]} : vector<8x290xf32> to vector<8x256xf32>
    %25 = vector.extract_strided_slice %23 {offsets = [0, 1], sizes = [8, 256], strides = [1, 1]} : vector<8x290xf32> to vector<8x256xf32>
    %26 = vector.extract_strided_slice %23 {offsets = [0, 2], sizes = [8, 256], strides = [1, 1]} : vector<8x290xf32> to vector<8x256xf32>
    %27 = vector.extract_strided_slice %23 {offsets = [0, 16], sizes = [8, 256], strides = [1, 1]} : vector<8x290xf32> to vector<8x256xf32>
    %28 = vector.extract_strided_slice %23 {offsets = [0, 17], sizes = [8, 256], strides = [1, 1]} : vector<8x290xf32> to vector<8x256xf32>
    %29 = vector.extract_strided_slice %23 {offsets = [0, 18], sizes = [8, 256], strides = [1, 1]} : vector<8x290xf32> to vector<8x256xf32>
    %30 = vector.extract_strided_slice %23 {offsets = [0, 32], sizes = [8, 256], strides = [1, 1]} : vector<8x290xf32> to vector<8x256xf32>
    %31 = vector.extract_strided_slice %23 {offsets = [0, 33], sizes = [8, 256], strides = [1, 1]} : vector<8x290xf32> to vector<8x256xf32>
    %32 = vector.extract_strided_slice %23 {offsets = [0, 34], sizes = [8, 256], strides = [1, 1]} : vector<8x290xf32> to vector<8x256xf32>
    %c3 = arith.constant 3 : index
    %c0_6 = arith.constant 0 : index
    %c0_7 = arith.constant 0 : index
    %33 = vector.load %arg1[%c3, %c0_6, %c0_7] : memref<4x8x290xf32, #tpu.memory_space<vmem>>, vector<1x8x290xf32>
    %34 = vector.shape_cast %33 : vector<1x8x290xf32> to vector<8x290xf32>
    %35 = vector.extract_strided_slice %34 {offsets = [0, 0], sizes = [8, 256], strides = [1, 1]} : vector<8x290xf32> to vector<8x256xf32>
    %36 = vector.extract_strided_slice %34 {offsets = [0, 1], sizes = [8, 256], strides = [1, 1]} : vector<8x290xf32> to vector<8x256xf32>
    %37 = vector.extract_strided_slice %34 {offsets = [0, 2], sizes = [8, 256], strides = [1, 1]} : vector<8x290xf32> to vector<8x256xf32>
    %38 = vector.extract_strided_slice %34 {offsets = [0, 16], sizes = [8, 256], strides = [1, 1]} : vector<8x290xf32> to vector<8x256xf32>
    %39 = vector.extract_strided_slice %34 {offsets = [0, 17], sizes = [8, 256], strides = [1, 1]} : vector<8x290xf32> to vector<8x256xf32>
    %40 = vector.extract_strided_slice %34 {offsets = [0, 18], sizes = [8, 256], strides = [1, 1]} : vector<8x290xf32> to vector<8x256xf32>
    %41 = vector.extract_strided_slice %34 {offsets = [0, 32], sizes = [8, 256], strides = [1, 1]} : vector<8x290xf32> to vector<8x256xf32>
    %42 = vector.extract_strided_slice %34 {offsets = [0, 33], sizes = [8, 256], strides = [1, 1]} : vector<8x290xf32> to vector<8x256xf32>
    %43 = vector.extract_strided_slice %34 {offsets = [0, 34], sizes = [8, 256], strides = [1, 1]} : vector<8x290xf32> to vector<8x256xf32>
    %c0_8 = arith.constant 0 : index
    %c0_9 = arith.constant 0 : index
    %44 = vector.load %arg8[%c0_8, %c0_9] : memref<1x32xf32, #tpu.memory_space<vmem>>, vector<1x32xf32>
    %c0_10 = arith.constant 0 : index
    %c0_11 = arith.constant 0 : index
    %45 = memref.load %arg5[%c0_10, %c0_11] : memref<6x36xf32, #tpu.memory_space<smem>>
    %46 = vector.broadcast %45 : f32 to vector<8x256xf32>
    %47 = arith.mulf %46, %2 : vector<8x256xf32>
    %c0_12 = arith.constant 0 : index
    %c1_13 = arith.constant 1 : index
    %48 = memref.load %arg5[%c0_12, %c1_13] : memref<6x36xf32, #tpu.memory_space<smem>>
    %49 = vector.broadcast %48 : f32 to vector<8x256xf32>
    %50 = arith.mulf %49, %3 : vector<8x256xf32>
    %51 = arith.addf %47, %50 : vector<8x256xf32>
    %c0_14 = arith.constant 0 : index
    %c2_15 = arith.constant 2 : index
    %52 = memref.load %arg5[%c0_14, %c2_15] : memref<6x36xf32, #tpu.memory_space<smem>>
    %53 = vector.broadcast %52 : f32 to vector<8x256xf32>
    %54 = arith.mulf %53, %4 : vector<8x256xf32>
    %55 = arith.addf %51, %54 : vector<8x256xf32>
    %c0_16 = arith.constant 0 : index
    %c3_17 = arith.constant 3 : index
    %56 = memref.load %arg5[%c0_16, %c3_17] : memref<6x36xf32, #tpu.memory_space<smem>>
    %57 = vector.broadcast %56 : f32 to vector<8x256xf32>
    %58 = arith.mulf %57, %5 : vector<8x256xf32>
    %59 = arith.addf %55, %58 : vector<8x256xf32>
    %c0_18 = arith.constant 0 : index
    %c4 = arith.constant 4 : index
    %60 = memref.load %arg5[%c0_18, %c4] : memref<6x36xf32, #tpu.memory_space<smem>>
    %61 = vector.broadcast %60 : f32 to vector<8x256xf32>
    %62 = arith.mulf %61, %6 : vector<8x256xf32>
    %63 = arith.addf %59, %62 : vector<8x256xf32>
    %c0_19 = arith.constant 0 : index
    %c5 = arith.constant 5 : index
    %64 = memref.load %arg5[%c0_19, %c5] : memref<6x36xf32, #tpu.memory_space<smem>>
    %65 = vector.broadcast %64 : f32 to vector<8x256xf32>
    %66 = arith.mulf %65, %7 : vector<8x256xf32>
    %67 = arith.addf %63, %66 : vector<8x256xf32>
    %c0_20 = arith.constant 0 : index
    %c6 = arith.constant 6 : index
    %68 = memref.load %arg5[%c0_20, %c6] : memref<6x36xf32, #tpu.memory_space<smem>>
    %69 = vector.broadcast %68 : f32 to vector<8x256xf32>
    %70 = arith.mulf %69, %8 : vector<8x256xf32>
    %71 = arith.addf %67, %70 : vector<8x256xf32>
    %c0_21 = arith.constant 0 : index
    %c7 = arith.constant 7 : index
    %72 = memref.load %arg5[%c0_21, %c7] : memref<6x36xf32, #tpu.memory_space<smem>>
    %73 = vector.broadcast %72 : f32 to vector<8x256xf32>
    %74 = arith.mulf %73, %9 : vector<8x256xf32>
    %75 = arith.addf %71, %74 : vector<8x256xf32>
    %c0_22 = arith.constant 0 : index
    %c8 = arith.constant 8 : index
    %76 = memref.load %arg5[%c0_22, %c8] : memref<6x36xf32, #tpu.memory_space<smem>>
    %77 = vector.broadcast %76 : f32 to vector<8x256xf32>
    %78 = arith.mulf %77, %10 : vector<8x256xf32>
    %79 = arith.addf %75, %78 : vector<8x256xf32>
    %c0_23 = arith.constant 0 : index
    %c9 = arith.constant 9 : index
    %80 = memref.load %arg5[%c0_23, %c9] : memref<6x36xf32, #tpu.memory_space<smem>>
    %81 = vector.broadcast %80 : f32 to vector<8x256xf32>
    %82 = arith.mulf %81, %13 : vector<8x256xf32>
    %83 = arith.addf %79, %82 : vector<8x256xf32>
    %c0_24 = arith.constant 0 : index
    %c10 = arith.constant 10 : index
    %84 = memref.load %arg5[%c0_24, %c10] : memref<6x36xf32, #tpu.memory_space<smem>>
    %85 = vector.broadcast %84 : f32 to vector<8x256xf32>
    %86 = arith.mulf %85, %14 : vector<8x256xf32>
    %87 = arith.addf %83, %86 : vector<8x256xf32>
    %c0_25 = arith.constant 0 : index
    %c11 = arith.constant 11 : index
    %88 = memref.load %arg5[%c0_25, %c11] : memref<6x36xf32, #tpu.memory_space<smem>>
    %89 = vector.broadcast %88 : f32 to vector<8x256xf32>
    %90 = arith.mulf %89, %15 : vector<8x256xf32>
    %91 = arith.addf %87, %90 : vector<8x256xf32>
    %c0_26 = arith.constant 0 : index
    %c12 = arith.constant 12 : index
    %92 = memref.load %arg5[%c0_26, %c12] : memref<6x36xf32, #tpu.memory_space<smem>>
    %93 = vector.broadcast %92 : f32 to vector<8x256xf32>
    %94 = arith.mulf %93, %16 : vector<8x256xf32>
    %95 = arith.addf %91, %94 : vector<8x256xf32>
    %c0_27 = arith.constant 0 : index
    %c13 = arith.constant 13 : index
    %96 = memref.load %arg5[%c0_27, %c13] : memref<6x36xf32, #tpu.memory_space<smem>>
    %97 = vector.broadcast %96 : f32 to vector<8x256xf32>
    %98 = arith.mulf %97, %17 : vector<8x256xf32>
    %99 = arith.addf %95, %98 : vector<8x256xf32>
    %c0_28 = arith.constant 0 : index
    %c14 = arith.constant 14 : index
    %100 = memref.load %arg5[%c0_28, %c14] : memref<6x36xf32, #tpu.memory_space<smem>>
    %101 = vector.broadcast %100 : f32 to vector<8x256xf32>
    %102 = arith.mulf %101, %18 : vector<8x256xf32>
    %103 = arith.addf %99, %102 : vector<8x256xf32>
    %c0_29 = arith.constant 0 : index
    %c15 = arith.constant 15 : index
    %104 = memref.load %arg5[%c0_29, %c15] : memref<6x36xf32, #tpu.memory_space<smem>>
    %105 = vector.broadcast %104 : f32 to vector<8x256xf32>
    %106 = arith.mulf %105, %19 : vector<8x256xf32>
    %107 = arith.addf %103, %106 : vector<8x256xf32>
    %c0_30 = arith.constant 0 : index
    %c16 = arith.constant 16 : index
    %108 = memref.load %arg5[%c0_30, %c16] : memref<6x36xf32, #tpu.memory_space<smem>>
    %109 = vector.broadcast %108 : f32 to vector<8x256xf32>
    %110 = arith.mulf %109, %20 : vector<8x256xf32>
    %111 = arith.addf %107, %110 : vector<8x256xf32>
    %c0_31 = arith.constant 0 : index
    %c17 = arith.constant 17 : index
    %112 = memref.load %arg5[%c0_31, %c17] : memref<6x36xf32, #tpu.memory_space<smem>>
    %113 = vector.broadcast %112 : f32 to vector<8x256xf32>
    %114 = arith.mulf %113, %21 : vector<8x256xf32>
    %115 = arith.addf %111, %114 : vector<8x256xf32>
    %c0_32 = arith.constant 0 : index
    %c18 = arith.constant 18 : index
    %116 = memref.load %arg5[%c0_32, %c18] : memref<6x36xf32, #tpu.memory_space<smem>>
    %117 = vector.broadcast %116 : f32 to vector<8x256xf32>
    %118 = arith.mulf %117, %24 : vector<8x256xf32>
    %119 = arith.addf %115, %118 : vector<8x256xf32>
    %c0_33 = arith.constant 0 : index
    %c19 = arith.constant 19 : index
    %120 = memref.load %arg5[%c0_33, %c19] : memref<6x36xf32, #tpu.memory_space<smem>>
    %121 = vector.broadcast %120 : f32 to vector<8x256xf32>
    %122 = arith.mulf %121, %25 : vector<8x256xf32>
    %123 = arith.addf %119, %122 : vector<8x256xf32>
    %c0_34 = arith.constant 0 : index
    %c20 = arith.constant 20 : index
    %124 = memref.load %arg5[%c0_34, %c20] : memref<6x36xf32, #tpu.memory_space<smem>>
    %125 = vector.broadcast %124 : f32 to vector<8x256xf32>
    %126 = arith.mulf %125, %26 : vector<8x256xf32>
    %127 = arith.addf %123, %126 : vector<8x256xf32>
    %c0_35 = arith.constant 0 : index
    %c21 = arith.constant 21 : index
    %128 = memref.load %arg5[%c0_35, %c21] : memref<6x36xf32, #tpu.memory_space<smem>>
    %129 = vector.broadcast %128 : f32 to vector<8x256xf32>
    %130 = arith.mulf %129, %27 : vector<8x256xf32>
    %131 = arith.addf %127, %130 : vector<8x256xf32>
    %c0_36 = arith.constant 0 : index
    %c22 = arith.constant 22 : index
    %132 = memref.load %arg5[%c0_36, %c22] : memref<6x36xf32, #tpu.memory_space<smem>>
    %133 = vector.broadcast %132 : f32 to vector<8x256xf32>
    %134 = arith.mulf %133, %28 : vector<8x256xf32>
    %135 = arith.addf %131, %134 : vector<8x256xf32>
    %c0_37 = arith.constant 0 : index
    %c23 = arith.constant 23 : index
    %136 = memref.load %arg5[%c0_37, %c23] : memref<6x36xf32, #tpu.memory_space<smem>>
    %137 = vector.broadcast %136 : f32 to vector<8x256xf32>
    %138 = arith.mulf %137, %29 : vector<8x256xf32>
    %139 = arith.addf %135, %138 : vector<8x256xf32>
    %c0_38 = arith.constant 0 : index
    %c24 = arith.constant 24 : index
    %140 = memref.load %arg5[%c0_38, %c24] : memref<6x36xf32, #tpu.memory_space<smem>>
    %141 = vector.broadcast %140 : f32 to vector<8x256xf32>
    %142 = arith.mulf %141, %30 : vector<8x256xf32>
    %143 = arith.addf %139, %142 : vector<8x256xf32>
    %c0_39 = arith.constant 0 : index
    %c25 = arith.constant 25 : index
    %144 = memref.load %arg5[%c0_39, %c25] : memref<6x36xf32, #tpu.memory_space<smem>>
    %145 = vector.broadcast %144 : f32 to vector<8x256xf32>
    %146 = arith.mulf %145, %31 : vector<8x256xf32>
    %147 = arith.addf %143, %146 : vector<8x256xf32>
    %c0_40 = arith.constant 0 : index
    %c26 = arith.constant 26 : index
    %148 = memref.load %arg5[%c0_40, %c26] : memref<6x36xf32, #tpu.memory_space<smem>>
    %149 = vector.broadcast %148 : f32 to vector<8x256xf32>
    %150 = arith.mulf %149, %32 : vector<8x256xf32>
    %151 = arith.addf %147, %150 : vector<8x256xf32>
    %c0_41 = arith.constant 0 : index
    %c27 = arith.constant 27 : index
    %152 = memref.load %arg5[%c0_41, %c27] : memref<6x36xf32, #tpu.memory_space<smem>>
    %153 = vector.broadcast %152 : f32 to vector<8x256xf32>
    %154 = arith.mulf %153, %35 : vector<8x256xf32>
    %155 = arith.addf %151, %154 : vector<8x256xf32>
    %c0_42 = arith.constant 0 : index
    %c28 = arith.constant 28 : index
    %156 = memref.load %arg5[%c0_42, %c28] : memref<6x36xf32, #tpu.memory_space<smem>>
    %157 = vector.broadcast %156 : f32 to vector<8x256xf32>
    %158 = arith.mulf %157, %36 : vector<8x256xf32>
    %159 = arith.addf %155, %158 : vector<8x256xf32>
    %c0_43 = arith.constant 0 : index
    %c29 = arith.constant 29 : index
    %160 = memref.load %arg5[%c0_43, %c29] : memref<6x36xf32, #tpu.memory_space<smem>>
    %161 = vector.broadcast %160 : f32 to vector<8x256xf32>
    %162 = arith.mulf %161, %37 : vector<8x256xf32>
    %163 = arith.addf %159, %162 : vector<8x256xf32>
    %c0_44 = arith.constant 0 : index
    %c30 = arith.constant 30 : index
    %164 = memref.load %arg5[%c0_44, %c30] : memref<6x36xf32, #tpu.memory_space<smem>>
    %165 = vector.broadcast %164 : f32 to vector<8x256xf32>
    %166 = arith.mulf %165, %38 : vector<8x256xf32>
    %167 = arith.addf %163, %166 : vector<8x256xf32>
    %c0_45 = arith.constant 0 : index
    %c31 = arith.constant 31 : index
    %168 = memref.load %arg5[%c0_45, %c31] : memref<6x36xf32, #tpu.memory_space<smem>>
    %169 = vector.broadcast %168 : f32 to vector<8x256xf32>
    %170 = arith.mulf %169, %39 : vector<8x256xf32>
    %171 = arith.addf %167, %170 : vector<8x256xf32>
    %c0_46 = arith.constant 0 : index
    %c32 = arith.constant 32 : index
    %172 = memref.load %arg5[%c0_46, %c32] : memref<6x36xf32, #tpu.memory_space<smem>>
    %173 = vector.broadcast %172 : f32 to vector<8x256xf32>
    %174 = arith.mulf %173, %40 : vector<8x256xf32>
    %175 = arith.addf %171, %174 : vector<8x256xf32>
    %c0_47 = arith.constant 0 : index
    %c33 = arith.constant 33 : index
    %176 = memref.load %arg5[%c0_47, %c33] : memref<6x36xf32, #tpu.memory_space<smem>>
    %177 = vector.broadcast %176 : f32 to vector<8x256xf32>
    %178 = arith.mulf %177, %41 : vector<8x256xf32>
    %179 = arith.addf %175, %178 : vector<8x256xf32>
    %c0_48 = arith.constant 0 : index
    %c34 = arith.constant 34 : index
    %180 = memref.load %arg5[%c0_48, %c34] : memref<6x36xf32, #tpu.memory_space<smem>>
    %181 = vector.broadcast %180 : f32 to vector<8x256xf32>
    %182 = arith.mulf %181, %42 : vector<8x256xf32>
    %183 = arith.addf %179, %182 : vector<8x256xf32>
    %c0_49 = arith.constant 0 : index
    %c35 = arith.constant 35 : index
    %184 = memref.load %arg5[%c0_49, %c35] : memref<6x36xf32, #tpu.memory_space<smem>>
    %185 = vector.broadcast %184 : f32 to vector<8x256xf32>
    %186 = arith.mulf %185, %43 : vector<8x256xf32>
    %187 = arith.addf %183, %186 : vector<8x256xf32>
    %c0_50 = arith.constant 0 : index
    %188 = memref.load %arg6[%c0_50] : memref<6xf32, #tpu.memory_space<smem>>
    %189 = vector.broadcast %188 : f32 to vector<8x256xf32>
    %190 = arith.addf %187, %189 : vector<8x256xf32>
    %cst = arith.constant 0.000000e+00 : f32
    %191 = vector.broadcast %cst : f32 to vector<8x256xf32>
    %192 = arith.maximumf %190, %191 : vector<8x256xf32>
    %c0_51 = arith.constant 0 : index
    %c0_52 = arith.constant 0 : index
    %c0_53 = arith.constant 0 : index
    %193 = vector.load %arg7[%c0_51, %c0_52, %c0_53] : memref<6x256x32xf32, #tpu.memory_space<vmem>>, vector<1x256x32xf32>
    %194 = vector.shape_cast %193 : vector<1x256x32xf32> to vector<256x32xf32>
    %cst_54 = arith.constant dense<0.000000e+00> : vector<8x32xf32>
    %195 = tpu.matmul %192, %194, %cst_54 {dimension_numbers = #tpu.dot_dimension_numbers<[1], [0], [0], [1], [0, 0, 1, 1], [], []>} : vector<8x256xf32>, vector<256x32xf32>, vector<8x32xf32> -> vector<8x32xf32>
    %196 = vector.broadcast %44 : vector<1x32xf32> to vector<8x32xf32>
    %197 = arith.addf %196, %195 : vector<8x32xf32>
    %c1_55 = arith.constant 1 : index
    %c0_56 = arith.constant 0 : index
    %198 = memref.load %arg5[%c1_55, %c0_56] : memref<6x36xf32, #tpu.memory_space<smem>>
    %199 = vector.broadcast %198 : f32 to vector<8x256xf32>
    %200 = arith.mulf %199, %2 : vector<8x256xf32>
    %c1_57 = arith.constant 1 : index
    %c1_58 = arith.constant 1 : index
    %201 = memref.load %arg5[%c1_57, %c1_58] : memref<6x36xf32, #tpu.memory_space<smem>>
    %202 = vector.broadcast %201 : f32 to vector<8x256xf32>
    %203 = arith.mulf %202, %3 : vector<8x256xf32>
    %204 = arith.addf %200, %203 : vector<8x256xf32>
    %c1_59 = arith.constant 1 : index
    %c2_60 = arith.constant 2 : index
    %205 = memref.load %arg5[%c1_59, %c2_60] : memref<6x36xf32, #tpu.memory_space<smem>>
    %206 = vector.broadcast %205 : f32 to vector<8x256xf32>
    %207 = arith.mulf %206, %4 : vector<8x256xf32>
    %208 = arith.addf %204, %207 : vector<8x256xf32>
    %c1_61 = arith.constant 1 : index
    %c3_62 = arith.constant 3 : index
    %209 = memref.load %arg5[%c1_61, %c3_62] : memref<6x36xf32, #tpu.memory_space<smem>>
    %210 = vector.broadcast %209 : f32 to vector<8x256xf32>
    %211 = arith.mulf %210, %5 : vector<8x256xf32>
    %212 = arith.addf %208, %211 : vector<8x256xf32>
    %c1_63 = arith.constant 1 : index
    %c4_64 = arith.constant 4 : index
    %213 = memref.load %arg5[%c1_63, %c4_64] : memref<6x36xf32, #tpu.memory_space<smem>>
    %214 = vector.broadcast %213 : f32 to vector<8x256xf32>
    %215 = arith.mulf %214, %6 : vector<8x256xf32>
    %216 = arith.addf %212, %215 : vector<8x256xf32>
    %c1_65 = arith.constant 1 : index
    %c5_66 = arith.constant 5 : index
    %217 = memref.load %arg5[%c1_65, %c5_66] : memref<6x36xf32, #tpu.memory_space<smem>>
    %218 = vector.broadcast %217 : f32 to vector<8x256xf32>
    %219 = arith.mulf %218, %7 : vector<8x256xf32>
    %220 = arith.addf %216, %219 : vector<8x256xf32>
    %c1_67 = arith.constant 1 : index
    %c6_68 = arith.constant 6 : index
    %221 = memref.load %arg5[%c1_67, %c6_68] : memref<6x36xf32, #tpu.memory_space<smem>>
    %222 = vector.broadcast %221 : f32 to vector<8x256xf32>
    %223 = arith.mulf %222, %8 : vector<8x256xf32>
    %224 = arith.addf %220, %223 : vector<8x256xf32>
    %c1_69 = arith.constant 1 : index
    %c7_70 = arith.constant 7 : index
    %225 = memref.load %arg5[%c1_69, %c7_70] : memref<6x36xf32, #tpu.memory_space<smem>>
    %226 = vector.broadcast %225 : f32 to vector<8x256xf32>
    %227 = arith.mulf %226, %9 : vector<8x256xf32>
    %228 = arith.addf %224, %227 : vector<8x256xf32>
    %c1_71 = arith.constant 1 : index
    %c8_72 = arith.constant 8 : index
    %229 = memref.load %arg5[%c1_71, %c8_72] : memref<6x36xf32, #tpu.memory_space<smem>>
    %230 = vector.broadcast %229 : f32 to vector<8x256xf32>
    %231 = arith.mulf %230, %10 : vector<8x256xf32>
    %232 = arith.addf %228, %231 : vector<8x256xf32>
    %c1_73 = arith.constant 1 : index
    %c9_74 = arith.constant 9 : index
    %233 = memref.load %arg5[%c1_73, %c9_74] : memref<6x36xf32, #tpu.memory_space<smem>>
    %234 = vector.broadcast %233 : f32 to vector<8x256xf32>
    %235 = arith.mulf %234, %13 : vector<8x256xf32>
    %236 = arith.addf %232, %235 : vector<8x256xf32>
    %c1_75 = arith.constant 1 : index
    %c10_76 = arith.constant 10 : index
    %237 = memref.load %arg5[%c1_75, %c10_76] : memref<6x36xf32, #tpu.memory_space<smem>>
    %238 = vector.broadcast %237 : f32 to vector<8x256xf32>
    %239 = arith.mulf %238, %14 : vector<8x256xf32>
    %240 = arith.addf %236, %239 : vector<8x256xf32>
    %c1_77 = arith.constant 1 : index
    %c11_78 = arith.constant 11 : index
    %241 = memref.load %arg5[%c1_77, %c11_78] : memref<6x36xf32, #tpu.memory_space<smem>>
    %242 = vector.broadcast %241 : f32 to vector<8x256xf32>
    %243 = arith.mulf %242, %15 : vector<8x256xf32>
    %244 = arith.addf %240, %243 : vector<8x256xf32>
    %c1_79 = arith.constant 1 : index
    %c12_80 = arith.constant 12 : index
    %245 = memref.load %arg5[%c1_79, %c12_80] : memref<6x36xf32, #tpu.memory_space<smem>>
    %246 = vector.broadcast %245 : f32 to vector<8x256xf32>
    %247 = arith.mulf %246, %16 : vector<8x256xf32>
    %248 = arith.addf %244, %247 : vector<8x256xf32>
    %c1_81 = arith.constant 1 : index
    %c13_82 = arith.constant 13 : index
    %249 = memref.load %arg5[%c1_81, %c13_82] : memref<6x36xf32, #tpu.memory_space<smem>>
    %250 = vector.broadcast %249 : f32 to vector<8x256xf32>
    %251 = arith.mulf %250, %17 : vector<8x256xf32>
    %252 = arith.addf %248, %251 : vector<8x256xf32>
    %c1_83 = arith.constant 1 : index
    %c14_84 = arith.constant 14 : index
    %253 = memref.load %arg5[%c1_83, %c14_84] : memref<6x36xf32, #tpu.memory_space<smem>>
    %254 = vector.broadcast %253 : f32 to vector<8x256xf32>
    %255 = arith.mulf %254, %18 : vector<8x256xf32>
    %256 = arith.addf %252, %255 : vector<8x256xf32>
    %c1_85 = arith.constant 1 : index
    %c15_86 = arith.constant 15 : index
    %257 = memref.load %arg5[%c1_85, %c15_86] : memref<6x36xf32, #tpu.memory_space<smem>>
    %258 = vector.broadcast %257 : f32 to vector<8x256xf32>
    %259 = arith.mulf %258, %19 : vector<8x256xf32>
    %260 = arith.addf %256, %259 : vector<8x256xf32>
    %c1_87 = arith.constant 1 : index
    %c16_88 = arith.constant 16 : index
    %261 = memref.load %arg5[%c1_87, %c16_88] : memref<6x36xf32, #tpu.memory_space<smem>>
    %262 = vector.broadcast %261 : f32 to vector<8x256xf32>
    %263 = arith.mulf %262, %20 : vector<8x256xf32>
    %264 = arith.addf %260, %263 : vector<8x256xf32>
    %c1_89 = arith.constant 1 : index
    %c17_90 = arith.constant 17 : index
    %265 = memref.load %arg5[%c1_89, %c17_90] : memref<6x36xf32, #tpu.memory_space<smem>>
    %266 = vector.broadcast %265 : f32 to vector<8x256xf32>
    %267 = arith.mulf %266, %21 : vector<8x256xf32>
    %268 = arith.addf %264, %267 : vector<8x256xf32>
    %c1_91 = arith.constant 1 : index
    %c18_92 = arith.constant 18 : index
    %269 = memref.load %arg5[%c1_91, %c18_92] : memref<6x36xf32, #tpu.memory_space<smem>>
    %270 = vector.broadcast %269 : f32 to vector<8x256xf32>
    %271 = arith.mulf %270, %24 : vector<8x256xf32>
    %272 = arith.addf %268, %271 : vector<8x256xf32>
    %c1_93 = arith.constant 1 : index
    %c19_94 = arith.constant 19 : index
    %273 = memref.load %arg5[%c1_93, %c19_94] : memref<6x36xf32, #tpu.memory_space<smem>>
    %274 = vector.broadcast %273 : f32 to vector<8x256xf32>
    %275 = arith.mulf %274, %25 : vector<8x256xf32>
    %276 = arith.addf %272, %275 : vector<8x256xf32>
    %c1_95 = arith.constant 1 : index
    %c20_96 = arith.constant 20 : index
    %277 = memref.load %arg5[%c1_95, %c20_96] : memref<6x36xf32, #tpu.memory_space<smem>>
    %278 = vector.broadcast %277 : f32 to vector<8x256xf32>
    %279 = arith.mulf %278, %26 : vector<8x256xf32>
    %280 = arith.addf %276, %279 : vector<8x256xf32>
    %c1_97 = arith.constant 1 : index
    %c21_98 = arith.constant 21 : index
    %281 = memref.load %arg5[%c1_97, %c21_98] : memref<6x36xf32, #tpu.memory_space<smem>>
    %282 = vector.broadcast %281 : f32 to vector<8x256xf32>
    %283 = arith.mulf %282, %27 : vector<8x256xf32>
    %284 = arith.addf %280, %283 : vector<8x256xf32>
    %c1_99 = arith.constant 1 : index
    %c22_100 = arith.constant 22 : index
    %285 = memref.load %arg5[%c1_99, %c22_100] : memref<6x36xf32, #tpu.memory_space<smem>>
    %286 = vector.broadcast %285 : f32 to vector<8x256xf32>
    %287 = arith.mulf %286, %28 : vector<8x256xf32>
    %288 = arith.addf %284, %287 : vector<8x256xf32>
    %c1_101 = arith.constant 1 : index
    %c23_102 = arith.constant 23 : index
    %289 = memref.load %arg5[%c1_101, %c23_102] : memref<6x36xf32, #tpu.memory_space<smem>>
    %290 = vector.broadcast %289 : f32 to vector<8x256xf32>
    %291 = arith.mulf %290, %29 : vector<8x256xf32>
    %292 = arith.addf %288, %291 : vector<8x256xf32>
    %c1_103 = arith.constant 1 : index
    %c24_104 = arith.constant 24 : index
    %293 = memref.load %arg5[%c1_103, %c24_104] : memref<6x36xf32, #tpu.memory_space<smem>>
    %294 = vector.broadcast %293 : f32 to vector<8x256xf32>
    %295 = arith.mulf %294, %30 : vector<8x256xf32>
    %296 = arith.addf %292, %295 : vector<8x256xf32>
    %c1_105 = arith.constant 1 : index
    %c25_106 = arith.constant 25 : index
    %297 = memref.load %arg5[%c1_105, %c25_106] : memref<6x36xf32, #tpu.memory_space<smem>>
    %298 = vector.broadcast %297 : f32 to vector<8x256xf32>
    %299 = arith.mulf %298, %31 : vector<8x256xf32>
    %300 = arith.addf %296, %299 : vector<8x256xf32>
    %c1_107 = arith.constant 1 : index
    %c26_108 = arith.constant 26 : index
    %301 = memref.load %arg5[%c1_107, %c26_108] : memref<6x36xf32, #tpu.memory_space<smem>>
    %302 = vector.broadcast %301 : f32 to vector<8x256xf32>
    %303 = arith.mulf %302, %32 : vector<8x256xf32>
    %304 = arith.addf %300, %303 : vector<8x256xf32>
    %c1_109 = arith.constant 1 : index
    %c27_110 = arith.constant 27 : index
    %305 = memref.load %arg5[%c1_109, %c27_110] : memref<6x36xf32, #tpu.memory_space<smem>>
    %306 = vector.broadcast %305 : f32 to vector<8x256xf32>
    %307 = arith.mulf %306, %35 : vector<8x256xf32>
    %308 = arith.addf %304, %307 : vector<8x256xf32>
    %c1_111 = arith.constant 1 : index
    %c28_112 = arith.constant 28 : index
    %309 = memref.load %arg5[%c1_111, %c28_112] : memref<6x36xf32, #tpu.memory_space<smem>>
    %310 = vector.broadcast %309 : f32 to vector<8x256xf32>
    %311 = arith.mulf %310, %36 : vector<8x256xf32>
    %312 = arith.addf %308, %311 : vector<8x256xf32>
    %c1_113 = arith.constant 1 : index
    %c29_114 = arith.constant 29 : index
    %313 = memref.load %arg5[%c1_113, %c29_114] : memref<6x36xf32, #tpu.memory_space<smem>>
    %314 = vector.broadcast %313 : f32 to vector<8x256xf32>
    %315 = arith.mulf %314, %37 : vector<8x256xf32>
    %316 = arith.addf %312, %315 : vector<8x256xf32>
    %c1_115 = arith.constant 1 : index
    %c30_116 = arith.constant 30 : index
    %317 = memref.load %arg5[%c1_115, %c30_116] : memref<6x36xf32, #tpu.memory_space<smem>>
    %318 = vector.broadcast %317 : f32 to vector<8x256xf32>
    %319 = arith.mulf %318, %38 : vector<8x256xf32>
    %320 = arith.addf %316, %319 : vector<8x256xf32>
    %c1_117 = arith.constant 1 : index
    %c31_118 = arith.constant 31 : index
    %321 = memref.load %arg5[%c1_117, %c31_118] : memref<6x36xf32, #tpu.memory_space<smem>>
    %322 = vector.broadcast %321 : f32 to vector<8x256xf32>
    %323 = arith.mulf %322, %39 : vector<8x256xf32>
    %324 = arith.addf %320, %323 : vector<8x256xf32>
    %c1_119 = arith.constant 1 : index
    %c32_120 = arith.constant 32 : index
    %325 = memref.load %arg5[%c1_119, %c32_120] : memref<6x36xf32, #tpu.memory_space<smem>>
    %326 = vector.broadcast %325 : f32 to vector<8x256xf32>
    %327 = arith.mulf %326, %40 : vector<8x256xf32>
    %328 = arith.addf %324, %327 : vector<8x256xf32>
    %c1_121 = arith.constant 1 : index
    %c33_122 = arith.constant 33 : index
    %329 = memref.load %arg5[%c1_121, %c33_122] : memref<6x36xf32, #tpu.memory_space<smem>>
    %330 = vector.broadcast %329 : f32 to vector<8x256xf32>
    %331 = arith.mulf %330, %41 : vector<8x256xf32>
    %332 = arith.addf %328, %331 : vector<8x256xf32>
    %c1_123 = arith.constant 1 : index
    %c34_124 = arith.constant 34 : index
    %333 = memref.load %arg5[%c1_123, %c34_124] : memref<6x36xf32, #tpu.memory_space<smem>>
    %334 = vector.broadcast %333 : f32 to vector<8x256xf32>
    %335 = arith.mulf %334, %42 : vector<8x256xf32>
    %336 = arith.addf %332, %335 : vector<8x256xf32>
    %c1_125 = arith.constant 1 : index
    %c35_126 = arith.constant 35 : index
    %337 = memref.load %arg5[%c1_125, %c35_126] : memref<6x36xf32, #tpu.memory_space<smem>>
    %338 = vector.broadcast %337 : f32 to vector<8x256xf32>
    %339 = arith.mulf %338, %43 : vector<8x256xf32>
    %340 = arith.addf %336, %339 : vector<8x256xf32>
    %c1_127 = arith.constant 1 : index
    %341 = memref.load %arg6[%c1_127] : memref<6xf32, #tpu.memory_space<smem>>
    %342 = vector.broadcast %341 : f32 to vector<8x256xf32>
    %343 = arith.addf %340, %342 : vector<8x256xf32>
    %cst_128 = arith.constant 0.000000e+00 : f32
    %344 = vector.broadcast %cst_128 : f32 to vector<8x256xf32>
    %345 = arith.maximumf %343, %344 : vector<8x256xf32>
    %c1_129 = arith.constant 1 : index
    %c0_130 = arith.constant 0 : index
    %c0_131 = arith.constant 0 : index
    %346 = vector.load %arg7[%c1_129, %c0_130, %c0_131] : memref<6x256x32xf32, #tpu.memory_space<vmem>>, vector<1x256x32xf32>
    %347 = vector.shape_cast %346 : vector<1x256x32xf32> to vector<256x32xf32>
    %cst_132 = arith.constant dense<0.000000e+00> : vector<8x32xf32>
    %348 = tpu.matmul %345, %347, %cst_132 {dimension_numbers = #tpu.dot_dimension_numbers<[1], [0], [0], [1], [0, 0, 1, 1], [], []>} : vector<8x256xf32>, vector<256x32xf32>, vector<8x32xf32> -> vector<8x32xf32>
    %349 = arith.addf %197, %348 : vector<8x32xf32>
    %c2_133 = arith.constant 2 : index
    %c0_134 = arith.constant 0 : index
    %350 = memref.load %arg5[%c2_133, %c0_134] : memref<6x36xf32, #tpu.memory_space<smem>>
    %351 = vector.broadcast %350 : f32 to vector<8x256xf32>
    %352 = arith.mulf %351, %2 : vector<8x256xf32>
    %c2_135 = arith.constant 2 : index
    %c1_136 = arith.constant 1 : index
    %353 = memref.load %arg5[%c2_135, %c1_136] : memref<6x36xf32, #tpu.memory_space<smem>>
    %354 = vector.broadcast %353 : f32 to vector<8x256xf32>
    %355 = arith.mulf %354, %3 : vector<8x256xf32>
    %356 = arith.addf %352, %355 : vector<8x256xf32>
    %c2_137 = arith.constant 2 : index
    %c2_138 = arith.constant 2 : index
    %357 = memref.load %arg5[%c2_137, %c2_138] : memref<6x36xf32, #tpu.memory_space<smem>>
    %358 = vector.broadcast %357 : f32 to vector<8x256xf32>
    %359 = arith.mulf %358, %4 : vector<8x256xf32>
    %360 = arith.addf %356, %359 : vector<8x256xf32>
    %c2_139 = arith.constant 2 : index
    %c3_140 = arith.constant 3 : index
    %361 = memref.load %arg5[%c2_139, %c3_140] : memref<6x36xf32, #tpu.memory_space<smem>>
    %362 = vector.broadcast %361 : f32 to vector<8x256xf32>
    %363 = arith.mulf %362, %5 : vector<8x256xf32>
    %364 = arith.addf %360, %363 : vector<8x256xf32>
    %c2_141 = arith.constant 2 : index
    %c4_142 = arith.constant 4 : index
    %365 = memref.load %arg5[%c2_141, %c4_142] : memref<6x36xf32, #tpu.memory_space<smem>>
    %366 = vector.broadcast %365 : f32 to vector<8x256xf32>
    %367 = arith.mulf %366, %6 : vector<8x256xf32>
    %368 = arith.addf %364, %367 : vector<8x256xf32>
    %c2_143 = arith.constant 2 : index
    %c5_144 = arith.constant 5 : index
    %369 = memref.load %arg5[%c2_143, %c5_144] : memref<6x36xf32, #tpu.memory_space<smem>>
    %370 = vector.broadcast %369 : f32 to vector<8x256xf32>
    %371 = arith.mulf %370, %7 : vector<8x256xf32>
    %372 = arith.addf %368, %371 : vector<8x256xf32>
    %c2_145 = arith.constant 2 : index
    %c6_146 = arith.constant 6 : index
    %373 = memref.load %arg5[%c2_145, %c6_146] : memref<6x36xf32, #tpu.memory_space<smem>>
    %374 = vector.broadcast %373 : f32 to vector<8x256xf32>
    %375 = arith.mulf %374, %8 : vector<8x256xf32>
    %376 = arith.addf %372, %375 : vector<8x256xf32>
    %c2_147 = arith.constant 2 : index
    %c7_148 = arith.constant 7 : index
    %377 = memref.load %arg5[%c2_147, %c7_148] : memref<6x36xf32, #tpu.memory_space<smem>>
    %378 = vector.broadcast %377 : f32 to vector<8x256xf32>
    %379 = arith.mulf %378, %9 : vector<8x256xf32>
    %380 = arith.addf %376, %379 : vector<8x256xf32>
    %c2_149 = arith.constant 2 : index
    %c8_150 = arith.constant 8 : index
    %381 = memref.load %arg5[%c2_149, %c8_150] : memref<6x36xf32, #tpu.memory_space<smem>>
    %382 = vector.broadcast %381 : f32 to vector<8x256xf32>
    %383 = arith.mulf %382, %10 : vector<8x256xf32>
    %384 = arith.addf %380, %383 : vector<8x256xf32>
    %c2_151 = arith.constant 2 : index
    %c9_152 = arith.constant 9 : index
    %385 = memref.load %arg5[%c2_151, %c9_152] : memref<6x36xf32, #tpu.memory_space<smem>>
    %386 = vector.broadcast %385 : f32 to vector<8x256xf32>
    %387 = arith.mulf %386, %13 : vector<8x256xf32>
    %388 = arith.addf %384, %387 : vector<8x256xf32>
    %c2_153 = arith.constant 2 : index
    %c10_154 = arith.constant 10 : index
    %389 = memref.load %arg5[%c2_153, %c10_154] : memref<6x36xf32, #tpu.memory_space<smem>>
    %390 = vector.broadcast %389 : f32 to vector<8x256xf32>
    %391 = arith.mulf %390, %14 : vector<8x256xf32>
    %392 = arith.addf %388, %391 : vector<8x256xf32>
    %c2_155 = arith.constant 2 : index
    %c11_156 = arith.constant 11 : index
    %393 = memref.load %arg5[%c2_155, %c11_156] : memref<6x36xf32, #tpu.memory_space<smem>>
    %394 = vector.broadcast %393 : f32 to vector<8x256xf32>
    %395 = arith.mulf %394, %15 : vector<8x256xf32>
    %396 = arith.addf %392, %395 : vector<8x256xf32>
    %c2_157 = arith.constant 2 : index
    %c12_158 = arith.constant 12 : index
    %397 = memref.load %arg5[%c2_157, %c12_158] : memref<6x36xf32, #tpu.memory_space<smem>>
    %398 = vector.broadcast %397 : f32 to vector<8x256xf32>
    %399 = arith.mulf %398, %16 : vector<8x256xf32>
    %400 = arith.addf %396, %399 : vector<8x256xf32>
    %c2_159 = arith.constant 2 : index
    %c13_160 = arith.constant 13 : index
    %401 = memref.load %arg5[%c2_159, %c13_160] : memref<6x36xf32, #tpu.memory_space<smem>>
    %402 = vector.broadcast %401 : f32 to vector<8x256xf32>
    %403 = arith.mulf %402, %17 : vector<8x256xf32>
    %404 = arith.addf %400, %403 : vector<8x256xf32>
    %c2_161 = arith.constant 2 : index
    %c14_162 = arith.constant 14 : index
    %405 = memref.load %arg5[%c2_161, %c14_162] : memref<6x36xf32, #tpu.memory_space<smem>>
    %406 = vector.broadcast %405 : f32 to vector<8x256xf32>
    %407 = arith.mulf %406, %18 : vector<8x256xf32>
    %408 = arith.addf %404, %407 : vector<8x256xf32>
    %c2_163 = arith.constant 2 : index
    %c15_164 = arith.constant 15 : index
    %409 = memref.load %arg5[%c2_163, %c15_164] : memref<6x36xf32, #tpu.memory_space<smem>>
    %410 = vector.broadcast %409 : f32 to vector<8x256xf32>
    %411 = arith.mulf %410, %19 : vector<8x256xf32>
    %412 = arith.addf %408, %411 : vector<8x256xf32>
    %c2_165 = arith.constant 2 : index
    %c16_166 = arith.constant 16 : index
    %413 = memref.load %arg5[%c2_165, %c16_166] : memref<6x36xf32, #tpu.memory_space<smem>>
    %414 = vector.broadcast %413 : f32 to vector<8x256xf32>
    %415 = arith.mulf %414, %20 : vector<8x256xf32>
    %416 = arith.addf %412, %415 : vector<8x256xf32>
    %c2_167 = arith.constant 2 : index
    %c17_168 = arith.constant 17 : index
    %417 = memref.load %arg5[%c2_167, %c17_168] : memref<6x36xf32, #tpu.memory_space<smem>>
    %418 = vector.broadcast %417 : f32 to vector<8x256xf32>
    %419 = arith.mulf %418, %21 : vector<8x256xf32>
    %420 = arith.addf %416, %419 : vector<8x256xf32>
    %c2_169 = arith.constant 2 : index
    %c18_170 = arith.constant 18 : index
    %421 = memref.load %arg5[%c2_169, %c18_170] : memref<6x36xf32, #tpu.memory_space<smem>>
    %422 = vector.broadcast %421 : f32 to vector<8x256xf32>
    %423 = arith.mulf %422, %24 : vector<8x256xf32>
    %424 = arith.addf %420, %423 : vector<8x256xf32>
    %c2_171 = arith.constant 2 : index
    %c19_172 = arith.constant 19 : index
    %425 = memref.load %arg5[%c2_171, %c19_172] : memref<6x36xf32, #tpu.memory_space<smem>>
    %426 = vector.broadcast %425 : f32 to vector<8x256xf32>
    %427 = arith.mulf %426, %25 : vector<8x256xf32>
    %428 = arith.addf %424, %427 : vector<8x256xf32>
    %c2_173 = arith.constant 2 : index
    %c20_174 = arith.constant 20 : index
    %429 = memref.load %arg5[%c2_173, %c20_174] : memref<6x36xf32, #tpu.memory_space<smem>>
    %430 = vector.broadcast %429 : f32 to vector<8x256xf32>
    %431 = arith.mulf %430, %26 : vector<8x256xf32>
    %432 = arith.addf %428, %431 : vector<8x256xf32>
    %c2_175 = arith.constant 2 : index
    %c21_176 = arith.constant 21 : index
    %433 = memref.load %arg5[%c2_175, %c21_176] : memref<6x36xf32, #tpu.memory_space<smem>>
    %434 = vector.broadcast %433 : f32 to vector<8x256xf32>
    %435 = arith.mulf %434, %27 : vector<8x256xf32>
    %436 = arith.addf %432, %435 : vector<8x256xf32>
    %c2_177 = arith.constant 2 : index
    %c22_178 = arith.constant 22 : index
    %437 = memref.load %arg5[%c2_177, %c22_178] : memref<6x36xf32, #tpu.memory_space<smem>>
    %438 = vector.broadcast %437 : f32 to vector<8x256xf32>
    %439 = arith.mulf %438, %28 : vector<8x256xf32>
    %440 = arith.addf %436, %439 : vector<8x256xf32>
    %c2_179 = arith.constant 2 : index
    %c23_180 = arith.constant 23 : index
    %441 = memref.load %arg5[%c2_179, %c23_180] : memref<6x36xf32, #tpu.memory_space<smem>>
    %442 = vector.broadcast %441 : f32 to vector<8x256xf32>
    %443 = arith.mulf %442, %29 : vector<8x256xf32>
    %444 = arith.addf %440, %443 : vector<8x256xf32>
    %c2_181 = arith.constant 2 : index
    %c24_182 = arith.constant 24 : index
    %445 = memref.load %arg5[%c2_181, %c24_182] : memref<6x36xf32, #tpu.memory_space<smem>>
    %446 = vector.broadcast %445 : f32 to vector<8x256xf32>
    %447 = arith.mulf %446, %30 : vector<8x256xf32>
    %448 = arith.addf %444, %447 : vector<8x256xf32>
    %c2_183 = arith.constant 2 : index
    %c25_184 = arith.constant 25 : index
    %449 = memref.load %arg5[%c2_183, %c25_184] : memref<6x36xf32, #tpu.memory_space<smem>>
    %450 = vector.broadcast %449 : f32 to vector<8x256xf32>
    %451 = arith.mulf %450, %31 : vector<8x256xf32>
    %452 = arith.addf %448, %451 : vector<8x256xf32>
    %c2_185 = arith.constant 2 : index
    %c26_186 = arith.constant 26 : index
    %453 = memref.load %arg5[%c2_185, %c26_186] : memref<6x36xf32, #tpu.memory_space<smem>>
    %454 = vector.broadcast %453 : f32 to vector<8x256xf32>
    %455 = arith.mulf %454, %32 : vector<8x256xf32>
    %456 = arith.addf %452, %455 : vector<8x256xf32>
    %c2_187 = arith.constant 2 : index
    %c27_188 = arith.constant 27 : index
    %457 = memref.load %arg5[%c2_187, %c27_188] : memref<6x36xf32, #tpu.memory_space<smem>>
    %458 = vector.broadcast %457 : f32 to vector<8x256xf32>
    %459 = arith.mulf %458, %35 : vector<8x256xf32>
    %460 = arith.addf %456, %459 : vector<8x256xf32>
    %c2_189 = arith.constant 2 : index
    %c28_190 = arith.constant 28 : index
    %461 = memref.load %arg5[%c2_189, %c28_190] : memref<6x36xf32, #tpu.memory_space<smem>>
    %462 = vector.broadcast %461 : f32 to vector<8x256xf32>
    %463 = arith.mulf %462, %36 : vector<8x256xf32>
    %464 = arith.addf %460, %463 : vector<8x256xf32>
    %c2_191 = arith.constant 2 : index
    %c29_192 = arith.constant 29 : index
    %465 = memref.load %arg5[%c2_191, %c29_192] : memref<6x36xf32, #tpu.memory_space<smem>>
    %466 = vector.broadcast %465 : f32 to vector<8x256xf32>
    %467 = arith.mulf %466, %37 : vector<8x256xf32>
    %468 = arith.addf %464, %467 : vector<8x256xf32>
    %c2_193 = arith.constant 2 : index
    %c30_194 = arith.constant 30 : index
    %469 = memref.load %arg5[%c2_193, %c30_194] : memref<6x36xf32, #tpu.memory_space<smem>>
    %470 = vector.broadcast %469 : f32 to vector<8x256xf32>
    %471 = arith.mulf %470, %38 : vector<8x256xf32>
    %472 = arith.addf %468, %471 : vector<8x256xf32>
    %c2_195 = arith.constant 2 : index
    %c31_196 = arith.constant 31 : index
    %473 = memref.load %arg5[%c2_195, %c31_196] : memref<6x36xf32, #tpu.memory_space<smem>>
    %474 = vector.broadcast %473 : f32 to vector<8x256xf32>
    %475 = arith.mulf %474, %39 : vector<8x256xf32>
    %476 = arith.addf %472, %475 : vector<8x256xf32>
    %c2_197 = arith.constant 2 : index
    %c32_198 = arith.constant 32 : index
    %477 = memref.load %arg5[%c2_197, %c32_198] : memref<6x36xf32, #tpu.memory_space<smem>>
    %478 = vector.broadcast %477 : f32 to vector<8x256xf32>
    %479 = arith.mulf %478, %40 : vector<8x256xf32>
    %480 = arith.addf %476, %479 : vector<8x256xf32>
    %c2_199 = arith.constant 2 : index
    %c33_200 = arith.constant 33 : index
    %481 = memref.load %arg5[%c2_199, %c33_200] : memref<6x36xf32, #tpu.memory_space<smem>>
    %482 = vector.broadcast %481 : f32 to vector<8x256xf32>
    %483 = arith.mulf %482, %41 : vector<8x256xf32>
    %484 = arith.addf %480, %483 : vector<8x256xf32>
    %c2_201 = arith.constant 2 : index
    %c34_202 = arith.constant 34 : index
    %485 = memref.load %arg5[%c2_201, %c34_202] : memref<6x36xf32, #tpu.memory_space<smem>>
    %486 = vector.broadcast %485 : f32 to vector<8x256xf32>
    %487 = arith.mulf %486, %42 : vector<8x256xf32>
    %488 = arith.addf %484, %487 : vector<8x256xf32>
    %c2_203 = arith.constant 2 : index
    %c35_204 = arith.constant 35 : index
    %489 = memref.load %arg5[%c2_203, %c35_204] : memref<6x36xf32, #tpu.memory_space<smem>>
    %490 = vector.broadcast %489 : f32 to vector<8x256xf32>
    %491 = arith.mulf %490, %43 : vector<8x256xf32>
    %492 = arith.addf %488, %491 : vector<8x256xf32>
    %c2_205 = arith.constant 2 : index
    %493 = memref.load %arg6[%c2_205] : memref<6xf32, #tpu.memory_space<smem>>
    %494 = vector.broadcast %493 : f32 to vector<8x256xf32>
    %495 = arith.addf %492, %494 : vector<8x256xf32>
    %cst_206 = arith.constant 0.000000e+00 : f32
    %496 = vector.broadcast %cst_206 : f32 to vector<8x256xf32>
    %497 = arith.maximumf %495, %496 : vector<8x256xf32>
    %c2_207 = arith.constant 2 : index
    %c0_208 = arith.constant 0 : index
    %c0_209 = arith.constant 0 : index
    %498 = vector.load %arg7[%c2_207, %c0_208, %c0_209] : memref<6x256x32xf32, #tpu.memory_space<vmem>>, vector<1x256x32xf32>
    %499 = vector.shape_cast %498 : vector<1x256x32xf32> to vector<256x32xf32>
    %cst_210 = arith.constant dense<0.000000e+00> : vector<8x32xf32>
    %500 = tpu.matmul %497, %499, %cst_210 {dimension_numbers = #tpu.dot_dimension_numbers<[1], [0], [0], [1], [0, 0, 1, 1], [], []>} : vector<8x256xf32>, vector<256x32xf32>, vector<8x32xf32> -> vector<8x32xf32>
    %501 = arith.addf %349, %500 : vector<8x32xf32>
    %c3_211 = arith.constant 3 : index
    %c0_212 = arith.constant 0 : index
    %502 = memref.load %arg5[%c3_211, %c0_212] : memref<6x36xf32, #tpu.memory_space<smem>>
    %503 = vector.broadcast %502 : f32 to vector<8x256xf32>
    %504 = arith.mulf %503, %2 : vector<8x256xf32>
    %c3_213 = arith.constant 3 : index
    %c1_214 = arith.constant 1 : index
    %505 = memref.load %arg5[%c3_213, %c1_214] : memref<6x36xf32, #tpu.memory_space<smem>>
    %506 = vector.broadcast %505 : f32 to vector<8x256xf32>
    %507 = arith.mulf %506, %3 : vector<8x256xf32>
    %508 = arith.addf %504, %507 : vector<8x256xf32>
    %c3_215 = arith.constant 3 : index
    %c2_216 = arith.constant 2 : index
    %509 = memref.load %arg5[%c3_215, %c2_216] : memref<6x36xf32, #tpu.memory_space<smem>>
    %510 = vector.broadcast %509 : f32 to vector<8x256xf32>
    %511 = arith.mulf %510, %4 : vector<8x256xf32>
    %512 = arith.addf %508, %511 : vector<8x256xf32>
    %c3_217 = arith.constant 3 : index
    %c3_218 = arith.constant 3 : index
    %513 = memref.load %arg5[%c3_217, %c3_218] : memref<6x36xf32, #tpu.memory_space<smem>>
    %514 = vector.broadcast %513 : f32 to vector<8x256xf32>
    %515 = arith.mulf %514, %5 : vector<8x256xf32>
    %516 = arith.addf %512, %515 : vector<8x256xf32>
    %c3_219 = arith.constant 3 : index
    %c4_220 = arith.constant 4 : index
    %517 = memref.load %arg5[%c3_219, %c4_220] : memref<6x36xf32, #tpu.memory_space<smem>>
    %518 = vector.broadcast %517 : f32 to vector<8x256xf32>
    %519 = arith.mulf %518, %6 : vector<8x256xf32>
    %520 = arith.addf %516, %519 : vector<8x256xf32>
    %c3_221 = arith.constant 3 : index
    %c5_222 = arith.constant 5 : index
    %521 = memref.load %arg5[%c3_221, %c5_222] : memref<6x36xf32, #tpu.memory_space<smem>>
    %522 = vector.broadcast %521 : f32 to vector<8x256xf32>
    %523 = arith.mulf %522, %7 : vector<8x256xf32>
    %524 = arith.addf %520, %523 : vector<8x256xf32>
    %c3_223 = arith.constant 3 : index
    %c6_224 = arith.constant 6 : index
    %525 = memref.load %arg5[%c3_223, %c6_224] : memref<6x36xf32, #tpu.memory_space<smem>>
    %526 = vector.broadcast %525 : f32 to vector<8x256xf32>
    %527 = arith.mulf %526, %8 : vector<8x256xf32>
    %528 = arith.addf %524, %527 : vector<8x256xf32>
    %c3_225 = arith.constant 3 : index
    %c7_226 = arith.constant 7 : index
    %529 = memref.load %arg5[%c3_225, %c7_226] : memref<6x36xf32, #tpu.memory_space<smem>>
    %530 = vector.broadcast %529 : f32 to vector<8x256xf32>
    %531 = arith.mulf %530, %9 : vector<8x256xf32>
    %532 = arith.addf %528, %531 : vector<8x256xf32>
    %c3_227 = arith.constant 3 : index
    %c8_228 = arith.constant 8 : index
    %533 = memref.load %arg5[%c3_227, %c8_228] : memref<6x36xf32, #tpu.memory_space<smem>>
    %534 = vector.broadcast %533 : f32 to vector<8x256xf32>
    %535 = arith.mulf %534, %10 : vector<8x256xf32>
    %536 = arith.addf %532, %535 : vector<8x256xf32>
    %c3_229 = arith.constant 3 : index
    %c9_230 = arith.constant 9 : index
    %537 = memref.load %arg5[%c3_229, %c9_230] : memref<6x36xf32, #tpu.memory_space<smem>>
    %538 = vector.broadcast %537 : f32 to vector<8x256xf32>
    %539 = arith.mulf %538, %13 : vector<8x256xf32>
    %540 = arith.addf %536, %539 : vector<8x256xf32>
    %c3_231 = arith.constant 3 : index
    %c10_232 = arith.constant 10 : index
    %541 = memref.load %arg5[%c3_231, %c10_232] : memref<6x36xf32, #tpu.memory_space<smem>>
    %542 = vector.broadcast %541 : f32 to vector<8x256xf32>
    %543 = arith.mulf %542, %14 : vector<8x256xf32>
    %544 = arith.addf %540, %543 : vector<8x256xf32>
    %c3_233 = arith.constant 3 : index
    %c11_234 = arith.constant 11 : index
    %545 = memref.load %arg5[%c3_233, %c11_234] : memref<6x36xf32, #tpu.memory_space<smem>>
    %546 = vector.broadcast %545 : f32 to vector<8x256xf32>
    %547 = arith.mulf %546, %15 : vector<8x256xf32>
    %548 = arith.addf %544, %547 : vector<8x256xf32>
    %c3_235 = arith.constant 3 : index
    %c12_236 = arith.constant 12 : index
    %549 = memref.load %arg5[%c3_235, %c12_236] : memref<6x36xf32, #tpu.memory_space<smem>>
    %550 = vector.broadcast %549 : f32 to vector<8x256xf32>
    %551 = arith.mulf %550, %16 : vector<8x256xf32>
    %552 = arith.addf %548, %551 : vector<8x256xf32>
    %c3_237 = arith.constant 3 : index
    %c13_238 = arith.constant 13 : index
    %553 = memref.load %arg5[%c3_237, %c13_238] : memref<6x36xf32, #tpu.memory_space<smem>>
    %554 = vector.broadcast %553 : f32 to vector<8x256xf32>
    %555 = arith.mulf %554, %17 : vector<8x256xf32>
    %556 = arith.addf %552, %555 : vector<8x256xf32>
    %c3_239 = arith.constant 3 : index
    %c14_240 = arith.constant 14 : index
    %557 = memref.load %arg5[%c3_239, %c14_240] : memref<6x36xf32, #tpu.memory_space<smem>>
    %558 = vector.broadcast %557 : f32 to vector<8x256xf32>
    %559 = arith.mulf %558, %18 : vector<8x256xf32>
    %560 = arith.addf %556, %559 : vector<8x256xf32>
    %c3_241 = arith.constant 3 : index
    %c15_242 = arith.constant 15 : index
    %561 = memref.load %arg5[%c3_241, %c15_242] : memref<6x36xf32, #tpu.memory_space<smem>>
    %562 = vector.broadcast %561 : f32 to vector<8x256xf32>
    %563 = arith.mulf %562, %19 : vector<8x256xf32>
    %564 = arith.addf %560, %563 : vector<8x256xf32>
    %c3_243 = arith.constant 3 : index
    %c16_244 = arith.constant 16 : index
    %565 = memref.load %arg5[%c3_243, %c16_244] : memref<6x36xf32, #tpu.memory_space<smem>>
    %566 = vector.broadcast %565 : f32 to vector<8x256xf32>
    %567 = arith.mulf %566, %20 : vector<8x256xf32>
    %568 = arith.addf %564, %567 : vector<8x256xf32>
    %c3_245 = arith.constant 3 : index
    %c17_246 = arith.constant 17 : index
    %569 = memref.load %arg5[%c3_245, %c17_246] : memref<6x36xf32, #tpu.memory_space<smem>>
    %570 = vector.broadcast %569 : f32 to vector<8x256xf32>
    %571 = arith.mulf %570, %21 : vector<8x256xf32>
    %572 = arith.addf %568, %571 : vector<8x256xf32>
    %c3_247 = arith.constant 3 : index
    %c18_248 = arith.constant 18 : index
    %573 = memref.load %arg5[%c3_247, %c18_248] : memref<6x36xf32, #tpu.memory_space<smem>>
    %574 = vector.broadcast %573 : f32 to vector<8x256xf32>
    %575 = arith.mulf %574, %24 : vector<8x256xf32>
    %576 = arith.addf %572, %575 : vector<8x256xf32>
    %c3_249 = arith.constant 3 : index
    %c19_250 = arith.constant 19 : index
    %577 = memref.load %arg5[%c3_249, %c19_250] : memref<6x36xf32, #tpu.memory_space<smem>>
    %578 = vector.broadcast %577 : f32 to vector<8x256xf32>
    %579 = arith.mulf %578, %25 : vector<8x256xf32>
    %580 = arith.addf %576, %579 : vector<8x256xf32>
    %c3_251 = arith.constant 3 : index
    %c20_252 = arith.constant 20 : index
    %581 = memref.load %arg5[%c3_251, %c20_252] : memref<6x36xf32, #tpu.memory_space<smem>>
    %582 = vector.broadcast %581 : f32 to vector<8x256xf32>
    %583 = arith.mulf %582, %26 : vector<8x256xf32>
    %584 = arith.addf %580, %583 : vector<8x256xf32>
    %c3_253 = arith.constant 3 : index
    %c21_254 = arith.constant 21 : index
    %585 = memref.load %arg5[%c3_253, %c21_254] : memref<6x36xf32, #tpu.memory_space<smem>>
    %586 = vector.broadcast %585 : f32 to vector<8x256xf32>
    %587 = arith.mulf %586, %27 : vector<8x256xf32>
    %588 = arith.addf %584, %587 : vector<8x256xf32>
    %c3_255 = arith.constant 3 : index
    %c22_256 = arith.constant 22 : index
    %589 = memref.load %arg5[%c3_255, %c22_256] : memref<6x36xf32, #tpu.memory_space<smem>>
    %590 = vector.broadcast %589 : f32 to vector<8x256xf32>
    %591 = arith.mulf %590, %28 : vector<8x256xf32>
    %592 = arith.addf %588, %591 : vector<8x256xf32>
    %c3_257 = arith.constant 3 : index
    %c23_258 = arith.constant 23 : index
    %593 = memref.load %arg5[%c3_257, %c23_258] : memref<6x36xf32, #tpu.memory_space<smem>>
    %594 = vector.broadcast %593 : f32 to vector<8x256xf32>
    %595 = arith.mulf %594, %29 : vector<8x256xf32>
    %596 = arith.addf %592, %595 : vector<8x256xf32>
    %c3_259 = arith.constant 3 : index
    %c24_260 = arith.constant 24 : index
    %597 = memref.load %arg5[%c3_259, %c24_260] : memref<6x36xf32, #tpu.memory_space<smem>>
    %598 = vector.broadcast %597 : f32 to vector<8x256xf32>
    %599 = arith.mulf %598, %30 : vector<8x256xf32>
    %600 = arith.addf %596, %599 : vector<8x256xf32>
    %c3_261 = arith.constant 3 : index
    %c25_262 = arith.constant 25 : index
    %601 = memref.load %arg5[%c3_261, %c25_262] : memref<6x36xf32, #tpu.memory_space<smem>>
    %602 = vector.broadcast %601 : f32 to vector<8x256xf32>
    %603 = arith.mulf %602, %31 : vector<8x256xf32>
    %604 = arith.addf %600, %603 : vector<8x256xf32>
    %c3_263 = arith.constant 3 : index
    %c26_264 = arith.constant 26 : index
    %605 = memref.load %arg5[%c3_263, %c26_264] : memref<6x36xf32, #tpu.memory_space<smem>>
    %606 = vector.broadcast %605 : f32 to vector<8x256xf32>
    %607 = arith.mulf %606, %32 : vector<8x256xf32>
    %608 = arith.addf %604, %607 : vector<8x256xf32>
    %c3_265 = arith.constant 3 : index
    %c27_266 = arith.constant 27 : index
    %609 = memref.load %arg5[%c3_265, %c27_266] : memref<6x36xf32, #tpu.memory_space<smem>>
    %610 = vector.broadcast %609 : f32 to vector<8x256xf32>
    %611 = arith.mulf %610, %35 : vector<8x256xf32>
    %612 = arith.addf %608, %611 : vector<8x256xf32>
    %c3_267 = arith.constant 3 : index
    %c28_268 = arith.constant 28 : index
    %613 = memref.load %arg5[%c3_267, %c28_268] : memref<6x36xf32, #tpu.memory_space<smem>>
    %614 = vector.broadcast %613 : f32 to vector<8x256xf32>
    %615 = arith.mulf %614, %36 : vector<8x256xf32>
    %616 = arith.addf %612, %615 : vector<8x256xf32>
    %c3_269 = arith.constant 3 : index
    %c29_270 = arith.constant 29 : index
    %617 = memref.load %arg5[%c3_269, %c29_270] : memref<6x36xf32, #tpu.memory_space<smem>>
    %618 = vector.broadcast %617 : f32 to vector<8x256xf32>
    %619 = arith.mulf %618, %37 : vector<8x256xf32>
    %620 = arith.addf %616, %619 : vector<8x256xf32>
    %c3_271 = arith.constant 3 : index
    %c30_272 = arith.constant 30 : index
    %621 = memref.load %arg5[%c3_271, %c30_272] : memref<6x36xf32, #tpu.memory_space<smem>>
    %622 = vector.broadcast %621 : f32 to vector<8x256xf32>
    %623 = arith.mulf %622, %38 : vector<8x256xf32>
    %624 = arith.addf %620, %623 : vector<8x256xf32>
    %c3_273 = arith.constant 3 : index
    %c31_274 = arith.constant 31 : index
    %625 = memref.load %arg5[%c3_273, %c31_274] : memref<6x36xf32, #tpu.memory_space<smem>>
    %626 = vector.broadcast %625 : f32 to vector<8x256xf32>
    %627 = arith.mulf %626, %39 : vector<8x256xf32>
    %628 = arith.addf %624, %627 : vector<8x256xf32>
    %c3_275 = arith.constant 3 : index
    %c32_276 = arith.constant 32 : index
    %629 = memref.load %arg5[%c3_275, %c32_276] : memref<6x36xf32, #tpu.memory_space<smem>>
    %630 = vector.broadcast %629 : f32 to vector<8x256xf32>
    %631 = arith.mulf %630, %40 : vector<8x256xf32>
    %632 = arith.addf %628, %631 : vector<8x256xf32>
    %c3_277 = arith.constant 3 : index
    %c33_278 = arith.constant 33 : index
    %633 = memref.load %arg5[%c3_277, %c33_278] : memref<6x36xf32, #tpu.memory_space<smem>>
    %634 = vector.broadcast %633 : f32 to vector<8x256xf32>
    %635 = arith.mulf %634, %41 : vector<8x256xf32>
    %636 = arith.addf %632, %635 : vector<8x256xf32>
    %c3_279 = arith.constant 3 : index
    %c34_280 = arith.constant 34 : index
    %637 = memref.load %arg5[%c3_279, %c34_280] : memref<6x36xf32, #tpu.memory_space<smem>>
    %638 = vector.broadcast %637 : f32 to vector<8x256xf32>
    %639 = arith.mulf %638, %42 : vector<8x256xf32>
    %640 = arith.addf %636, %639 : vector<8x256xf32>
    %c3_281 = arith.constant 3 : index
    %c35_282 = arith.constant 35 : index
    %641 = memref.load %arg5[%c3_281, %c35_282] : memref<6x36xf32, #tpu.memory_space<smem>>
    %642 = vector.broadcast %641 : f32 to vector<8x256xf32>
    %643 = arith.mulf %642, %43 : vector<8x256xf32>
    %644 = arith.addf %640, %643 : vector<8x256xf32>
    %c3_283 = arith.constant 3 : index
    %645 = memref.load %arg6[%c3_283] : memref<6xf32, #tpu.memory_space<smem>>
    %646 = vector.broadcast %645 : f32 to vector<8x256xf32>
    %647 = arith.addf %644, %646 : vector<8x256xf32>
    %cst_284 = arith.constant 0.000000e+00 : f32
    %648 = vector.broadcast %cst_284 : f32 to vector<8x256xf32>
    %649 = arith.maximumf %647, %648 : vector<8x256xf32>
    %c3_285 = arith.constant 3 : index
    %c0_286 = arith.constant 0 : index
    %c0_287 = arith.constant 0 : index
    %650 = vector.load %arg7[%c3_285, %c0_286, %c0_287] : memref<6x256x32xf32, #tpu.memory_space<vmem>>, vector<1x256x32xf32>
    %651 = vector.shape_cast %650 : vector<1x256x32xf32> to vector<256x32xf32>
    %cst_288 = arith.constant dense<0.000000e+00> : vector<8x32xf32>
    %652 = tpu.matmul %649, %651, %cst_288 {dimension_numbers = #tpu.dot_dimension_numbers<[1], [0], [0], [1], [0, 0, 1, 1], [], []>} : vector<8x256xf32>, vector<256x32xf32>, vector<8x32xf32> -> vector<8x32xf32>
    %653 = arith.addf %501, %652 : vector<8x32xf32>
    %c4_289 = arith.constant 4 : index
    %c0_290 = arith.constant 0 : index
    %654 = memref.load %arg5[%c4_289, %c0_290] : memref<6x36xf32, #tpu.memory_space<smem>>
    %655 = vector.broadcast %654 : f32 to vector<8x256xf32>
    %656 = arith.mulf %655, %2 : vector<8x256xf32>
    %c4_291 = arith.constant 4 : index
    %c1_292 = arith.constant 1 : index
    %657 = memref.load %arg5[%c4_291, %c1_292] : memref<6x36xf32, #tpu.memory_space<smem>>
    %658 = vector.broadcast %657 : f32 to vector<8x256xf32>
    %659 = arith.mulf %658, %3 : vector<8x256xf32>
    %660 = arith.addf %656, %659 : vector<8x256xf32>
    %c4_293 = arith.constant 4 : index
    %c2_294 = arith.constant 2 : index
    %661 = memref.load %arg5[%c4_293, %c2_294] : memref<6x36xf32, #tpu.memory_space<smem>>
    %662 = vector.broadcast %661 : f32 to vector<8x256xf32>
    %663 = arith.mulf %662, %4 : vector<8x256xf32>
    %664 = arith.addf %660, %663 : vector<8x256xf32>
    %c4_295 = arith.constant 4 : index
    %c3_296 = arith.constant 3 : index
    %665 = memref.load %arg5[%c4_295, %c3_296] : memref<6x36xf32, #tpu.memory_space<smem>>
    %666 = vector.broadcast %665 : f32 to vector<8x256xf32>
    %667 = arith.mulf %666, %5 : vector<8x256xf32>
    %668 = arith.addf %664, %667 : vector<8x256xf32>
    %c4_297 = arith.constant 4 : index
    %c4_298 = arith.constant 4 : index
    %669 = memref.load %arg5[%c4_297, %c4_298] : memref<6x36xf32, #tpu.memory_space<smem>>
    %670 = vector.broadcast %669 : f32 to vector<8x256xf32>
    %671 = arith.mulf %670, %6 : vector<8x256xf32>
    %672 = arith.addf %668, %671 : vector<8x256xf32>
    %c4_299 = arith.constant 4 : index
    %c5_300 = arith.constant 5 : index
    %673 = memref.load %arg5[%c4_299, %c5_300] : memref<6x36xf32, #tpu.memory_space<smem>>
    %674 = vector.broadcast %673 : f32 to vector<8x256xf32>
    %675 = arith.mulf %674, %7 : vector<8x256xf32>
    %676 = arith.addf %672, %675 : vector<8x256xf32>
    %c4_301 = arith.constant 4 : index
    %c6_302 = arith.constant 6 : index
    %677 = memref.load %arg5[%c4_301, %c6_302] : memref<6x36xf32, #tpu.memory_space<smem>>
    %678 = vector.broadcast %677 : f32 to vector<8x256xf32>
    %679 = arith.mulf %678, %8 : vector<8x256xf32>
    %680 = arith.addf %676, %679 : vector<8x256xf32>
    %c4_303 = arith.constant 4 : index
    %c7_304 = arith.constant 7 : index
    %681 = memref.load %arg5[%c4_303, %c7_304] : memref<6x36xf32, #tpu.memory_space<smem>>
    %682 = vector.broadcast %681 : f32 to vector<8x256xf32>
    %683 = arith.mulf %682, %9 : vector<8x256xf32>
    %684 = arith.addf %680, %683 : vector<8x256xf32>
    %c4_305 = arith.constant 4 : index
    %c8_306 = arith.constant 8 : index
    %685 = memref.load %arg5[%c4_305, %c8_306] : memref<6x36xf32, #tpu.memory_space<smem>>
    %686 = vector.broadcast %685 : f32 to vector<8x256xf32>
    %687 = arith.mulf %686, %10 : vector<8x256xf32>
    %688 = arith.addf %684, %687 : vector<8x256xf32>
    %c4_307 = arith.constant 4 : index
    %c9_308 = arith.constant 9 : index
    %689 = memref.load %arg5[%c4_307, %c9_308] : memref<6x36xf32, #tpu.memory_space<smem>>
    %690 = vector.broadcast %689 : f32 to vector<8x256xf32>
    %691 = arith.mulf %690, %13 : vector<8x256xf32>
    %692 = arith.addf %688, %691 : vector<8x256xf32>
    %c4_309 = arith.constant 4 : index
    %c10_310 = arith.constant 10 : index
    %693 = memref.load %arg5[%c4_309, %c10_310] : memref<6x36xf32, #tpu.memory_space<smem>>
    %694 = vector.broadcast %693 : f32 to vector<8x256xf32>
    %695 = arith.mulf %694, %14 : vector<8x256xf32>
    %696 = arith.addf %692, %695 : vector<8x256xf32>
    %c4_311 = arith.constant 4 : index
    %c11_312 = arith.constant 11 : index
    %697 = memref.load %arg5[%c4_311, %c11_312] : memref<6x36xf32, #tpu.memory_space<smem>>
    %698 = vector.broadcast %697 : f32 to vector<8x256xf32>
    %699 = arith.mulf %698, %15 : vector<8x256xf32>
    %700 = arith.addf %696, %699 : vector<8x256xf32>
    %c4_313 = arith.constant 4 : index
    %c12_314 = arith.constant 12 : index
    %701 = memref.load %arg5[%c4_313, %c12_314] : memref<6x36xf32, #tpu.memory_space<smem>>
    %702 = vector.broadcast %701 : f32 to vector<8x256xf32>
    %703 = arith.mulf %702, %16 : vector<8x256xf32>
    %704 = arith.addf %700, %703 : vector<8x256xf32>
    %c4_315 = arith.constant 4 : index
    %c13_316 = arith.constant 13 : index
    %705 = memref.load %arg5[%c4_315, %c13_316] : memref<6x36xf32, #tpu.memory_space<smem>>
    %706 = vector.broadcast %705 : f32 to vector<8x256xf32>
    %707 = arith.mulf %706, %17 : vector<8x256xf32>
    %708 = arith.addf %704, %707 : vector<8x256xf32>
    %c4_317 = arith.constant 4 : index
    %c14_318 = arith.constant 14 : index
    %709 = memref.load %arg5[%c4_317, %c14_318] : memref<6x36xf32, #tpu.memory_space<smem>>
    %710 = vector.broadcast %709 : f32 to vector<8x256xf32>
    %711 = arith.mulf %710, %18 : vector<8x256xf32>
    %712 = arith.addf %708, %711 : vector<8x256xf32>
    %c4_319 = arith.constant 4 : index
    %c15_320 = arith.constant 15 : index
    %713 = memref.load %arg5[%c4_319, %c15_320] : memref<6x36xf32, #tpu.memory_space<smem>>
    %714 = vector.broadcast %713 : f32 to vector<8x256xf32>
    %715 = arith.mulf %714, %19 : vector<8x256xf32>
    %716 = arith.addf %712, %715 : vector<8x256xf32>
    %c4_321 = arith.constant 4 : index
    %c16_322 = arith.constant 16 : index
    %717 = memref.load %arg5[%c4_321, %c16_322] : memref<6x36xf32, #tpu.memory_space<smem>>
    %718 = vector.broadcast %717 : f32 to vector<8x256xf32>
    %719 = arith.mulf %718, %20 : vector<8x256xf32>
    %720 = arith.addf %716, %719 : vector<8x256xf32>
    %c4_323 = arith.constant 4 : index
    %c17_324 = arith.constant 17 : index
    %721 = memref.load %arg5[%c4_323, %c17_324] : memref<6x36xf32, #tpu.memory_space<smem>>
    %722 = vector.broadcast %721 : f32 to vector<8x256xf32>
    %723 = arith.mulf %722, %21 : vector<8x256xf32>
    %724 = arith.addf %720, %723 : vector<8x256xf32>
    %c4_325 = arith.constant 4 : index
    %c18_326 = arith.constant 18 : index
    %725 = memref.load %arg5[%c4_325, %c18_326] : memref<6x36xf32, #tpu.memory_space<smem>>
    %726 = vector.broadcast %725 : f32 to vector<8x256xf32>
    %727 = arith.mulf %726, %24 : vector<8x256xf32>
    %728 = arith.addf %724, %727 : vector<8x256xf32>
    %c4_327 = arith.constant 4 : index
    %c19_328 = arith.constant 19 : index
    %729 = memref.load %arg5[%c4_327, %c19_328] : memref<6x36xf32, #tpu.memory_space<smem>>
    %730 = vector.broadcast %729 : f32 to vector<8x256xf32>
    %731 = arith.mulf %730, %25 : vector<8x256xf32>
    %732 = arith.addf %728, %731 : vector<8x256xf32>
    %c4_329 = arith.constant 4 : index
    %c20_330 = arith.constant 20 : index
    %733 = memref.load %arg5[%c4_329, %c20_330] : memref<6x36xf32, #tpu.memory_space<smem>>
    %734 = vector.broadcast %733 : f32 to vector<8x256xf32>
    %735 = arith.mulf %734, %26 : vector<8x256xf32>
    %736 = arith.addf %732, %735 : vector<8x256xf32>
    %c4_331 = arith.constant 4 : index
    %c21_332 = arith.constant 21 : index
    %737 = memref.load %arg5[%c4_331, %c21_332] : memref<6x36xf32, #tpu.memory_space<smem>>
    %738 = vector.broadcast %737 : f32 to vector<8x256xf32>
    %739 = arith.mulf %738, %27 : vector<8x256xf32>
    %740 = arith.addf %736, %739 : vector<8x256xf32>
    %c4_333 = arith.constant 4 : index
    %c22_334 = arith.constant 22 : index
    %741 = memref.load %arg5[%c4_333, %c22_334] : memref<6x36xf32, #tpu.memory_space<smem>>
    %742 = vector.broadcast %741 : f32 to vector<8x256xf32>
    %743 = arith.mulf %742, %28 : vector<8x256xf32>
    %744 = arith.addf %740, %743 : vector<8x256xf32>
    %c4_335 = arith.constant 4 : index
    %c23_336 = arith.constant 23 : index
    %745 = memref.load %arg5[%c4_335, %c23_336] : memref<6x36xf32, #tpu.memory_space<smem>>
    %746 = vector.broadcast %745 : f32 to vector<8x256xf32>
    %747 = arith.mulf %746, %29 : vector<8x256xf32>
    %748 = arith.addf %744, %747 : vector<8x256xf32>
    %c4_337 = arith.constant 4 : index
    %c24_338 = arith.constant 24 : index
    %749 = memref.load %arg5[%c4_337, %c24_338] : memref<6x36xf32, #tpu.memory_space<smem>>
    %750 = vector.broadcast %749 : f32 to vector<8x256xf32>
    %751 = arith.mulf %750, %30 : vector<8x256xf32>
    %752 = arith.addf %748, %751 : vector<8x256xf32>
    %c4_339 = arith.constant 4 : index
    %c25_340 = arith.constant 25 : index
    %753 = memref.load %arg5[%c4_339, %c25_340] : memref<6x36xf32, #tpu.memory_space<smem>>
    %754 = vector.broadcast %753 : f32 to vector<8x256xf32>
    %755 = arith.mulf %754, %31 : vector<8x256xf32>
    %756 = arith.addf %752, %755 : vector<8x256xf32>
    %c4_341 = arith.constant 4 : index
    %c26_342 = arith.constant 26 : index
    %757 = memref.load %arg5[%c4_341, %c26_342] : memref<6x36xf32, #tpu.memory_space<smem>>
    %758 = vector.broadcast %757 : f32 to vector<8x256xf32>
    %759 = arith.mulf %758, %32 : vector<8x256xf32>
    %760 = arith.addf %756, %759 : vector<8x256xf32>
    %c4_343 = arith.constant 4 : index
    %c27_344 = arith.constant 27 : index
    %761 = memref.load %arg5[%c4_343, %c27_344] : memref<6x36xf32, #tpu.memory_space<smem>>
    %762 = vector.broadcast %761 : f32 to vector<8x256xf32>
    %763 = arith.mulf %762, %35 : vector<8x256xf32>
    %764 = arith.addf %760, %763 : vector<8x256xf32>
    %c4_345 = arith.constant 4 : index
    %c28_346 = arith.constant 28 : index
    %765 = memref.load %arg5[%c4_345, %c28_346] : memref<6x36xf32, #tpu.memory_space<smem>>
    %766 = vector.broadcast %765 : f32 to vector<8x256xf32>
    %767 = arith.mulf %766, %36 : vector<8x256xf32>
    %768 = arith.addf %764, %767 : vector<8x256xf32>
    %c4_347 = arith.constant 4 : index
    %c29_348 = arith.constant 29 : index
    %769 = memref.load %arg5[%c4_347, %c29_348] : memref<6x36xf32, #tpu.memory_space<smem>>
    %770 = vector.broadcast %769 : f32 to vector<8x256xf32>
    %771 = arith.mulf %770, %37 : vector<8x256xf32>
    %772 = arith.addf %768, %771 : vector<8x256xf32>
    %c4_349 = arith.constant 4 : index
    %c30_350 = arith.constant 30 : index
    %773 = memref.load %arg5[%c4_349, %c30_350] : memref<6x36xf32, #tpu.memory_space<smem>>
    %774 = vector.broadcast %773 : f32 to vector<8x256xf32>
    %775 = arith.mulf %774, %38 : vector<8x256xf32>
    %776 = arith.addf %772, %775 : vector<8x256xf32>
    %c4_351 = arith.constant 4 : index
    %c31_352 = arith.constant 31 : index
    %777 = memref.load %arg5[%c4_351, %c31_352] : memref<6x36xf32, #tpu.memory_space<smem>>
    %778 = vector.broadcast %777 : f32 to vector<8x256xf32>
    %779 = arith.mulf %778, %39 : vector<8x256xf32>
    %780 = arith.addf %776, %779 : vector<8x256xf32>
    %c4_353 = arith.constant 4 : index
    %c32_354 = arith.constant 32 : index
    %781 = memref.load %arg5[%c4_353, %c32_354] : memref<6x36xf32, #tpu.memory_space<smem>>
    %782 = vector.broadcast %781 : f32 to vector<8x256xf32>
    %783 = arith.mulf %782, %40 : vector<8x256xf32>
    %784 = arith.addf %780, %783 : vector<8x256xf32>
    %c4_355 = arith.constant 4 : index
    %c33_356 = arith.constant 33 : index
    %785 = memref.load %arg5[%c4_355, %c33_356] : memref<6x36xf32, #tpu.memory_space<smem>>
    %786 = vector.broadcast %785 : f32 to vector<8x256xf32>
    %787 = arith.mulf %786, %41 : vector<8x256xf32>
    %788 = arith.addf %784, %787 : vector<8x256xf32>
    %c4_357 = arith.constant 4 : index
    %c34_358 = arith.constant 34 : index
    %789 = memref.load %arg5[%c4_357, %c34_358] : memref<6x36xf32, #tpu.memory_space<smem>>
    %790 = vector.broadcast %789 : f32 to vector<8x256xf32>
    %791 = arith.mulf %790, %42 : vector<8x256xf32>
    %792 = arith.addf %788, %791 : vector<8x256xf32>
    %c4_359 = arith.constant 4 : index
    %c35_360 = arith.constant 35 : index
    %793 = memref.load %arg5[%c4_359, %c35_360] : memref<6x36xf32, #tpu.memory_space<smem>>
    %794 = vector.broadcast %793 : f32 to vector<8x256xf32>
    %795 = arith.mulf %794, %43 : vector<8x256xf32>
    %796 = arith.addf %792, %795 : vector<8x256xf32>
    %c4_361 = arith.constant 4 : index
    %797 = memref.load %arg6[%c4_361] : memref<6xf32, #tpu.memory_space<smem>>
    %798 = vector.broadcast %797 : f32 to vector<8x256xf32>
    %799 = arith.addf %796, %798 : vector<8x256xf32>
    %cst_362 = arith.constant 0.000000e+00 : f32
    %800 = vector.broadcast %cst_362 : f32 to vector<8x256xf32>
    %801 = arith.maximumf %799, %800 : vector<8x256xf32>
    %c4_363 = arith.constant 4 : index
    %c0_364 = arith.constant 0 : index
    %c0_365 = arith.constant 0 : index
    %802 = vector.load %arg7[%c4_363, %c0_364, %c0_365] : memref<6x256x32xf32, #tpu.memory_space<vmem>>, vector<1x256x32xf32>
    %803 = vector.shape_cast %802 : vector<1x256x32xf32> to vector<256x32xf32>
    %cst_366 = arith.constant dense<0.000000e+00> : vector<8x32xf32>
    %804 = tpu.matmul %801, %803, %cst_366 {dimension_numbers = #tpu.dot_dimension_numbers<[1], [0], [0], [1], [0, 0, 1, 1], [], []>} : vector<8x256xf32>, vector<256x32xf32>, vector<8x32xf32> -> vector<8x32xf32>
    %805 = arith.addf %653, %804 : vector<8x32xf32>
    %c5_367 = arith.constant 5 : index
    %c0_368 = arith.constant 0 : index
    %806 = memref.load %arg5[%c5_367, %c0_368] : memref<6x36xf32, #tpu.memory_space<smem>>
    %807 = vector.broadcast %806 : f32 to vector<8x256xf32>
    %808 = arith.mulf %807, %2 : vector<8x256xf32>
    %c5_369 = arith.constant 5 : index
    %c1_370 = arith.constant 1 : index
    %809 = memref.load %arg5[%c5_369, %c1_370] : memref<6x36xf32, #tpu.memory_space<smem>>
    %810 = vector.broadcast %809 : f32 to vector<8x256xf32>
    %811 = arith.mulf %810, %3 : vector<8x256xf32>
    %812 = arith.addf %808, %811 : vector<8x256xf32>
    %c5_371 = arith.constant 5 : index
    %c2_372 = arith.constant 2 : index
    %813 = memref.load %arg5[%c5_371, %c2_372] : memref<6x36xf32, #tpu.memory_space<smem>>
    %814 = vector.broadcast %813 : f32 to vector<8x256xf32>
    %815 = arith.mulf %814, %4 : vector<8x256xf32>
    %816 = arith.addf %812, %815 : vector<8x256xf32>
    %c5_373 = arith.constant 5 : index
    %c3_374 = arith.constant 3 : index
    %817 = memref.load %arg5[%c5_373, %c3_374] : memref<6x36xf32, #tpu.memory_space<smem>>
    %818 = vector.broadcast %817 : f32 to vector<8x256xf32>
    %819 = arith.mulf %818, %5 : vector<8x256xf32>
    %820 = arith.addf %816, %819 : vector<8x256xf32>
    %c5_375 = arith.constant 5 : index
    %c4_376 = arith.constant 4 : index
    %821 = memref.load %arg5[%c5_375, %c4_376] : memref<6x36xf32, #tpu.memory_space<smem>>
    %822 = vector.broadcast %821 : f32 to vector<8x256xf32>
    %823 = arith.mulf %822, %6 : vector<8x256xf32>
    %824 = arith.addf %820, %823 : vector<8x256xf32>
    %c5_377 = arith.constant 5 : index
    %c5_378 = arith.constant 5 : index
    %825 = memref.load %arg5[%c5_377, %c5_378] : memref<6x36xf32, #tpu.memory_space<smem>>
    %826 = vector.broadcast %825 : f32 to vector<8x256xf32>
    %827 = arith.mulf %826, %7 : vector<8x256xf32>
    %828 = arith.addf %824, %827 : vector<8x256xf32>
    %c5_379 = arith.constant 5 : index
    %c6_380 = arith.constant 6 : index
    %829 = memref.load %arg5[%c5_379, %c6_380] : memref<6x36xf32, #tpu.memory_space<smem>>
    %830 = vector.broadcast %829 : f32 to vector<8x256xf32>
    %831 = arith.mulf %830, %8 : vector<8x256xf32>
    %832 = arith.addf %828, %831 : vector<8x256xf32>
    %c5_381 = arith.constant 5 : index
    %c7_382 = arith.constant 7 : index
    %833 = memref.load %arg5[%c5_381, %c7_382] : memref<6x36xf32, #tpu.memory_space<smem>>
    %834 = vector.broadcast %833 : f32 to vector<8x256xf32>
    %835 = arith.mulf %834, %9 : vector<8x256xf32>
    %836 = arith.addf %832, %835 : vector<8x256xf32>
    %c5_383 = arith.constant 5 : index
    %c8_384 = arith.constant 8 : index
    %837 = memref.load %arg5[%c5_383, %c8_384] : memref<6x36xf32, #tpu.memory_space<smem>>
    %838 = vector.broadcast %837 : f32 to vector<8x256xf32>
    %839 = arith.mulf %838, %10 : vector<8x256xf32>
    %840 = arith.addf %836, %839 : vector<8x256xf32>
    %c5_385 = arith.constant 5 : index
    %c9_386 = arith.constant 9 : index
    %841 = memref.load %arg5[%c5_385, %c9_386] : memref<6x36xf32, #tpu.memory_space<smem>>
    %842 = vector.broadcast %841 : f32 to vector<8x256xf32>
    %843 = arith.mulf %842, %13 : vector<8x256xf32>
    %844 = arith.addf %840, %843 : vector<8x256xf32>
    %c5_387 = arith.constant 5 : index
    %c10_388 = arith.constant 10 : index
    %845 = memref.load %arg5[%c5_387, %c10_388] : memref<6x36xf32, #tpu.memory_space<smem>>
    %846 = vector.broadcast %845 : f32 to vector<8x256xf32>
    %847 = arith.mulf %846, %14 : vector<8x256xf32>
    %848 = arith.addf %844, %847 : vector<8x256xf32>
    %c5_389 = arith.constant 5 : index
    %c11_390 = arith.constant 11 : index
    %849 = memref.load %arg5[%c5_389, %c11_390] : memref<6x36xf32, #tpu.memory_space<smem>>
    %850 = vector.broadcast %849 : f32 to vector<8x256xf32>
    %851 = arith.mulf %850, %15 : vector<8x256xf32>
    %852 = arith.addf %848, %851 : vector<8x256xf32>
    %c5_391 = arith.constant 5 : index
    %c12_392 = arith.constant 12 : index
    %853 = memref.load %arg5[%c5_391, %c12_392] : memref<6x36xf32, #tpu.memory_space<smem>>
    %854 = vector.broadcast %853 : f32 to vector<8x256xf32>
    %855 = arith.mulf %854, %16 : vector<8x256xf32>
    %856 = arith.addf %852, %855 : vector<8x256xf32>
    %c5_393 = arith.constant 5 : index
    %c13_394 = arith.constant 13 : index
    %857 = memref.load %arg5[%c5_393, %c13_394] : memref<6x36xf32, #tpu.memory_space<smem>>
    %858 = vector.broadcast %857 : f32 to vector<8x256xf32>
    %859 = arith.mulf %858, %17 : vector<8x256xf32>
    %860 = arith.addf %856, %859 : vector<8x256xf32>
    %c5_395 = arith.constant 5 : index
    %c14_396 = arith.constant 14 : index
    %861 = memref.load %arg5[%c5_395, %c14_396] : memref<6x36xf32, #tpu.memory_space<smem>>
    %862 = vector.broadcast %861 : f32 to vector<8x256xf32>
    %863 = arith.mulf %862, %18 : vector<8x256xf32>
    %864 = arith.addf %860, %863 : vector<8x256xf32>
    %c5_397 = arith.constant 5 : index
    %c15_398 = arith.constant 15 : index
    %865 = memref.load %arg5[%c5_397, %c15_398] : memref<6x36xf32, #tpu.memory_space<smem>>
    %866 = vector.broadcast %865 : f32 to vector<8x256xf32>
    %867 = arith.mulf %866, %19 : vector<8x256xf32>
    %868 = arith.addf %864, %867 : vector<8x256xf32>
    %c5_399 = arith.constant 5 : index
    %c16_400 = arith.constant 16 : index
    %869 = memref.load %arg5[%c5_399, %c16_400] : memref<6x36xf32, #tpu.memory_space<smem>>
    %870 = vector.broadcast %869 : f32 to vector<8x256xf32>
    %871 = arith.mulf %870, %20 : vector<8x256xf32>
    %872 = arith.addf %868, %871 : vector<8x256xf32>
    %c5_401 = arith.constant 5 : index
    %c17_402 = arith.constant 17 : index
    %873 = memref.load %arg5[%c5_401, %c17_402] : memref<6x36xf32, #tpu.memory_space<smem>>
    %874 = vector.broadcast %873 : f32 to vector<8x256xf32>
    %875 = arith.mulf %874, %21 : vector<8x256xf32>
    %876 = arith.addf %872, %875 : vector<8x256xf32>
    %c5_403 = arith.constant 5 : index
    %c18_404 = arith.constant 18 : index
    %877 = memref.load %arg5[%c5_403, %c18_404] : memref<6x36xf32, #tpu.memory_space<smem>>
    %878 = vector.broadcast %877 : f32 to vector<8x256xf32>
    %879 = arith.mulf %878, %24 : vector<8x256xf32>
    %880 = arith.addf %876, %879 : vector<8x256xf32>
    %c5_405 = arith.constant 5 : index
    %c19_406 = arith.constant 19 : index
    %881 = memref.load %arg5[%c5_405, %c19_406] : memref<6x36xf32, #tpu.memory_space<smem>>
    %882 = vector.broadcast %881 : f32 to vector<8x256xf32>
    %883 = arith.mulf %882, %25 : vector<8x256xf32>
    %884 = arith.addf %880, %883 : vector<8x256xf32>
    %c5_407 = arith.constant 5 : index
    %c20_408 = arith.constant 20 : index
    %885 = memref.load %arg5[%c5_407, %c20_408] : memref<6x36xf32, #tpu.memory_space<smem>>
    %886 = vector.broadcast %885 : f32 to vector<8x256xf32>
    %887 = arith.mulf %886, %26 : vector<8x256xf32>
    %888 = arith.addf %884, %887 : vector<8x256xf32>
    %c5_409 = arith.constant 5 : index
    %c21_410 = arith.constant 21 : index
    %889 = memref.load %arg5[%c5_409, %c21_410] : memref<6x36xf32, #tpu.memory_space<smem>>
    %890 = vector.broadcast %889 : f32 to vector<8x256xf32>
    %891 = arith.mulf %890, %27 : vector<8x256xf32>
    %892 = arith.addf %888, %891 : vector<8x256xf32>
    %c5_411 = arith.constant 5 : index
    %c22_412 = arith.constant 22 : index
    %893 = memref.load %arg5[%c5_411, %c22_412] : memref<6x36xf32, #tpu.memory_space<smem>>
    %894 = vector.broadcast %893 : f32 to vector<8x256xf32>
    %895 = arith.mulf %894, %28 : vector<8x256xf32>
    %896 = arith.addf %892, %895 : vector<8x256xf32>
    %c5_413 = arith.constant 5 : index
    %c23_414 = arith.constant 23 : index
    %897 = memref.load %arg5[%c5_413, %c23_414] : memref<6x36xf32, #tpu.memory_space<smem>>
    %898 = vector.broadcast %897 : f32 to vector<8x256xf32>
    %899 = arith.mulf %898, %29 : vector<8x256xf32>
    %900 = arith.addf %896, %899 : vector<8x256xf32>
    %c5_415 = arith.constant 5 : index
    %c24_416 = arith.constant 24 : index
    %901 = memref.load %arg5[%c5_415, %c24_416] : memref<6x36xf32, #tpu.memory_space<smem>>
    %902 = vector.broadcast %901 : f32 to vector<8x256xf32>
    %903 = arith.mulf %902, %30 : vector<8x256xf32>
    %904 = arith.addf %900, %903 : vector<8x256xf32>
    %c5_417 = arith.constant 5 : index
    %c25_418 = arith.constant 25 : index
    %905 = memref.load %arg5[%c5_417, %c25_418] : memref<6x36xf32, #tpu.memory_space<smem>>
    %906 = vector.broadcast %905 : f32 to vector<8x256xf32>
    %907 = arith.mulf %906, %31 : vector<8x256xf32>
    %908 = arith.addf %904, %907 : vector<8x256xf32>
    %c5_419 = arith.constant 5 : index
    %c26_420 = arith.constant 26 : index
    %909 = memref.load %arg5[%c5_419, %c26_420] : memref<6x36xf32, #tpu.memory_space<smem>>
    %910 = vector.broadcast %909 : f32 to vector<8x256xf32>
    %911 = arith.mulf %910, %32 : vector<8x256xf32>
    %912 = arith.addf %908, %911 : vector<8x256xf32>
    %c5_421 = arith.constant 5 : index
    %c27_422 = arith.constant 27 : index
    %913 = memref.load %arg5[%c5_421, %c27_422] : memref<6x36xf32, #tpu.memory_space<smem>>
    %914 = vector.broadcast %913 : f32 to vector<8x256xf32>
    %915 = arith.mulf %914, %35 : vector<8x256xf32>
    %916 = arith.addf %912, %915 : vector<8x256xf32>
    %c5_423 = arith.constant 5 : index
    %c28_424 = arith.constant 28 : index
    %917 = memref.load %arg5[%c5_423, %c28_424] : memref<6x36xf32, #tpu.memory_space<smem>>
    %918 = vector.broadcast %917 : f32 to vector<8x256xf32>
    %919 = arith.mulf %918, %36 : vector<8x256xf32>
    %920 = arith.addf %916, %919 : vector<8x256xf32>
    %c5_425 = arith.constant 5 : index
    %c29_426 = arith.constant 29 : index
    %921 = memref.load %arg5[%c5_425, %c29_426] : memref<6x36xf32, #tpu.memory_space<smem>>
    %922 = vector.broadcast %921 : f32 to vector<8x256xf32>
    %923 = arith.mulf %922, %37 : vector<8x256xf32>
    %924 = arith.addf %920, %923 : vector<8x256xf32>
    %c5_427 = arith.constant 5 : index
    %c30_428 = arith.constant 30 : index
    %925 = memref.load %arg5[%c5_427, %c30_428] : memref<6x36xf32, #tpu.memory_space<smem>>
    %926 = vector.broadcast %925 : f32 to vector<8x256xf32>
    %927 = arith.mulf %926, %38 : vector<8x256xf32>
    %928 = arith.addf %924, %927 : vector<8x256xf32>
    %c5_429 = arith.constant 5 : index
    %c31_430 = arith.constant 31 : index
    %929 = memref.load %arg5[%c5_429, %c31_430] : memref<6x36xf32, #tpu.memory_space<smem>>
    %930 = vector.broadcast %929 : f32 to vector<8x256xf32>
    %931 = arith.mulf %930, %39 : vector<8x256xf32>
    %932 = arith.addf %928, %931 : vector<8x256xf32>
    %c5_431 = arith.constant 5 : index
    %c32_432 = arith.constant 32 : index
    %933 = memref.load %arg5[%c5_431, %c32_432] : memref<6x36xf32, #tpu.memory_space<smem>>
    %934 = vector.broadcast %933 : f32 to vector<8x256xf32>
    %935 = arith.mulf %934, %40 : vector<8x256xf32>
    %936 = arith.addf %932, %935 : vector<8x256xf32>
    %c5_433 = arith.constant 5 : index
    %c33_434 = arith.constant 33 : index
    %937 = memref.load %arg5[%c5_433, %c33_434] : memref<6x36xf32, #tpu.memory_space<smem>>
    %938 = vector.broadcast %937 : f32 to vector<8x256xf32>
    %939 = arith.mulf %938, %41 : vector<8x256xf32>
    %940 = arith.addf %936, %939 : vector<8x256xf32>
    %c5_435 = arith.constant 5 : index
    %c34_436 = arith.constant 34 : index
    %941 = memref.load %arg5[%c5_435, %c34_436] : memref<6x36xf32, #tpu.memory_space<smem>>
    %942 = vector.broadcast %941 : f32 to vector<8x256xf32>
    %943 = arith.mulf %942, %42 : vector<8x256xf32>
    %944 = arith.addf %940, %943 : vector<8x256xf32>
    %c5_437 = arith.constant 5 : index
    %c35_438 = arith.constant 35 : index
    %945 = memref.load %arg5[%c5_437, %c35_438] : memref<6x36xf32, #tpu.memory_space<smem>>
    %946 = vector.broadcast %945 : f32 to vector<8x256xf32>
    %947 = arith.mulf %946, %43 : vector<8x256xf32>
    %948 = arith.addf %944, %947 : vector<8x256xf32>
    %c5_439 = arith.constant 5 : index
    %949 = memref.load %arg6[%c5_439] : memref<6xf32, #tpu.memory_space<smem>>
    %950 = vector.broadcast %949 : f32 to vector<8x256xf32>
    %951 = arith.addf %948, %950 : vector<8x256xf32>
    %cst_440 = arith.constant 0.000000e+00 : f32
    %952 = vector.broadcast %cst_440 : f32 to vector<8x256xf32>
    %953 = arith.maximumf %951, %952 : vector<8x256xf32>
    %c5_441 = arith.constant 5 : index
    %c0_442 = arith.constant 0 : index
    %c0_443 = arith.constant 0 : index
    %954 = vector.load %arg7[%c5_441, %c0_442, %c0_443] : memref<6x256x32xf32, #tpu.memory_space<vmem>>, vector<1x256x32xf32>
    %955 = vector.shape_cast %954 : vector<1x256x32xf32> to vector<256x32xf32>
    %cst_444 = arith.constant dense<0.000000e+00> : vector<8x32xf32>
    %956 = tpu.matmul %953, %955, %cst_444 {dimension_numbers = #tpu.dot_dimension_numbers<[1], [0], [0], [1], [0, 0, 1, 1], [], []>} : vector<8x256xf32>, vector<256x32xf32>, vector<8x32xf32> -> vector<8x32xf32>
    %957 = arith.addf %805, %956 : vector<8x32xf32>
    %cst_445 = arith.constant 0.000000e+00 : f32
    %958 = vector.broadcast %cst_445 : f32 to vector<8x32xf32>
    %959 = arith.maximumf %957, %958 : vector<8x32xf32>
    %c0_446 = arith.constant 0 : index
    %c0_447 = arith.constant 0 : index
    %960 = vector.load %arg9[%c0_446, %c0_447] : memref<32x32xf32, #tpu.memory_space<vmem>>, vector<32x32xf32>
    %cst_448 = arith.constant dense<0.000000e+00> : vector<8x32xf32>
    %961 = tpu.matmul %959, %960, %cst_448 {dimension_numbers = #tpu.dot_dimension_numbers<[1], [0], [0], [1], [0, 0, 1, 1], [], []>} : vector<8x32xf32>, vector<32x32xf32>, vector<8x32xf32> -> vector<8x32xf32>
    %c0_449 = arith.constant 0 : index
    %c0_450 = arith.constant 0 : index
    %962 = vector.load %arg10[%c0_449, %c0_450] : memref<1x32xf32, #tpu.memory_space<vmem>>, vector<1x32xf32>
    %963 = vector.broadcast %962 : vector<1x32xf32> to vector<8x32xf32>
    %964 = arith.addf %961, %963 : vector<8x32xf32>
    %cst_451 = arith.constant 0.000000e+00 : f32
    %965 = vector.broadcast %cst_451 : f32 to vector<8x32xf32>
    %966 = arith.maximumf %964, %965 : vector<8x32xf32>
    %c0_452 = arith.constant 0 : index
    %c0_453 = arith.constant 0 : index
    %967 = vector.load %arg11[%c0_452, %c0_453] : memref<32x512xf32, #tpu.memory_space<vmem>>, vector<32x512xf32>
    %cst_454 = arith.constant dense<0.000000e+00> : vector<8x512xf32>
    %968 = tpu.matmul %966, %967, %cst_454 {dimension_numbers = #tpu.dot_dimension_numbers<[1], [0], [0], [1], [0, 0, 1, 1], [], []>} : vector<8x32xf32>, vector<32x512xf32>, vector<8x512xf32> -> vector<8x512xf32>
    %c0_455 = arith.constant 0 : index
    %c0_456 = arith.constant 0 : index
    %969 = vector.load %arg3[%c0_455, %c0_456] : memref<8x128xf32, #tpu.memory_space<vmem>>, vector<8x128xf32>
    %c0_457 = arith.constant 0 : index
    %c0_458 = arith.constant 0 : index
    %970 = vector.load %arg14[%c0_457, %c0_458] : memref<128x512xf32, #tpu.memory_space<vmem>>, vector<128x512xf32>
    %cst_459 = arith.constant dense<0.000000e+00> : vector<8x512xf32>
    %971 = tpu.matmul %969, %970, %cst_459 {dimension_numbers = #tpu.dot_dimension_numbers<[1], [0], [0], [1], [0, 0, 1, 1], [], []>} : vector<8x128xf32>, vector<128x512xf32>, vector<8x512xf32> -> vector<8x512xf32>
    %972 = arith.addf %968, %971 : vector<8x512xf32>
    %c0_460 = arith.constant 0 : index
    %c0_461 = arith.constant 0 : index
    %973 = vector.load %arg13[%c0_460, %c0_461] : memref<1x512xf32, #tpu.memory_space<vmem>>, vector<1x512xf32>
    %974 = vector.broadcast %973 : vector<1x512xf32> to vector<8x512xf32>
    %975 = arith.addf %972, %974 : vector<8x512xf32>
    %c0_462 = arith.constant 0 : index
    %c0_463 = arith.constant 0 : index
    %976 = vector.load %arg2[%c0_462, %c0_463] : memref<8x3xf32, #tpu.memory_space<vmem>>, vector<8x3xf32>
    %c0_464 = arith.constant 0 : index
    %c0_465 = arith.constant 0 : index
    %977 = vector.load %arg12[%c0_464, %c0_465] : memref<3x512xf32, #tpu.memory_space<vmem>>, vector<3x512xf32>
    %978 = vector.extract_strided_slice %976 {offsets = [0, 0], sizes = [8, 1], strides = [1, 1]} : vector<8x3xf32> to vector<8x1xf32>
    %979 = vector.extract_strided_slice %977 {offsets = [0, 0], sizes = [1, 512], strides = [1, 1]} : vector<3x512xf32> to vector<1x512xf32>
    %980 = vector.broadcast %978 : vector<8x1xf32> to vector<8x512xf32>
    %981 = vector.broadcast %979 : vector<1x512xf32> to vector<8x512xf32>
    %982 = arith.mulf %980, %981 : vector<8x512xf32>
    %983 = arith.addf %975, %982 : vector<8x512xf32>
    %984 = vector.extract_strided_slice %976 {offsets = [0, 1], sizes = [8, 1], strides = [1, 1]} : vector<8x3xf32> to vector<8x1xf32>
    %985 = vector.extract_strided_slice %977 {offsets = [1, 0], sizes = [1, 512], strides = [1, 1]} : vector<3x512xf32> to vector<1x512xf32>
    %986 = vector.broadcast %984 : vector<8x1xf32> to vector<8x512xf32>
    %987 = vector.broadcast %985 : vector<1x512xf32> to vector<8x512xf32>
    %988 = arith.mulf %986, %987 : vector<8x512xf32>
    %989 = arith.addf %983, %988 : vector<8x512xf32>
    %990 = vector.extract_strided_slice %976 {offsets = [0, 2], sizes = [8, 1], strides = [1, 1]} : vector<8x3xf32> to vector<8x1xf32>
    %991 = vector.extract_strided_slice %977 {offsets = [2, 0], sizes = [1, 512], strides = [1, 1]} : vector<3x512xf32> to vector<1x512xf32>
    %992 = vector.broadcast %990 : vector<8x1xf32> to vector<8x512xf32>
    %993 = vector.broadcast %991 : vector<1x512xf32> to vector<8x512xf32>
    %994 = arith.mulf %992, %993 : vector<8x512xf32>
    %995 = arith.addf %989, %994 : vector<8x512xf32>
    %996 = vector.extract_strided_slice %995 {offsets = [0, 0], sizes = [8, 128], strides = [1, 1]} : vector<8x512xf32> to vector<8x128xf32>
    %997 = arith.negf %996 : vector<8x128xf32>
    %998 = math.exp %997 : vector<8x128xf32>
    %cst_466 = arith.constant 1.000000e+00 : f32
    %999 = vector.broadcast %cst_466 : f32 to vector<8x128xf32>
    %1000 = arith.addf %999, %998 : vector<8x128xf32>
    %1001 = arith.divf %999, %1000 : vector<8x128xf32>
    %1002 = vector.extract_strided_slice %995 {offsets = [0, 128], sizes = [8, 128], strides = [1, 1]} : vector<8x512xf32> to vector<8x128xf32>
    %1003 = arith.negf %1002 : vector<8x128xf32>
    %1004 = math.exp %1003 : vector<8x128xf32>
    %cst_467 = arith.constant 1.000000e+00 : f32
    %1005 = vector.broadcast %cst_467 : f32 to vector<8x128xf32>
    %1006 = arith.addf %1005, %1004 : vector<8x128xf32>
    %1007 = arith.divf %1005, %1006 : vector<8x128xf32>
    %1008 = vector.extract_strided_slice %995 {offsets = [0, 256], sizes = [8, 128], strides = [1, 1]} : vector<8x512xf32> to vector<8x128xf32>
    %1009 = math.tanh %1008 : vector<8x128xf32>
    %1010 = vector.extract_strided_slice %995 {offsets = [0, 384], sizes = [8, 128], strides = [1, 1]} : vector<8x512xf32> to vector<8x128xf32>
    %1011 = arith.negf %1010 : vector<8x128xf32>
    %1012 = math.exp %1011 : vector<8x128xf32>
    %cst_468 = arith.constant 1.000000e+00 : f32
    %1013 = vector.broadcast %cst_468 : f32 to vector<8x128xf32>
    %1014 = arith.addf %1013, %1012 : vector<8x128xf32>
    %1015 = arith.divf %1013, %1014 : vector<8x128xf32>
    %c0_469 = arith.constant 0 : index
    %c0_470 = arith.constant 0 : index
    %1016 = vector.load %arg4[%c0_469, %c0_470] : memref<8x128xf32, #tpu.memory_space<vmem>>, vector<8x128xf32>
    %1017 = arith.mulf %1007, %1016 : vector<8x128xf32>
    %1018 = arith.mulf %1001, %1009 : vector<8x128xf32>
    %1019 = arith.addf %1017, %1018 : vector<8x128xf32>
    %1020 = math.tanh %1019 : vector<8x128xf32>
    %1021 = arith.mulf %1015, %1020 : vector<8x128xf32>
    %c0_471 = arith.constant 0 : index
    %c0_472 = arith.constant 0 : index
    %1022 = vector.load %arg15[%c0_471, %c0_472] : memref<128x128xf32, #tpu.memory_space<vmem>>, vector<128x128xf32>
    %cst_473 = arith.constant dense<0.000000e+00> : vector<8x128xf32>
    %1023 = tpu.matmul %1021, %1022, %cst_473 {dimension_numbers = #tpu.dot_dimension_numbers<[1], [0], [0], [1], [0, 0, 1, 1], [], []>} : vector<8x128xf32>, vector<128x128xf32>, vector<8x128xf32> -> vector<8x128xf32>
    %c0_474 = arith.constant 0 : index
    %c0_475 = arith.constant 0 : index
    %1024 = vector.load %arg16[%c0_474, %c0_475] : memref<1x128xf32, #tpu.memory_space<vmem>>, vector<1x128xf32>
    %1025 = vector.broadcast %1024 : vector<1x128xf32> to vector<8x128xf32>
    %1026 = arith.addf %1023, %1025 : vector<8x128xf32>
    %c0_476 = arith.constant 0 : index
    %c0_477 = arith.constant 0 : index
    %1027 = vector.load %arg17[%c0_476, %c0_477] : memref<8x128xf32, #tpu.memory_space<vmem>>, vector<8x128xf32>
    tpu.vector_store %arg17[%c0_476, %c0_477], %1026 {strides = array<i32>} : memref<8x128xf32, #tpu.memory_space<vmem>>, vector<8x128xf32>,
    %c0_478 = arith.constant 0 : index
    %c0_479 = arith.constant 0 : index
    %1028 = vector.load %arg18[%c0_478, %c0_479] : memref<8x128xf32, #tpu.memory_space<vmem>>, vector<8x128xf32>
    tpu.vector_store %arg18[%c0_478, %c0_479], %1021 {strides = array<i32>} : memref<8x128xf32, #tpu.memory_space<vmem>>, vector<8x128xf32>,
    %c0_480 = arith.constant 0 : index
    %c0_481 = arith.constant 0 : index
    %1029 = vector.load %arg19[%c0_480, %c0_481] : memref<8x128xf32, #tpu.memory_space<vmem>>, vector<8x128xf32>
    tpu.vector_store %arg19[%c0_480, %c0_481], %1019 {strides = array<i32>} : memref<8x128xf32, #tpu.memory_space<vmem>>, vector<8x128xf32>,
    return
  }
  func.func @transform_0(%arg0: i32) -> (i32, i32, i32) {
    %c0_i32 = arith.constant 0 : i32
    %c0_i32_0 = arith.constant 0 : i32
    %c0_i32_1 = arith.constant 0 : i32
    return %c0_i32, %arg0, %c0_i32_0 : i32, i32, i32
  }
  func.func @transform_1(%arg0: i32) -> (i32, i32) {
    %c0_i32 = arith.constant 0 : i32
    %c0_i32_0 = arith.constant 0 : i32
    return %arg0, %c0_i32 : i32, i32
  }
  func.func @transform_2(%arg0: i32) -> (i32, i32) {
    %c0_i32 = arith.constant 0 : i32
    %c0_i32_0 = arith.constant 0 : i32
    return %arg0, %c0_i32 : i32, i32
  }
  func.func @transform_3(%arg0: i32) -> (i32, i32) {
    %c0_i32 = arith.constant 0 : i32
    %c0_i32_0 = arith.constant 0 : i32
    return %arg0, %c0_i32 : i32, i32
  }
  func.func @transform_4(%arg0: i32) -> (i32, i32) {
    %c0_i32 = arith.constant 0 : i32
    %c0_i32_0 = arith.constant 0 : i32
    %c0_i32_1 = arith.constant 0 : i32
    return %c0_i32, %c0_i32_0 : i32, i32
  }
  func.func @transform_5(%arg0: i32) -> i32 {
    %c0_i32 = arith.constant 0 : i32
    %c0_i32_0 = arith.constant 0 : i32
    return %c0_i32 : i32
  }
  func.func @transform_6(%arg0: i32) -> (i32, i32, i32) {
    %c0_i32 = arith.constant 0 : i32
    %c0_i32_0 = arith.constant 0 : i32
    %c0_i32_1 = arith.constant 0 : i32
    %c0_i32_2 = arith.constant 0 : i32
    return %c0_i32, %c0_i32_0, %c0_i32_1 : i32, i32, i32
  }
  func.func @transform_7(%arg0: i32) -> (i32, i32) {
    %c0_i32 = arith.constant 0 : i32
    %c0_i32_0 = arith.constant 0 : i32
    %c0_i32_1 = arith.constant 0 : i32
    return %c0_i32, %c0_i32_0 : i32, i32
  }
  func.func @transform_8(%arg0: i32) -> (i32, i32) {
    %c0_i32 = arith.constant 0 : i32
    %c0_i32_0 = arith.constant 0 : i32
    %c0_i32_1 = arith.constant 0 : i32
    return %c0_i32, %c0_i32_0 : i32, i32
  }
  func.func @transform_9(%arg0: i32) -> (i32, i32) {
    %c0_i32 = arith.constant 0 : i32
    %c0_i32_0 = arith.constant 0 : i32
    %c0_i32_1 = arith.constant 0 : i32
    return %c0_i32, %c0_i32_0 : i32, i32
  }
  func.func @transform_10(%arg0: i32) -> (i32, i32) {
    %c0_i32 = arith.constant 0 : i32
    %c0_i32_0 = arith.constant 0 : i32
    %c0_i32_1 = arith.constant 0 : i32
    return %c0_i32, %c0_i32_0 : i32, i32
  }
  func.func @transform_11(%arg0: i32) -> (i32, i32) {
    %c0_i32 = arith.constant 0 : i32
    %c0_i32_0 = arith.constant 0 : i32
    %c0_i32_1 = arith.constant 0 : i32
    return %c0_i32, %c0_i32_0 : i32, i32
  }
  func.func @transform_12(%arg0: i32) -> (i32, i32) {
    %c0_i32 = arith.constant 0 : i32
    %c0_i32_0 = arith.constant 0 : i32
    %c0_i32_1 = arith.constant 0 : i32
    return %c0_i32, %c0_i32_0 : i32, i32
  }
  func.func @transform_13(%arg0: i32) -> (i32, i32) {
    %c0_i32 = arith.constant 0 : i32
    %c0_i32_0 = arith.constant 0 : i32
    %c0_i32_1 = arith.constant 0 : i32
    return %c0_i32, %c0_i32_0 : i32, i32
  }
  func.func @transform_14(%arg0: i32) -> (i32, i32) {
    %c0_i32 = arith.constant 0 : i32
    %c0_i32_0 = arith.constant 0 : i32
    %c0_i32_1 = arith.constant 0 : i32
    return %c0_i32, %c0_i32_0 : i32, i32
  }
  func.func @transform_15(%arg0: i32) -> (i32, i32) {
    %c0_i32 = arith.constant 0 : i32
    %c0_i32_0 = arith.constant 0 : i32
    %c0_i32_1 = arith.constant 0 : i32
    return %c0_i32, %c0_i32_0 : i32, i32
  }
  func.func @transform_16(%arg0: i32) -> (i32, i32) {
    %c0_i32 = arith.constant 0 : i32
    %c0_i32_0 = arith.constant 0 : i32
    return %arg0, %c0_i32 : i32, i32
  }
  func.func @transform_17(%arg0: i32) -> (i32, i32) {
    %c0_i32 = arith.constant 0 : i32
    %c0_i32_0 = arith.constant 0 : i32
    return %arg0, %c0_i32 : i32, i32
  }
  func.func @transform_18(%arg0: i32) -> (i32, i32) {
    %c0_i32 = arith.constant 0 : i32
    %c0_i32_0 = arith.constant 0 : i32
    return %arg0, %c0_i32 : i32, i32
  }
}

</mosaic_0001>

<bundles_post_ra>
// kernel: agent_forward_pallas.1
= control target key start
LH: loop header
LB: loop body
LE: loop exit
PB: predicated region body
PF: predicated region fallthrough
CT: control target
= control target key end

     0   :  { %s10195_s0 = inlined_call_operand.vmem [shape: f32[4,8,290], index: 0, kind: input, shape index: {}]   ;;  %s10196_s1 = inlined_call_operand.vmem [shape: f32[8,3], index: 1, kind: input, shape index: {}]   ;;  %s10197_s2 = inlined_call_operand.vmem [shape: f32[8,128], index: 2, kind: input, shape index: {}, may-alias: {2,17}]   ;;  %s10198_s3 = inlined_call_operand.vmem [shape: f32[8,128], index: 3, kind: input, shape index: {}, may-alias: {3,18}]   ;;  %s10199_s4 = inlined_call_operand.vmem [shape: f32[6,36], index: 4, kind: input, shape index: {}]   ;;  %s10200_s5 = inlined_call_operand.vmem [shape: f32[6], index: 5, kind: input, shape index: {}]   ;;  %s10201_s6 = inlined_call_operand.vmem [shape: f32[6,256,32], index: 6, kind: input, shape index: {}]   ;;  %s10202_s7 = inlined_call_operand.vmem [shape: f32[1,32], index: 7, kind: input, shape index: {}]   ;;  %s10203_s8 = inlined_call_operand.vmem [shape: f32[32,32], index: 8, kind: input, shape index: {}]   ;;  %s10204_s9 = inlined_call_operand.vmem [shape: f32[1,32], index: 9, kind: input, shape index: {}]   ;;  %s10205_s10 = inlined_call_operand.vmem [shape: f32[32,512], index: 10, kind: input, shape index: {}]   ;;  %s10206_s11 = inlined_call_operand.vmem [shape: f32[3,512], index: 11, kind: input, shape index: {}]   ;;  %s10207_s12 = inlined_call_operand.vmem [shape: f32[1,512], index: 12, kind: input, shape index: {}]   ;;  %s10208_s13 = inlined_call_operand.vmem [shape: f32[128,512], index: 13, kind: input, shape index: {}]   ;;  %s10209_s14 = inlined_call_operand.vmem [shape: f32[128,128], index: 14, kind: input, shape index: {}]   ;;  %s10210_s15 = inlined_call_operand.vmem [shape: f32[1,128], index: 15, kind: input, shape index: {}]   ;;  %s10211_s16 = inlined_call_operand.vmem [shape: f32[8,128], index: 16, kind: output, shape index: {0}]   ;;  %s10212_s17 = inlined_call_operand.vmem [shape: f32[8,128], index: 17, kind: output, shape index: {1}, may-alias: {2,17}]   ;;  %s10213_s18 = inlined_call_operand.vmem [shape: f32[8,128], index: 18, kind: output, shape index: {2}, may-alias: {3,18}]  }
   0x1   :  { %10283 = sst [smem:[#allocation97_spill]] %s10195_s0 }
   0x2   :  { %10284 = sst [smem:[#allocation98_spill]] %s10196_s1 }
   0x3   :  { %10285 = sst [smem:[#allocation99_spill]] %s10197_s2 }
   0x4   :  { %24 = vsyncpa [#allocation3], 0  ;;  %s39_s29 = sshll.u32 %s10199_s4, 4  ;;  %s40_s29 = int_to_ptr.vmem [resolvable:$true] %s39_s29 }
   0x5   :  { %25 = vsyncpa [#allocation5], 0  ;;  %s48_s19 = sshll.u32 %s10200_s5, 4  ;;  %s5556_s1 = smov [#allocation2]   ;;  %s49_s19 = int_to_ptr.vmem [resolvable:$true] %s48_s19 }
   0x6   :  { %42 = dma.vmem_to_smem %s40_s29, 128, %s5556_s1, [#allocation3]  }
   0x7   :  { %s5557_s20 = smov [#allocation4]  }
   0x8   :  { %51 = dma.vmem_to_smem %s49_s19, 16, %s5557_s20, [#allocation5]  }
   0x9   :  { %5552 = dma.done.wait [#allocation3], 128  }
   0xa   :  { %5553 = vsyncadd [#allocation3], 4294967168 }
   0xb   :  { %5554 = dma.done.wait [#allocation5], 16  }
   0xc   :  { %5555 = vsyncadd [#allocation5], 4294967280 }
   0xd   :  { %80 = sfence }
   0xe   :  { %s5059_s21 = sld [smem:[#allocation2 + $0x1]]  ;;  %s10237_s27 = smov 127   ;;  %vm115_vm0 = vcmask 1039360   ;;  %vm136_vm1 = vcmask 1031168   ;;  %vm157_vm2 = vcmask 916480   ;;  %vm178_vm3 = vcmask 908288  }
   0xf   :  { %s5060_s22 = sld [smem:[#allocation2 + $0x2]]  ;;  %s10224_s28 = smov 126   ;;  %vm199_vm4 = vcmask 900096   ;;  %vm220_vm5 = vcmask 785408   ;;  %vm241_vm6 = vcmask 777216   ;;  %vm262_vm7 = vcmask 769024  }
  0x10   :  { %s10286_s23 = sld [smem:[#allocation97_spill]]  ;;  %s5560_s0 = smov 112   ;;  %vm4568_vm8 = vcmask 261120  }
  0x11   :  { %s5061_s29 = sld [smem:[#allocation2 + $0x3]]  ;;  %s5561_s1 = smov 111  }
  0x12   :  { %s5062_s30 = sld [smem:[#allocation2 + $0x4]]  ;;  %s5563_s2 = smov 96  }
  0x13   :  { %s5063_s19 = sld [smem:[#allocation2 + $0x5]]  ;;  %s10251_s24 = smov 95  }
  0x14   :  { %v102_v2 = vstv %s5059_s21  ;;  %s5064_s20 = sld [smem:[#allocation2 + $0x6]]  ;;  %s5562_s21 = smov 110  }
  0x15   :  { %v123_v5 = vstv %s5060_s22  ;;  %s5065_s22 = sld [smem:[#allocation2 + $0x7]]  ;;  %s10249_s5 = smov 94  }
  0x16   :  { %v5673_v0 = vld [vmem:[%s10286_s23 + $0x10] sm:$0xff]  ;;  %v5678_v1 = vld [vmem:[%s10286_s23] sm:$0xff]  ;;  %v5685_v6 = vld [vmem:[%s10286_s23 + $0x8] sm:$0xff]  ;;  %s5066_s4 = sld [smem:[#allocation2 + $0x8]] }
  0x17   :  { %v105_v3 = vmul.f32 %v102_v2, %v5673_v0  ;;  %v103_v4 = vmul.f32 %v102_v2, %v5678_v1  ;;  %v125_v7 = vmul.f32 %v123_v5, %v5685_v6  ;;  %v124_v8 = vmul.f32 %v123_v5, %v5678_v1  ;;  %s5068_s25 = sld [smem:[#allocation2 + $0xa]]  ;;  %v5735_v35 = vld [vmem:[%s10286_s23 + $0x20] sm:$0xff]  ;;  %v5740_v37 = vld [vmem:[%s10286_s23 + $0x18] sm:$0xff]  ;;  %v5746_v38 = vld [vmem:[%s10286_s23 + $0x28] sm:$0xff] }
  0x18   :  { %v104_v9 = vmul.f32 %v102_v2, %v5685_v6  ;;  %v126_v10 = vmul.f32 %v123_v5, %v5673_v0  ;;  %v144_v11 = vstv %s5061_s29  ;;  %v165_v15 = vstv %s5062_s30  ;;  %s5071_s26 = sld [smem:[#allocation2 + $0xd]] }
  0x19   :  { %113 = vrot.lane.b32.xlu1 %v105_v3, %s10237_s27  ;;  %109 = vrot.lane.b32.xlu0 %v103_v4, %s10237_s27  ;;  %v146_v12 = vmul.f32 %v144_v11, %v5685_v6  ;;  %v145_v13 = vmul.f32 %v144_v11, %v5678_v1  ;;  %v147_v14 = vmul.f32 %v144_v11, %v5673_v0  ;;  %v186_v19 = vstv %s5063_s19  ;;  %s5072_s29 = sld [smem:[#allocation2 + $0xe]] }
  0x1a   :  { %132 = vrot.lane.b32.xlu2 %v125_v7, %s10224_s28  ;;  %v167_v16 = vmul.f32 %v165_v15, %v5685_v6  ;;  %v166_v17 = vmul.f32 %v165_v15, %v5678_v1  ;;  %v168_v18 = vmul.f32 %v165_v15, %v5673_v0  ;;  %v188_v20 = vmul.f32 %v186_v19, %v5685_v6  ;;  %s5073_s30 = sld [smem:[#allocation2 + $0xf]]  ;;  %v5810_v15 = vld [vmem:[%s10286_s23 + $0x38] sm:$0xff] }
  0x1b   :  { %v187_v21 = vmul.f32 %v186_v19, %v5678_v1  ;;  %v189_v22 = vmul.f32 %v186_v19, %v5673_v0  ;;  %v207_v23 = vstv %s5064_s20  ;;  %v228_v27 = vstv %s5065_s22  ;;  %s5069_s20 = sld [smem:[#allocation2 + $0xb]]  ;;  %10287 = vst [vmem:[#allocation8_spill] sm:$0xff] %v5810_v15 }
  0x1c   :  { %v209_v24 = vmul.f32 %v207_v23, %v5685_v6  ;;  %v208_v25 = vmul.f32 %v207_v23, %v5678_v1  ;;  %v210_v26 = vmul.f32 %v207_v23, %v5673_v0  ;;  %v230_v28 = vmul.f32 %v228_v27, %v5685_v6  ;;  %s5074_s19 = sld [smem:[#allocation2 + $0x10]] }
  0x1d   :  { %v229_v29 = vmul.f32 %v228_v27, %v5678_v1  ;;  %v231_v30 = vmul.f32 %v228_v27, %v5673_v0  ;;  %v249_v31 = vstv %s5066_s4  ;;  %v276_v36 = vstv %s5068_s25  ;;  %s5070_s25 = sld [smem:[#allocation2 + $0xc]] }
  0x1e   :  { %v251_v32 = vmul.f32 %v249_v31, %v5685_v6  ;;  %v250_v33 = vmul.f32 %v249_v31, %v5678_v1  ;;  %v252_v34 = vmul.f32 %v249_v31, %v5673_v0  ;;  %v278_v39 = vmul.f32 %v5735_v35, %v276_v36  ;;  %s5077_s22 = sld [smem:[#allocation2 + $0x13]] }
  0x1f   :  { %v277_v40 = vmul.f32 %v5740_v37, %v276_v36  ;;  %v279_v41 = vmul.f32 %v5746_v38, %v276_v36  ;;  %v336_v50 = vstv %s5071_s26  ;;  %v356_v54 = vstv %s5072_s29  ;;  %s5080_s4 = sld [smem:[#allocation2 + $0x16]] }
  0x20   :  { %v338_v51 = vmul.f32 %v5735_v35, %v336_v50  ;;  %v337_v52 = vmul.f32 %v5740_v37, %v336_v50  ;;  %v339_v53 = vmul.f32 %v5746_v38, %v336_v50  ;;  %v358_v56 = vmul.f32 %v5735_v35, %v356_v54  ;;  %s5082_s26 = sld [smem:[#allocation2 + $0x18]] }
  0x21   :  { %130 = vrot.lane.b32.xlu1 %v124_v8, %s10224_s28  ;;  %111 = vrot.lane.b32.xlu0 %v104_v9, %s10237_s27  ;;  %v296_v42 = vstv %s5069_s20  ;;  %v357_v57 = vmul.f32 %v5740_v37, %v356_v54  ;;  %v359_v58 = vmul.f32 %v5746_v38, %v356_v54  ;;  %v376_v59 = vstv %s5073_s30  ;;  %s5075_s20 = sld [smem:[#allocation2 + $0x11]] }
  0x22   :  { %134 = vrot.lane.b32.xlu2 %v126_v10, %s10224_s28  ;;  %v298_v43 = vmul.f32 %v5735_v35, %v296_v42  ;;  %v297_v44 = vmul.f32 %v5740_v37, %v296_v42  ;;  %v299_v45 = vmul.f32 %v5746_v38, %v296_v42  ;;  %v378_v61 = vmul.f32 %v5735_v35, %v376_v59  ;;  %s5078_s30 = sld [smem:[#allocation2 + $0x14]] }
  0x23   :  { %v316_v46 = vstv %s5070_s25  ;;  %v377_v62 = vmul.f32 %v5740_v37, %v376_v59  ;;  %v379_v63 = vmul.f32 %v5746_v38, %v376_v59  ;;  %v396_v2 = vstv %s5074_s19  ;;  %s5081_s25 = sld [smem:[#allocation2 + $0x17]] }
  0x24   :  { %v318_v47 = vmul.f32 %v5735_v35, %v316_v46  ;;  %v317_v48 = vmul.f32 %v5740_v37, %v316_v46  ;;  %v319_v49 = vmul.f32 %v5746_v38, %v316_v46  ;;  %v398_v4 = vmul.f32 %v5735_v35, %v396_v2  ;;  %s5083_s29 = sld [smem:[#allocation2 + $0x19]] }
  0x25   :  { %v397_v5 = vmul.f32 %v5740_v37, %v396_v2  ;;  %v399_v7 = vmul.f32 %v5746_v38, %v396_v2  ;;  %v502_v42 = vstv %s5080_s4  ;;  %s5086_s19 = sld [smem:[#allocation2 + $0x1c]] }
  0x26   :  { %v504_v46 = vmul.f32 %v5810_v15, %v502_v42  ;;  %s5091_s4 = sld [smem:[#allocation2 + $0x21]] }
  0x27   :  { %v416_v8 = vstv %s5075_s20  ;;  %s5089_s20 = sld [smem:[#allocation2 + $0x1f]] }
  0x29   :  { %153 = vrot.lane.b32.xlu1 %v146_v12, %s5560_s0  ;;  %151 = vrot.lane.b32.xlu0 %v145_v13, %s5560_s0  ;;  %v418_v12 = vmul.f32 %v5735_v35, %v416_v8  ;;  %v417_v13 = vmul.f32 %v5740_v37, %v416_v8 }
  0x2a   :  { %155 = vrot.lane.b32.xlu2 %v147_v14, %s5560_s0  ;;  %v419_v14 = vmul.f32 %v5746_v38, %v416_v8 }
  0x31   :  { %174 = vrot.lane.b32.xlu1 %v167_v16, %s5561_s1  ;;  %172 = vrot.lane.b32.xlu0 %v166_v17, %s5561_s1  ;;  %v442_v16 = vstv %s5077_s22  ;;  %v5815_v17 = vld [vmem:[%s10286_s23 + $0x30] sm:$0xff]  ;;  %s5079_s22 = sld [smem:[#allocation2 + $0x15]] }
  0x32   :  { %176 = vrot.lane.b32.xlu2 %v168_v18, %s5561_s1  ;;  %10288 = vst [vmem:[#allocation9_spill] sm:$0xff] %v5815_v17  ;;  %v443_v23 = vmul.f32 %v5815_v17, %v442_v16 }
  0x39   :  { %195 = vrot.lane.b32.xlu1 %v188_v20, %s5562_s21  ;;  %193 = vrot.lane.b32.xlu0 %v187_v21, %s5562_s21  ;;  %v5825_v20 = vld [vmem:[%s10286_s23 + $0x40] sm:$0xff] }
  0x3a   :  { %197 = vrot.lane.b32.xlu2 %v189_v22, %s5562_s21  ;;  %v444_v22 = vmul.f32 %v5810_v15, %v442_v16 }
  0x41   :  { %216 = vrot.lane.b32.xlu1 %v209_v24, %s5563_s2  ;;  %214 = vrot.lane.b32.xlu0 %v208_v25, %s5563_s2  ;;  %v445_v24 = vmul.f32 %v5825_v20, %v442_v16  ;;  %v462_v25 = vstv %s5078_s30  ;;  %s5084_s30 = sld [smem:[#allocation2 + $0x1a]] }
  0x42   :  { %218 = vrot.lane.b32.xlu2 %v210_v26, %s5563_s2  ;;  %v465_v31 = vmul.f32 %v5825_v20, %v462_v25 }
  0x47   :  { %v582_v16 = vstv %s5084_s30  ;;  %s5096_s30 = sld [smem:[#allocation2 + $0x82]] }
  0x49   :  { %237 = vrot.lane.b32.xlu1 %v230_v28, %s10251_s24  ;;  %235 = vrot.lane.b32.xlu0 %v229_v29, %s10251_s24  ;;  %v464_v29 = vmul.f32 %v5810_v15, %v462_v25 }
  0x4a   :  { %239 = vrot.lane.b32.xlu2 %v231_v30, %s10251_s24  ;;  %v463_v30 = vmul.f32 %v5815_v17, %v462_v25  ;;  %v584_v25 = vmul.f32 %v5810_v15, %v582_v16 }
  0x51   :  { %258 = vrot.lane.b32.xlu1 %v251_v32, %s10249_s5  ;;  %256 = vrot.lane.b32.xlu0 %v250_v33, %s10249_s5  ;;  %v482_v32 = vstv %s5079_s22  ;;  %s5090_s22 = sld [smem:[#allocation2 + $0x20]] }
  0x52   :  { %260 = vrot.lane.b32.xlu2 %v252_v34, %s10249_s5 }
  0x59   :  { %285 = vrot.lane.b32.xlu1 %v278_v39, %s10237_s27  ;;  %283 = vrot.lane.b32.xlu0 %v277_v40, %s10237_s27  ;;  %v484_v39 = vmul.f32 %v5810_v15, %v482_v32  ;;  %v483_v40 = vmul.f32 %v5815_v17, %v482_v32 }
  0x5a   :  { %287 = vrot.lane.b32.xlu2 %v279_v41, %s10237_s27  ;;  %v485_v41 = vmul.f32 %v5825_v20, %v482_v32  ;;  %v608_v32 = vstv %s5086_s19  ;;  %s5088_s19 = sld [smem:[#allocation2 + $0x1e]] }
  0x61   :  { %305 = vrot.lane.b32.xlu1 %v298_v43, %s10224_s28  ;;  %303 = vrot.lane.b32.xlu0 %v297_v44, %s10224_s28 }
  0x62   :  { %307 = vrot.lane.b32.xlu2 %v299_v45, %s10224_s28 }
  0x69   :  { %325 = vrot.lane.b32.xlu1 %v318_v47, %s5560_s0  ;;  %323 = vrot.lane.b32.xlu0 %v317_v48, %s5560_s0  ;;  %v503_v47 = vmul.f32 %v5815_v17, %v502_v42  ;;  %v505_v48 = vmul.f32 %v5825_v20, %v502_v42 }
  0x6a   :  { %327 = vrot.lane.b32.xlu2 %v319_v49, %s5560_s0  ;;  %v522_v49 = vstv %s5081_s25  ;;  %s5092_s25 = sld [smem:[#allocation2 + $0x22]] }
  0x6b   :  { %v523_v54 = vmul.f32 %v5815_v17, %v522_v49 }
  0x71   :  { %345 = vrot.lane.b32.xlu1 %v338_v51, %s5561_s1  ;;  %343 = vrot.lane.b32.xlu0 %v337_v52, %s5561_s1 }
  0x72   :  { %347 = vrot.lane.b32.xlu2 %v339_v53, %s5561_s1  ;;  %v524_v53 = vmul.f32 %v5810_v15, %v522_v49 }
  0x74   :  { %v5772_v55 = vpop.permute.xlu2 %132 }
  0x79   :  { %365 = vrot.lane.b32.xlu1 %v358_v56, %s5562_s21  ;;  %363 = vrot.lane.b32.xlu0 %v357_v57, %s5562_s21  ;;  %v525_v56 = vmul.f32 %v5825_v20, %v522_v49  ;;  %v542_v57 = vstv %s5082_s26  ;;  %s5087_s26 = sld [smem:[#allocation2 + $0x1d]] }
  0x7a   :  { %367 = vrot.lane.b32.xlu2 %v359_v58, %s5562_s21  ;;  %v545_v2 = vmul.f32 %v5825_v20, %v542_v57 }
  0x7c   :  { %v5780_v60 = vpop.permute.xlu2 %134 }
  0x7f   :  { %v628_v49 = vstv %s5087_s26  ;;  %s5093_s26 = sld [smem:[#allocation2 + $0x23]] }
  0x81   :  { %385 = vrot.lane.b32.xlu1 %v378_v61, %s5563_s2  ;;  %383 = vrot.lane.b32.xlu0 %v377_v62, %s5563_s2  ;;  %v544_v62 = vmul.f32 %v5810_v15, %v542_v57 }
  0x82   :  { %387 = vrot.lane.b32.xlu2 %v379_v63, %s5563_s2  ;;  %v543_v63 = vmul.f32 %v5815_v17, %v542_v57 }
  0x84   :  { %v5788_v3 = vpop.permute.xlu2 %155 }
  0x89   :  { %405 = vrot.lane.b32.xlu1 %v398_v4, %s10251_s24  ;;  %403 = vrot.lane.b32.xlu0 %v397_v5, %s10251_s24  ;;  %v562_v4 = vstv %s5083_s29  ;;  %s5095_s29 = sld [smem:[#allocation2 + $0x81]] }
  0x8a   :  { %407 = vrot.lane.b32.xlu2 %v399_v7, %s10251_s24 }
  0x8b   :  { %v5796_v9 = vpop.permute.xlu1 %113  ;;  %v5798_v10 = vpop.permute.xlu0 %109 }
  0x8c   :  { %v5800_v11 = vpop.permute.xlu2 %176 }
  0x91   :  { %425 = vrot.lane.b32.xlu1 %v418_v12, %s10249_s5  ;;  %423 = vrot.lane.b32.xlu0 %v417_v13, %s10249_s5  ;;  %v564_v12 = vmul.f32 %v5810_v15, %v562_v4  ;;  %v563_v13 = vmul.f32 %v5815_v17, %v562_v4 }
  0x92   :  { %427 = vrot.lane.b32.xlu2 %v419_v14, %s10249_s5  ;;  %v565_v14 = vmul.f32 %v5825_v20, %v562_v4 }
  0x93   :  { %v5818_v18 = vpop.permute.xlu1 %130  ;;  %v5820_v19 = vpop.permute.xlu0 %111 }
  0x94   :  { %v5827_v21 = vpop.permute.xlu2 %197 }
  0x99   :  { %451 = vrot.lane.b32.xlu1 %v444_v22, %s10237_s27  ;;  %449 = vrot.lane.b32.xlu0 %v443_v23, %s10237_s27 }
  0x9a   :  { %453 = vrot.lane.b32.xlu2 %v445_v24, %s10237_s27 }
  0x9b   :  { %v5835_v26 = vpop.permute.xlu1 %153  ;;  %v5837_v27 = vpop.permute.xlu0 %151 }
  0x9c   :  { %v5839_v28 = vpop.permute.xlu2 %218 }
  0xa1   :  { %471 = vrot.lane.b32.xlu1 %v464_v29, %s10224_s28  ;;  %469 = vrot.lane.b32.xlu0 %v463_v30, %s10224_s28  ;;  %v583_v29 = vmul.f32 %v5815_v17, %v582_v16  ;;  %v585_v30 = vmul.f32 %v5825_v20, %v582_v16 }
  0xa2   :  { %473 = vrot.lane.b32.xlu2 %v465_v31, %s10224_s28  ;;  %v5921_v31 = vld [vmem:[%s10286_s23 + $0x50] sm:$0xff] }
  0xa3   :  { %v5847_v33 = vpop.permute.xlu1 %174  ;;  %v5849_v34 = vpop.permute.xlu0 %172  ;;  %10289 = vst [vmem:[#allocation10_spill] sm:$0xff] %v5921_v31  ;;  %v630_v57 = vmul.f32 %v5921_v31, %v628_v49 }
  0xa4   :  { %v5851_v36 = vpop.permute.xlu2 %239 }
  0xa9   :  { %491 = vrot.lane.b32.xlu1 %v484_v39, %s5560_s0  ;;  %489 = vrot.lane.b32.xlu0 %v483_v40, %s5560_s0  ;;  %v5926_v39 = vld [vmem:[%s10286_s23 + $0x48] sm:$0xff] }
  0xaa   :  { %493 = vrot.lane.b32.xlu2 %v485_v41, %s5560_s0  ;;  %10290 = vst [vmem:[#allocation11_spill] sm:$0xff] %v5926_v39  ;;  %v5936_v41 = vld [vmem:[%s10286_s23 + $0x58] sm:$0xff] }
  0xab   :  { %v5859_v43 = vpop.permute.xlu1 %195  ;;  %v5861_v44 = vpop.permute.xlu0 %193 }
  0xac   :  { %v5863_v45 = vpop.permute.xlu2 %260 }
  0xb1   :  { %511 = vrot.lane.b32.xlu1 %v504_v46, %s5561_s1  ;;  %509 = vrot.lane.b32.xlu0 %v503_v47, %s5561_s1  ;;  %v610_v46 = vmul.f32 %v5921_v31, %v608_v32  ;;  %v609_v47 = vmul.f32 %v5926_v39, %v608_v32 }
  0xb2   :  { %513 = vrot.lane.b32.xlu2 %v505_v48, %s5561_s1  ;;  %v611_v48 = vmul.f32 %v5936_v41, %v608_v32 }
  0xb3   :  { %v5871_v50 = vpop.permute.xlu1 %216  ;;  %v5873_v51 = vpop.permute.xlu0 %214 }
  0xb4   :  { %v5875_v52 = vpop.permute.xlu2 %287 }
  0xb9   :  { %531 = vrot.lane.b32.xlu1 %v524_v53, %s5562_s21  ;;  %529 = vrot.lane.b32.xlu0 %v523_v54, %s5562_s21 }
  0xba   :  { %533 = vrot.lane.b32.xlu2 %v525_v56, %s5562_s21 }
  0xbb   :  { %v5883_v58 = vpop.permute.xlu1 %237  ;;  %v5885_v59 = vpop.permute.xlu0 %235 }
  0xbc   :  { %v5887_v61 = vpop.permute.xlu2 %307 }
  0xc1   :  { %551 = vrot.lane.b32.xlu1 %v544_v62, %s5563_s2  ;;  %549 = vrot.lane.b32.xlu0 %v543_v63, %s5563_s2  ;;  %v629_v62 = vmul.f32 %v5926_v39, %v628_v49  ;;  %v631_v63 = vmul.f32 %v5936_v41, %v628_v49 }
  0xc2   :  { %553 = vrot.lane.b32.xlu2 %v545_v2, %s5563_s2  ;;  %v648_v2 = vstv %s5088_s19  ;;  %s5097_s19 = sld [smem:[#allocation2 + $0x83]] }
  0xc3   :  { %v5895_v5 = vpop.permute.xlu1 %258  ;;  %v5897_v7 = vpop.permute.xlu0 %256  ;;  %v649_v16 = vmul.f32 %v5926_v39, %v648_v2 }
  0xc4   :  { %v5899_v8 = vpop.permute.xlu2 %327 }
  0xc9   :  { %571 = vrot.lane.b32.xlu1 %v564_v12, %s10251_s24  ;;  %569 = vrot.lane.b32.xlu0 %v563_v13, %s10251_s24 }
  0xca   :  { %573 = vrot.lane.b32.xlu2 %v565_v14, %s10251_s24  ;;  %v650_v14 = vmul.f32 %v5921_v31, %v648_v2 }
  0xcb   :  { %v5907_v22 = vpop.permute.xlu1 %285  ;;  %v5909_v23 = vpop.permute.xlu0 %283 }
  0xcc   :  { %v5911_v24 = vpop.permute.xlu2 %347 }
  0xd1   :  { %591 = vrot.lane.b32.xlu1 %v584_v25, %s10249_s5  ;;  %589 = vrot.lane.b32.xlu0 %v583_v29, %s10249_s5  ;;  %v651_v25 = vmul.f32 %v5936_v41, %v648_v2  ;;  %v668_v29 = vstv %s5089_s20  ;;  %s5098_s20 = sld [smem:[#allocation2 + $0x84]] }
  0xd2   :  { %593 = vrot.lane.b32.xlu2 %v585_v30, %s10249_s5  ;;  %v671_v49 = vmul.f32 %v5936_v41, %v668_v29 }
  0xd3   :  { %v5929_v40 = vpop.permute.xlu1 %305  ;;  %v5931_v20 = vpop.permute.xlu0 %303 }
  0xd4   :  { %v5938_v42 = vpop.permute.xlu2 %367 }
  0xd9   :  { %617 = vrot.lane.b32.xlu1 %v610_v46, %s10237_s27  ;;  %615 = vrot.lane.b32.xlu0 %v609_v47, %s10237_s27  ;;  %v670_v47 = vmul.f32 %v5921_v31, %v668_v29 }
  0xda   :  { %619 = vrot.lane.b32.xlu2 %v611_v48, %s10237_s27  ;;  %v669_v48 = vmul.f32 %v5926_v39, %v668_v29  ;;  %v708_v29 = vstv %s5091_s4  ;;  %s5099_s4 = sld [smem:[#allocation2 + $0x85]] }
  0xdb   :  { %v5946_v53 = vpop.permute.xlu1 %325  ;;  %v5948_v54 = vpop.permute.xlu0 %323  ;;  %v709_v17 = vmul.f32 %v5926_v39, %v708_v29 }
  0xdc   :  { %v5950_v56 = vpop.permute.xlu2 %387 }
  0xe1   :  { %637 = vrot.lane.b32.xlu1 %v630_v57, %s10224_s28  ;;  %635 = vrot.lane.b32.xlu0 %v629_v62, %s10224_s28  ;;  %v688_v57 = vstv %s5090_s22  ;;  %s97_s22 = sld [smem:[#allocation2]] }
  0xe2   :  { %639 = vrot.lane.b32.xlu2 %v631_v63, %s10224_s28 }
  0xe3   :  { %v5958_v4 = vpop.permute.xlu1 %345  ;;  %v5960_v12 = vpop.permute.xlu0 %343 }
  0xe4   :  { %v5962_v13 = vpop.permute.xlu2 %407 }
  0xe9   :  { %657 = vrot.lane.b32.xlu1 %v650_v14, %s5560_s0  ;;  %655 = vrot.lane.b32.xlu0 %v649_v16, %s5560_s0  ;;  %v690_v14 = vmul.f32 %v5921_v31, %v688_v57  ;;  %v689_v16 = vmul.f32 %v5926_v39, %v688_v57 }
  0xea   :  { %659 = vrot.lane.b32.xlu2 %v651_v25, %s5560_s0  ;;  %v691_v25 = vmul.f32 %v5936_v41, %v688_v57  ;;  %v711_v57 = vmul.f32 %v5936_v41, %v708_v29 }
  0xeb   :  { %v5970_v30 = vpop.permute.xlu1 %365  ;;  %v5972_v32 = vpop.permute.xlu0 %363 }
  0xec   :  { %v5974_v46 = vpop.permute.xlu2 %427 }
  0xed   :  { %10291 = vst [vmem:[#allocation12_spill] sm:$0xff] %v5974_v46 }
  0xf1   :  { %677 = vrot.lane.b32.xlu1 %v670_v47, %s5561_s1  ;;  %675 = vrot.lane.b32.xlu0 %v669_v48, %s5561_s1 }
  0xf2   :  { %679 = vrot.lane.b32.xlu2 %v671_v49, %s5561_s1 }
  0xf3   :  { %v5982_v62 = vpop.permute.xlu1 %385  ;;  %v5984_v63 = vpop.permute.xlu0 %383 }
  0xf4   :  { %v5986_v2 = vpop.permute.xlu2 %453 }
  0xf5   :  { %10292 = vst [vmem:[#allocation13_spill] sm:$0xff] %v5986_v2  ;;  %v710_v2 = vmul.f32 %v5921_v31, %v708_v29 }
  0xf9   :  { %697 = vrot.lane.b32.xlu1 %v690_v14, %s5562_s21  ;;  %695 = vrot.lane.b32.xlu0 %v689_v16, %s5562_s21  ;;  %v728_v14 = vstv %s5092_s25  ;;  %s5100_s25 = sld [smem:[#allocation2 + $0x86]] }
  0xfa   :  { %699 = vrot.lane.b32.xlu2 %v691_v25, %s5562_s21  ;;  %v729_v46 = vmul.f32 %v5926_v39, %v728_v14  ;;  %v731_v29 = vmul.f32 %v5936_v41, %v728_v14 }
  0xfb   :  { %v5994_v47 = vpop.permute.xlu1 %405  ;;  %v5996_v48 = vpop.permute.xlu0 %403 }
  0xfc   :  { %v5998_v49 = vpop.permute.xlu2 %473 }
  0xfd   :  { %10293 = vst [vmem:[#allocation14_spill] sm:$0xff] %v5998_v49  ;;  %v730_v49 = vmul.f32 %v5921_v31, %v728_v14 }
 0x101   :  { %717 = vrot.lane.b32.xlu1 %v710_v2, %s5563_s2  ;;  %715 = vrot.lane.b32.xlu0 %v709_v17, %s5563_s2  ;;  %v748_v17 = vstv %s5093_s26  ;;  %s6097_s26 = sld [smem:[#allocation2 + $0x87]] }
 0x102   :  { %719 = vrot.lane.b32.xlu2 %v711_v57, %s5563_s2  ;;  %v751_v14 = vmul.f32 %v5936_v41, %v748_v17 }
 0x103   :  { %v6006_v16 = vpop.permute.xlu1 %425  ;;  %v6008_v25 = vpop.permute.xlu0 %423 }
 0x104   :  { %10294 = vst [vmem:[#allocation15_spill] sm:$0xff] %v6006_v16  ;;  %v6010_v15 = vpop.permute.xlu2 %493  ;;  %v749_v16 = vmul.f32 %v5926_v39, %v748_v17 }
 0x105   :  { %10295 = vst [vmem:[#allocation16_spill] sm:$0xff] %v6008_v25 }
 0x106   :  { %10296 = vst [vmem:[#allocation17_spill] sm:$0xff] %v6010_v15  ;;  %v750_v15 = vmul.f32 %v5921_v31, %v748_v17 }
 0x109   :  { %737 = vrot.lane.b32.xlu1 %v730_v49, %s10251_s24  ;;  %735 = vrot.lane.b32.xlu0 %v729_v46, %s10251_s24  ;;  %v854_v46 = vstv %s5095_s29  ;;  %s6116_s29 = sld [smem:[#allocation2 + $0x9]] }
 0x10a   :  { %739 = vrot.lane.b32.xlu2 %v731_v29, %s10251_s24  ;;  %v856_v31 = vmul.f32 %v854_v46, %v5685_v6  ;;  %v855_v39 = vmul.f32 %v854_v46, %v5678_v1  ;;  %v857_v41 = vmul.f32 %v854_v46, %v5673_v0 }
 0x10b   :  { %v6018_v2 = vpop.permute.xlu1 %451  ;;  %v6020_v57 = vpop.permute.xlu0 %449 }
 0x10c   :  { %10297 = vst [vmem:[#allocation18_spill] sm:$0xff] %v6020_v57  ;;  %v6022_v25 = vpop.permute.xlu2 %513 }
 0x10d   :  { %10298 = vst [vmem:[#allocation19_spill] sm:$0xff] %v6022_v25 }
 0x111   :  { %757 = vrot.lane.b32.xlu1 %v750_v15, %s10249_s5  ;;  %755 = vrot.lane.b32.xlu0 %v749_v16, %s10249_s5  ;;  %v874_v15 = vstv %s5096_s30  ;;  %s5102_s30 = sld [smem:[#allocation2 + $0x88]] }
 0x112   :  { %759 = vrot.lane.b32.xlu2 %v751_v14, %s10249_s5  ;;  %v875_v25 = vmul.f32 %v874_v15, %v5678_v1  ;;  %v877_v46 = vmul.f32 %v874_v15, %v5673_v0 }
 0x113   :  { %v6030_v49 = vpop.permute.xlu1 %471  ;;  %v6032_v29 = vpop.permute.xlu0 %469 }
 0x114   :  { %10299 = vst [vmem:[#allocation20_spill] sm:$0xff] %v6032_v29  ;;  %v6034_v57 = vpop.permute.xlu2 %533  ;;  %v116_v29 = vsel %vm115_vm0, %v5798_v10, %v5820_v19  ;;  %v138_v10 = vsel %vm136_vm1, %v5772_v55, %v5780_v60 }
 0x115   :  { %10300 = vst [vmem:[#allocation21_spill] sm:$0xff] %v6034_v57  ;;  %v876_v57 = vmul.f32 %v874_v15, %v5685_v6 }
 0x119   :  { %863 = vrot.lane.b32.xlu1 %v856_v31, %s10237_s27  ;;  %861 = vrot.lane.b32.xlu0 %v855_v39, %s10237_s27  ;;  %v894_v31 = vstv %s5097_s19  ;;  %s6171_s19 = sld [smem:[#allocation2 + $0x8a]] }
 0x11a   :  { %865 = vrot.lane.b32.xlu2 %v857_v41, %s10237_s27  ;;  %v897_v15 = vmul.f32 %v894_v31, %v5673_v0 }
 0x11b   :  { %v6042_v16 = vpop.permute.xlu1 %491  ;;  %v6044_v17 = vpop.permute.xlu0 %489 }
 0x11c   :  { %10301 = vst [vmem:[#allocation22_spill] sm:$0xff] %v6042_v16  ;;  %v6046_v14 = vpop.permute.xlu2 %553  ;;  %v895_v16 = vmul.f32 %v894_v31, %v5678_v1 }
 0x11d   :  { %10302 = vst [vmem:[#allocation23_spill] sm:$0xff] %v6044_v17 }
 0x11e   :  { %10303 = vst [vmem:[#allocation24_spill] sm:$0xff] %v6046_v14  ;;  %v896_v14 = vmul.f32 %v894_v31, %v5685_v6 }
 0x121   :  { %883 = vrot.lane.b32.xlu1 %v876_v57, %s10224_s28  ;;  %881 = vrot.lane.b32.xlu0 %v875_v25, %s10224_s28  ;;  %v914_v25 = vstv %s5098_s20  ;;  %s6495_s20 = sld [smem:[#allocation4]] }
 0x122   :  { %885 = vrot.lane.b32.xlu2 %v877_v46, %s10224_s28  ;;  %v917_v31 = vmul.f32 %v914_v25, %v5673_v0 }
 0x123   :  { %v6054_v39 = vpop.permute.xlu1 %511  ;;  %v6056_v41 = vpop.permute.xlu0 %509 }
 0x124   :  { %10304 = vst [vmem:[#allocation25_spill] sm:$0xff] %v6054_v39  ;;  %v6058_v17 = vpop.permute.xlu2 %573  ;;  %v915_v39 = vmul.f32 %v914_v25, %v5678_v1 }
 0x125   :  { %10305 = vst [vmem:[#allocation26_spill] sm:$0xff] %v6056_v41  ;;  %v916_v41 = vmul.f32 %v914_v25, %v5685_v6 }
 0x126   :  { %10306 = vst [vmem:[#allocation27_spill] sm:$0xff] %v6058_v17 }
 0x129   :  { %903 = vrot.lane.b32.xlu1 %v896_v14, %s5560_s0  ;;  %901 = vrot.lane.b32.xlu0 %v895_v16, %s5560_s0  ;;  %v98_v16 = vstv %s97_s22  ;;  %v934_v14 = vstv %s5099_s4  ;;  %s6427_s4 = sld [smem:[#allocation2 + $0x8e]] }
 0x12a   :  { %905 = vrot.lane.b32.xlu2 %v897_v15, %s5560_s0  ;;  %v99_v25 = vmul.f32 %v98_v16, %v5678_v1  ;;  %s5111_s22 = sld [smem:[#allocation2 + $0x91]] }
 0x12b   :  { %v6066_v57 = vpop.permute.xlu1 %531  ;;  %v6068_v46 = vpop.permute.xlu0 %529 }
 0x12c   :  { %10307 = vst [vmem:[#allocation28_spill] sm:$0xff] %v6066_v57  ;;  %v6070_v17 = vpop.permute.xlu2 %593  ;;  %v100_v57 = vmul.f32 %v98_v16, %v5685_v6  ;;  %v954_v16 = vstv %s5100_s25  ;;  %s6236_s25 = sld [smem:[#allocation2 + $0x8b]] }
 0x12d   :  { %10308 = vst [vmem:[#allocation29_spill] sm:$0xff] %v6068_v46 }
 0x12e   :  { %10309 = vst [vmem:[#allocation30_spill] sm:$0xff] %v6070_v17 }
 0x131   :  { %923 = vrot.lane.b32.xlu1 %v916_v41, %s5561_s1  ;;  %921 = vrot.lane.b32.xlu0 %v915_v39, %s5561_s1  ;;  %v936_v41 = vmul.f32 %v934_v14, %v5685_v6  ;;  %v935_v39 = vmul.f32 %v934_v14, %v5678_v1 }
 0x132   :  { %925 = vrot.lane.b32.xlu2 %v917_v31, %s5561_s1  ;;  %v117_v31 = vsel %vm115_vm0, %v5820_v19, %v5796_v9 }
 0x133   :  { %v6078_v15 = vpop.permute.xlu1 %551  ;;  %v6080_v46 = vpop.permute.xlu0 %549 }
 0x134   :  { %10310 = vst [vmem:[#allocation31_spill] sm:$0xff] %v6078_v15  ;;  %v6082_v17 = vpop.permute.xlu2 %619  ;;  %v121_v15 = vadd.f32 %v117_v31, %v100_v57  ;;  %v159_v57 = vsel %vm157_vm2, %v5835_v26, %v5788_v3  ;;  %v179_v3 = vsel %vm178_vm3, %v5849_v34, %v5847_v33 }
 0x135   :  { %10311 = vst [vmem:[#allocation32_spill] sm:$0xff] %v6080_v46  ;;  %v937_v46 = vmul.f32 %v934_v14, %v5673_v0 }
 0x136   :  { %10312 = vst [vmem:[#allocation33_spill] sm:$0xff] %v6082_v17  ;;  %v120_v17 = vadd.f32 %v116_v29, %v99_v25  ;;  %v137_v29 = vsel %vm136_vm1, %v5818_v18, %v5772_v55  ;;  %v142_v25 = vadd.f32 %v138_v10, %v121_v15  ;;  %v180_v55 = vsel %vm178_vm3, %v5847_v33, %v5800_v11 }
 0x137   :  { %v957_v18 = vmul.f32 %v954_v16, %v5673_v0  ;;  %v200_v15 = vsel %vm199_vm4, %v5861_v44, %v5859_v43  ;;  %v222_v11 = vsel %vm220_vm5, %v5871_v50, %v5839_v28  ;;  %v974_v33 = vstv %s6097_s26  ;;  %s5117_s26 = sld [smem:[#allocation2 + $0x97]] }
 0x138   :  { %v141_v14 = vadd.f32 %v137_v29, %v120_v17  ;;  %v201_v17 = vsel %vm199_vm4, %v5859_v43, %v5827_v21  ;;  %v221_v21 = vsel %vm220_vm5, %v5873_v51, %v5871_v50  ;;  %v243_v29 = vsel %vm241_vm6, %v5883_v58, %v5851_v36 }
 0x139   :  { %943 = vrot.lane.b32.xlu1 %v936_v41, %s5562_s21  ;;  %941 = vrot.lane.b32.xlu0 %v935_v39, %s5562_s21  ;;  %v956_v41 = vmul.f32 %v954_v16, %v5685_v6  ;;  %v955_v39 = vmul.f32 %v954_v16, %v5678_v1  ;;  %v242_v28 = vsel %vm241_vm6, %v5885_v59, %v5883_v58  ;;  %v270_v50 = vstv %s6116_s29  ;;  %s6219_s29 = sld [smem:[#allocation2 + $0x12]] }
 0x13a   :  { %945 = vrot.lane.b32.xlu2 %v937_v46, %s5562_s21  ;;  %v158_v46 = vsel %vm157_vm2, %v5837_v27, %v5835_v26  ;;  %v163_v26 = vadd.f32 %v159_v57, %v142_v25  ;;  %v975_v25 = vmul.f32 %v974_v33, %v5678_v1  ;;  %v263_v36 = vsel %vm262_vm7, %v5897_v7, %v5895_v5  ;;  %v788_v7 = vld [vmem:[%s10201_s6 + $0x78] sm:$0xff] }
 0x13b   :  { %v6103_v9 = vpop.permute.xlu1 %571  ;;  %v6105_v19 = vpop.permute.xlu0 %569  ;;  %v162_v27 = vadd.f32 %v158_v46, %v141_v14  ;;  %v976_v14 = vmul.f32 %v974_v33, %v5685_v6  ;;  %805 = vmatpush.msra.mxu0 %v788_v7 }
 0x13c   :  { %v6118_v60 = vpop.permute.xlu2 %639  ;;  %v184_v31 = vadd.f32 %v180_v55, %v163_v26  ;;  %v272_v55 = vmul.f32 %v5735_v35, %v270_v50  ;;  %v271_v26 = vmul.f32 %v5740_v37, %v270_v50 }
 0x13d   :  { %v183_v10 = vadd.f32 %v179_v3, %v162_v27  ;;  %v994_v27 = vstv %s5102_s30  ;;  %s5118_s30 = sld [smem:[#allocation2 + $0x98]] }
 0x13e   :  { %v205_v34 = vadd.f32 %v201_v17, %v184_v31  ;;  %v804_v17 = vld [vmem:[%s10201_s6 + $0xf8] sm:$0xff]  ;;  %v289_v31 = vsel %vm115_vm0, %v5909_v23, %v5907_v22  ;;  %v310_v23 = vsel %vm136_vm1, %v5929_v40, %v5887_v61  ;;  %v329_v61 = vsel %vm157_vm2, %v5948_v54, %v5946_v53 }
 0x13f   :  { %v204_v43 = vadd.f32 %v200_v15, %v183_v10  ;;  %v290_v15 = vsel %vm115_vm0, %v5907_v22, %v5875_v52  ;;  %825 = vmatpush.msra.mxu1 %v804_v17  ;;  %v803_v52 = vld [vmem:[%s10201_s6 + $0xf0] sm:$0xff]  ;;  %v786_v22 = vld [vmem:[%s10201_s6 + $0x68] sm:$0xff]  ;;  %v349_v54 = vsel %vm178_vm3, %v5960_v12, %v5958_v4  ;;  %v370_v12 = vsel %vm199_vm4, %v5970_v30, %v5938_v42 }
 0x140   :  { %v226_v57 = vadd.f32 %v222_v11, %v205_v34  ;;  %v995_v34 = vmul.f32 %v994_v27, %v5678_v1  ;;  %v309_v1 = vsel %vm136_vm1, %v5931_v20, %v5929_v40  ;;  %v785_v20 = vld [vmem:[%s10201_s6 + $0x60] sm:$0xff]  ;;  %v799_v42 = vld [vmem:[%s10201_s6 + $0xd0] sm:$0xff] }
 0x141   :  { %963 = vrot.lane.b32.xlu1 %v956_v41, %s5563_s2  ;;  %961 = vrot.lane.b32.xlu0 %v955_v39, %s5563_s2  ;;  %v225_v46 = vadd.f32 %v221_v21, %v204_v43  ;;  %v264_v41 = vsel %vm262_vm7, %v5895_v5, %v5863_v45  ;;  %v977_v39 = vmul.f32 %v974_v33, %v5673_v0  ;;  %v787_v43 = vld [vmem:[%s10201_s6 + $0x70] sm:$0xff] }
 0x142   :  { %965 = vrot.lane.b32.xlu2 %v957_v18, %s5563_s2  ;;  %v247_v58 = vadd.f32 %v243_v29, %v226_v57  ;;  %v996_v33 = vmul.f32 %v994_v27, %v5685_v6  ;;  %v997_v6 = vmul.f32 %v994_v27, %v5673_v0  ;;  %806 = vmatpush.msra.mxu0 %v787_v43  ;;  %v802_v29 = vld [vmem:[%s10201_s6 + $0xe8] sm:$0xff]  ;;  %v10314_v43 = vld [vmem:[#allocation15_spill] sm:$0xff] }
 0x143   :  { %v6145_v44 = vpop.permute.xlu1 %591  ;;  %v6147_v16 = vpop.permute.xlu0 %589  ;;  %v246_v59 = vadd.f32 %v242_v28, %v225_v46  ;;  %826 = vmatpush.msra.mxu1 %v803_v52  ;;  %v330_v57 = vsel %vm157_vm2, %v5946_v53, %v5899_v8  ;;  %v801_v8 = vld [vmem:[%s10201_s6 + $0xe0] sm:$0xff]  ;;  %v350_v53 = vsel %vm178_vm3, %v5958_v4, %v5911_v24  ;;  %v1020_v46 = vstv %s6171_s19  ;;  %v784_v24 = vld [vmem:[%s10201_s6 + $0x58] sm:$0xff]  ;;  %s6350_s19 = sld [smem:[#allocation2 + $0x8d]] }
 0x144   :  { %v6156_v51 = vpop.permute.xlu2 %659  ;;  %v268_v3 = vadd.f32 %v264_v41, %v247_v58  ;;  %807 = vmatpush.msra.mxu0 %v786_v22  ;;  %v800_v4 = vld [vmem:[%s10201_s6 + $0xd8] sm:$0xff]  ;;  %v389_v27 = vsel %vm220_vm5, %v5984_v63, %v5982_v62  ;;  %v1023_v7 = vmul.f32 %v5746_v38, %v1020_v46  ;;  %v1040_v22 = vstv %s6236_s25  ;;  %s5119_s25 = sld [smem:[#allocation2 + $0x99]] }
 0x145   :  { %v267_v18 = vadd.f32 %v263_v36, %v246_v59  ;;  %827 = vmatpush.msra.mxu1 %v802_v29 }
 0x146   :  { %v274_v11 = vadd.f32 %v272_v55, %v268_v3  ;;  %808 = vmatpush.msra.mxu0 %v785_v20  ;;  %v1022_v3 = vmul.f32 %v5735_v35, %v1020_v46 }
 0x147   :  { %v273_v21 = vadd.f32 %v271_v26, %v267_v18  ;;  %828 = vmatpush.msra.mxu1 %v801_v8  ;;  %v1021_v18 = vmul.f32 %v5740_v37, %v1020_v46  ;;  %v783_v26 = vld [vmem:[%s10201_s6 + $0x50] sm:$0xff]  ;;  %v1041_v46 = vmul.f32 %v5740_v37, %v1040_v22 }
 0x148   :  { %v294_v28 = vadd.f32 %v290_v15, %v274_v11  ;;  %809 = vmatpush.msra.mxu0 %v784_v24  ;;  %v410_v11 = vsel %vm241_vm6, %v5994_v47, %v5962_v13  ;;  %v797_v13 = vld [vmem:[%s10201_s6 + $0xc0] sm:$0xff]  ;;  %v1043_v24 = vmul.f32 %v5746_v38, %v1040_v22 }
 0x149   :  { %983 = vrot.lane.b32.xlu1 %v976_v14, %s10251_s24  ;;  %981 = vrot.lane.b32.xlu0 %v975_v25, %s10251_s24  ;;  %v293_v50 = vadd.f32 %v289_v31, %v273_v21  ;;  %v798_v31 = vld [vmem:[%s10201_s6 + $0xc8] sm:$0xff] }
 0x14a   :  { %985 = vrot.lane.b32.xlu2 %v977_v39, %s10251_s24  ;;  %v314_v0 = vadd.f32 %v310_v23, %v294_v28  ;;  %v369_v39 = vsel %vm199_vm4, %v5972_v32, %v5970_v30  ;;  %829 = vmatpush.msra.mxu1 %v800_v4  ;;  %v782_v30 = vld [vmem:[%s10201_s6 + $0x48] sm:$0xff]  ;;  %v390_v32 = vsel %vm220_vm5, %v5982_v62, %v5950_v56  ;;  %v436_v62 = vstv %s6219_s29  ;;  %s6300_s29 = sld [smem:[#allocation2 + $0x8c]]  ;;  %v780_v28 = vld [vmem:[%s10201_s6 + $0x38] sm:$0xff] }
 0x14b   :  { %v6174_v45 = vpop.permute.xlu1 %617  ;;  %v6176_v5 = vpop.permute.xlu0 %615  ;;  %v313_v40 = vadd.f32 %v309_v1, %v293_v50  ;;  %810 = vmatpush.msra.mxu0 %v783_v26  ;;  %v409_v56 = vsel %vm241_vm6, %v5996_v48, %v5994_v47  ;;  %v10315_v48 = vld [vmem:[#allocation16_spill] sm:$0xff]  ;;  %v796_v50 = vld [vmem:[%s10201_s6 + $0xb8] sm:$0xff]  ;;  %v10318_v4 = vld [vmem:[#allocation13_spill] sm:$0xff] }
 0x14c   :  { %v6190_v10 = vpop.permute.xlu2 %679  ;;  %v334_v14 = vadd.f32 %v330_v57, %v314_v0  ;;  %830 = vmatpush.msra.mxu1 %v799_v42  ;;  %v429_v52 = vsel %vm262_vm7, %v10315_v48, %v10314_v43  ;;  %v10316_v57 = vld [vmem:[#allocation8_spill] sm:$0xff]  ;;  %v10317_v0 = vld [vmem:[#allocation9_spill] sm:$0xff]  ;;  %v456_v37 = vsel %vm115_vm0, %v6018_v2, %v10318_v4  ;;  %v6385_v48 = vld [vmem:[%s10286_s23 + $0x18] sm:$0xff] }
 0x14d   :  { %v333_v25 = vadd.f32 %v329_v61, %v313_v40  ;;  %811 = vmatpush.msra.mxu0 %v782_v30  ;;  %v438_v61 = vmul.f32 %v10316_v57, %v436_v62  ;;  %v437_v40 = vmul.f32 %v10317_v0, %v436_v62  ;;  %v10324_v62 = vld [vmem:[#allocation23_spill] sm:$0xff] }
 0x14e   :  { %v354_v59 = vadd.f32 %v350_v53, %v334_v14  ;;  %831 = vmatpush.msra.mxu1 %v798_v31  ;;  %v779_v14 = vld [vmem:[%s10201_s6 + $0x30] sm:$0xff]  ;;  %v10322_v31 = vld [vmem:[#allocation17_spill] sm:$0xff] }
 0x14f   :  { %v353_v55 = vadd.f32 %v349_v54, %v333_v25  ;;  %v1042_v54 = vmul.f32 %v5735_v35, %v1040_v22  ;;  %v795_v25 = vld [vmem:[%s10201_s6 + $0xb0] sm:$0xff]  ;;  %v778_v35 = vld [vmem:[%s10201_s6 + $0x28] sm:$0xff] }
 0x150   :  { %v374_v17 = vadd.f32 %v370_v12, %v354_v59  ;;  %832 = vmatpush.msra.mxu1 %v797_v13  ;;  %v10319_v12 = vld [vmem:[#allocation18_spill] sm:$0xff]  ;;  %v794_v59 = vld [vmem:[%s10201_s6 + $0xa8] sm:$0xff]  ;;  %v1060_v30 = vstv %s6300_s29  ;;  %s6369_s29 = sld [smem:[#allocation2 + $0x1b]] }
 0x151   :  { %1003 = vrot.lane.b32.xlu1 %v996_v33, %s10249_s5  ;;  %1001 = vrot.lane.b32.xlu0 %v995_v34, %s10249_s5  ;;  %v373_v15 = vadd.f32 %v369_v39, %v353_v55  ;;  %v781_v33 = vld [vmem:[%s10201_s6 + $0x40] sm:$0xff]  ;;  %v455_v39 = vsel %vm115_vm0, %v10319_v12, %v6018_v2  ;;  %v775_v22 = vld [vmem:[%s10201_s6 + $0x10] sm:$0xff] }
 0x152   :  { %1005 = vrot.lane.b32.xlu2 %v997_v6, %s10249_s5  ;;  %v394_v63 = vadd.f32 %v390_v32, %v374_v17  ;;  %v10313_v34 = vld [vmem:[#allocation12_spill] sm:$0xff]  ;;  %812 = vmatpush.msra.mxu0 %v781_v33  ;;  %v792_v33 = vld [vmem:[%s10201_s6 + $0x98] sm:$0xff]  ;;  %v790_v12 = vld [vmem:[%s10201_s6 + $0x88] sm:$0xff] }
 0x153   :  { %v6239_v41 = vpop.permute.xlu1 %637  ;;  %v6241_v36 = vpop.permute.xlu0 %635  ;;  %v393_v21 = vadd.f32 %v389_v27, %v373_v15  ;;  %v430_v47 = vsel %vm262_vm7, %v10314_v43, %v10313_v34  ;;  %833 = vmatpush.msra.mxu1 %v796_v50  ;;  %v10321_v2 = vld [vmem:[#allocation20_spill] sm:$0xff]  ;;  %v10327_v50 = vld [vmem:[#allocation26_spill] sm:$0xff] }
 0x154   :  { %v6255_v58 = vpop.permute.xlu2 %699  ;;  %v414_v23 = vadd.f32 %v410_v11, %v394_v63  ;;  %813 = vmatpush.msra.mxu0 %v780_v28  ;;  %v475_v42 = vsel %vm136_vm1, %v10321_v2, %v6030_v49  ;;  %v793_v32 = vld [vmem:[%s10201_s6 + $0xa0] sm:$0xff]  ;;  %v10323_v11 = vld [vmem:[#allocation22_spill] sm:$0xff] }
 0x155   :  { %v413_v1 = vadd.f32 %v409_v56, %v393_v21  ;;  %834 = vmatpush.msra.mxu1 %v795_v25  ;;  %v496_v56 = vsel %vm157_vm2, %v10323_v11, %v10322_v31  ;;  %v495_v63 = vsel %vm157_vm2, %v10324_v62, %v10323_v11  ;;  %v6379_v43 = vld [vmem:[%s10286_s23 + $0x20] sm:$0xff]  ;;  %v10330_v25 = vld [vmem:[#allocation29_spill] sm:$0xff]  ;;  %v575_v31 = vsel %vm241_vm6, %v6105_v19, %v6103_v9 }
 0x156   :  { %v434_v8 = vadd.f32 %v430_v47, %v414_v23  ;;  %814 = vmatpush.msra.mxu0 %v779_v14  ;;  %v1062_v47 = vmul.f32 %v6379_v43, %v1060_v30  ;;  %v10325_v23 = vld [vmem:[#allocation19_spill] sm:$0xff]  ;;  %v602_v11 = vstv %s6369_s29  ;;  %s5110_s29 = sld [smem:[#allocation2 + $0x90]] }
 0x157   :  { %v433_v53 = vadd.f32 %v429_v52, %v413_v1  ;;  %835 = vmatpush.msra.mxu1 %v794_v59  ;;  %v1061_v52 = vmul.f32 %v6385_v48, %v1060_v30  ;;  %v10326_v1 = vld [vmem:[#allocation25_spill] sm:$0xff]  ;;  %v10332_v59 = vld [vmem:[#allocation31_spill] sm:$0xff] }
 0x158   :  { %v440_v38 = vadd.f32 %v438_v61, %v434_v8  ;;  %815 = vmatpush.msra.mxu0 %v778_v35  ;;  %v516_v28 = vsel %vm178_vm3, %v10326_v1, %v10325_v23  ;;  %v515_v57 = vsel %vm178_vm3, %v10327_v50, %v10326_v1  ;;  %v6400_v61 = vld [vmem:[%s10286_s23 + $0x28] sm:$0xff]  ;;  %v10336_v23 = vld [vmem:[#allocation10_spill] sm:$0xff] }
 0x159   :  { %1029 = vrot.lane.b32.xlu1 %v1022_v3, %s10237_s27  ;;  %1027 = vrot.lane.b32.xlu0 %v1021_v18, %s10237_s27  ;;  %v439_v55 = vadd.f32 %v437_v40, %v433_v53  ;;  %v777_v3 = vld [vmem:[%s10201_s6 + $0x20] sm:$0xff]  ;;  %v10320_v18 = vld [vmem:[#allocation14_spill] sm:$0xff]  ;;  %v1063_v0 = vmul.f32 %v6400_v61, %v1060_v30  ;;  %v774_v35 = vld [vmem:[%s10201_s6 + $0x8] sm:$0xff]  ;;  %v604_v1 = vmul.f32 %v10336_v23, %v602_v11 }
 0x15a   :  { %1031 = vrot.lane.b32.xlu2 %v1023_v7, %s10237_s27  ;;  %v476_v26 = vsel %vm136_vm1, %v6030_v49, %v10320_v18  ;;  %v460_v27 = vadd.f32 %v456_v37, %v440_v38  ;;  %v776_v49 = vld [vmem:[%s10201_s6 + $0x18] sm:$0xff]  ;;  %816 = vmatpush.msra.mxu0 %v777_v3  ;;  %v791_v53 = vld [vmem:[%s10201_s6 + $0x90] sm:$0xff]  ;;  %v1080_v18 = vstv %s6350_s19  ;;  %s5109_s19 = sld [smem:[#allocation2 + $0x8f]] }
 0x15b   :  { %v6303_v6 = vpop.permute.xlu1 %657  ;;  %v6305_v29 = vpop.permute.xlu0 %655  ;;  %v459_v7 = vadd.f32 %v455_v39, %v439_v55  ;;  %836 = vmatpush.msra.mxu1 %v793_v32  ;;  %v10331_v39 = vld [vmem:[#allocation24_spill] sm:$0xff]  ;;  %v1083_v19 = vmul.f32 %v6400_v61, %v1080_v18 }
 0x15c   :  { %v6315_v20 = vpop.permute.xlu2 %719  ;;  %v480_v13 = vadd.f32 %v476_v26, %v460_v27  ;;  %817 = vmatpush.msra.mxu0 %v776_v49  ;;  %v556_v38 = vsel %vm220_vm5, %v10332_v59, %v10331_v39  ;;  %v10333_v55 = vld [vmem:[#allocation32_spill] sm:$0xff] }
 0x15d   :  { %v479_v34 = vadd.f32 %v475_v42, %v459_v7  ;;  %837 = vmatpush.msra.mxu1 %v792_v33  ;;  %v555_v3 = vsel %vm220_vm5, %v10333_v55, %v10332_v59  ;;  %v773_v26 = vld [vmem:[%s10201_s6] sm:$0xff]  ;;  %v10334_v7 = vld [vmem:[#allocation27_spill] sm:$0xff]  ;;  %v1082_v33 = vmul.f32 %v6379_v43, %v1080_v18  ;;  %v661_v59 = vsel %vm157_vm2, %v6305_v29, %v6303_v6 }
 0x15e   :  { %v500_v40 = vadd.f32 %v496_v56, %v480_v13  ;;  %818 = vmatpush.msra.mxu0 %v775_v22  ;;  %v789_v27 = vld [vmem:[%s10201_s6 + $0x80] sm:$0xff]  ;;  %v576_v49 = vsel %vm241_vm6, %v6103_v9, %v10334_v7  ;;  %v1081_v13 = vmul.f32 %v6385_v48, %v1080_v18  ;;  %v595_v9 = vsel %vm262_vm7, %v6147_v16, %v6145_v44 }
 0x15f   :  { %v499_v8 = vadd.f32 %v495_v63, %v479_v34  ;;  %838 = vmatpush.msra.mxu1 %v791_v53  ;;  %v10335_v34 = vld [vmem:[#allocation30_spill] sm:$0xff] }
 0x160   :  { %v520_v4 = vadd.f32 %v516_v28, %v500_v40  ;;  %819 = vmatpush.msra.mxu0 %v774_v35  ;;  %v1100_v40 = vstv %s6427_s4  ;;  %s5113_s4 = sld [smem:[#allocation2 + $0x93]] }
 0x161   :  { %1049 = vrot.lane.b32.xlu1 %v1042_v54, %s10224_s28  ;;  %1047 = vrot.lane.b32.xlu0 %v1041_v46, %s10224_s28  ;;  %v10328_v54 = vld [vmem:[#allocation21_spill] sm:$0xff]  ;;  %v10329_v46 = vld [vmem:[#allocation28_spill] sm:$0xff]  ;;  %v519_v37 = vadd.f32 %v515_v57, %v499_v8  ;;  %v10337_v57 = vld [vmem:[#allocation11_spill] sm:$0xff]  ;;  %v1101_v35 = vmul.f32 %v6385_v48, %v1100_v40 }
 0x162   :  { %1051 = vrot.lane.b32.xlu2 %v1043_v24, %s10224_s28  ;;  %v536_v14 = vsel %vm199_vm4, %v10329_v46, %v10328_v54  ;;  %v535_v24 = vsel %vm199_vm4, %v10330_v25, %v10329_v46  ;;  %839 = vmatpush.msra.mxu1 %v790_v12  ;;  %v10338_v8 = vld [vmem:[#allocation33_spill] sm:$0xff]  ;;  %v621_v54 = vsel %vm115_vm0, %v6176_v5, %v6174_v45  ;;  %s5114_s28 = sld [smem:[#allocation2 + $0x94]] }
 0x163   :  { %v6356_v17 = vpop.permute.xlu1 %677  ;;  %v6358_v15 = vpop.permute.xlu0 %675  ;;  %v540_v2 = vadd.f32 %v536_v14, %v520_v4  ;;  %v539_v42 = vadd.f32 %v535_v24, %v519_v37  ;;  %820 = vmatpush.msra.mxu0 %v773_v26  ;;  %v622_v53 = vsel %vm115_vm0, %v6174_v45, %v10338_v8  ;;  %v1102_v24 = vmul.f32 %v6379_v43, %v1100_v40 }
 0x164   :  { %v6371_v21 = vpop.permute.xlu2 %739  ;;  %840 = vmatpush.msra.mxu1 %v789_v27  ;;  %v642_v4 = vsel %vm136_vm1, %v6239_v41, %v6118_v60  ;;  %v641_v37 = vsel %vm136_vm1, %v6241_v36, %v6239_v41  ;;  %v1103_v12 = vmul.f32 %v6400_v61, %v1100_v40  ;;  %v662_v5 = vsel %vm157_vm2, %v6303_v6, %v6156_v51 }
 0x165   :  { %v560_v62 = vadd.f32 %v556_v38, %v540_v2  ;;  %v559_v63 = vadd.f32 %v555_v3, %v539_v42  ;;  %v682_v60 = vsel %vm178_vm3, %v6356_v17, %v6190_v10  ;;  %v681_v41 = vsel %vm178_vm3, %v6358_v15, %v6356_v17 }
 0x166   :  { %v1120_v36 = vstv %s5109_s19  ;;  %v1160_v40 = vstv %s5111_s22  ;;  %s5115_s22 = sld [smem:[#allocation2 + $0x95]] }
 0x167   :  { %v579_v22 = vadd.f32 %v575_v31, %v559_v63  ;;  %v1122_v17 = vmul.f32 %v6379_v43, %v1120_v36  ;;  %v1121_v15 = vmul.f32 %v6385_v48, %v1120_v36  ;;  %v1140_v63 = vstv %s5110_s29  ;;  %s5120_s19 = sld [smem:[#allocation2 + $0x9a]] }
 0x168   :  { %v1141_v23 = vmul.f32 %v6385_v48, %v1140_v63  ;;  %s5122_s29 = sld [smem:[#allocation2 + $0x9c]] }
 0x169   :  { %1069 = vrot.lane.b32.xlu1 %v1062_v47, %s5560_s0  ;;  %1067 = vrot.lane.b32.xlu0 %v1061_v52, %s5560_s0  ;;  %v596_v47 = vsel %vm262_vm7, %v6145_v44, %v10335_v34  ;;  %v580_v52 = vadd.f32 %v576_v49, %v560_v62  ;;  %v599_v50 = vadd.f32 %v595_v9, %v579_v22  ;;  %v768_v9 = vstv %s6495_s20  ;;  %s5123_s20 = sld [smem:[#allocation2 + $0x9d]] }
 0x16a   :  { %1071 = vrot.lane.b32.xlu2 %v1063_v0, %s5560_s0  ;;  %v603_v0 = vmul.f32 %v10337_v57, %v602_v11  ;;  %v1123_v49 = vmul.f32 %v6400_v61, %v1120_v36  ;;  %v1142_v22 = vmul.f32 %v6379_v43, %v1140_v63 }
 0x16b   :  { %v698_v30 = vpop.permute.xlu1 %697  ;;  %v696_v32 = vpop.permute.xlu0 %695  ;;  %v600_v28 = vadd.f32 %v596_v47, %v580_v52 }
 0x16c   :  { %v6443_v56 = vpop.permute.xlu2 %759  ;;  %v605_v25 = vadd.f32 %v603_v0, %v599_v50  ;;  %v702_v18 = vsel %vm199_vm4, %v698_v30, %v6255_v58  ;;  %v701_v26 = vsel %vm199_vm4, %v696_v32, %v698_v30 }
 0x16d   :  { %v606_v14 = vadd.f32 %v604_v1, %v600_v28  ;;  %v1143_v28 = vmul.f32 %v6400_v61, %v1140_v63 }
 0x16e   :  { %v625_v45 = vadd.f32 %v621_v54, %v605_v25  ;;  %v1161_v54 = vmul.f32 %v6385_v48, %v1160_v40  ;;  %v1186_v25 = vstv %s5113_s4  ;;  %s10341_s4 = smov 126  }
 0x16f   :  { %v626_v39 = vadd.f32 %v622_v53, %v606_v14  ;;  %v1162_v53 = vmul.f32 %v6379_v43, %v1160_v40  ;;  %v1163_v14 = vmul.f32 %v6400_v61, %v1160_v40 }
 0x170   :  { %v645_v55 = vadd.f32 %v641_v37, %v625_v45  ;;  %v6544_v37 = vld [vmem:[%s10286_s23 + $0x38] sm:$0xff] }
 0x171   :  { %1089 = vrot.lane.b32.xlu1 %v1082_v33, %s5561_s1  ;;  %1087 = vrot.lane.b32.xlu0 %v1081_v13, %s5561_s1  ;;  %v646_v38 = vadd.f32 %v642_v4, %v626_v39  ;;  %10339 = vst [vmem:[#allocation12_spill] sm:$0xff] %v6544_v37  ;;  %v6550_v39 = vld [vmem:[%s10286_s23 + $0x30] sm:$0xff] }
 0x172   :  { %1091 = vrot.lane.b32.xlu2 %v1083_v19, %s5561_s1  ;;  %v665_v6 = vadd.f32 %v661_v59, %v645_v55  ;;  %10340 = vst [vmem:[#allocation15_spill] sm:$0xff] %v6550_v39  ;;  %v1187_v45 = vmul.f32 %v6550_v39, %v1186_v25 }
 0x173   :  { %v718_v44 = vpop.permute.xlu1 %717  ;;  %v716_v16 = vpop.permute.xlu0 %715  ;;  %v666_v51 = vadd.f32 %v662_v5, %v646_v38  ;;  %v6556_v5 = vld [vmem:[%s10286_s23 + $0x40] sm:$0xff]  ;;  %v1206_v38 = vstv %s5114_s28  ;;  %s5116_s28 = sld [smem:[#allocation2 + $0x96]] }
 0x174   :  { %v6466_v46 = vpop.permute.xlu2 %865  ;;  %v685_v42 = vadd.f32 %v681_v41, %v665_v6  ;;  %v722_v27 = vsel %vm220_vm5, %v718_v44, %v6315_v20  ;;  %v721_v7 = vsel %vm220_vm5, %v716_v16, %v718_v44  ;;  %v1189_v59 = vmul.f32 %v6556_v5, %v1186_v25 }
 0x175   :  { %v686_v2 = vadd.f32 %v682_v60, %v666_v51  ;;  %v1208_v36 = vmul.f32 %v6544_v37, %v1206_v38  ;;  %v1207_v51 = vmul.f32 %v6550_v39, %v1206_v38  ;;  %v1209_v6 = vmul.f32 %v6556_v5, %v1206_v38 }
 0x176   :  { %v705_v31 = vadd.f32 %v701_v26, %v685_v42  ;;  %v1352_v38 = vstv %s5122_s29  ;;  %s5124_s29 = sld [smem:[#allocation2 + $0x9e]] }
 0x177   :  { %v706_v58 = vadd.f32 %v702_v18, %v686_v2 }
 0x178   :  { %v725_v62 = vadd.f32 %v721_v7, %v705_v31 }
 0x179   :  { %1109 = vrot.lane.b32.xlu1 %v1102_v24, %s5562_s21  ;;  %1107 = vrot.lane.b32.xlu0 %v1101_v35, %s5562_s21  ;;  %v726_v11 = vadd.f32 %v722_v27, %v706_v58 }
 0x17a   :  { %1111 = vrot.lane.b32.xlu2 %v1103_v12, %s5562_s21  ;;  %v1188_v12 = vmul.f32 %v6544_v37, %v1186_v25 }
 0x17b   :  { %v738_v29 = vpop.permute.xlu1 %737  ;;  %v736_v3 = vpop.permute.xlu0 %735 }
 0x17c   :  { %v6497_v10 = vpop.permute.xlu2 %885  ;;  %v742_v30 = vsel %vm241_vm6, %v738_v29, %v6371_v21  ;;  %v741_v32 = vsel %vm241_vm6, %v736_v3, %v738_v29  ;;  %v1226_v29 = vstv %s5115_s22  ;;  %s5126_s22 = sld [smem:[#allocation2 + $0xa0]] }
 0x17d   :  { %v746_v20 = vadd.f32 %v742_v30, %v726_v11  ;;  %v745_v33 = vadd.f32 %v741_v32, %v725_v62  ;;  %v1228_v2 = vmul.f32 %v6544_v37, %v1226_v29  ;;  %v1227_v42 = vmul.f32 %v6550_v39, %v1226_v29 }
 0x17e   :  { %v1266_v32 = vstv %s5117_s26  ;;  %s5128_s26 = sld [smem:[#allocation2 + $0xa2]] }
 0x181   :  { %1129 = vrot.lane.b32.xlu1 %v1122_v17, %s5563_s2  ;;  %1127 = vrot.lane.b32.xlu0 %v1121_v15, %s5563_s2  ;;  %v1229_v17 = vmul.f32 %v6556_v5, %v1226_v29  ;;  %v1246_v15 = vstv %s5116_s28  ;;  %v6655_v29 = vld [vmem:[%s10286_s23 + $0x50] sm:$0xff]  ;;  %s5127_s28 = sld [smem:[#allocation2 + $0xa1]] }
 0x182   :  { %1131 = vrot.lane.b32.xlu2 %v1123_v49, %s5563_s2  ;;  %v1248_v58 = vmul.f32 %v6544_v37, %v1246_v15  ;;  %v1247_v31 = vmul.f32 %v6550_v39, %v1246_v15  ;;  %v1249_v30 = vmul.f32 %v6556_v5, %v1246_v15  ;;  %10342 = vst [vmem:[#allocation16_spill] sm:$0xff] %v6655_v29 }
 0x183   :  { %v758_v13 = vpop.permute.xlu1 %757  ;;  %v756_v34 = vpop.permute.xlu0 %755 }
 0x184   :  { %v762_v47 = vsel %vm262_vm7, %v758_v13, %v6443_v56  ;;  %v761_v21 = vsel %vm262_vm7, %v756_v34, %v758_v13  ;;  %v6515_v19 = vpop.permute.xlu2 %905  ;;  %v1269_v13 = vmul.f32 %v6556_v5, %v1266_v32  ;;  %v1286_v34 = vstv %s5118_s30  ;;  %s5129_s30 = sld [smem:[#allocation2 + $0xa3]] }
 0x185   :  { %v765_v52 = vadd.f32 %v761_v21, %v745_v33  ;;  %v766_v1 = vadd.f32 %v762_v47, %v746_v20  ;;  %v1268_v20 = vmul.f32 %v6544_v37, %v1266_v32  ;;  %v1267_v33 = vmul.f32 %v6550_v39, %v1266_v32 }
 0x187   :  { %v770_v50 = vadd.f32 %v768_v9, %v766_v1  ;;  %v769_v57 = vadd.f32 %v768_v9, %v765_v52  ;;  %v1288_v52 = vmul.f32 %v6544_v37, %v1286_v34  ;;  %v1306_v1 = vstv %s5119_s25  ;;  %s5164_s25 = sld [smem:[#allocation2 + $0x101]] }
 0x188   :  { %v1309_v40 = vmul.f32 %v6556_v5, %v1306_v1 }
 0x189   :  { %1149 = vrot.lane.b32.xlu1 %v1142_v22, %s10251_s24  ;;  %1147 = vrot.lane.b32.xlu0 %v1141_v23, %s10251_s24  ;;  %v772_v56 = vmax.f32 %v770_v50, 0.0  ;;  %v771_v0 = vmax.f32 %v769_v57, 0.0  ;;  %v1287_v22 = vmul.f32 %v6550_v39, %v1286_v34  ;;  %v1289_v23 = vmul.f32 %v6556_v5, %v1286_v34 }
 0x18a   :  { %1151 = vrot.lane.b32.xlu2 %v1143_v28, %s10251_s24  ;;  %v1392_v34 = vstv %s5124_s29  ;;  %s5168_s29 = sld [smem:[#allocation2 + $0x105]] }
 0x18b   :  { %v6523_v44 = vpop.permute.xlu1 %863  ;;  %841 = vmatmul.f32.vlgmr.msra.gmra.mxu1 %v772_v56  ;;  %v6525_v16 = vpop.permute.xlu0 %861  ;;  %821 = vmatmul.f32.vlgmr.msra.gmra.mxu0 %v771_v0  ;;  %v1308_v56 = vmul.f32 %v6544_v37, %v1306_v1  ;;  %v1307_v0 = vmul.f32 %v6550_v39, %v1306_v1  ;;  %v1394_v1 = vmul.f32 %v6655_v29, %v1392_v34 }
 0x18c   :  { %v6527_v8 = vpop.permute.xlu2 %925 }
 0x191   :  { %1169 = vrot.lane.b32.xlu1 %v1162_v53, %s10249_s5  ;;  %1167 = vrot.lane.b32.xlu0 %v1161_v54, %s10249_s5  ;;  %v1326_v53 = vstv %s5120_s19  ;;  %s5165_s19 = sld [smem:[#allocation2 + $0x102]] }
 0x192   :  { %1171 = vrot.lane.b32.xlu2 %v1163_v14, %s10249_s5 }
 0x193   :  { %v6535_v24 = vpop.permute.xlu1 %883  ;;  %v6537_v35 = vpop.permute.xlu0 %881 }
 0x194   :  { %v6539_v4 = vpop.permute.xlu2 %945 }
 0x199   :  { %1195 = vrot.lane.b32.xlu1 %v1188_v12, %s10237_s27  ;;  %1193 = vrot.lane.b32.xlu0 %v1187_v45, %s10237_s27  ;;  %v1328_v12 = vmul.f32 %v6544_v37, %v1326_v53  ;;  %v1327_v45 = vmul.f32 %v6550_v39, %v1326_v53 }
 0x19a   :  { %1197 = vrot.lane.b32.xlu2 %v1189_v59, %s10237_s27  ;;  %v1329_v59 = vmul.f32 %v6556_v5, %v1326_v53  ;;  %v1354_v5 = vmul.f32 %v6655_v29, %v1352_v38 }
 0x19b   :  { %v6562_v55 = vpop.permute.xlu1 %903  ;;  %v6564_v60 = vpop.permute.xlu0 %901 }
 0x19c   :  { %v6566_v41 = vpop.permute.xlu2 %965 }
 0x1a1   :  { %1215 = vrot.lane.b32.xlu1 %v1208_v36, %s10341_s4  ;;  %1213 = vrot.lane.b32.xlu0 %v1207_v51, %s10341_s4 }
 0x1a2   :  { %1217 = vrot.lane.b32.xlu2 %v1209_v6, %s10341_s4 }
 0x1a3   :  { %v6574_v3 = vpop.permute.xlu1 %923  ;;  %v6576_v18 = vpop.permute.xlu0 %921 }
 0x1a4   :  { %v6578_v26 = vpop.permute.xlu2 %985 }
 0x1a9   :  { %1235 = vrot.lane.b32.xlu1 %v1228_v2, %s5560_s0  ;;  %1233 = vrot.lane.b32.xlu0 %v1227_v42, %s5560_s0  ;;  %v6661_v2 = vld [vmem:[%s10286_s23 + $0x48] sm:$0xff] }
 0x1aa   :  { %1237 = vrot.lane.b32.xlu2 %v1229_v17, %s5560_s0  ;;  %10343 = vst [vmem:[#allocation8_spill] sm:$0xff] %v6661_v2  ;;  %v1353_v42 = vmul.f32 %v6661_v2, %v1352_v38  ;;  %v6667_v17 = vld [vmem:[%s10286_s23 + $0x58] sm:$0xff] }
 0x1ab   :  { %v6586_v27 = vpop.permute.xlu1 %943  ;;  %v6588_v7 = vpop.permute.xlu0 %941  ;;  %v1355_v15 = vmul.f32 %v6667_v17, %v1352_v38 }
 0x1ac   :  { %v6590_v49 = vpop.permute.xlu2 %1005 }
 0x1b1   :  { %1255 = vrot.lane.b32.xlu1 %v1248_v58, %s5561_s1  ;;  %1253 = vrot.lane.b32.xlu0 %v1247_v31, %s5561_s1  ;;  %v1372_v58 = vstv %s5123_s20  ;;  %s5125_s20 = sld [smem:[#allocation2 + $0x9f]] }
 0x1b2   :  { %1257 = vrot.lane.b32.xlu2 %v1249_v30, %s5561_s1 }
 0x1b3   :  { %v6598_v11 = vpop.permute.xlu1 %963  ;;  %v6600_v62 = vpop.permute.xlu0 %961 }
 0x1b4   :  { %v6602_v63 = vpop.permute.xlu2 %1031 }
 0x1b9   :  { %1275 = vrot.lane.b32.xlu1 %v1268_v20, %s5562_s21  ;;  %1273 = vrot.lane.b32.xlu0 %v1267_v33, %s5562_s21  ;;  %v1374_v20 = vmul.f32 %v6655_v29, %v1372_v58  ;;  %v1373_v33 = vmul.f32 %v6661_v2, %v1372_v58 }
 0x1ba   :  { %1277 = vrot.lane.b32.xlu2 %v1269_v13, %s5562_s21  ;;  %v1375_v13 = vmul.f32 %v6667_v17, %v1372_v58 }
 0x1bb   :  { %v6610_v47 = vpop.permute.xlu1 %983  ;;  %v6612_v21 = vpop.permute.xlu0 %981 }
 0x1bc   :  { %v6614_v9 = vpop.permute.xlu2 %1051 }
 0x1c1   :  { %1295 = vrot.lane.b32.xlu1 %v1288_v52, %s5563_s2  ;;  %1293 = vrot.lane.b32.xlu0 %v1287_v22, %s5563_s2 }
 0x1c2   :  { %1297 = vrot.lane.b32.xlu2 %v1289_v23, %s5563_s2 }
 0x1c3   :  { %v6622_v28 = vpop.permute.xlu1 %1003  ;;  %v6624_v50 = vpop.permute.xlu0 %1001 }
 0x1c4   :  { %v6626_v57 = vpop.permute.xlu2 %1071 }
 0x1c9   :  { %1315 = vrot.lane.b32.xlu1 %v1308_v56, %s10251_s24  ;;  %1313 = vrot.lane.b32.xlu0 %v1307_v0, %s10251_s24  ;;  %v1393_v56 = vmul.f32 %v6661_v2, %v1392_v34  ;;  %v1395_v0 = vmul.f32 %v6667_v17, %v1392_v34 }
 0x1ca   :  { %1317 = vrot.lane.b32.xlu2 %v1309_v40, %s10251_s24  ;;  %v1412_v40 = vstv %s5125_s20  ;;  %s5094_s20 = sld [smem:[#allocation2 + $0x80]] }
 0x1cb   :  { %v6634_v54 = vpop.permute.xlu1 %1029  ;;  %v6636_v14 = vpop.permute.xlu0 %1027  ;;  %v1413_v38 = vmul.f32 %v6661_v2, %v1412_v40 }
 0x1cc   :  { %v6638_v25 = vpop.permute.xlu2 %1091 }
 0x1d1   :  { %1335 = vrot.lane.b32.xlu1 %v1328_v12, %s10249_s5  ;;  %1333 = vrot.lane.b32.xlu0 %v1327_v45, %s10249_s5 }
 0x1d2   :  { %1337 = vrot.lane.b32.xlu2 %v1329_v59, %s10249_s5  ;;  %v1414_v59 = vmul.f32 %v6655_v29, %v1412_v40 }
 0x1d3   :  { %v6646_v36 = vpop.permute.xlu1 %1049  ;;  %v6648_v51 = vpop.permute.xlu0 %1047 }
 0x1d4   :  { %v6650_v6 = vpop.permute.xlu2 %1111 }
 0x1d9   :  { %1361 = vrot.lane.b32.xlu1 %v1354_v5, %s10237_s27  ;;  %1359 = vrot.lane.b32.xlu0 %v1353_v42, %s10237_s27  ;;  %v1415_v5 = vmul.f32 %v6667_v17, %v1412_v40  ;;  %v1432_v42 = vstv %s5126_s22  ;;  %s5169_s22 = sld [smem:[#allocation2 + $0x106]] }
 0x1da   :  { %1363 = vrot.lane.b32.xlu2 %v1355_v15, %s10237_s27  ;;  %v1435_v34 = vmul.f32 %v6667_v17, %v1432_v42 }
 0x1db   :  { %v6673_v31 = vpop.permute.xlu1 %1069  ;;  %v6675_v30 = vpop.permute.xlu0 %1067 }
 0x1dc   :  { %v6677_v32 = vpop.permute.xlu2 %1131 }
 0x1e1   :  { %1381 = vrot.lane.b32.xlu1 %v1374_v20, %s10341_s4  ;;  %1379 = vrot.lane.b32.xlu0 %v1373_v33, %s10341_s4  ;;  %v1434_v33 = vmul.f32 %v6655_v29, %v1432_v42 }
 0x1e2   :  { %1383 = vrot.lane.b32.xlu2 %v1375_v13, %s10341_s4  ;;  %v1433_v13 = vmul.f32 %v6661_v2, %v1432_v42  ;;  %v1472_v42 = vstv %s5128_s26  ;;  %s6856_s26 = sld [smem:[#allocation2 + $0x89]] }
 0x1e3   :  { %v6685_v52 = vpop.permute.xlu1 %1089  ;;  %v6687_v22 = vpop.permute.xlu0 %1087 }
 0x1e4   :  { %v6689_v23 = vpop.permute.xlu2 %1151 }
 0x1e9   :  { %1401 = vrot.lane.b32.xlu1 %v1394_v1, %s5560_s0  ;;  %1399 = vrot.lane.b32.xlu0 %v1393_v56, %s5560_s0  ;;  %v1452_v1 = vstv %s5127_s28  ;;  %s5170_s28 = sld [smem:[#allocation2 + $0x107]] }
 0x1ea   :  { %1403 = vrot.lane.b32.xlu2 %v1395_v0, %s5560_s0 }
 0x1eb   :  { %v6697_v53 = vpop.permute.xlu1 %1109  ;;  %v6699_v12 = vpop.permute.xlu0 %1107 }
 0x1ec   :  { %v6701_v45 = vpop.permute.xlu2 %1171 }
 0x1f1   :  { %1421 = vrot.lane.b32.xlu1 %v1414_v59, %s5561_s1  ;;  %1419 = vrot.lane.b32.xlu0 %v1413_v38, %s5561_s1  ;;  %v1454_v59 = vmul.f32 %v6655_v29, %v1452_v1  ;;  %v1453_v38 = vmul.f32 %v6661_v2, %v1452_v1 }
 0x1f2   :  { %1423 = vrot.lane.b32.xlu2 %v1415_v5, %s5561_s1  ;;  %v1455_v5 = vmul.f32 %v6667_v17, %v1452_v1  ;;  %v1475_v1 = vmul.f32 %v6667_v17, %v1472_v42 }
 0x1f3   :  { %v6709_v15 = vpop.permute.xlu1 %1129  ;;  %v6711_v58 = vpop.permute.xlu0 %1127 }
 0x1f4   :  { %v6713_v20 = vpop.permute.xlu2 %1197 }
 0x1f5   :  { %10344 = vst [vmem:[#allocation9_spill] sm:$0xff] %v6713_v20  ;;  %v1473_v20 = vmul.f32 %v6661_v2, %v1472_v42 }
 0x1f9   :  { %1441 = vrot.lane.b32.xlu1 %v1434_v33, %s5562_s21  ;;  %1439 = vrot.lane.b32.xlu0 %v1433_v13, %s5562_s21 }
 0x1fa   :  { %1443 = vrot.lane.b32.xlu2 %v1435_v34, %s5562_s21 }
 0x1fb   :  { %v6721_v56 = vpop.permute.xlu1 %1149  ;;  %v6723_v0 = vpop.permute.xlu0 %1147 }
 0x1fc   :  { %v6725_v40 = vpop.permute.xlu2 %1217 }
 0x1fd   :  { %10345 = vst [vmem:[#allocation13_spill] sm:$0xff] %v6725_v40  ;;  %v1474_v40 = vmul.f32 %v6655_v29, %v1472_v42 }
 0x201   :  { %1461 = vrot.lane.b32.xlu1 %v1454_v59, %s5563_s2  ;;  %1459 = vrot.lane.b32.xlu0 %v1453_v38, %s5563_s2  ;;  %v1492_v59 = vstv %s5129_s30  ;;  %s5171_s30 = sld [smem:[#allocation2 + $0x108]] }
 0x202   :  { %1463 = vrot.lane.b32.xlu2 %v1455_v5, %s5563_s2  ;;  %v1493_v37 = vmul.f32 %v6661_v2, %v1492_v59  ;;  %v1495_v42 = vmul.f32 %v6667_v17, %v1492_v59  ;;  %v6766_v2 = vld [vmem:[%s10286_s23 + $0x8] sm:$0xff] }
 0x203   :  { %v6733_v33 = vpop.permute.xlu1 %1169  ;;  %v6735_v13 = vpop.permute.xlu0 %1167 }
 0x204   :  { %10346 = vst [vmem:[#allocation18_spill] sm:$0xff] %v6733_v33  ;;  %v6737_v34 = vpop.permute.xlu2 %1237 }
 0x205   :  { %10347 = vst [vmem:[#allocation14_spill] sm:$0xff] %v6735_v13 }
 0x206   :  { %10348 = vst [vmem:[#allocation20_spill] sm:$0xff] %v6737_v34  ;;  %v1494_v34 = vmul.f32 %v6655_v29, %v1492_v59  ;;  %v6778_v59 = vld [vmem:[%s10286_s23 + $0x10] sm:$0xff]  ;;  %v1616_v29 = vstv %s5165_s19  ;;  %s5167_s19 = sld [smem:[#allocation2 + $0x104]] }
 0x209   :  { %1481 = vrot.lane.b32.xlu1 %v1474_v40, %s10251_s24  ;;  %1479 = vrot.lane.b32.xlu0 %v1473_v20, %s10251_s24  ;;  %v1596_v20 = vstv %s5164_s25  ;;  %s5166_s25 = sld [smem:[#allocation2 + $0x103]] }
 0x20a   :  { %1483 = vrot.lane.b32.xlu2 %v1475_v1, %s10251_s24  ;;  %v1598_v17 = vmul.f32 %v6766_v2, %v1596_v20 }
 0x20b   :  { %v6745_v38 = vpop.permute.xlu1 %1195  ;;  %v6747_v5 = vpop.permute.xlu0 %1193 }
 0x20c   :  { %10349 = vst [vmem:[#allocation17_spill] sm:$0xff] %v6745_v38  ;;  %v6749_v39 = vpop.permute.xlu2 %1257 }
 0x20d   :  { %10350 = vst [vmem:[#allocation22_spill] sm:$0xff] %v6747_v5 }
 0x20e   :  { %10351 = vst [vmem:[#allocation23_spill] sm:$0xff] %v6749_v39 }
 0x211   :  { %1501 = vrot.lane.b32.xlu1 %v1494_v34, %s10249_s5  ;;  %1499 = vrot.lane.b32.xlu0 %v1493_v37, %s10249_s5  ;;  %v6772_v37 = vld [vmem:[%s10286_s23] sm:$0xff] }
 0x212   :  { %1503 = vrot.lane.b32.xlu2 %v1495_v42, %s10249_s5  ;;  %v1597_v34 = vmul.f32 %v6772_v37, %v1596_v20  ;;  %v1599_v42 = vmul.f32 %v6778_v59, %v1596_v20  ;;  %v1617_v38 = vmul.f32 %v6772_v37, %v1616_v29  ;;  %v1619_v20 = vmul.f32 %v6778_v59, %v1616_v29 }
 0x213   :  { %v6757_v40 = vpop.permute.xlu1 %1215  ;;  %v6759_v1 = vpop.permute.xlu0 %1213 }
 0x214   :  { %10352 = vst [vmem:[#allocation19_spill] sm:$0xff] %v6757_v40  ;;  %v6761_v5 = vpop.permute.xlu2 %1277  ;;  %v1618_v40 = vmul.f32 %v6766_v2, %v1616_v29 }
 0x215   :  { %10353 = vst [vmem:[#allocation25_spill] sm:$0xff] %v6759_v1 }
 0x216   :  { %10354 = vst [vmem:[#allocation26_spill] sm:$0xff] %v6761_v5 }
 0x219   :  { %1605 = vrot.lane.b32.xlu1 %v1598_v17, %s10237_s27  ;;  %1603 = vrot.lane.b32.xlu0 %v1597_v34, %s10237_s27  ;;  %v1636_v17 = vstv %s5166_s25  ;;  %s6910_s25 = sld [smem:[#allocation2 + $0x10a]] }
 0x21a   :  { %1607 = vrot.lane.b32.xlu2 %v1599_v42, %s10237_s27  ;;  %v1639_v29 = vmul.f32 %v6778_v59, %v1636_v17 }
 0x21b   :  { %v6784_v5 = vpop.permute.xlu1 %1235  ;;  %v6786_v39 = vpop.permute.xlu0 %1233 }
 0x21c   :  { %10355 = vst [vmem:[#allocation21_spill] sm:$0xff] %v6784_v5  ;;  %v6788_v1 = vpop.permute.xlu2 %1297  ;;  %v1637_v5 = vmul.f32 %v6772_v37, %v1636_v17 }
 0x21d   :  { %10356 = vst [vmem:[#allocation28_spill] sm:$0xff] %v6786_v39 }
 0x21e   :  { %10357 = vst [vmem:[#allocation29_spill] sm:$0xff] %v6788_v1  ;;  %v1638_v1 = vmul.f32 %v6766_v2, %v1636_v17 }
 0x221   :  { %1625 = vrot.lane.b32.xlu1 %v1618_v40, %s10341_s4  ;;  %1623 = vrot.lane.b32.xlu0 %v1617_v38, %s10341_s4  ;;  %v1656_v38 = vstv %s5167_s19  ;;  %s7166_s19 = sld [smem:[#allocation2 + $0x10e]] }
 0x222   :  { %1627 = vrot.lane.b32.xlu2 %v1619_v20, %s10341_s4  ;;  %v1659_v17 = vmul.f32 %v6778_v59, %v1656_v38 }
 0x223   :  { %v6796_v34 = vpop.permute.xlu1 %1255  ;;  %v6798_v42 = vpop.permute.xlu0 %1253 }
 0x224   :  { %10358 = vst [vmem:[#allocation24_spill] sm:$0xff] %v6796_v34  ;;  %v6800_v39 = vpop.permute.xlu2 %1317  ;;  %v1657_v34 = vmul.f32 %v6772_v37, %v1656_v38 }
 0x225   :  { %10359 = vst [vmem:[#allocation31_spill] sm:$0xff] %v6798_v42  ;;  %v1658_v42 = vmul.f32 %v6766_v2, %v1656_v38 }
 0x226   :  { %10360 = vst [vmem:[#allocation32_spill] sm:$0xff] %v6800_v39 }
 0x229   :  { %1645 = vrot.lane.b32.xlu1 %v1638_v1, %s5560_s0  ;;  %1643 = vrot.lane.b32.xlu0 %v1637_v5, %s5560_s0  ;;  %v1676_v5 = vstv %s5168_s29  ;;  %s5183_s29 = sld [smem:[#allocation2 + $0x114]] }
 0x22a   :  { %1647 = vrot.lane.b32.xlu2 %v1639_v29, %s5560_s0  ;;  %v1677_v13 = vmul.f32 %v6772_v37, %v1676_v5  ;;  %v1679_v38 = vmul.f32 %v6778_v59, %v1676_v5 }
 0x22b   :  { %v6808_v40 = vpop.permute.xlu1 %1275  ;;  %v6810_v20 = vpop.permute.xlu0 %1273 }
 0x22c   :  { %10361 = vst [vmem:[#allocation27_spill] sm:$0xff] %v6808_v40  ;;  %v6812_v39 = vpop.permute.xlu2 %1337  ;;  %v1678_v40 = vmul.f32 %v6766_v2, %v1676_v5  ;;  %v888_v5 = vsel %vm136_vm1, %v6535_v24, %v6497_v10  ;;  %v907_v10 = vsel %vm157_vm2, %v6564_v60, %v6562_v55 }
 0x22d   :  { %10362 = vst [vmem:[#allocation30_spill] sm:$0xff] %v6810_v20  ;;  %v850_v20 = vstv %s5094_s20  ;;  %s5188_s20 = sld [smem:[#allocation2 + $0x119]] }
 0x22e   :  { %10363 = vst [vmem:[#allocation10_spill] sm:$0xff] %v6812_v39 }
 0x231   :  { %1665 = vrot.lane.b32.xlu1 %v1658_v42, %s5561_s1  ;;  %1663 = vrot.lane.b32.xlu0 %v1657_v34, %s5561_s1  ;;  %v852_v42 = vmul.f32 %v6766_v2, %v850_v20  ;;  %v851_v34 = vmul.f32 %v6772_v37, %v850_v20  ;;  %v887_v20 = vsel %vm136_vm1, %v6537_v35, %v6535_v24 }
 0x232   :  { %1667 = vrot.lane.b32.xlu2 %v1659_v17, %s5561_s1  ;;  %v868_v17 = vsel %vm115_vm0, %v6523_v44, %v6466_v46 }
 0x233   :  { %v6820_v1 = vpop.permute.xlu1 %1295  ;;  %v6822_v29 = vpop.permute.xlu0 %1293  ;;  %v872_v46 = vadd.f32 %v868_v17, %v852_v42 }
 0x234   :  { %10364 = vst [vmem:[#allocation11_spill] sm:$0xff] %v6820_v1  ;;  %v6824_v39 = vpop.permute.xlu2 %1363 }
 0x235   :  { %10365 = vst [vmem:[#allocation33_spill] sm:$0xff] %v6822_v29  ;;  %v867_v29 = vsel %vm115_vm0, %v6525_v16, %v6523_v44  ;;  %v908_v16 = vsel %vm157_vm2, %v6562_v55, %v6515_v19  ;;  %v892_v35 = vadd.f32 %v888_v5, %v872_v46  ;;  %v927_v19 = vsel %vm178_vm3, %v6576_v18, %v6574_v3 }
 0x236   :  { %10366 = vst [vmem:[#allocation34_spill] sm:$0xff] %v6824_v39  ;;  %v1696_v39 = vstv %s5169_s22  ;;  %v871_v1 = vadd.f32 %v867_v29, %v851_v34  ;;  %v947_v34 = vsel %vm199_vm4, %v6588_v7, %v6586_v27  ;;  %v1014_v46 = vstv %s6856_s26  ;;  %s6958_s26 = sld [smem:[#allocation2 + $0x92]] }
 0x237   :  { %v1697_v29 = vmul.f32 %v6772_v37, %v1696_v39  ;;  %v1699_v55 = vmul.f32 %v6778_v59, %v1696_v39  ;;  %v912_v60 = vadd.f32 %v908_v16, %v892_v35  ;;  %s6975_s22 = sld [smem:[#allocation2 + $0x10b]] }
 0x239   :  { %1685 = vrot.lane.b32.xlu1 %v1678_v40, %s5562_s21  ;;  %1683 = vrot.lane.b32.xlu0 %v1677_v13, %s5562_s21  ;;  %v891_v13 = vadd.f32 %v887_v20, %v871_v1  ;;  %v1698_v40 = vmul.f32 %v6766_v2, %v1696_v39  ;;  %v948_v1 = vsel %vm199_vm4, %v6586_v27, %v6539_v4  ;;  %v1716_v4 = vstv %s5170_s28  ;;  %s7234_s28 = sld [smem:[#allocation4 + $0x1]] }
 0x23a   :  { %1687 = vrot.lane.b32.xlu2 %v1679_v38, %s5562_s21  ;;  %v928_v38 = vsel %vm178_vm3, %v6574_v3, %v6527_v8  ;;  %v968_v8 = vsel %vm220_vm5, %v6598_v11, %v6566_v41  ;;  %v967_v39 = vsel %vm220_vm5, %v6600_v62, %v6598_v11  ;;  %v988_v20 = vsel %vm241_vm6, %v6610_v47, %v6578_v26 }
 0x23b   :  { %v6846_v33 = vpop.permute.xlu1 %1315  ;;  %v6848_v44 = vpop.permute.xlu0 %1313  ;;  %v911_v42 = vadd.f32 %v907_v10, %v891_v13  ;;  %v932_v17 = vadd.f32 %v928_v38, %v912_v60  ;;  %v987_v41 = vsel %vm241_vm6, %v6612_v21, %v6610_v47  ;;  %v1718_v10 = vmul.f32 %v6766_v2, %v1716_v4 }
 0x23c   :  { %v6858_v24 = vpop.permute.xlu2 %1383  ;;  %v1717_v35 = vmul.f32 %v6772_v37, %v1716_v4  ;;  %v1008_v13 = vsel %vm262_vm7, %v6622_v28, %v6590_v49  ;;  %v1007_v26 = vsel %vm262_vm7, %v6624_v50, %v6622_v28  ;;  %v1736_v60 = vstv %s5171_s30  ;;  %v5146_v50 = vld [vmem:[%s10201_s6 + $0x178] sm:$0xff]  ;;  %s5180_s30 = sld [smem:[#allocation2 + $0x111]] }
 0x23d   :  { %v931_v5 = vadd.f32 %v927_v19, %v911_v42  ;;  %v952_v3 = vadd.f32 %v948_v1, %v932_v17  ;;  %v5162_v42 = vld [vmem:[%s10201_s6 + $0x1f8] sm:$0xff]  ;;  %v1034_v1 = vsel %vm115_vm0, %v6634_v54, %v6602_v63  ;;  %1550 = vmatpush.msra.mxu2 %v5146_v50  ;;  %v5161_v63 = vld [vmem:[%s10201_s6 + $0x1f0] sm:$0xff]  ;;  %v5156_v50 = vld [vmem:[%s10201_s6 + $0x1c8] sm:$0xff] }
 0x23e   :  { %1570 = vmatpush.msra.mxu3 %v5162_v42  ;;  %v1154_v42 = vsel %vm241_vm6, %v6721_v56, %v6689_v23  ;;  %v5155_v23 = vld [vmem:[%s10201_s6 + $0x1c0] sm:$0xff] }
 0x23f   :  { %v951_v18 = vadd.f32 %v947_v34, %v931_v5  ;;  %v972_v62 = vadd.f32 %v968_v8, %v952_v3  ;;  %v1033_v34 = vsel %vm115_vm0, %v6636_v14, %v6634_v54  ;;  %v5145_v3 = vld [vmem:[%s10201_s6 + $0x170] sm:$0xff]  ;;  %v5144_v54 = vld [vmem:[%s10201_s6 + $0x168] sm:$0xff]  ;;  %v1054_v14 = vsel %vm136_vm1, %v6646_v36, %v6614_v9 }
 0x240   :  { %1551 = vmatpush.msra.mxu2 %v5145_v3  ;;  %1571 = vmatpush.msra.mxu3 %v5161_v63  ;;  %v1073_v9 = vsel %vm157_vm2, %v6675_v30, %v6673_v31  ;;  %v1093_v30 = vsel %vm178_vm3, %v6687_v22, %v6685_v52  ;;  %v1114_v22 = vsel %vm199_vm4, %v6697_v53, %v6650_v6  ;;  %v5157_v6 = vld [vmem:[%s10201_s6 + $0x1d0] sm:$0xff] }
 0x241   :  { %1705 = vrot.lane.b32.xlu1 %v1698_v40, %s5563_s2  ;;  %1703 = vrot.lane.b32.xlu0 %v1697_v29, %s5563_s2  ;;  %v971_v16 = vadd.f32 %v967_v39, %v951_v18  ;;  %v1719_v40 = vmul.f32 %v6778_v59, %v1716_v4  ;;  %v992_v47 = vadd.f32 %v988_v20, %v972_v62  ;;  %v5160_v18 = vld [vmem:[%s10201_s6 + $0x1e8] sm:$0xff]  ;;  %v1762_v62 = vstv %s6910_s25  ;;  %s5186_s25 = sld [smem:[#allocation2 + $0x117]] }
 0x242   :  { %1707 = vrot.lane.b32.xlu2 %v1699_v55, %s5563_s2  ;;  %v1016_v29 = vmul.f32 %v6379_v43, %v1014_v46  ;;  %v1015_v55 = vmul.f32 %v6385_v48, %v1014_v46  ;;  %v1738_v39 = vmul.f32 %v6766_v2, %v1736_v60  ;;  %v1737_v4 = vmul.f32 %v6772_v37, %v1736_v60 }
 0x243   :  { %v6884_v27 = vpop.permute.xlu1 %1335  ;;  %v6886_v7 = vpop.permute.xlu0 %1333  ;;  %v991_v21 = vadd.f32 %v987_v41, %v971_v16  ;;  %v1012_v38 = vadd.f32 %v1008_v13, %v992_v47  ;;  %v1053_v2 = vsel %vm136_vm1, %v6648_v51, %v6646_v36  ;;  %v1739_v37 = vmul.f32 %v6778_v59, %v1736_v60  ;;  %1552 = vmatpush.msra.mxu2 %v5144_v54  ;;  %v5143_v59 = vld [vmem:[%s10201_s6 + $0x160] sm:$0xff]  ;;  %v5154_v54 = vld [vmem:[%s10201_s6 + $0x1b8] sm:$0xff] }
 0x244   :  { %v6895_v11 = vpop.permute.xlu2 %1403  ;;  %v1074_v46 = vsel %vm157_vm2, %v6673_v31, %v6626_v57  ;;  %1572 = vmatpush.msra.mxu3 %v5160_v18  ;;  %v5159_v57 = vld [vmem:[%s10201_s6 + $0x1e0] sm:$0xff]  ;;  %v1094_v31 = vsel %vm178_vm3, %v6685_v52, %v6638_v25  ;;  %v5142_v25 = vld [vmem:[%s10201_s6 + $0x158] sm:$0xff] }
 0x245   :  { %v1011_v19 = vadd.f32 %v1007_v26, %v991_v21  ;;  %v1018_v5 = vadd.f32 %v1016_v29, %v1012_v38  ;;  %1553 = vmatpush.msra.mxu2 %v5143_v59  ;;  %v5158_v52 = vld [vmem:[%s10201_s6 + $0x1d8] sm:$0xff]  ;;  %v1113_v26 = vsel %vm199_vm4, %v6699_v12, %v6697_v53  ;;  %v1764_v29 = vmul.f32 %v6379_v43, %v1762_v62  ;;  %v5140_v53 = vld [vmem:[%s10201_s6 + $0x148] sm:$0xff] }
 0x246   :  { %1573 = vmatpush.msra.mxu3 %v5159_v57  ;;  %v1763_v38 = vmul.f32 %v6385_v48, %v1762_v62  ;;  %v1134_v43 = vsel %vm220_vm5, %v6709_v15, %v6677_v32  ;;  %v1133_v48 = vsel %vm220_vm5, %v6711_v58, %v6709_v15  ;;  %v1765_v12 = vmul.f32 %v6400_v61, %v1762_v62  ;;  %v5137_v57 = vld [vmem:[%s10201_s6 + $0x130] sm:$0xff] }
 0x247   :  { %v1017_v8 = vadd.f32 %v1015_v55, %v1011_v19  ;;  %v1038_v20 = vadd.f32 %v1034_v1, %v1018_v5  ;;  %1554 = vmatpush.msra.mxu2 %v5142_v25  ;;  %v5141_v19 = vld [vmem:[%s10201_s6 + $0x150] sm:$0xff]  ;;  %v1153_v32 = vsel %vm241_vm6, %v6723_v0, %v6721_v56  ;;  %v1180_v15 = vstv %s6958_s26  ;;  %v5139_v1 = vld [vmem:[%s10201_s6 + $0x140] sm:$0xff]  ;;  %s7039_s26 = sld [smem:[#allocation2 + $0x10c]]  ;;  %v10372_v25 = vld [vmem:[#allocation17_spill] sm:$0xff] }
 0x248   :  { %1574 = vmatpush.msra.mxu3 %v5158_v52  ;;  %v10368_v0 = vld [vmem:[#allocation14_spill] sm:$0xff] }
 0x249   :  { %1725 = vrot.lane.b32.xlu1 %v1718_v10, %s10251_s24  ;;  %1723 = vrot.lane.b32.xlu0 %v1717_v35, %s10251_s24  ;;  %v1037_v41 = vadd.f32 %v1033_v34, %v1017_v8  ;;  %v1058_v36 = vadd.f32 %v1054_v14, %v1038_v20  ;;  %v10367_v34 = vld [vmem:[#allocation18_spill] sm:$0xff]  ;;  %v1782_v8 = vstv %s6975_s22  ;;  %v10369_v14 = vld [vmem:[#allocation12_spill] sm:$0xff]  ;;  %s7104_s22 = sld [smem:[#allocation2 + $0x10d]] }
 0x24a   :  { %1727 = vrot.lane.b32.xlu2 %v1719_v40, %s10251_s24  ;;  %1555 = vmatpush.msra.mxu2 %v5141_v19  ;;  %v1174_v56 = vsel %vm262_vm7, %v10367_v34, %v6701_v45  ;;  %v1173_v5 = vsel %vm262_vm7, %v10368_v0, %v10367_v34  ;;  %v5138_v45 = vld [vmem:[%s10201_s6 + $0x138] sm:$0xff]  ;;  %v10374_v19 = vld [vmem:[#allocation13_spill] sm:$0xff] }
 0x24b   :  { %v6913_v49 = vpop.permute.xlu1 %1361  ;;  %v6915_v28 = vpop.permute.xlu0 %1359  ;;  %v1057_v51 = vadd.f32 %v1053_v2, %v1037_v41  ;;  %v1078_v16 = vadd.f32 %v1074_v46, %v1058_v36  ;;  %1575 = vmatpush.msra.mxu3 %v5157_v6  ;;  %v1182_v2 = vmul.f32 %v10369_v14, %v1180_v15  ;;  %v10375_v6 = vld [vmem:[#allocation19_spill] sm:$0xff]  ;;  %v10381_v14 = vld [vmem:[#allocation24_spill] sm:$0xff] }
 0x24c   :  { %v6929_v17 = vpop.permute.xlu2 %1423  ;;  %1556 = vmatpush.msra.mxu2 %v5140_v53  ;;  %v1220_v53 = vsel %vm136_vm1, %v10375_v6, %v10374_v19  ;;  %v5150_v0 = vld [vmem:[%s10201_s6 + $0x198] sm:$0xff] }
 0x24d   :  { %v1077_v10 = vadd.f32 %v1073_v9, %v1057_v51  ;;  %v1098_v47 = vadd.f32 %v1094_v31, %v1078_v16  ;;  %1576 = vmatpush.msra.mxu3 %v5156_v50  ;;  %v7059_v9 = vld [vmem:[%s10286_s23 + $0x20] sm:$0xff]  ;;  %v7065_v51 = vld [vmem:[%s10286_s23 + $0x18] sm:$0xff]  ;;  %v5153_v31 = vld [vmem:[%s10201_s6 + $0x1b0] sm:$0xff] }
 0x24e   :  { %1557 = vmatpush.msra.mxu2 %v5139_v1  ;;  %v1784_v36 = vmul.f32 %v7059_v9, %v1782_v8  ;;  %v1783_v59 = vmul.f32 %v7065_v51, %v1782_v8  ;;  %v5136_v16 = vld [vmem:[%s10201_s6 + $0x128] sm:$0xff] }
 0x24f   :  { %v1097_v21 = vadd.f32 %v1093_v30, %v1077_v10  ;;  %v1118_v55 = vadd.f32 %v1114_v22, %v1098_v47  ;;  %1577 = vmatpush.msra.mxu3 %v5155_v23  ;;  %v7077_v30 = vld [vmem:[%s10286_s23 + $0x28] sm:$0xff]  ;;  %v10373_v22 = vld [vmem:[#allocation22_spill] sm:$0xff]  ;;  %v10379_v23 = vld [vmem:[#allocation28_spill] sm:$0xff] }
 0x250   :  { %1558 = vmatpush.msra.mxu2 %v5138_v45  ;;  %v1785_v62 = vmul.f32 %v7077_v30, %v1782_v8  ;;  %v10371_v10 = vld [vmem:[#allocation9_spill] sm:$0xff]  ;;  %v5133_v45 = vld [vmem:[%s10201_s6 + $0x110] sm:$0xff] }
 0x251   :  { %1745 = vrot.lane.b32.xlu1 %v1738_v39, %s10249_s5  ;;  %1743 = vrot.lane.b32.xlu0 %v1737_v4, %s10249_s5  ;;  %v1117_v60 = vadd.f32 %v1113_v26, %v1097_v21  ;;  %v1138_v61 = vadd.f32 %v1134_v43, %v1118_v55  ;;  %v1200_v52 = vsel %vm115_vm0, %v10372_v25, %v10371_v10  ;;  %v5152_v47 = vld [vmem:[%s10201_s6 + $0x1a8] sm:$0xff]  ;;  %v5151_v55 = vld [vmem:[%s10201_s6 + $0x1a0] sm:$0xff] }
 0x252   :  { %1747 = vrot.lane.b32.xlu2 %v1739_v37, %s10249_s5  ;;  %v10370_v37 = vld [vmem:[#allocation15_spill] sm:$0xff]  ;;  %1578 = vmatpush.msra.mxu3 %v5154_v54  ;;  %v1199_v26 = vsel %vm115_vm0, %v10373_v22, %v10372_v25  ;;  %v10376_v43 = vld [vmem:[#allocation25_spill] sm:$0xff] }
 0x253   :  { %v6978_v35 = vpop.permute.xlu1 %1381  ;;  %v6980_v13 = vpop.permute.xlu0 %1379  ;;  %v1137_v58 = vadd.f32 %v1133_v48, %v1117_v60  ;;  %v1158_v39 = vadd.f32 %v1154_v42, %v1138_v61  ;;  %v1181_v18 = vmul.f32 %v10370_v37, %v1180_v15  ;;  %1559 = vmatpush.msra.mxu2 %v5137_v57  ;;  %v1219_v48 = vsel %vm136_vm1, %v10376_v43, %v10375_v6  ;;  %v5134_v15 = vld [vmem:[%s10201_s6 + $0x118] sm:$0xff]  ;;  %v10377_v61 = vld [vmem:[#allocation20_spill] sm:$0xff]  ;;  %v10383_v57 = vld [vmem:[#allocation26_spill] sm:$0xff] }
 0x254   :  { %v6994_v40 = vpop.permute.xlu2 %1443  ;;  %1579 = vmatpush.msra.mxu3 %v5153_v31  ;;  %v10380_v54 = vld [vmem:[#allocation23_spill] sm:$0xff]  ;;  %v5132_v25 = vld [vmem:[%s10201_s6 + $0x108] sm:$0xff]  ;;  %v1822_v6 = vstv %s7104_s22  ;;  %s5178_s22 = sld [smem:[#allocation2 + $0x10f]] }
 0x255   :  { %v1157_v4 = vadd.f32 %v1153_v32, %v1137_v58  ;;  %v1178_v41 = vadd.f32 %v1174_v56, %v1158_v39  ;;  %1560 = vmatpush.msra.mxu2 %v5136_v16  ;;  %v10378_v58 = vld [vmem:[#allocation21_spill] sm:$0xff]  ;;  %v10382_v37 = vld [vmem:[#allocation31_spill] sm:$0xff]  ;;  %v10385_v16 = vld [vmem:[#allocation30_spill] sm:$0xff] }
 0x256   :  { %1580 = vmatpush.msra.mxu3 %v5152_v47  ;;  %v1240_v1 = vsel %vm157_vm2, %v10378_v58, %v10377_v61  ;;  %v1239_v34 = vsel %vm157_vm2, %v10379_v23, %v10378_v58  ;;  %v10384_v31 = vld [vmem:[#allocation27_spill] sm:$0xff]  ;;  %v10386_v47 = vld [vmem:[#allocation29_spill] sm:$0xff]  ;;  %v1319_v61 = vsel %vm241_vm6, %v6848_v44, %v6846_v33  ;;  %v1825_v44 = vmul.f32 %v7077_v30, %v1822_v6 }
 0x257   :  { %v1177_v46 = vadd.f32 %v1173_v5, %v1157_v4  ;;  %v1184_v21 = vadd.f32 %v1182_v2, %v1178_v41  ;;  %v1260_v2 = vsel %vm178_vm3, %v10381_v14, %v10380_v54  ;;  %v1279_v10 = vsel %vm199_vm4, %v10385_v16, %v10384_v31  ;;  %v10391_v54 = vld [vmem:[#allocation16_spill] sm:$0xff] }
 0x258   :  { %1581 = vmatpush.msra.mxu3 %v5151_v55 }
 0x259   :  { %1771 = vrot.lane.b32.xlu1 %v1764_v29, %s10237_s27  ;;  %1769 = vrot.lane.b32.xlu0 %v1763_v38, %s10237_s27  ;;  %v1183_v29 = vadd.f32 %v1181_v18, %v1177_v46  ;;  %v5135_v38 = vld [vmem:[%s10201_s6 + $0x120] sm:$0xff]  ;;  %v1204_v60 = vadd.f32 %v1200_v52, %v1184_v21  ;;  %v1259_v18 = vsel %vm178_vm3, %v10382_v37, %v10381_v14  ;;  %v10387_v21 = vld [vmem:[#allocation11_spill] sm:$0xff] }
 0x25a   :  { %1773 = vrot.lane.b32.xlu2 %v1765_v12, %s10237_s27  ;;  %v1802_v12 = vstv %s7039_s26  ;;  %s7123_s26 = sld [smem:[#allocation2 + $0x9b]]  ;;  %1561 = vmatpush.msra.mxu2 %v5135_v38  ;;  %v10388_v38 = vld [vmem:[#allocation33_spill] sm:$0xff] }
 0x25b   :  { %v7042_v3 = vpop.permute.xlu1 %1401  ;;  %v7044_v63 = vpop.permute.xlu0 %1399  ;;  %v1203_v50 = vadd.f32 %v1199_v26, %v1183_v29  ;;  %v1224_v5 = vadd.f32 %v1220_v53, %v1204_v60  ;;  %v1804_v39 = vmul.f32 %v7059_v9, %v1802_v12  ;;  %v1803_v4 = vmul.f32 %v7065_v51, %v1802_v12  ;;  %1582 = vmatpush.msra.mxu3 %v5150_v0  ;;  %v5148_v26 = vld [vmem:[%s10201_s6 + $0x188] sm:$0xff]  ;;  %v5131_v53 = vld [vmem:[%s10201_s6 + $0x100] sm:$0xff]  ;;  %s5187_s27 = sld [smem:[#allocation2 + $0x118]] }
 0x25c   :  { %v7054_v20 = vpop.permute.xlu2 %1463  ;;  %v1805_v41 = vmul.f32 %v7077_v30, %v1802_v12  ;;  %1562 = vmatpush.msra.mxu2 %v5134_v15  ;;  %v1300_v29 = vsel %vm220_vm5, %v10387_v21, %v10386_v47  ;;  %v1299_v19 = vsel %vm220_vm5, %v10388_v38, %v10387_v21  ;;  %v5147_v60 = vld [vmem:[%s10201_s6 + $0x180] sm:$0xff]  ;;  %v1824_v0 = vmul.f32 %v7059_v9, %v1822_v6 }
 0x25d   :  { %v1223_v8 = vadd.f32 %v1219_v48, %v1203_v50  ;;  %v1244_v46 = vadd.f32 %v1240_v1, %v1224_v5  ;;  %v10389_v50 = vld [vmem:[#allocation32_spill] sm:$0xff]  ;;  %v1823_v5 = vmul.f32 %v7065_v51, %v1822_v6  ;;  %v1405_v21 = vsel %vm157_vm2, %v7044_v63, %v7042_v3 }
 0x25e   :  { %1563 = vmatpush.msra.mxu2 %v5133_v45  ;;  %v1320_v15 = vsel %vm241_vm6, %v6846_v33, %v10389_v50  ;;  %v1339_v33 = vsel %vm262_vm7, %v6886_v7, %v6884_v27 }
 0x25f   :  { %v1264_v52 = vadd.f32 %v1260_v2, %v1244_v46  ;;  %v1842_v46 = vstv %s7166_s19  ;;  %s5182_s19 = sld [smem:[#allocation2 + $0x113]] }
 0x260   :  { %1564 = vmatpush.msra.mxu2 %v5132_v25  ;;  %v1346_v58 = vstv %s7123_s26  ;;  %v1843_v25 = vmul.f32 %v7065_v51, %v1842_v46  ;;  %s5179_s26 = sld [smem:[#allocation2 + $0x110]] }
 0x261   :  { %1791 = vrot.lane.b32.xlu1 %v1784_v36, %s10341_s4  ;;  %1789 = vrot.lane.b32.xlu0 %v1783_v59, %s10341_s4  ;;  %v1243_v36 = vadd.f32 %v1239_v34, %v1223_v8  ;;  %v5149_v59 = vld [vmem:[%s10201_s6 + $0x190] sm:$0xff]  ;;  %v1348_v14 = vmul.f32 %v10391_v54, %v1346_v58 }
 0x262   :  { %1793 = vrot.lane.b32.xlu2 %v1785_v62, %s10341_s4  ;;  %v1280_v62 = vsel %vm199_vm4, %v10384_v31, %v10383_v57  ;;  %1583 = vmatpush.msra.mxu3 %v5149_v59  ;;  %v10390_v8 = vld [vmem:[#allocation10_spill] sm:$0xff]  ;;  %v1365_v57 = vsel %vm115_vm0, %v6915_v28, %v6913_v49  ;;  %v1406_v28 = vsel %vm157_vm2, %v7042_v3, %v6895_v11 }
 0x263   :  { %v7110_v42 = vpop.permute.xlu1 %1421  ;;  %v7112_v32 = vpop.permute.xlu0 %1419  ;;  %v1263_v22 = vadd.f32 %v1259_v18, %v1243_v36  ;;  %v1284_v43 = vadd.f32 %v1280_v62, %v1264_v52  ;;  %1565 = vmatpush.msra.mxu2 %v5131_v53  ;;  %v10392_v18 = vld [vmem:[#allocation8_spill] sm:$0xff]  ;;  %v10393_v36 = vld [vmem:[#allocation34_spill] sm:$0xff]  ;;  %v1386_v52 = vsel %vm136_vm1, %v6978_v35, %v6858_v24 }
 0x264   :  { %v7125_v56 = vpop.permute.xlu2 %1483  ;;  %1584 = vmatpush.msra.mxu3 %v5148_v26  ;;  %v1366_v59 = vsel %vm115_vm0, %v6913_v49, %v10393_v36  ;;  %v1845_v26 = vmul.f32 %v7077_v30, %v1842_v46  ;;  %v1426_v24 = vsel %vm178_vm3, %v7110_v42, %v6929_v17 }
 0x265   :  { %v1283_v48 = vadd.f32 %v1279_v10, %v1263_v22  ;;  %v1304_v23 = vadd.f32 %v1300_v29, %v1284_v43  ;;  %v1844_v10 = vmul.f32 %v7059_v9, %v1842_v46  ;;  %v1385_v22 = vsel %vm136_vm1, %v6980_v13, %v6978_v35 }
 0x266   :  { %1585 = vmatpush.msra.mxu3 %v5147_v60  ;;  %v1425_v35 = vsel %vm178_vm3, %v7112_v32, %v7110_v42  ;;  %v1862_v13 = vstv %s5178_s22  ;;  %v1902_v46 = vstv %s5180_s30  ;;  %s10396_s30 = smov 127   ;;  %s5189_s22 = sld [smem:[#allocation2 + $0x11a]] }
 0x267   :  { %v1303_v34 = vadd.f32 %v1299_v19, %v1283_v48  ;;  %v1864_v42 = vmul.f32 %v7059_v9, %v1862_v13  ;;  %v1863_v32 = vmul.f32 %v7065_v51, %v1862_v13 }
 0x269   :  { %1811 = vrot.lane.b32.xlu1 %v1804_v39, %s5560_s0  ;;  %1809 = vrot.lane.b32.xlu0 %v1803_v4, %s5560_s0  ;;  %v1340_v39 = vsel %vm262_vm7, %v6884_v27, %v10390_v8  ;;  %v1324_v4 = vadd.f32 %v1320_v15, %v1304_v23  ;;  %v1323_v45 = vadd.f32 %v1319_v61, %v1303_v34  ;;  %v1882_v34 = vstv %s5179_s26  ;;  %s5191_s26 = sld [smem:[#allocation2 + $0x11c]] }
 0x26a   :  { %1813 = vrot.lane.b32.xlu2 %v1805_v41, %s5560_s0  ;;  %v1347_v41 = vmul.f32 %v10392_v18, %v1346_v58  ;;  %v1865_v15 = vmul.f32 %v7077_v30, %v1862_v13  ;;  %v1883_v54 = vmul.f32 %v7065_v51, %v1882_v34 }
 0x26b   :  { %v1442_v12 = vpop.permute.xlu1 %1441  ;;  %v1440_v55 = vpop.permute.xlu0 %1439  ;;  %v1344_v2 = vadd.f32 %v1340_v39, %v1324_v4  ;;  %v1343_v37 = vadd.f32 %v1339_v33, %v1323_v45  ;;  %v1512_v33 = vstv %s7234_s28  ;;  %v1884_v45 = vmul.f32 %v7059_v9, %v1882_v34  ;;  %s5192_s28 = sld [smem:[#allocation2 + $0x11d]] }
 0x26c   :  { %v7182_v1 = vpop.permute.xlu2 %1503  ;;  %v1446_v6 = vsel %vm199_vm4, %v1442_v12, %v6994_v40  ;;  %v1445_v53 = vsel %vm199_vm4, %v1440_v55, %v1442_v12 }
 0x26d   :  { %v1350_v62 = vadd.f32 %v1348_v14, %v1344_v2  ;;  %v1349_v16 = vadd.f32 %v1347_v41, %v1343_v37  ;;  %v1885_v2 = vmul.f32 %v7077_v30, %v1882_v34 }
 0x26f   :  { %v1370_v47 = vadd.f32 %v1366_v59, %v1350_v62  ;;  %v1369_v49 = vadd.f32 %v1365_v57, %v1349_v16  ;;  %v1904_v59 = vmul.f32 %v7059_v9, %v1902_v46  ;;  %v1903_v57 = vmul.f32 %v7065_v51, %v1902_v46 }
 0x270   :  { %v1905_v62 = vmul.f32 %v7077_v30, %v1902_v46  ;;  %v1928_v16 = vstv %s5182_s19  ;;  %s5184_s19 = sld [smem:[#allocation2 + $0x115]]  ;;  %v2068_v46 = vstv %s5189_s22 }
 0x271   :  { %1831 = vrot.lane.b32.xlu1 %v1824_v0, %s5561_s1  ;;  %1829 = vrot.lane.b32.xlu0 %v1823_v5, %s5561_s1  ;;  %v1390_v29 = vadd.f32 %v1386_v52, %v1370_v47  ;;  %v1389_v38 = vadd.f32 %v1385_v22, %v1369_v49  ;;  %v7283_v22 = vld [vmem:[%s10286_s23 + $0x38] sm:$0xff]  ;;  %v7295_v49 = vld [vmem:[%s10286_s23 + $0x40] sm:$0xff]  ;;  %s5234_s22 = sld [smem:[#allocation2 + $0x182]] }
 0x272   :  { %1833 = vrot.lane.b32.xlu2 %v1825_v44, %s5561_s1  ;;  %10394 = vst [vmem:[#allocation18_spill] sm:$0xff] %v7283_v22  ;;  %v1930_v30 = vmul.f32 %v7283_v22, %v1928_v16 }
 0x273   :  { %v1462_v27 = vpop.permute.xlu1 %1461  ;;  %v1460_v7 = vpop.permute.xlu0 %1459  ;;  %v1410_v11 = vadd.f32 %v1406_v28, %v1390_v29  ;;  %v1409_v3 = vadd.f32 %v1405_v21, %v1389_v38  ;;  %v1931_v28 = vmul.f32 %v7295_v49, %v1928_v16  ;;  %v1948_v21 = vstv %s5183_s29  ;;  %s5185_s29 = sld [smem:[#allocation2 + $0x116]] }
 0x274   :  { %v7205_v31 = vpop.permute.xlu2 %1607  ;;  %v1466_v60 = vsel %vm220_vm5, %v1462_v27, %v7054_v20  ;;  %v1465_v50 = vsel %vm220_vm5, %v1460_v7, %v1462_v27 }
 0x275   :  { %v1430_v43 = vadd.f32 %v1426_v24, %v1410_v11  ;;  %v1429_v48 = vadd.f32 %v1425_v35, %v1409_v3  ;;  %v1950_v35 = vmul.f32 %v7283_v22, %v1948_v21  ;;  %v1951_v11 = vmul.f32 %v7295_v49, %v1948_v21 }
 0x276   :  { %v1968_v3 = vstv %s5184_s19  ;;  %s5195_s19 = sld [smem:[#allocation2 + $0x120]] }
 0x277   :  { %v1450_v40 = vadd.f32 %v1446_v6, %v1430_v43  ;;  %v1449_v61 = vadd.f32 %v1445_v53, %v1429_v48  ;;  %v1970_v53 = vmul.f32 %v7283_v22, %v1968_v3  ;;  %v1971_v48 = vmul.f32 %v7295_v49, %v1968_v3 }
 0x279   :  { %1851 = vrot.lane.b32.xlu1 %v1844_v10, %s5562_s21  ;;  %1849 = vrot.lane.b32.xlu0 %v1843_v25, %s5562_s21  ;;  %v1470_v58 = vadd.f32 %v1466_v60, %v1450_v40  ;;  %v1469_v23 = vadd.f32 %v1465_v50, %v1449_v61 }
 0x27a   :  { %1853 = vrot.lane.b32.xlu2 %v1845_v26, %s5562_s21  ;;  %v7289_v26 = vld [vmem:[%s10286_s23 + $0x30] sm:$0xff] }
 0x27b   :  { %v1482_v63 = vpop.permute.xlu1 %1481  ;;  %v1480_v19 = vpop.permute.xlu0 %1479  ;;  %10395 = vst [vmem:[#allocation14_spill] sm:$0xff] %v7289_v26  ;;  %v1929_v47 = vmul.f32 %v7289_v26, %v1928_v16  ;;  %v1949_v13 = vmul.f32 %v7289_v26, %v1948_v21  ;;  %v1969_v43 = vmul.f32 %v7289_v26, %v1968_v3  ;;  %v2070_v16 = vmul.f32 %v7283_v22, %v2068_v46  ;;  %v7400_v3 = vld [vmem:[%s10286_s23 + $0x48] sm:$0xff] }
 0x27c   :  { %v7236_v17 = vpop.permute.xlu2 %1627  ;;  %v1486_v12 = vsel %vm241_vm6, %v1482_v63, %v7125_v56  ;;  %v1485_v55 = vsel %vm241_vm6, %v1480_v19, %v1482_v63  ;;  %10398 = vst [vmem:[#allocation15_spill] sm:$0xff] %v7400_v3 }
 0x27d   :  { %v1490_v20 = vadd.f32 %v1486_v12, %v1470_v58  ;;  %v1489_v0 = vadd.f32 %v1485_v55, %v1469_v23  ;;  %v2008_v12 = vstv %s5186_s25  ;;  %s5197_s25 = sld [smem:[#allocation2 + $0x122]] }
 0x27e   :  { %v2010_v34 = vmul.f32 %v7283_v22, %v2008_v12 }
 0x281   :  { %1871 = vrot.lane.b32.xlu1 %v1864_v42, %s5563_s2  ;;  %1869 = vrot.lane.b32.xlu0 %v1863_v32, %s5563_s2  ;;  %v1988_v42 = vstv %s5185_s29  ;;  %s5196_s29 = sld [smem:[#allocation2 + $0x121]] }
 0x282   :  { %1873 = vrot.lane.b32.xlu2 %v1865_v15, %s5563_s2  ;;  %v1990_v15 = vmul.f32 %v7283_v22, %v1988_v42  ;;  %v1989_v40 = vmul.f32 %v7289_v26, %v1988_v42  ;;  %v1991_v61 = vmul.f32 %v7295_v49, %v1988_v42  ;;  %v2114_v42 = vstv %s5192_s28  ;;  %s5194_s28 = sld [smem:[#allocation2 + $0x11f]] }
 0x283   :  { %v1502_v5 = vpop.permute.xlu1 %1501  ;;  %v1500_v8 = vpop.permute.xlu0 %1499 }
 0x284   :  { %v1506_v39 = vsel %vm262_vm7, %v1502_v5, %v7182_v1  ;;  %v1505_v56 = vsel %vm262_vm7, %v1500_v8, %v1502_v5  ;;  %v7254_v44 = vpop.permute.xlu2 %1647  ;;  %v2028_v5 = vstv %s5187_s27  ;;  %s5198_s27 = sld [smem:[#allocation2 + $0x123]] }
 0x285   :  { %v1509_v4 = vadd.f32 %v1505_v56, %v1489_v0  ;;  %v1510_v14 = vadd.f32 %v1506_v39, %v1490_v20  ;;  %v2009_v20 = vmul.f32 %v7289_v26, %v2008_v12  ;;  %v2011_v0 = vmul.f32 %v7295_v49, %v2008_v12 }
 0x287   :  { %v1514_v37 = vadd.f32 %v1512_v33, %v1510_v14  ;;  %v1513_v18 = vadd.f32 %v1512_v33, %v1509_v4  ;;  %v2030_v33 = vmul.f32 %v7283_v22, %v2028_v5  ;;  %v2029_v4 = vmul.f32 %v7289_v26, %v2028_v5 }
 0x289   :  { %1891 = vrot.lane.b32.xlu1 %v1884_v45, %s10251_s24  ;;  %1889 = vrot.lane.b32.xlu0 %v1883_v54, %s10251_s24  ;;  %v1516_v1 = vmax.f32 %v1514_v37, 0.0  ;;  %v1515_v41 = vmax.f32 %v1513_v18, 0.0  ;;  %v2031_v45 = vmul.f32 %v7295_v49, %v2028_v5  ;;  %v2048_v54 = vstv %s5188_s20  ;;  %s5233_s20 = sld [smem:[#allocation2 + $0x181]] }
 0x28a   :  { %1893 = vrot.lane.b32.xlu2 %v1885_v2, %s10251_s24  ;;  %v2050_v18 = vmul.f32 %v7283_v22, %v2048_v54 }
 0x28b   :  { %1586 = vmatmul.f32.vlgmr.msra.gmra.mxu3 %v1516_v1  ;;  %v7262_v27 = vpop.permute.xlu1 %1605  ;;  %1566 = vmatmul.f32.vlgmr.msra.gmra.mxu2 %v1515_v41  ;;  %v7264_v7 = vpop.permute.xlu0 %1603  ;;  %v2049_v1 = vmul.f32 %v7289_v26, %v2048_v54  ;;  %v2051_v41 = vmul.f32 %v7295_v49, %v2048_v54 }
 0x28c   :  { %v7266_v36 = vpop.permute.xlu2 %1667 }
 0x291   :  { %1911 = vrot.lane.b32.xlu1 %v1904_v59, %s10249_s5  ;;  %1909 = vrot.lane.b32.xlu0 %v1903_v57, %s10249_s5 }
 0x292   :  { %1913 = vrot.lane.b32.xlu2 %v1905_v62, %s10249_s5 }
 0x293   :  { %v7274_v10 = vpop.permute.xlu1 %1625  ;;  %v7276_v25 = vpop.permute.xlu0 %1623 }
 0x294   :  { %v7278_v52 = vpop.permute.xlu2 %1687 }
 0x299   :  { %1937 = vrot.lane.b32.xlu1 %v1930_v30, %s10396_s30  ;;  %1935 = vrot.lane.b32.xlu0 %v1929_v47, %s10396_s30  ;;  %v2069_v30 = vmul.f32 %v7289_v26, %v2068_v46  ;;  %v2071_v47 = vmul.f32 %v7295_v49, %v2068_v46 }
 0x29a   :  { %1939 = vrot.lane.b32.xlu2 %v1931_v28, %s10396_s30  ;;  %v2094_v28 = vstv %s5191_s26  ;;  %s5193_s26 = sld [smem:[#allocation2 + $0x11e]] }
 0x29b   :  { %v7301_v29 = vpop.permute.xlu1 %1645  ;;  %v7303_v38 = vpop.permute.xlu0 %1643 }
 0x29c   :  { %v7305_v24 = vpop.permute.xlu2 %1707 }
 0x2a1   :  { %1957 = vrot.lane.b32.xlu1 %v1950_v35, %s10341_s4  ;;  %1955 = vrot.lane.b32.xlu0 %v1949_v13, %s10341_s4 }
 0x2a2   :  { %1959 = vrot.lane.b32.xlu2 %v1951_v11, %s10341_s4  ;;  %v7394_v11 = vld [vmem:[%s10286_s23 + $0x50] sm:$0xff] }
 0x2a3   :  { %v7313_v63 = vpop.permute.xlu1 %1665  ;;  %v7315_v19 = vpop.permute.xlu0 %1663  ;;  %10397 = vst [vmem:[#allocation12_spill] sm:$0xff] %v7394_v11  ;;  %v2096_v49 = vmul.f32 %v7394_v11, %v2094_v28  ;;  %v2116_v12 = vmul.f32 %v7394_v11, %v2114_v42 }
 0x2a4   :  { %v7317_v6 = vpop.permute.xlu2 %1727 }
 0x2a9   :  { %1977 = vrot.lane.b32.xlu1 %v1970_v53, %s5560_s0  ;;  %1975 = vrot.lane.b32.xlu0 %v1969_v43, %s5560_s0  ;;  %v2095_v53 = vmul.f32 %v7400_v3, %v2094_v28  ;;  %v7406_v43 = vld [vmem:[%s10286_s23 + $0x58] sm:$0xff] }
 0x2aa   :  { %1979 = vrot.lane.b32.xlu2 %v1971_v48, %s5560_s0  ;;  %v2097_v48 = vmul.f32 %v7406_v43, %v2094_v28 }
 0x2ab   :  { %v7325_v32 = vpop.permute.xlu1 %1685  ;;  %v7327_v60 = vpop.permute.xlu0 %1683 }
 0x2ac   :  { %v7329_v50 = vpop.permute.xlu2 %1747 }
 0x2b1   :  { %1997 = vrot.lane.b32.xlu1 %v1990_v15, %s5561_s1  ;;  %1995 = vrot.lane.b32.xlu0 %v1989_v40, %s5561_s1 }
 0x2b2   :  { %1999 = vrot.lane.b32.xlu2 %v1991_v61, %s5561_s1 }
 0x2b3   :  { %v7337_v55 = vpop.permute.xlu1 %1705  ;;  %v7339_v58 = vpop.permute.xlu0 %1703 }
 0x2b4   :  { %v7341_v23 = vpop.permute.xlu2 %1773 }
 0x2b9   :  { %2017 = vrot.lane.b32.xlu1 %v2010_v34, %s5562_s21  ;;  %2015 = vrot.lane.b32.xlu0 %v2009_v20, %s5562_s21  ;;  %v2115_v34 = vmul.f32 %v7400_v3, %v2114_v42  ;;  %v2117_v20 = vmul.f32 %v7406_v43, %v2114_v42 }
 0x2ba   :  { %2019 = vrot.lane.b32.xlu2 %v2011_v0, %s5562_s21  ;;  %v2134_v0 = vstv %s5193_s26  ;;  %s5237_s26 = sld [smem:[#allocation2 + $0x185]] }
 0x2bb   :  { %v7349_v8 = vpop.permute.xlu1 %1725  ;;  %v7351_v39 = vpop.permute.xlu0 %1723  ;;  %v2135_v54 = vmul.f32 %v7400_v3, %v2134_v0 }
 0x2bc   :  { %v7353_v56 = vpop.permute.xlu2 %1793 }
 0x2c1   :  { %2037 = vrot.lane.b32.xlu1 %v2030_v33, %s5563_s2  ;;  %2035 = vrot.lane.b32.xlu0 %v2029_v4, %s5563_s2 }
 0x2c2   :  { %2039 = vrot.lane.b32.xlu2 %v2031_v45, %s5563_s2  ;;  %v2136_v45 = vmul.f32 %v7394_v11, %v2134_v0 }
 0x2c3   :  { %v7361_v14 = vpop.permute.xlu1 %1745  ;;  %v7363_v2 = vpop.permute.xlu0 %1743 }
 0x2c4   :  { %v7365_v37 = vpop.permute.xlu2 %1813 }
 0x2c9   :  { %2057 = vrot.lane.b32.xlu1 %v2050_v18, %s10251_s24  ;;  %2055 = vrot.lane.b32.xlu0 %v2049_v1, %s10251_s24  ;;  %v2137_v18 = vmul.f32 %v7406_v43, %v2134_v0  ;;  %v2154_v1 = vstv %s5194_s28  ;;  %v2194_v0 = vstv %s5196_s29  ;;  %s5163_s28 = sld [smem:[#allocation2 + $0x100]] }
 0x2ca   :  { %2059 = vrot.lane.b32.xlu2 %v2051_v41, %s10251_s24  ;;  %v2157_v28 = vmul.f32 %v7406_v43, %v2154_v1  ;;  %s5239_s29 = sld [smem:[#allocation2 + $0x187]] }
 0x2cb   :  { %v7373_v59 = vpop.permute.xlu1 %1771  ;;  %v7375_v57 = vpop.permute.xlu0 %1769 }
 0x2cc   :  { %v7377_v62 = vpop.permute.xlu2 %1833 }
 0x2d1   :  { %2077 = vrot.lane.b32.xlu1 %v2070_v16, %s10249_s5  ;;  %2075 = vrot.lane.b32.xlu0 %v2069_v30, %s10249_s5  ;;  %v2156_v30 = vmul.f32 %v7394_v11, %v2154_v1 }
 0x2d2   :  { %2079 = vrot.lane.b32.xlu2 %v2071_v47, %s10249_s5  ;;  %v2155_v47 = vmul.f32 %v7400_v3, %v2154_v1  ;;  %v2196_v1 = vmul.f32 %v7394_v11, %v2194_v0 }
 0x2d3   :  { %v7385_v21 = vpop.permute.xlu1 %1791  ;;  %v7387_v35 = vpop.permute.xlu0 %1789 }
 0x2d4   :  { %v7389_v13 = vpop.permute.xlu2 %1853 }
 0x2d9   :  { %2103 = vrot.lane.b32.xlu1 %v2096_v49, %s10396_s30  ;;  %2101 = vrot.lane.b32.xlu0 %v2095_v53, %s10396_s30  ;;  %v2174_v49 = vstv %s5195_s19  ;;  %s5238_s19 = sld [smem:[#allocation2 + $0x186]] }
 0x2da   :  { %2105 = vrot.lane.b32.xlu2 %v2097_v48, %s10396_s30 }
 0x2db   :  { %v7412_v15 = vpop.permute.xlu1 %1811  ;;  %v7414_v40 = vpop.permute.xlu0 %1809 }
 0x2dc   :  { %v7416_v61 = vpop.permute.xlu2 %1873 }
 0x2e1   :  { %2123 = vrot.lane.b32.xlu1 %v2116_v12, %s10341_s4  ;;  %2121 = vrot.lane.b32.xlu0 %v2115_v34, %s10341_s4  ;;  %v2176_v12 = vmul.f32 %v7394_v11, %v2174_v49  ;;  %v2175_v34 = vmul.f32 %v7400_v3, %v2174_v49 }
 0x2e2   :  { %2125 = vrot.lane.b32.xlu2 %v2117_v20, %s10341_s4  ;;  %v2177_v20 = vmul.f32 %v7406_v43, %v2174_v49 }
 0x2e3   :  { %v7424_v5 = vpop.permute.xlu1 %1831  ;;  %v7426_v33 = vpop.permute.xlu0 %1829 }
 0x2e4   :  { %v7428_v4 = vpop.permute.xlu2 %1893 }
 0x2e9   :  { %2143 = vrot.lane.b32.xlu1 %v2136_v45, %s5560_s0  ;;  %2141 = vrot.lane.b32.xlu0 %v2135_v54, %s5560_s0 }
 0x2ea   :  { %2145 = vrot.lane.b32.xlu2 %v2137_v18, %s5560_s0 }
 0x2eb   :  { %v7436_v41 = vpop.permute.xlu1 %1851  ;;  %v7438_v46 = vpop.permute.xlu0 %1849 }
 0x2ec   :  { %v7440_v16 = vpop.permute.xlu2 %1913 }
 0x2f1   :  { %2163 = vrot.lane.b32.xlu1 %v2156_v30, %s5561_s1  ;;  %2161 = vrot.lane.b32.xlu0 %v2155_v47, %s5561_s1  ;;  %v2195_v30 = vmul.f32 %v7400_v3, %v2194_v0  ;;  %v2197_v47 = vmul.f32 %v7406_v43, %v2194_v0 }
 0x2f2   :  { %2165 = vrot.lane.b32.xlu2 %v2157_v28, %s5561_s1  ;;  %v2214_v28 = vstv %s5197_s25  ;;  %s7595_s25 = sld [smem:[#allocation2 + $0x109]] }
 0x2f3   :  { %v7448_v53 = vpop.permute.xlu1 %1871  ;;  %v7450_v48 = vpop.permute.xlu0 %1869  ;;  %v2217_v0 = vmul.f32 %v7406_v43, %v2214_v28 }
 0x2f4   :  { %v7452_v42 = vpop.permute.xlu2 %1939 }
 0x2f5   :  { %10399 = vst [vmem:[#allocation9_spill] sm:$0xff] %v7452_v42 }
 0x2f9   :  { %2183 = vrot.lane.b32.xlu1 %v2176_v12, %s5562_s21  ;;  %2181 = vrot.lane.b32.xlu0 %v2175_v34, %s5562_s21 }
 0x2fa   :  { %2185 = vrot.lane.b32.xlu2 %v2177_v20, %s5562_s21  ;;  %v2216_v20 = vmul.f32 %v7394_v11, %v2214_v28 }
 0x2fb   :  { %v7460_v45 = vpop.permute.xlu1 %1891  ;;  %v7462_v54 = vpop.permute.xlu0 %1889 }
 0x2fc   :  { %v7464_v18 = vpop.permute.xlu2 %1959 }
 0x2fd   :  { %10400 = vst [vmem:[#allocation17_spill] sm:$0xff] %v7464_v18  ;;  %v2215_v18 = vmul.f32 %v7400_v3, %v2214_v28 }
 0x301   :  { %2203 = vrot.lane.b32.xlu1 %v2196_v1, %s5563_s2  ;;  %2201 = vrot.lane.b32.xlu0 %v2195_v30, %s5563_s2  ;;  %v2234_v1 = vstv %s5198_s27  ;;  %s5240_s27 = sld [smem:[#allocation2 + $0x188]] }
 0x302   :  { %2205 = vrot.lane.b32.xlu2 %v2197_v47, %s5563_s2  ;;  %v2235_v26 = vmul.f32 %v7400_v3, %v2234_v1  ;;  %v2237_v28 = vmul.f32 %v7406_v43, %v2234_v1  ;;  %v7505_v3 = vld [vmem:[%s10286_s23 + $0x8] sm:$0xff] }
 0x303   :  { %v7472_v49 = vpop.permute.xlu1 %1911  ;;  %v7474_v12 = vpop.permute.xlu0 %1909 }
 0x304   :  { %10401 = vst [vmem:[#allocation22_spill] sm:$0xff] %v7474_v12  ;;  %v7476_v34 = vpop.permute.xlu2 %1979 }
 0x305   :  { %10402 = vst [vmem:[#allocation13_spill] sm:$0xff] %v7476_v34  ;;  %v2236_v34 = vmul.f32 %v7394_v11, %v2234_v1  ;;  %v7517_v1 = vld [vmem:[%s10286_s23 + $0x10] sm:$0xff]  ;;  %v2358_v11 = vstv %s5234_s22  ;;  %s5236_s22 = sld [smem:[#allocation2 + $0x184]] }
 0x309   :  { %2223 = vrot.lane.b32.xlu1 %v2216_v20, %s10251_s24  ;;  %2221 = vrot.lane.b32.xlu0 %v2215_v18, %s10251_s24  ;;  %v2338_v18 = vstv %s5233_s20  ;;  %s5235_s20 = sld [smem:[#allocation2 + $0x183]] }
 0x30a   :  { %2225 = vrot.lane.b32.xlu2 %v2217_v0, %s10251_s24  ;;  %v2340_v43 = vmul.f32 %v7505_v3, %v2338_v18 }
 0x30b   :  { %v7484_v30 = vpop.permute.xlu1 %1937  ;;  %v7486_v47 = vpop.permute.xlu0 %1935 }
 0x30c   :  { %10403 = vst [vmem:[#allocation19_spill] sm:$0xff] %v7484_v30  ;;  %v7488_v42 = vpop.permute.xlu2 %1999 }
 0x30d   :  { %10404 = vst [vmem:[#allocation25_spill] sm:$0xff] %v7486_v47 }
 0x30e   :  { %10405 = vst [vmem:[#allocation20_spill] sm:$0xff] %v7488_v42 }
 0x311   :  { %2243 = vrot.lane.b32.xlu1 %v2236_v34, %s10249_s5  ;;  %2241 = vrot.lane.b32.xlu0 %v2235_v26, %s10249_s5  ;;  %v7511_v26 = vld [vmem:[%s10286_s23] sm:$0xff] }
 0x312   :  { %2245 = vrot.lane.b32.xlu2 %v2237_v28, %s10249_s5  ;;  %v2339_v34 = vmul.f32 %v7511_v26, %v2338_v18  ;;  %v2341_v28 = vmul.f32 %v7517_v1, %v2338_v18  ;;  %v2359_v30 = vmul.f32 %v7511_v26, %v2358_v11  ;;  %v2361_v18 = vmul.f32 %v7517_v1, %v2358_v11 }
 0x313   :  { %v7496_v20 = vpop.permute.xlu1 %1957  ;;  %v7498_v0 = vpop.permute.xlu0 %1955 }
 0x314   :  { %10406 = vst [vmem:[#allocation21_spill] sm:$0xff] %v7496_v20  ;;  %v7500_v47 = vpop.permute.xlu2 %2019  ;;  %v2360_v20 = vmul.f32 %v7505_v3, %v2358_v11 }
 0x315   :  { %10407 = vst [vmem:[#allocation28_spill] sm:$0xff] %v7498_v0 }
 0x316   :  { %10408 = vst [vmem:[#allocation23_spill] sm:$0xff] %v7500_v47 }
 0x319   :  { %2347 = vrot.lane.b32.xlu1 %v2340_v43, %s10396_s30  ;;  %2345 = vrot.lane.b32.xlu0 %v2339_v34, %s10396_s30  ;;  %v2378_v43 = vstv %s5235_s20  ;;  %s7649_s20 = sld [smem:[#allocation2 + $0x18a]] }
 0x31a   :  { %2349 = vrot.lane.b32.xlu2 %v2341_v28, %s10396_s30  ;;  %v2381_v11 = vmul.f32 %v7517_v1, %v2378_v43 }
 0x31b   :  { %v7523_v47 = vpop.permute.xlu1 %1977  ;;  %v7525_v42 = vpop.permute.xlu0 %1975 }
 0x31c   :  { %10409 = vst [vmem:[#allocation24_spill] sm:$0xff] %v7523_v47  ;;  %v7527_v0 = vpop.permute.xlu2 %2039  ;;  %v2379_v47 = vmul.f32 %v7511_v26, %v2378_v43 }
 0x31d   :  { %10410 = vst [vmem:[#allocation31_spill] sm:$0xff] %v7525_v42 }
 0x31e   :  { %10411 = vst [vmem:[#allocation26_spill] sm:$0xff] %v7527_v0  ;;  %v2380_v0 = vmul.f32 %v7505_v3, %v2378_v43 }
 0x321   :  { %2367 = vrot.lane.b32.xlu1 %v2360_v20, %s10341_s4  ;;  %2365 = vrot.lane.b32.xlu0 %v2359_v30, %s10341_s4  ;;  %v2398_v30 = vstv %s5236_s22  ;;  %s7843_s22 = sld [smem:[#allocation2 + $0x18d]] }
 0x322   :  { %2369 = vrot.lane.b32.xlu2 %v2361_v18, %s10341_s4  ;;  %v2401_v43 = vmul.f32 %v7517_v1, %v2398_v30 }
 0x323   :  { %v7535_v34 = vpop.permute.xlu1 %1997  ;;  %v7537_v28 = vpop.permute.xlu0 %1995 }
 0x324   :  { %10412 = vst [vmem:[#allocation27_spill] sm:$0xff] %v7535_v34  ;;  %v7539_v42 = vpop.permute.xlu2 %2059  ;;  %v2399_v34 = vmul.f32 %v7511_v26, %v2398_v30 }
 0x325   :  { %10413 = vst [vmem:[#allocation30_spill] sm:$0xff] %v7537_v28  ;;  %v2400_v28 = vmul.f32 %v7505_v3, %v2398_v30 }
 0x326   :  { %10414 = vst [vmem:[#allocation29_spill] sm:$0xff] %v7539_v42 }
 0x329   :  { %2387 = vrot.lane.b32.xlu1 %v2380_v0, %s5560_s0  ;;  %2385 = vrot.lane.b32.xlu0 %v2379_v47, %s5560_s0  ;;  %v2418_v47 = vstv %s5237_s26  ;;  %s5252_s26 = sld [smem:[#allocation2 + $0x194]] }
 0x32a   :  { %2389 = vrot.lane.b32.xlu2 %v2381_v11, %s5560_s0  ;;  %v2419_v22 = vmul.f32 %v7511_v26, %v2418_v47  ;;  %v2421_v30 = vmul.f32 %v7517_v1, %v2418_v47 }
 0x32b   :  { %v7547_v20 = vpop.permute.xlu1 %2017  ;;  %v7549_v18 = vpop.permute.xlu0 %2015 }
 0x32c   :  { %10415 = vst [vmem:[#allocation11_spill] sm:$0xff] %v7547_v20  ;;  %v7551_v42 = vpop.permute.xlu2 %2079  ;;  %v2420_v20 = vmul.f32 %v7505_v3, %v2418_v47  ;;  %v1630_v47 = vsel %vm136_vm1, %v7274_v10, %v7236_v17  ;;  %v1649_v17 = vsel %vm157_vm2, %v7303_v38, %v7301_v29 }
 0x32d   :  { %10416 = vst [vmem:[#allocation33_spill] sm:$0xff] %v7549_v18  ;;  %v1592_v18 = vstv %s5163_s28  ;;  %s5255_s28 = sld [smem:[#allocation2 + $0x197]] }
 0x32e   :  { %10417 = vst [vmem:[#allocation32_spill] sm:$0xff] %v7551_v42 }
 0x331   :  { %2407 = vrot.lane.b32.xlu1 %v2400_v28, %s5561_s1  ;;  %2405 = vrot.lane.b32.xlu0 %v2399_v34, %s5561_s1  ;;  %v1594_v28 = vmul.f32 %v7505_v3, %v1592_v18  ;;  %v1593_v34 = vmul.f32 %v7511_v26, %v1592_v18  ;;  %v1629_v18 = vsel %vm136_vm1, %v7276_v25, %v7274_v10 }
 0x332   :  { %2409 = vrot.lane.b32.xlu2 %v2401_v43, %s5561_s1  ;;  %v1610_v43 = vsel %vm115_vm0, %v7262_v27, %v7205_v31 }
 0x333   :  { %v7559_v0 = vpop.permute.xlu1 %2037  ;;  %v7561_v11 = vpop.permute.xlu0 %2035  ;;  %v1614_v31 = vadd.f32 %v1610_v43, %v1594_v28 }
 0x334   :  { %10418 = vst [vmem:[#allocation10_spill] sm:$0xff] %v7559_v0  ;;  %v7563_v42 = vpop.permute.xlu2 %2105 }
 0x335   :  { %10419 = vst [vmem:[#allocation16_spill] sm:$0xff] %v7561_v11  ;;  %v1609_v11 = vsel %vm115_vm0, %v7264_v7, %v7262_v27  ;;  %v1650_v7 = vsel %vm157_vm2, %v7301_v29, %v7254_v44  ;;  %v1634_v25 = vadd.f32 %v1630_v47, %v1614_v31  ;;  %v1669_v44 = vsel %vm178_vm3, %v7315_v19, %v7313_v63 }
 0x336   :  { %10420 = vst [vmem:[#allocation8_spill] sm:$0xff] %v7563_v42  ;;  %v2438_v42 = vstv %s5238_s19  ;;  %v1613_v0 = vadd.f32 %v1609_v11, %v1593_v34  ;;  %v1689_v34 = vsel %vm199_vm4, %v7327_v60, %v7325_v32  ;;  %v1756_v31 = vstv %s7595_s25  ;;  %s7697_s25 = sld [smem:[#allocation2 + $0x112]] }
 0x337   :  { %v2439_v11 = vmul.f32 %v7511_v26, %v2438_v42  ;;  %v2441_v29 = vmul.f32 %v7517_v1, %v2438_v42  ;;  %v1654_v38 = vadd.f32 %v1650_v7, %v1634_v25  ;;  %s7714_s19 = sld [smem:[#allocation2 + $0x18b]] }
 0x339   :  { %2427 = vrot.lane.b32.xlu1 %v2420_v20, %s5562_s21  ;;  %2425 = vrot.lane.b32.xlu0 %v2419_v22, %s5562_s21  ;;  %v1633_v22 = vadd.f32 %v1629_v18, %v1613_v0  ;;  %v2440_v20 = vmul.f32 %v7505_v3, %v2438_v42  ;;  %v1690_v0 = vsel %vm199_vm4, %v7325_v32, %v7278_v52  ;;  %v2458_v52 = vstv %s5239_s29  ;;  %s7973_s29 = sld [smem:[#allocation4 + $0x2]] }
 0x33a   :  { %2429 = vrot.lane.b32.xlu2 %v2421_v30, %s5562_s21  ;;  %v1670_v30 = vsel %vm178_vm3, %v7313_v63, %v7266_v36  ;;  %v1710_v36 = vsel %vm220_vm5, %v7337_v55, %v7305_v24  ;;  %v1709_v63 = vsel %vm220_vm5, %v7339_v58, %v7337_v55  ;;  %v1730_v18 = vsel %vm241_vm6, %v7349_v8, %v7317_v6 }
 0x33b   :  { %v7585_v12 = vpop.permute.xlu1 %2057  ;;  %v7587_v27 = vpop.permute.xlu0 %2055  ;;  %v1653_v28 = vadd.f32 %v1649_v17, %v1633_v22  ;;  %v1674_v43 = vadd.f32 %v1670_v30, %v1654_v38  ;;  %v1729_v24 = vsel %vm241_vm6, %v7351_v39, %v7349_v8  ;;  %v2460_v17 = vmul.f32 %v7505_v3, %v2458_v52 }
 0x33c   :  { %v7597_v10 = vpop.permute.xlu2 %2125  ;;  %v2459_v25 = vmul.f32 %v7511_v26, %v2458_v52  ;;  %v1750_v22 = vsel %vm262_vm7, %v7361_v14, %v7329_v50  ;;  %v1749_v6 = vsel %vm262_vm7, %v7363_v2, %v7361_v14  ;;  %v2478_v38 = vstv %s5240_s27  ;;  %s5249_s27 = sld [smem:[#allocation2 + $0x191]] }
 0x33d   :  { %v1673_v47 = vadd.f32 %v1669_v44, %v1653_v28  ;;  %v1694_v19 = vadd.f32 %v1690_v0, %v1674_v43  ;;  %v1776_v2 = vsel %vm115_vm0, %v7373_v59, %v7341_v23  ;;  %v1775_v28 = vsel %vm115_vm0, %v7375_v57, %v7373_v59  ;;  %v5230_v23 = vld [vmem:[%s10201_s6 + $0x2f0] sm:$0xff]  ;;  %v5213_v59 = vld [vmem:[%s10201_s6 + $0x268] sm:$0xff] }
 0x33e   :  { %v1796_v57 = vsel %vm136_vm1, %v7385_v21, %v7353_v56  ;;  %v1815_v56 = vsel %vm157_vm2, %v7414_v40, %v7412_v15  ;;  %v1835_v40 = vsel %vm178_vm3, %v7426_v33, %v7424_v5  ;;  %v1856_v33 = vsel %vm199_vm4, %v7436_v41, %v7389_v13  ;;  %v7744_v13 = vld [vmem:[%s10286_s23 + $0x18] sm:$0xff] }
 0x33f   :  { %v1693_v32 = vadd.f32 %v1689_v34, %v1673_v47  ;;  %v1714_v58 = vadd.f32 %v1710_v36, %v1694_v19  ;;  %v2480_v47 = vmul.f32 %v7505_v3, %v2478_v38  ;;  %v2479_v36 = vmul.f32 %v7511_v26, %v2478_v38 }
 0x340   :  { %v2481_v19 = vmul.f32 %v7517_v1, %v2478_v38  ;;  %v5209_v38 = vld [vmem:[%s10201_s6 + $0x248] sm:$0xff] }
 0x341   :  { %2447 = vrot.lane.b32.xlu1 %v2440_v20, %s5563_s2  ;;  %2445 = vrot.lane.b32.xlu0 %v2439_v11, %s5563_s2  ;;  %v1713_v7 = vadd.f32 %v1709_v63, %v1693_v32  ;;  %v2461_v20 = vmul.f32 %v7517_v1, %v2458_v52  ;;  %v1734_v8 = vadd.f32 %v1730_v18, %v1714_v58  ;;  %v5214_v63 = vld [vmem:[%s10201_s6 + $0x270] sm:$0xff]  ;;  %v5229_v32 = vld [vmem:[%s10201_s6 + $0x2e8] sm:$0xff] }
 0x342   :  { %2449 = vrot.lane.b32.xlu2 %v2441_v29, %s5563_s2  ;;  %v1758_v11 = vmul.f32 %v7059_v9, %v1756_v31  ;;  %v1757_v29 = vmul.f32 %v7065_v51, %v1756_v31  ;;  %v5215_v9 = vld [vmem:[%s10201_s6 + $0x278] sm:$0xff]  ;;  %v1795_v52 = vsel %vm136_vm1, %v7387_v35, %v7385_v21  ;;  %v1816_v31 = vsel %vm157_vm2, %v7412_v15, %v7365_v37  ;;  %v5212_v58 = vld [vmem:[%s10201_s6 + $0x260] sm:$0xff] }
 0x343   :  { %v7623_v60 = vpop.permute.xlu1 %2077  ;;  %v7625_v42 = vpop.permute.xlu0 %2075  ;;  %v1733_v39 = vadd.f32 %v1729_v24, %v1713_v7  ;;  %v1754_v30 = vadd.f32 %v1750_v22, %v1734_v8  ;;  %v5231_v51 = vld [vmem:[%s10201_s6 + $0x2f8] sm:$0xff]  ;;  %2292 = vmatpush.msrb.mxu0 %v5215_v9  ;;  %v5228_v37 = vld [vmem:[%s10201_s6 + $0x2e0] sm:$0xff]  ;;  %v1836_v15 = vsel %vm178_vm3, %v7424_v5, %v7377_v62  ;;  %v2504_v7 = vstv %s7649_s20  ;;  %s5371_s20 = sld [smem:[#allocation2 + $0x281]] }
 0x344   :  { %v7634_v55 = vpop.permute.xlu2 %2145  ;;  %2312 = vmatpush.msrb.mxu1 %v5231_v51  ;;  %v5211_v62 = vld [vmem:[%s10201_s6 + $0x258] sm:$0xff]  ;;  %v1876_v9 = vsel %vm220_vm5, %v7448_v53, %v7416_v61  ;;  %v1875_v51 = vsel %vm220_vm5, %v7450_v48, %v7448_v53  ;;  %v5225_v61 = vld [vmem:[%s10201_s6 + $0x2c8] sm:$0xff]  ;;  %v1896_v53 = vsel %vm241_vm6, %v7460_v45, %v7428_v4  ;;  %v1895_v48 = vsel %vm241_vm6, %v7462_v54, %v7460_v45  ;;  %v5224_v4 = vld [vmem:[%s10201_s6 + $0x2c0] sm:$0xff] }
 0x345   :  { %v1753_v44 = vadd.f32 %v1749_v6, %v1733_v39  ;;  %v1760_v34 = vadd.f32 %v1758_v11, %v1754_v30  ;;  %2293 = vmatpush.msrb.mxu0 %v5214_v63  ;;  %v5227_v5 = vld [vmem:[%s10201_s6 + $0x2d8] sm:$0xff]  ;;  %v7738_v30 = vld [vmem:[%s10286_s23 + $0x20] sm:$0xff]  ;;  %v1916_v45 = vsel %vm262_vm7, %v7472_v49, %v7440_v16  ;;  %v10421_v54 = vld [vmem:[#allocation22_spill] sm:$0xff] }
 0x346   :  { %2313 = vmatpush.msrb.mxu1 %v5230_v23  ;;  %v5208_v23 = vld [vmem:[%s10201_s6 + $0x240] sm:$0xff]  ;;  %v5207_v16 = vld [vmem:[%s10201_s6 + $0x238] sm:$0xff] }
 0x347   :  { %v1759_v43 = vadd.f32 %v1757_v29, %v1753_v44  ;;  %v1780_v18 = vadd.f32 %v1776_v2, %v1760_v34  ;;  %2294 = vmatpush.msrb.mxu0 %v5213_v59  ;;  %v2506_v44 = vmul.f32 %v7738_v30, %v2504_v7  ;;  %v2505_v29 = vmul.f32 %v7744_v13, %v2504_v7  ;;  %v7765_v2 = vld [vmem:[%s10286_s23 + $0x28] sm:$0xff] }
 0x348   :  { %2314 = vmatpush.msrb.mxu1 %v5229_v32  ;;  %v1915_v59 = vsel %vm262_vm7, %v10421_v54, %v7472_v49  ;;  %v5223_v49 = vld [vmem:[%s10201_s6 + $0x2b8] sm:$0xff] }
 0x349   :  { %2467 = vrot.lane.b32.xlu1 %v2460_v17, %s10251_s24  ;;  %2465 = vrot.lane.b32.xlu0 %v2459_v25, %s10251_s24  ;;  %v1779_v24 = vadd.f32 %v1775_v28, %v1759_v43  ;;  %v1800_v21 = vadd.f32 %v1796_v57, %v1780_v18  ;;  %v2507_v28 = vmul.f32 %v7765_v2, %v2504_v7  ;;  %v2524_v57 = vstv %s7714_s19  ;;  %v5206_v7 = vld [vmem:[%s10201_s6 + $0x230] sm:$0xff]  ;;  %v10432_v54 = vld [vmem:[#allocation31_spill] sm:$0xff]  ;;  %s10448_s19 = smov 94  }
 0x34a   :  { %2469 = vrot.lane.b32.xlu2 %v2461_v20, %s10251_s24  ;;  %2295 = vmatpush.msrb.mxu0 %v5212_v58  ;;  %v1855_v20 = vsel %vm199_vm4, %v7438_v46, %v7436_v41  ;;  %v5210_v41 = vld [vmem:[%s10201_s6 + $0x250] sm:$0xff]  ;;  %s10447_s24 = smov 95  }
 0x34b   :  { %v7652_v50 = vpop.permute.xlu1 %2103  ;;  %v7654_v14 = vpop.permute.xlu0 %2101  ;;  %v1799_v35 = vadd.f32 %v1795_v52, %v1779_v24  ;;  %v1820_v17 = vadd.f32 %v1816_v31, %v1800_v21  ;;  %2315 = vmatpush.msrb.mxu1 %v5228_v37  ;;  %v5226_v46 = vld [vmem:[%s10201_s6 + $0x2d0] sm:$0xff] }
 0x34c   :  { %v7668_v0 = vpop.permute.xlu2 %2165  ;;  %2296 = vmatpush.msrb.mxu0 %v5211_v62  ;;  %v10422_v24 = vld [vmem:[#allocation18_spill] sm:$0xff]  ;;  %v5205_v62 = vld [vmem:[%s10201_s6 + $0x228] sm:$0xff] }
 0x34d   :  { %v1819_v25 = vadd.f32 %v1815_v56, %v1799_v35  ;;  %v1840_v39 = vadd.f32 %v1836_v15, %v1820_v17  ;;  %2316 = vmatpush.msrb.mxu1 %v5227_v5  ;;  %v10423_v56 = vld [vmem:[#allocation14_spill] sm:$0xff]  ;;  %v2526_v15 = vmul.f32 %v7738_v30, %v2524_v57  ;;  %v10424_v5 = vld [vmem:[#allocation9_spill] sm:$0xff] }
 0x34e   :  { %2297 = vmatpush.msrb.mxu0 %v5210_v41  ;;  %v5222_v17 = vld [vmem:[%s10201_s6 + $0x2b0] sm:$0xff] }
 0x34f   :  { %v1839_v11 = vadd.f32 %v1835_v40, %v1819_v25  ;;  %v1860_v34 = vadd.f32 %v1856_v33, %v1840_v39  ;;  %2317 = vmatpush.msrb.mxu1 %v5226_v46  ;;  %v2525_v40 = vmul.f32 %v7744_v13, %v2524_v57  ;;  %v2527_v25 = vmul.f32 %v7765_v2, %v2524_v57  ;;  %v10425_v33 = vld [vmem:[#allocation19_spill] sm:$0xff]  ;;  %v10426_v39 = vld [vmem:[#allocation25_spill] sm:$0xff]  ;;  %v5204_v46 = vld [vmem:[%s10201_s6 + $0x220] sm:$0xff] }
 0x350   :  { %2298 = vmatpush.msrb.mxu0 %v5209_v38  ;;  %v10427_v38 = vld [vmem:[#allocation17_spill] sm:$0xff] }
 0x351   :  { %2487 = vrot.lane.b32.xlu1 %v2480_v47, %s10249_s5  ;;  %2485 = vrot.lane.b32.xlu0 %v2479_v36, %s10249_s5  ;;  %v1859_v43 = vadd.f32 %v1855_v20, %v1839_v11  ;;  %v1922_v47 = vstv %s7697_s25  ;;  %v1880_v36 = vadd.f32 %v1876_v9, %v1860_v34  ;;  %s7793_s25 = sld [smem:[#allocation2 + $0x18c]]  ;;  %v1942_v20 = vsel %vm115_vm0, %v10425_v33, %v10424_v5  ;;  %v10428_v9 = vld [vmem:[#allocation21_spill] sm:$0xff]  ;;  %v10437_v5 = vld [vmem:[#allocation11_spill] sm:$0xff] }
 0x352   :  { %2489 = vrot.lane.b32.xlu2 %v2481_v19, %s10249_s5  ;;  %2318 = vmatpush.msrb.mxu1 %v5225_v61  ;;  %v1924_v31 = vmul.f32 %v10422_v24, %v1922_v47  ;;  %v1923_v21 = vmul.f32 %v10423_v56, %v1922_v47  ;;  %v1941_v11 = vsel %vm115_vm0, %v10426_v39, %v10425_v33  ;;  %v5220_v61 = vld [vmem:[%s10201_s6 + $0x2a0] sm:$0xff]  ;;  %s7905_s5 = sld [smem:[#allocation2 + $0x18e]] }
 0x353   :  { %v7717_v22 = vpop.permute.xlu1 %2123  ;;  %v7719_v6 = vpop.permute.xlu0 %2121  ;;  %v1879_v63 = vadd.f32 %v1875_v51, %v1859_v43  ;;  %v1900_v52 = vadd.f32 %v1896_v53, %v1880_v36  ;;  %2299 = vmatpush.msrb.mxu0 %v5208_v23  ;;  %v1962_v51 = vsel %vm136_vm1, %v10428_v9, %v10427_v38  ;;  %v10430_v23 = vld [vmem:[#allocation13_spill] sm:$0xff]  ;;  %v10433_v56 = vld [vmem:[#allocation20_spill] sm:$0xff]  ;;  %v10440_v38 = vld [vmem:[#allocation10_spill] sm:$0xff] }
 0x354   :  { %v7733_v8 = vpop.permute.xlu2 %2185  ;;  %2319 = vmatpush.msrb.mxu1 %v5224_v4  ;;  %v10431_v4 = vld [vmem:[#allocation24_spill] sm:$0xff] }
 0x355   :  { %v1899_v19 = vadd.f32 %v1895_v48, %v1879_v63  ;;  %v1920_v58 = vadd.f32 %v1916_v45, %v1900_v52  ;;  %2300 = vmatpush.msrb.mxu0 %v5207_v16  ;;  %v5203_v63 = vld [vmem:[%s10201_s6 + $0x218] sm:$0xff]  ;;  %v1982_v45 = vsel %vm157_vm2, %v10431_v4, %v10430_v23  ;;  %v5216_v23 = vld [vmem:[%s10201_s6 + $0x280] sm:$0xff] }
 0x356   :  { %2320 = vmatpush.msrb.mxu1 %v5223_v49  ;;  %v5219_v52 = vld [vmem:[%s10201_s6 + $0x298] sm:$0xff] }
 0x357   :  { %v1919_v37 = vadd.f32 %v1915_v59, %v1899_v19  ;;  %2301 = vmatpush.msrb.mxu0 %v5206_v7  ;;  %v2544_v43 = vstv %s7793_s25  ;;  %v1981_v59 = vsel %vm157_vm2, %v10432_v54, %v10431_v4  ;;  %s7862_s25 = sld [smem:[#allocation2 + $0x11b]]  ;;  %v10442_v4 = vld [vmem:[#allocation29_spill] sm:$0xff]  ;;  %v2061_v54 = vsel %vm241_vm6, %v7587_v27, %v7585_v12 }
 0x358   :  { %2321 = vmatpush.msrb.mxu1 %v5222_v17  ;;  %v2546_v49 = vmul.f32 %v7738_v30, %v2544_v43  ;;  %v2545_v24 = vmul.f32 %v7744_v13, %v2544_v43 }
 0x359   :  { %2513 = vrot.lane.b32.xlu1 %v2506_v44, %s10396_s30  ;;  %2511 = vrot.lane.b32.xlu0 %v2505_v29, %s10396_s30  ;;  %v5221_v44 = vld [vmem:[%s10201_s6 + $0x2a8] sm:$0xff]  ;;  %v1926_v29 = vadd.f32 %v1924_v31, %v1920_v58  ;;  %v1925_v41 = vadd.f32 %v1923_v21, %v1919_v37  ;;  %v5202_v31 = vld [vmem:[%s10201_s6 + $0x210] sm:$0xff]  ;;  %v10434_v21 = vld [vmem:[#allocation27_spill] sm:$0xff] }
 0x35a   :  { %2515 = vrot.lane.b32.xlu2 %v2507_v28, %s10396_s30  ;;  %v10429_v28 = vld [vmem:[#allocation28_spill] sm:$0xff]  ;;  %2302 = vmatpush.msrb.mxu0 %v5205_v62  ;;  %v2002_v58 = vsel %vm178_vm3, %v10434_v21, %v10433_v56  ;;  %v10435_v37 = vld [vmem:[#allocation30_spill] sm:$0xff]  ;;  %v10436_v62 = vld [vmem:[#allocation23_spill] sm:$0xff] }
 0x35b   :  { %v7796_v32 = vpop.permute.xlu1 %2143  ;;  %v7798_v18 = vpop.permute.xlu0 %2141  ;;  %v1961_v34 = vsel %vm136_vm1, %v10429_v28, %v10428_v9  ;;  %v1946_v53 = vadd.f32 %v1942_v20, %v1926_v29  ;;  %v1945_v48 = vadd.f32 %v1941_v11, %v1925_v41  ;;  %2322 = vmatpush.msrb.mxu1 %v5221_v44  ;;  %v2022_v33 = vsel %vm199_vm4, %v10437_v5, %v10436_v62  ;;  %v10438_v20 = vld [vmem:[#allocation33_spill] sm:$0xff] }
 0x35c   :  { %v7808_v35 = vpop.permute.xlu2 %2205  ;;  %2303 = vmatpush.msrb.mxu0 %v5204_v46  ;;  %v2021_v39 = vsel %vm199_vm4, %v10438_v20, %v10437_v5  ;;  %v5201_v11 = vld [vmem:[%s10201_s6 + $0x208] sm:$0xff]  ;;  %v10439_v46 = vld [vmem:[#allocation26_spill] sm:$0xff]  ;;  %v2584_v62 = vstv %s7905_s5  ;;  %v10446_v5 = vld [vmem:[#allocation8_spill] sm:$0xff]  ;;  %v2107_v20 = vsel %vm115_vm0, %v7654_v14, %v7652_v50  ;;  %v2148_v14 = vsel %vm157_vm2, %v7796_v32, %v7634_v55  ;;  %s5251_s5 = sld [smem:[#allocation2 + $0x193]] }
 0x35d   :  { %v1966_v19 = vadd.f32 %v1962_v51, %v1946_v53  ;;  %v1965_v16 = vadd.f32 %v1961_v34, %v1945_v48  ;;  %2323 = vmatpush.msrb.mxu1 %v5220_v61  ;;  %v5217_v41 = vld [vmem:[%s10201_s6 + $0x288] sm:$0xff]  ;;  %v2042_v9 = vsel %vm220_vm5, %v10440_v38, %v10439_v46  ;;  %v10441_v51 = vld [vmem:[#allocation16_spill] sm:$0xff]  ;;  %v2564_v34 = vstv %s7843_s22  ;;  %s5247_s22 = sld [smem:[#allocation2 + $0x18f]] }
 0x35e   :  { %2304 = vmatpush.msrb.mxu0 %v5203_v63  ;;  %v2041_v28 = vsel %vm220_vm5, %v10441_v51, %v10440_v38  ;;  %v2567_v27 = vmul.f32 %v7765_v2, %v2564_v34  ;;  %v2128_v46 = vsel %vm136_vm1, %v7717_v22, %v7597_v10  ;;  %v2127_v38 = vsel %vm136_vm1, %v7719_v6, %v7717_v22 }
 0x35f   :  { %v1986_v7 = vadd.f32 %v1982_v45, %v1966_v19  ;;  %v1985_v17 = vadd.f32 %v1981_v59, %v1965_v16  ;;  %2324 = vmatpush.msrb.mxu1 %v5219_v52  ;;  %v2062_v45 = vsel %vm241_vm6, %v7585_v12, %v10442_v4  ;;  %v2088_v59 = vstv %s7862_s25  ;;  %s5248_s25 = sld [smem:[#allocation2 + $0x190]] }
 0x360   :  { %2305 = vmatpush.msrb.mxu0 %v5202_v31  ;;  %v10443_v31 = vld [vmem:[#allocation32_spill] sm:$0xff]  ;;  %v2081_v12 = vsel %vm262_vm7, %v7625_v42, %v7623_v60 }
 0x361   :  { %2533 = vrot.lane.b32.xlu1 %v2526_v15, %s10341_s4  ;;  %2531 = vrot.lane.b32.xlu0 %v2525_v40, %s10341_s4  ;;  %v2001_v15 = vsel %vm178_vm3, %v10435_v37, %v10434_v21  ;;  %v2547_v40 = vmul.f32 %v7765_v2, %v2544_v43  ;;  %v2006_v44 = vadd.f32 %v2002_v58, %v1986_v7  ;;  %v5200_v43 = vld [vmem:[%s10201_s6 + $0x200] sm:$0xff] }
 0x362   :  { %2535 = vrot.lane.b32.xlu2 %v2527_v25, %s10341_s4  ;;  %v5218_v25 = vld [vmem:[%s10201_s6 + $0x290] sm:$0xff]  ;;  %v2005_v29 = vadd.f32 %v2001_v15, %v1985_v17  ;;  %2306 = vmatpush.msrb.mxu0 %v5201_v11  ;;  %v2082_v56 = vsel %vm262_vm7, %v7623_v60, %v10443_v31  ;;  %v10444_v37 = vld [vmem:[#allocation12_spill] sm:$0xff]  ;;  %v10445_v17 = vld [vmem:[#allocation15_spill] sm:$0xff] }
 0x363   :  { %v7849_v47 = vpop.permute.xlu1 %2163  ;;  %v7851_v36 = vpop.permute.xlu0 %2161  ;;  %2325 = vmatpush.msrb.mxu1 %v5218_v25  ;;  %v2026_v61 = vadd.f32 %v2022_v33, %v2006_v44  ;;  %v2090_v15 = vmul.f32 %v10444_v37, %v2088_v59  ;;  %v2089_v25 = vmul.f32 %v10445_v17, %v2088_v59  ;;  %v2108_v33 = vsel %vm115_vm0, %v7652_v50, %v10446_v5 }
 0x364   :  { %v7864_v57 = vpop.permute.xlu2 %2225  ;;  %v2025_v53 = vadd.f32 %v2021_v39, %v2005_v29  ;;  %2307 = vmatpush.msrb.mxu0 %v5200_v43  ;;  %v2586_v29 = vmul.f32 %v7738_v30, %v2584_v62  ;;  %v2168_v10 = vsel %vm178_vm3, %v7849_v47, %v7668_v0  ;;  %v2167_v22 = vsel %vm178_vm3, %v7851_v36, %v7849_v47 }
 0x365   :  { %2326 = vmatpush.msrb.mxu1 %v5217_v41  ;;  %v2046_v19 = vadd.f32 %v2042_v9, %v2026_v61  ;;  %v2585_v41 = vmul.f32 %v7744_v13, %v2584_v62  ;;  %v2587_v9 = vmul.f32 %v7765_v2, %v2584_v62  ;;  %v2604_v6 = vstv %s5247_s22  ;;  %s5372_s22 = sld [smem:[#allocation2 + $0x282]] }
 0x366   :  { %v2045_v16 = vadd.f32 %v2041_v28, %v2025_v53  ;;  %v2147_v28 = vsel %vm157_vm2, %v7798_v18, %v7796_v32  ;;  %v2606_v47 = vmul.f32 %v7738_v30, %v2604_v6  ;;  %v2605_v36 = vmul.f32 %v7744_v13, %v2604_v6 }
 0x367   :  { %2327 = vmatpush.msrb.mxu1 %v5216_v23  ;;  %v2066_v21 = vadd.f32 %v2062_v45, %v2046_v19  ;;  %v2607_v19 = vmul.f32 %v7765_v2, %v2604_v6  ;;  %v2624_v31 = vstv %s5248_s25  ;;  %v2644_v5 = vstv %s5249_s27  ;;  %s5302_s25 = sld [smem:[#allocation2 + $0x201]] }
 0x368   :  { %v2065_v58 = vadd.f32 %v2061_v54, %v2045_v16  ;;  %v2625_v17 = vmul.f32 %v7744_v13, %v2624_v31  ;;  %s5303_s27 = sld [smem:[#allocation2 + $0x202]] }
 0x369   :  { %2553 = vrot.lane.b32.xlu1 %v2546_v49, %s5560_s0  ;;  %2551 = vrot.lane.b32.xlu0 %v2545_v24, %s5560_s0  ;;  %v2566_v49 = vmul.f32 %v7738_v30, %v2564_v34  ;;  %v2565_v24 = vmul.f32 %v7744_v13, %v2564_v34 }
 0x36a   :  { %2555 = vrot.lane.b32.xlu2 %v2547_v40, %s5560_s0  ;;  %v2086_v40 = vadd.f32 %v2082_v56, %v2066_v21  ;;  %v2085_v7 = vadd.f32 %v2081_v12, %v2065_v58  ;;  %v2254_v58 = vstv %s7973_s29  ;;  %s5373_s29 = sld [smem:[#allocation2 + $0x283]] }
 0x36b   :  { %v2184_v48 = vpop.permute.xlu1 %2183  ;;  %v2182_v63 = vpop.permute.xlu0 %2181 }
 0x36c   :  { %v7921_v52 = vpop.permute.xlu2 %2245  ;;  %v2092_v11 = vadd.f32 %v2090_v15, %v2086_v40  ;;  %v2091_v44 = vadd.f32 %v2089_v25, %v2085_v7  ;;  %v2188_v53 = vsel %vm199_vm4, %v2184_v48, %v7733_v8  ;;  %v2187_v23 = vsel %vm199_vm4, %v2182_v63, %v2184_v48 }
 0x36d   :  { %v2626_v7 = vmul.f32 %v7738_v30, %v2624_v31  ;;  %v2627_v25 = vmul.f32 %v7765_v2, %v2624_v31  ;;  %v3822_v31 = vstv %s5371_s20  ;;  %s5375_s20 = sld [smem:[#allocation2 + $0x285]] }
 0x36e   :  { %v2112_v51 = vadd.f32 %v2108_v33, %v2092_v11  ;;  %v2111_v50 = vadd.f32 %v2107_v20, %v2091_v44  ;;  %v2646_v44 = vmul.f32 %v7738_v30, %v2644_v5 }
 0x370   :  { %v2132_v34 = vadd.f32 %v2128_v46, %v2112_v51  ;;  %v2131_v43 = vadd.f32 %v2127_v38, %v2111_v50  ;;  %v2670_v46 = vstv %s5251_s5  ;;  %v8022_v50 = vld [vmem:[%s10286_s23 + $0x38] sm:$0xff]  ;;  %s5253_s5 = sld [smem:[#allocation2 + $0x195]] }
 0x371   :  { %2573 = vrot.lane.b32.xlu1 %v2566_v49, %s5561_s1  ;;  %2571 = vrot.lane.b32.xlu0 %v2565_v24, %s5561_s1 }
 0x372   :  { %2575 = vrot.lane.b32.xlu2 %v2567_v27, %s5561_s1  ;;  %v2152_v55 = vadd.f32 %v2148_v14, %v2132_v34  ;;  %v2151_v32 = vadd.f32 %v2147_v28, %v2131_v43  ;;  %v2672_v14 = vmul.f32 %v8022_v50, %v2670_v46  ;;  %v8028_v28 = vld [vmem:[%s10286_s23 + $0x30] sm:$0xff]  ;;  %v8034_v43 = vld [vmem:[%s10286_s23 + $0x40] sm:$0xff] }
 0x373   :  { %v2204_v60 = vpop.permute.xlu1 %2203  ;;  %v2202_v42 = vpop.permute.xlu0 %2201  ;;  %v2671_v34 = vmul.f32 %v8028_v28, %v2670_v46 }
 0x374   :  { %v7944_v39 = vpop.permute.xlu2 %2349  ;;  %v2172_v4 = vadd.f32 %v2168_v10, %v2152_v55  ;;  %v2171_v45 = vadd.f32 %v2167_v22, %v2151_v32  ;;  %v2208_v54 = vsel %vm220_vm5, %v2204_v60, %v7808_v35  ;;  %v2207_v59 = vsel %vm220_vm5, %v2202_v42, %v2204_v60 }
 0x375   :  { %v2673_v10 = vmul.f32 %v8034_v43, %v2670_v46  ;;  %v2690_v22 = vstv %s5252_s26  ;;  %s5254_s26 = sld [smem:[#allocation2 + $0x196]] }
 0x376   :  { %v2192_v8 = vadd.f32 %v2188_v53, %v2172_v4  ;;  %v2191_v16 = vadd.f32 %v2187_v23, %v2171_v45  ;;  %v2693_v53 = vmul.f32 %v8034_v43, %v2690_v22  ;;  %v2710_v23 = vstv %s5253_s5  ;;  %s5374_s5 = sld [smem:[#allocation2 + $0x284]] }
 0x378   :  { %v2212_v49 = vadd.f32 %v2208_v54, %v2192_v8  ;;  %v2211_v24 = vadd.f32 %v2207_v59, %v2191_v16  ;;  %v2711_v54 = vmul.f32 %v8028_v28, %v2710_v23  ;;  %v2713_v59 = vmul.f32 %v8034_v43, %v2710_v23 }
 0x379   :  { %2593 = vrot.lane.b32.xlu1 %v2586_v29, %s5562_s21  ;;  %2591 = vrot.lane.b32.xlu0 %v2585_v41, %s5562_s21  ;;  %v2645_v29 = vmul.f32 %v7744_v13, %v2644_v5  ;;  %v2647_v41 = vmul.f32 %v7765_v2, %v2644_v5 }
 0x37a   :  { %2595 = vrot.lane.b32.xlu2 %v2587_v9, %s5562_s21 }
 0x37b   :  { %v2224_v18 = vpop.permute.xlu1 %2223  ;;  %v2222_v61 = vpop.permute.xlu0 %2221 }
 0x37c   :  { %v7975_v0 = vpop.permute.xlu2 %2369  ;;  %v2228_v48 = vsel %vm241_vm6, %v2224_v18, %v7864_v57  ;;  %v2227_v63 = vsel %vm241_vm6, %v2222_v61, %v2224_v18  ;;  %v2692_v18 = vmul.f32 %v8022_v50, %v2690_v22  ;;  %v2691_v61 = vmul.f32 %v8028_v28, %v2690_v22 }
 0x37d   :  { %v2232_v35 = vadd.f32 %v2228_v48, %v2212_v49  ;;  %v2231_v56 = vadd.f32 %v2227_v63, %v2211_v24 }
 0x381   :  { %2613 = vrot.lane.b32.xlu1 %v2606_v47, %s5563_s2  ;;  %2611 = vrot.lane.b32.xlu0 %v2605_v36, %s5563_s2  ;;  %v2712_v36 = vmul.f32 %v8022_v50, %v2710_v23  ;;  %v3100_v23 = vstv %s5303_s27  ;;  %s5308_s27 = sld [smem:[#allocation2 + $0x207]] }
 0x382   :  { %2615 = vrot.lane.b32.xlu2 %v2607_v19, %s5563_s2  ;;  %v2730_v19 = vstv %s5254_s26  ;;  %s5304_s26 = sld [smem:[#allocation2 + $0x203]] }
 0x383   :  { %v2244_v12 = vpop.permute.xlu1 %2243  ;;  %v2242_v27 = vpop.permute.xlu0 %2241  ;;  %v2732_v63 = vmul.f32 %v8022_v50, %v2730_v19  ;;  %v2731_v49 = vmul.f32 %v8028_v28, %v2730_v19  ;;  %v2733_v24 = vmul.f32 %v8034_v43, %v2730_v19  ;;  %v3101_v19 = vmul.f32 %v7511_v26, %v3100_v23 }
 0x384   :  { %v2248_v21 = vsel %vm262_vm7, %v2244_v12, %v7921_v52  ;;  %v2247_v57 = vsel %vm262_vm7, %v2242_v27, %v2244_v12  ;;  %v7993_v37 = vpop.permute.xlu2 %2389 }
 0x385   :  { %v2252_v15 = vadd.f32 %v2248_v21, %v2232_v35  ;;  %v2251_v40 = vadd.f32 %v2247_v57, %v2231_v56  ;;  %v8075_v35 = vstv %s5255_s28  ;;  %v3823_v21 = vmul.f32 %v7511_v26, %v3822_v31  ;;  %s5306_s28 = sld [smem:[#allocation2 + $0x205]] }
 0x386   :  { %v2751_v57 = vmul.f32 %v8028_v28, %v8075_v35 }
 0x387   :  { %v2256_v62 = vadd.f32 %v2254_v58, %v2252_v15  ;;  %v2255_v60 = vadd.f32 %v2254_v58, %v2251_v40  ;;  %v3824_v58 = vmul.f32 %v7505_v3, %v3822_v31  ;;  %v3842_v15 = vstv %s5372_s22  ;;  %s5377_s22 = sld [smem:[#allocation2 + $0x287]] }
 0x389   :  { %2633 = vrot.lane.b32.xlu1 %v2626_v7, %s10447_s24  ;;  %2631 = vrot.lane.b32.xlu0 %v2625_v17, %s10447_s24  ;;  %v2258_v52 = vmax.f32 %v2256_v62, 0.0  ;;  %v2257_v42 = vmax.f32 %v2255_v60, 0.0  ;;  %v3825_v62 = vmul.f32 %v7517_v1, %v3822_v31  ;;  %v3844_v60 = vmul.f32 %v7505_v3, %v3842_v15 }
 0x38a   :  { %2635 = vrot.lane.b32.xlu2 %v2627_v25, %s10447_s24  ;;  %v3843_v25 = vmul.f32 %v7511_v26, %v3842_v15 }
 0x38b   :  { %v8001_v33 = vpop.permute.xlu1 %2347  ;;  %2328 = vmatmul.f32.vlgmr.msrb.gmra.mxu1 %v2258_v52  ;;  %v8003_v20 = vpop.permute.xlu0 %2345  ;;  %2308 = vmatmul.f32.vlgmr.msrb.gmra.mxu0 %v2257_v42  ;;  %v3080_v52 = vstv %s5302_s25  ;;  %s5305_s25 = sld [smem:[#allocation2 + $0x204]] }
 0x38c   :  { %v8005_v11 = vpop.permute.xlu2 %2409  ;;  %v3082_v46 = vmul.f32 %v7505_v3, %v3080_v52 }
 0x391   :  { %2653 = vrot.lane.b32.xlu1 %v2646_v44, %s10448_s19  ;;  %2651 = vrot.lane.b32.xlu0 %v2645_v29, %s10448_s19  ;;  %v3081_v29 = vmul.f32 %v7511_v26, %v3080_v52 }
 0x392   :  { %2655 = vrot.lane.b32.xlu2 %v2647_v41, %s10448_s19  ;;  %v3845_v41 = vmul.f32 %v7517_v1, %v3842_v15  ;;  %v3103_v15 = vmul.f32 %v7517_v1, %v3100_v23 }
 0x393   :  { %v8013_v38 = vpop.permute.xlu1 %2367  ;;  %v8015_v9 = vpop.permute.xlu0 %2365 }
 0x394   :  { %v8017_v51 = vpop.permute.xlu2 %2429 }
 0x399   :  { %2679 = vrot.lane.b32.xlu1 %v2672_v14, %s10396_s30  ;;  %2677 = vrot.lane.b32.xlu0 %v2671_v34, %s10396_s30  ;;  %v3862_v14 = vstv %s5373_s29  ;;  %s5378_s29 = sld [smem:[#allocation2 + $0x288]] }
 0x39a   :  { %2681 = vrot.lane.b32.xlu2 %v2673_v10, %s10396_s30 }
 0x39b   :  { %v8040_v6 = vpop.permute.xlu1 %2387  ;;  %v8042_v55 = vpop.permute.xlu0 %2385 }
 0x39c   :  { %v8044_v32 = vpop.permute.xlu2 %2449 }
 0x3a1   :  { %2699 = vrot.lane.b32.xlu1 %v2692_v18, %s10341_s4  ;;  %2697 = vrot.lane.b32.xlu0 %v2691_v61, %s10341_s4  ;;  %v3863_v18 = vmul.f32 %v7511_v26, %v3862_v14  ;;  %v3083_v61 = vmul.f32 %v7517_v1, %v3080_v52 }
 0x3a2   :  { %2701 = vrot.lane.b32.xlu2 %v2693_v53, %s10341_s4  ;;  %v3864_v53 = vmul.f32 %v7505_v3, %v3862_v14 }
 0x3a3   :  { %v8052_v4 = vpop.permute.xlu1 %2407  ;;  %v8054_v45 = vpop.permute.xlu0 %2405 }
 0x3a4   :  { %v8056_v47 = vpop.permute.xlu2 %2469 }
 0x3a9   :  { %2719 = vrot.lane.b32.xlu1 %v2712_v36, %s5560_s0  ;;  %2717 = vrot.lane.b32.xlu0 %v2711_v54, %s5560_s0 }
 0x3aa   :  { %2721 = vrot.lane.b32.xlu2 %v2713_v59, %s5560_s0 }
 0x3ab   :  { %v8064_v8 = vpop.permute.xlu1 %2427  ;;  %v8066_v16 = vpop.permute.xlu0 %2425 }
 0x3ac   :  { %v8068_v48 = vpop.permute.xlu2 %2489 }
 0x3b1   :  { %2739 = vrot.lane.b32.xlu1 %v2732_v63, %s5561_s1  ;;  %2737 = vrot.lane.b32.xlu0 %v2731_v49, %s5561_s1  ;;  %v3865_v63 = vmul.f32 %v7517_v1, %v3862_v14  ;;  %v3102_v49 = vmul.f32 %v7505_v3, %v3100_v23 }
 0x3b2   :  { %2741 = vrot.lane.b32.xlu2 %v2733_v24, %s5561_s1  ;;  %v3882_v24 = vstv %s5374_s5  ;;  %s5309_s5 = sld [smem:[#allocation2 + $0x208]] }
 0x3b3   :  { %v8078_v56 = vpop.permute.xlu1 %2447  ;;  %v8080_v12 = vpop.permute.xlu0 %2445 }
 0x3b4   :  { %v8082_v27 = vpop.permute.xlu2 %2515 }
 0x3b9   :  { %3829 = vrot.lane.b32.xlu1 %v3823_v21, %s10396_s30  ;;  %2757 = vrot.lane.b32.xlu0 %v2751_v57, %s5562_s21 }
 0x3ba   :  { %3831 = vrot.lane.b32.xlu2 %v3824_v58, %s10396_s30  ;;  %v3883_v58 = vmul.f32 %v7511_v26, %v3882_v24 }
 0x3bb   :  { %v8091_v40 = vpop.permute.xlu1 %2467  ;;  %v8093_v7 = vpop.permute.xlu0 %2465 }
 0x3bc   :  { %v8095_v17 = vpop.permute.xlu2 %2535 }
 0x3c1   :  { %3849 = vrot.lane.b32.xlu1 %v3843_v25, %s10341_s4  ;;  %3833 = vrot.lane.b32.xlu0 %v3825_v62, %s10396_s30  ;;  %v3884_v25 = vmul.f32 %v7505_v3, %v3882_v24  ;;  %v3120_v62 = vstv %s5304_s26  ;;  %v8162_v3 = vld [vmem:[%s10286_s23 + $0x8] sm:$0xff]  ;;  %s5380_s26 = sld [smem:[#allocation2 + $0x28a]] }
 0x3c2   :  { %3851 = vrot.lane.b32.xlu2 %v3844_v60, %s10341_s4  ;;  %v3122_v14 = vmul.f32 %v8162_v3, %v3120_v62 }
 0x3c3   :  { %v8103_v42 = vpop.permute.xlu1 %2487  ;;  %v8105_v5 = vpop.permute.xlu0 %2485 }
 0x3c4   :  { %v8107_v44 = vpop.permute.xlu2 %2555 }
 0x3c5   :  { %10449 = vst [vmem:[#allocation34_spill] sm:$0xff] %v8107_v44 }
 0x3c9   :  { %3087 = vrot.lane.b32.xlu1 %v3081_v29, %s10396_s30  ;;  %3853 = vrot.lane.b32.xlu0 %v3845_v41, %s10341_s4  ;;  %v3121_v41 = vmul.f32 %v7511_v26, %v3120_v62 }
 0x3ca   :  { %3089 = vrot.lane.b32.xlu2 %v3082_v46, %s10396_s30  ;;  %v3885_v46 = vmul.f32 %v7517_v1, %v3882_v24  ;;  %v3140_v24 = vstv %s5305_s25  ;;  %s5307_s25 = sld [smem:[#allocation2 + $0x206]] }
 0x3cb   :  { %v8115_v34 = vpop.permute.xlu1 %2513  ;;  %v8117_v10 = vpop.permute.xlu0 %2511 }
 0x3cc   :  { %v8119_v22 = vpop.permute.xlu2 %2575 }
 0x3cd   :  { %10450 = vst [vmem:[#allocation22_spill] sm:$0xff] %v8119_v22 }
 0x3d1   :  { %3869 = vrot.lane.b32.xlu1 %v3863_v18, %s5560_s0  ;;  %3091 = vrot.lane.b32.xlu0 %v3083_v61, %s10396_s30  ;;  %v3902_v18 = vstv %s5375_s20  ;;  %s5376_s20 = sld [smem:[#allocation2 + $0x286]] }
 0x3d2   :  { %3871 = vrot.lane.b32.xlu2 %v3864_v53, %s5560_s0  ;;  %v8177_v53 = vld [vmem:[%s10286_s23] sm:$0xff] }
 0x3d3   :  { %v8127_v36 = vpop.permute.xlu1 %2533  ;;  %v8129_v54 = vpop.permute.xlu0 %2531  ;;  %v3903_v23 = vmul.f32 %v8177_v53, %v3902_v18 }
 0x3d4   :  { %v8131_v59 = vpop.permute.xlu2 %2595 }
 0x3d5   :  { %10451 = vst [vmem:[#allocation18_spill] sm:$0xff] %v8131_v59 }
 0x3d9   :  { %3107 = vrot.lane.b32.xlu1 %v3101_v19, %s10341_s4  ;;  %3873 = vrot.lane.b32.xlu0 %v3865_v63, %s5560_s0  ;;  %v8183_v19 = vld [vmem:[%s10286_s23 + $0x10] sm:$0xff] }
 0x3da   :  { %3109 = vrot.lane.b32.xlu2 %v3102_v49, %s10341_s4  ;;  %v3123_v63 = vmul.f32 %v8183_v19, %v3120_v62  ;;  %v3904_v49 = vmul.f32 %v8162_v3, %v3902_v18  ;;  %v3905_v62 = vmul.f32 %v8183_v19, %v3902_v18  ;;  %v3143_v18 = vmul.f32 %v8183_v19, %v3140_v24 }
 0x3db   :  { %v8139_v31 = vpop.permute.xlu1 %2553  ;;  %v8141_v21 = vpop.permute.xlu0 %2551 }
 0x3dc   :  { %10452 = vst [vmem:[#allocation14_spill] sm:$0xff] %v8139_v31  ;;  %v8143_v57 = vpop.permute.xlu2 %2615 }
 0x3dd   :  { %10453 = vst [vmem:[#allocation9_spill] sm:$0xff] %v8141_v21 }
 0x3de   :  { %10454 = vst [vmem:[#allocation19_spill] sm:$0xff] %v8143_v57 }
 0x3e1   :  { %3889 = vrot.lane.b32.xlu1 %v3883_v58, %s5561_s1  ;;  %3111 = vrot.lane.b32.xlu0 %v3103_v15, %s10341_s4 }
 0x3e2   :  { %3891 = vrot.lane.b32.xlu2 %v3884_v25, %s5561_s1 }
 0x3e3   :  { %v8151_v60 = vpop.permute.xlu1 %2573  ;;  %v8153_v52 = vpop.permute.xlu0 %2571 }
 0x3e4   :  { %10455 = vst [vmem:[#allocation25_spill] sm:$0xff] %v8151_v60  ;;  %v8155_v29 = vpop.permute.xlu2 %2635 }
 0x3e5   :  { %10456 = vst [vmem:[#allocation17_spill] sm:$0xff] %v8153_v52 }
 0x3e6   :  { %10457 = vst [vmem:[#allocation21_spill] sm:$0xff] %v8155_v29 }
 0x3e9   :  { %3127 = vrot.lane.b32.xlu1 %v3121_v41, %s5560_s0  ;;  %3893 = vrot.lane.b32.xlu0 %v3885_v46, %s5561_s1  ;;  %v3141_v41 = vmul.f32 %v8177_v53, %v3140_v24  ;;  %v3142_v46 = vmul.f32 %v8162_v3, %v3140_v24 }
 0x3ea   :  { %3129 = vrot.lane.b32.xlu2 %v3122_v14, %s5560_s0  ;;  %v3922_v14 = vstv %s5376_s20  ;;  %s5381_s20 = sld [smem:[#allocation2 + $0x28b]] }
 0x3eb   :  { %v8168_v61 = vpop.permute.xlu1 %2593  ;;  %v8170_v26 = vpop.permute.xlu0 %2591  ;;  %v3925_v24 = vmul.f32 %v8183_v19, %v3922_v14 }
 0x3ec   :  { %10458 = vst [vmem:[#allocation28_spill] sm:$0xff] %v8168_v61  ;;  %v8172_v1 = vpop.permute.xlu2 %2655 }
 0x3ed   :  { %10459 = vst [vmem:[#allocation13_spill] sm:$0xff] %v8170_v26 }
 0x3ee   :  { %10460 = vst [vmem:[#allocation24_spill] sm:$0xff] %v8172_v1  ;;  %v3924_v1 = vmul.f32 %v8162_v3, %v3922_v14 }
 0x3f1   :  { %3909 = vrot.lane.b32.xlu1 %v3903_v23, %s5562_s21  ;;  %3131 = vrot.lane.b32.xlu0 %v3123_v63, %s5560_s0 }
 0x3f2   :  { %3911 = vrot.lane.b32.xlu2 %v3904_v49, %s5562_s21 }
 0x3f3   :  { %v8190_v58 = vpop.permute.xlu1 %2613  ;;  %v8192_v15 = vpop.permute.xlu0 %2611 }
 0x3f4   :  { %10461 = vst [vmem:[#allocation31_spill] sm:$0xff] %v8190_v58  ;;  %v8194_v25 = vpop.permute.xlu2 %2681 }
 0x3f5   :  { %10462 = vst [vmem:[#allocation20_spill] sm:$0xff] %v8192_v15 }
 0x3f6   :  { %10463 = vst [vmem:[#allocation27_spill] sm:$0xff] %v8194_v25  ;;  %v3923_v25 = vmul.f32 %v8177_v53, %v3922_v14 }
 0x3f9   :  { %3147 = vrot.lane.b32.xlu1 %v3141_v41, %s5561_s1  ;;  %3913 = vrot.lane.b32.xlu0 %v3905_v62, %s5562_s21  ;;  %v3160_v41 = vstv %s5306_s28  ;;  %s5311_s28 = sld [smem:[#allocation2 + $0x20a]] }
 0x3fa   :  { %3149 = vrot.lane.b32.xlu2 %v3142_v46, %s5561_s1  ;;  %v3163_v14 = vmul.f32 %v8183_v19, %v3160_v41 }
 0x3fb   :  { %v8202_v23 = vpop.permute.xlu1 %2633  ;;  %v8204_v63 = vpop.permute.xlu0 %2631 }
 0x3fc   :  { %10464 = vst [vmem:[#allocation30_spill] sm:$0xff] %v8202_v23  ;;  %v8206_v49 = vpop.permute.xlu2 %2701  ;;  %v3162_v23 = vmul.f32 %v8162_v3, %v3160_v41 }
 0x3fd   :  { %10465 = vst [vmem:[#allocation23_spill] sm:$0xff] %v8204_v63 }
 0x3fe   :  { %10466 = vst [vmem:[#allocation11_spill] sm:$0xff] %v8206_v49  ;;  %v3161_v49 = vmul.f32 %v8177_v53, %v3160_v41 }
 0x401   :  { %3929 = vrot.lane.b32.xlu1 %v3923_v25, %s5563_s2  ;;  %3151 = vrot.lane.b32.xlu0 %v3143_v18, %s5561_s1  ;;  %v3942_v25 = vstv %s5377_s22  ;;  %s5382_s22 = sld [smem:[#allocation2 + $0x28c]] }
 0x402   :  { %3931 = vrot.lane.b32.xlu2 %v3924_v1, %s5563_s2  ;;  %v3945_v41 = vmul.f32 %v8183_v19, %v3942_v25 }
 0x403   :  { %v8214_v62 = vpop.permute.xlu1 %2653  ;;  %v8216_v46 = vpop.permute.xlu0 %2651 }
 0x404   :  { %10467 = vst [vmem:[#allocation33_spill] sm:$0xff] %v8214_v62  ;;  %v8218_v63 = vpop.permute.xlu2 %2721  ;;  %v3944_v62 = vmul.f32 %v8162_v3, %v3942_v25 }
 0x405   :  { %10468 = vst [vmem:[#allocation26_spill] sm:$0xff] %v8216_v46 }
 0x406   :  { %10469 = vst [vmem:[#allocation10_spill] sm:$0xff] %v8218_v63  ;;  %v3943_v63 = vmul.f32 %v8177_v53, %v3942_v25 }
 0x409   :  { %3167 = vrot.lane.b32.xlu1 %v3161_v49, %s5562_s21  ;;  %3933 = vrot.lane.b32.xlu0 %v3925_v24, %s5563_s2  ;;  %v3180_v49 = vstv %s5307_s25  ;;  %s5312_s25 = sld [smem:[#allocation2 + $0x20b]] }
 0x40a   :  { %3169 = vrot.lane.b32.xlu2 %v3162_v23, %s5562_s21  ;;  %v3183_v25 = vmul.f32 %v8183_v19, %v3180_v49 }
 0x40b   :  { %v8226_v1 = vpop.permute.xlu1 %2679  ;;  %v8228_v18 = vpop.permute.xlu0 %2677 }
 0x40c   :  { %10470 = vst [vmem:[#allocation16_spill] sm:$0xff] %v8226_v1  ;;  %v8230_v46 = vpop.permute.xlu2 %2741  ;;  %v3182_v1 = vmul.f32 %v8162_v3, %v3180_v49 }
 0x40d   :  { %10471 = vst [vmem:[#allocation29_spill] sm:$0xff] %v8228_v18 }
 0x40e   :  { %10472 = vst [vmem:[#allocation32_spill] sm:$0xff] %v8230_v46  ;;  %v3181_v46 = vmul.f32 %v8177_v53, %v3180_v49 }
 0x411   :  { %3949 = vrot.lane.b32.xlu1 %v3943_v63, %s10447_s24  ;;  %3171 = vrot.lane.b32.xlu0 %v3163_v14, %s5562_s21  ;;  %v3962_v63 = vstv %s5378_s29  ;;  %s5383_s29 = sld [smem:[#allocation2 + $0x28d]] }
 0x412   :  { %3951 = vrot.lane.b32.xlu2 %v3944_v62, %s10447_s24  ;;  %v3964_v29 = vmul.f32 %v8162_v3, %v3962_v63  ;;  %v3965_v49 = vmul.f32 %v8183_v19, %v3962_v63 }
 0x413   :  { %v8238_v23 = vpop.permute.xlu1 %2699  ;;  %v8240_v24 = vpop.permute.xlu0 %2697 }
 0x414   :  { %10473 = vst [vmem:[#allocation12_spill] sm:$0xff] %v8238_v23  ;;  %v8242_v18 = vpop.permute.xlu2 %3831  ;;  %v3963_v23 = vmul.f32 %v8177_v53, %v3962_v63 }
 0x415   :  { %10474 = vst [vmem:[#allocation15_spill] sm:$0xff] %v8240_v24 }
 0x419   :  { %3187 = vrot.lane.b32.xlu1 %v3181_v46, %s5563_s2  ;;  %3953 = vrot.lane.b32.xlu0 %v3945_v41, %s10447_s24  ;;  %v3200_v46 = vstv %s5308_s27  ;;  %s5313_s27 = sld [smem:[#allocation2 + $0x20c]] }
 0x41a   :  { %3189 = vrot.lane.b32.xlu2 %v3182_v1, %s5563_s2  ;;  %v3202_v15 = vmul.f32 %v8162_v3, %v3200_v46  ;;  %v3203_v63 = vmul.f32 %v8183_v19, %v3200_v46 }
 0x41b   :  { %v8250_v62 = vpop.permute.xlu1 %2719  ;;  %v8252_v14 = vpop.permute.xlu0 %2717 }
 0x41c   :  { %10475 = vst [vmem:[#allocation8_spill] sm:$0xff] %v8250_v62  ;;  %v8254_v24 = vpop.permute.xlu2 %3851  ;;  %v3201_v62 = vmul.f32 %v8177_v53, %v3200_v46 }
 0x41d   :  { %10476 = vst [vmem:[#allocation35_spill] sm:$0xff] %v8252_v14 }
 0x421   :  { %3969 = vrot.lane.b32.xlu1 %v3963_v23, %s10448_s19  ;;  %3191 = vrot.lane.b32.xlu0 %v3183_v25, %s5563_s2  ;;  %v3220_v23 = vstv %s5309_s5  ;;  %s5384_s5 = sld [smem:[#allocation2 + $0x28e]] }
 0x422   :  { %3971 = vrot.lane.b32.xlu2 %v3964_v29, %s10448_s19  ;;  %v3222_v58 = vmul.f32 %v8162_v3, %v3220_v23  ;;  %v3223_v46 = vmul.f32 %v8183_v19, %v3220_v23 }
 0x423   :  { %v8262_v1 = vpop.permute.xlu1 %2739  ;;  %v8264_v41 = vpop.permute.xlu0 %2737 }
 0x424   :  { %10477 = vst [vmem:[#allocation36_spill] sm:$0xff] %v8262_v1  ;;  %v8266_v14 = vpop.permute.xlu2 %3089  ;;  %v3221_v1 = vmul.f32 %v8177_v53, %v3220_v23 }
 0x425   :  { %10478 = vst [vmem:[#allocation37_spill] sm:$0xff] %v8264_v41 }
 0x429   :  { %3207 = vrot.lane.b32.xlu1 %v3201_v62, %s10447_s24  ;;  %3973 = vrot.lane.b32.xlu0 %v3965_v49, %s10448_s19  ;;  %v3988_v62 = vstv %s5380_s26  ;;  %s5315_s26 = sld [smem:[#allocation2 + $0x20e]] }
 0x42a   :  { %3209 = vrot.lane.b32.xlu2 %v3202_v15, %s10447_s24  ;;  %v3989_v57 = vmul.f32 %v7744_v13, %v3988_v62  ;;  %v3990_v26 = vmul.f32 %v7738_v30, %v3988_v62  ;;  %v3991_v19 = vmul.f32 %v7765_v2, %v3988_v62 }
 0x42b   :  { %v8274_v29 = vpop.permute.xlu1 %3829  ;;  %v8276_v25 = vpop.permute.xlu0 %2757 }
 0x42c   :  { %10479 = vst [vmem:[#allocation38_spill] sm:$0xff] %v8276_v25  ;;  %v8278_v41 = vpop.permute.xlu2 %3871 }
 0x431   :  { %3227 = vrot.lane.b32.xlu1 %v3221_v1, %s10448_s19  ;;  %3211 = vrot.lane.b32.xlu0 %v3203_v63, %s10447_s24  ;;  %v4008_v1 = vstv %s5381_s20  ;;  %s5386_s20 = sld [smem:[#allocation2 + $0x290]] }
 0x432   :  { %3229 = vrot.lane.b32.xlu2 %v3222_v58, %s10448_s19  ;;  %v4009_v59 = vmul.f32 %v7744_v13, %v4008_v1  ;;  %v4010_v23 = vmul.f32 %v7738_v30, %v4008_v1  ;;  %v4011_v62 = vmul.f32 %v7765_v2, %v4008_v1 }
 0x433   :  { %v8286_v15 = vpop.permute.xlu1 %3849  ;;  %v8288_v49 = vpop.permute.xlu0 %3833 }
 0x434   :  { %v8290_v25 = vpop.permute.xlu2 %3109 }
 0x439   :  { %3995 = vrot.lane.b32.xlu1 %v3989_v57, %s10396_s30  ;;  %3231 = vrot.lane.b32.xlu0 %v3223_v46, %s10448_s19  ;;  %v3246_v57 = vstv %s5311_s28  ;;  %s5316_s28 = sld [smem:[#allocation2 + $0x20f]] }
 0x43a   :  { %3997 = vrot.lane.b32.xlu2 %v3990_v26, %s10396_s30  ;;  %v3247_v60 = vmul.f32 %v7744_v13, %v3246_v57  ;;  %v3248_v22 = vmul.f32 %v7738_v30, %v3246_v57  ;;  %v3249_v1 = vmul.f32 %v7765_v2, %v3246_v57 }
 0x43b   :  { %v8298_v58 = vpop.permute.xlu1 %3087  ;;  %v8300_v63 = vpop.permute.xlu0 %3853 }
 0x43c   :  { %v8302_v61 = vpop.permute.xlu2 %3891 }
 0x43d   :  { %10480 = vst [vmem:[#allocation39_spill] sm:$0xff] %v8302_v61 }
 0x441   :  { %4015 = vrot.lane.b32.xlu1 %v4009_v59, %s10341_s4  ;;  %3999 = vrot.lane.b32.xlu0 %v3991_v19, %s10396_s30  ;;  %v4028_v59 = vstv %s5382_s22  ;;  %s5387_s22 = sld [smem:[#allocation2 + $0x291]] }
 0x442   :  { %4017 = vrot.lane.b32.xlu2 %v4010_v23, %s10341_s4  ;;  %v4029_v31 = vmul.f32 %v7744_v13, %v4028_v59  ;;  %v4030_v44 = vmul.f32 %v7738_v30, %v4028_v59  ;;  %v4031_v57 = vmul.f32 %v7765_v2, %v4028_v59 }
 0x443   :  { %v8310_v26 = vpop.permute.xlu1 %3869  ;;  %v8312_v46 = vpop.permute.xlu0 %3091 }
 0x444   :  { %10481 = vst [vmem:[#allocation40_spill] sm:$0xff] %v8312_v46  ;;  %v8314_v52 = vpop.permute.xlu2 %3129 }
 0x449   :  { %3253 = vrot.lane.b32.xlu1 %v3247_v60, %s10396_s30  ;;  %4019 = vrot.lane.b32.xlu0 %v4011_v62, %s10341_s4  ;;  %v3266_v60 = vstv %s5312_s25  ;;  %s5314_s25 = sld [smem:[#allocation2 + $0x20d]] }
 0x44a   :  { %3255 = vrot.lane.b32.xlu2 %v3248_v22, %s10396_s30  ;;  %v3268_v61 = vmul.f32 %v7738_v30, %v3266_v60  ;;  %v3269_v59 = vmul.f32 %v7765_v2, %v3266_v60 }
 0x44b   :  { %v8322_v19 = vpop.permute.xlu1 %3107  ;;  %v8324_v23 = vpop.permute.xlu0 %3873 }
 0x44c   :  { %v8326_v21 = vpop.permute.xlu2 %3911 }
 0x44d   :  { %10482 = vst [vmem:[#allocation41_spill] sm:$0xff] %v8326_v21  ;;  %v3267_v21 = vmul.f32 %v7744_v13, %v3266_v60  ;;  %v8374_v60 = vld [vmem:[%s10286_s23 + $0x20] sm:$0xff] }
 0x451   :  { %4035 = vrot.lane.b32.xlu1 %v4029_v31, %s5560_s0  ;;  %3257 = vrot.lane.b32.xlu0 %v3249_v1, %s10396_s30  ;;  %v4048_v31 = vstv %s5383_s29  ;;  %s5318_s29 = sld [smem:[#allocation2 + $0x211]] }
 0x452   :  { %4037 = vrot.lane.b32.xlu2 %v4030_v44, %s5560_s0 }
 0x453   :  { %v8334_v22 = vpop.permute.xlu1 %3889  ;;  %v8336_v62 = vpop.permute.xlu0 %3111 }
 0x454   :  { %10483 = vst [vmem:[#allocation42_spill] sm:$0xff] %v8334_v22  ;;  %v8338_v46 = vpop.permute.xlu2 %3149  ;;  %v4050_v22 = vmul.f32 %v7738_v30, %v4048_v31 }
 0x455   :  { %10484 = vst [vmem:[#allocation43_spill] sm:$0xff] %v8336_v62 }
 0x456   :  { %10485 = vst [vmem:[#allocation44_spill] sm:$0xff] %v8338_v46  ;;  %v4049_v46 = vmul.f32 %v7744_v13, %v4048_v31  ;;  %v8367_v13 = vld [vmem:[%s10286_s23 + $0x18] sm:$0xff] }
 0x459   :  { %3273 = vrot.lane.b32.xlu1 %v3267_v21, %s10341_s4  ;;  %4039 = vrot.lane.b32.xlu0 %v4031_v57, %s5560_s0  ;;  %v3286_v21 = vstv %s5313_s27  ;;  %s5389_s27 = sld [smem:[#allocation2 + $0x293]] }
 0x45a   :  { %3275 = vrot.lane.b32.xlu2 %v3268_v61, %s10341_s4  ;;  %v3287_v30 = vmul.f32 %v8367_v13, %v3286_v21 }
 0x45b   :  { %v8346_v44 = vpop.permute.xlu1 %3127  ;;  %v8348_v1 = vpop.permute.xlu0 %3893 }
 0x45c   :  { %10486 = vst [vmem:[#allocation45_spill] sm:$0xff] %v8346_v44  ;;  %v8350_v62 = vpop.permute.xlu2 %3931 }
 0x45d   :  { %10487 = vst [vmem:[#allocation46_spill] sm:$0xff] %v8348_v1 }
 0x45e   :  { %10488 = vst [vmem:[#allocation47_spill] sm:$0xff] %v8350_v62  ;;  %v8390_v62 = vld [vmem:[%s10286_s23 + $0x28] sm:$0xff] }
 0x461   :  { %4055 = vrot.lane.b32.xlu1 %v4049_v46, %s5561_s1  ;;  %3277 = vrot.lane.b32.xlu0 %v3269_v59, %s10341_s4  ;;  %v4051_v46 = vmul.f32 %v7765_v2, %v4048_v31  ;;  %v4068_v59 = vstv %s5384_s5  ;;  %s5385_s5 = sld [smem:[#allocation2 + $0x28f]] }
 0x462   :  { %4057 = vrot.lane.b32.xlu2 %v4050_v22, %s5561_s1  ;;  %v3288_v22 = vmul.f32 %v8374_v60, %v3286_v21  ;;  %v4069_v31 = vmul.f32 %v8367_v13, %v4068_v59 }
 0x463   :  { %v8358_v61 = vpop.permute.xlu1 %3909  ;;  %v8360_v57 = vpop.permute.xlu0 %3131 }
 0x464   :  { %10489 = vst [vmem:[#allocation48_spill] sm:$0xff] %v8358_v61  ;;  %v8362_v1 = vpop.permute.xlu2 %3169 }
 0x465   :  { %10490 = vst [vmem:[#allocation49_spill] sm:$0xff] %v8360_v57 }
 0x466   :  { %10491 = vst [vmem:[#allocation50_spill] sm:$0xff] %v8362_v1 }
 0x469   :  { %3293 = vrot.lane.b32.xlu1 %v3287_v30, %s5560_s0  ;;  %4059 = vrot.lane.b32.xlu0 %v4051_v46, %s5561_s1  ;;  %v3289_v30 = vmul.f32 %v8390_v62, %v3286_v21  ;;  %v4070_v46 = vmul.f32 %v8374_v60, %v4068_v59  ;;  %v4071_v21 = vmul.f32 %v8390_v62, %v4068_v59 }
 0x46a   :  { %3295 = vrot.lane.b32.xlu2 %v3288_v22, %s5560_s0  ;;  %v3306_v22 = vstv %s5314_s25  ;;  %s5317_s25 = sld [smem:[#allocation2 + $0x210]] }
 0x46b   :  { %v8380_v61 = vpop.permute.xlu1 %3147  ;;  %v8382_v57 = vpop.permute.xlu0 %3913  ;;  %v3308_v44 = vmul.f32 %v8374_v60, %v3306_v22  ;;  %v3309_v59 = vmul.f32 %v8390_v62, %v3306_v22 }
 0x46c   :  { %10492 = vst [vmem:[#allocation51_spill] sm:$0xff] %v8380_v61  ;;  %v8384_v2 = vpop.permute.xlu2 %3951  ;;  %v3307_v61 = vmul.f32 %v8367_v13, %v3306_v22 }
 0x46d   :  { %10493 = vst [vmem:[#allocation52_spill] sm:$0xff] %v8382_v57 }
 0x46e   :  { %10494 = vst [vmem:[#allocation53_spill] sm:$0xff] %v8384_v2 }
 0x471   :  { %4075 = vrot.lane.b32.xlu1 %v4069_v31, %s5562_s21  ;;  %3297 = vrot.lane.b32.xlu0 %v3289_v30, %s5560_s0  ;;  %v4088_v31 = vstv %s5385_s5  ;;  %s5256_s5 = sld [smem:[#allocation2 + $0x198]] }
 0x472   :  { %4077 = vrot.lane.b32.xlu2 %v4070_v46, %s5562_s21  ;;  %v4091_v22 = vmul.f32 %v8390_v62, %v4088_v31 }
 0x473   :  { %v8397_v2 = vpop.permute.xlu1 %3929  ;;  %v8399_v1 = vpop.permute.xlu0 %3151 }
 0x474   :  { %10495 = vst [vmem:[#allocation54_spill] sm:$0xff] %v8397_v2  ;;  %v8401_v57 = vpop.permute.xlu2 %3189 }
 0x475   :  { %10496 = vst [vmem:[#allocation55_spill] sm:$0xff] %v8399_v1  ;;  %v4089_v1 = vmul.f32 %v8367_v13, %v4088_v31 }
 0x476   :  { %10497 = vst [vmem:[#allocation56_spill] sm:$0xff] %v8401_v57  ;;  %v4090_v57 = vmul.f32 %v8374_v60, %v4088_v31 }
 0x479   :  { %3313 = vrot.lane.b32.xlu1 %v3307_v61, %s5561_s1  ;;  %4079 = vrot.lane.b32.xlu0 %v4071_v21, %s5562_s21  ;;  %v3326_v61 = vstv %s5315_s26  ;;  %s5390_s26 = sld [smem:[#allocation2 + $0x294]] }
 0x47a   :  { %3315 = vrot.lane.b32.xlu2 %v3308_v44, %s5561_s1  ;;  %v3329_v31 = vmul.f32 %v8390_v62, %v3326_v61 }
 0x47b   :  { %v8409_v30 = vpop.permute.xlu1 %3167  ;;  %v8411_v46 = vpop.permute.xlu0 %3933 }
 0x47c   :  { %10498 = vst [vmem:[#allocation57_spill] sm:$0xff] %v8409_v30  ;;  %v8413_v2 = vpop.permute.xlu2 %3971  ;;  %v3328_v30 = vmul.f32 %v8374_v60, %v3326_v61 }
 0x47d   :  { %10499 = vst [vmem:[#allocation58_spill] sm:$0xff] %v8411_v46 }
 0x47e   :  { %10500 = vst [vmem:[#allocation59_spill] sm:$0xff] %v8413_v2  ;;  %v3327_v2 = vmul.f32 %v8367_v13, %v3326_v61 }
 0x481   :  { %4095 = vrot.lane.b32.xlu1 %v4089_v1, %s5563_s2  ;;  %3317 = vrot.lane.b32.xlu0 %v3309_v59, %s5561_s1  ;;  %v4108_v1 = vstv %s5386_s20  ;;  %s5257_s20 = sld [smem:[#allocation2 + $0x199]] }
 0x482   :  { %4097 = vrot.lane.b32.xlu2 %v4090_v57, %s5563_s2  ;;  %v4111_v61 = vmul.f32 %v8390_v62, %v4108_v1 }
 0x483   :  { %v8421_v44 = vpop.permute.xlu1 %3949  ;;  %v8423_v21 = vpop.permute.xlu0 %3171 }
 0x484   :  { %10501 = vst [vmem:[#allocation60_spill] sm:$0xff] %v8421_v44  ;;  %v8425_v46 = vpop.permute.xlu2 %3209 }
 0x485   :  { %10502 = vst [vmem:[#allocation61_spill] sm:$0xff] %v8423_v21  ;;  %v4109_v21 = vmul.f32 %v8367_v13, %v4108_v1 }
 0x486   :  { %10503 = vst [vmem:[#allocation62_spill] sm:$0xff] %v8425_v46  ;;  %v4110_v46 = vmul.f32 %v8374_v60, %v4108_v1 }
 0x489   :  { %3333 = vrot.lane.b32.xlu1 %v3327_v2, %s5562_s21  ;;  %4099 = vrot.lane.b32.xlu0 %v4091_v22, %s5563_s2  ;;  %v3346_v2 = vstv %s5316_s28  ;;  %s5320_s28 = sld [smem:[#allocation2 + $0x213]] }
 0x48a   :  { %3335 = vrot.lane.b32.xlu2 %v3328_v30, %s5562_s21  ;;  %v3349_v1 = vmul.f32 %v8390_v62, %v3346_v2 }
 0x48b   :  { %v8433_v57 = vpop.permute.xlu1 %3187  ;;  %v8435_v59 = vpop.permute.xlu0 %3953 }
 0x48c   :  { %10504 = vst [vmem:[#allocation63_spill] sm:$0xff] %v8433_v57  ;;  %v8437_v44 = vpop.permute.xlu2 %3229  ;;  %v3348_v57 = vmul.f32 %v8374_v60, %v3346_v2 }
 0x48d   :  { %10505 = vst [vmem:[#allocation64_spill] sm:$0xff] %v8435_v59 }
 0x48e   :  { %10506 = vst [vmem:[#allocation65_spill] sm:$0xff] %v8437_v44  ;;  %v3347_v44 = vmul.f32 %v8367_v13, %v3346_v2 }
 0x491   :  { %4115 = vrot.lane.b32.xlu1 %v4109_v21, %s10447_s24  ;;  %3337 = vrot.lane.b32.xlu0 %v3329_v31, %s5562_s21  ;;  %v4128_v21 = vstv %s5387_s22  ;;  %s5232_s22 = sld [smem:[#allocation2 + $0x180]] }
 0x492   :  { %4117 = vrot.lane.b32.xlu2 %v4110_v46, %s10447_s24 }
 0x493   :  { %v8445_v30 = vpop.permute.xlu1 %3969  ;;  %v8447_v22 = vpop.permute.xlu0 %3191 }
 0x494   :  { %10507 = vst [vmem:[#allocation66_spill] sm:$0xff] %v8445_v30  ;;  %v8449_v59 = vpop.permute.xlu2 %3997 }
 0x495   :  { %10508 = vst [vmem:[#allocation67_spill] sm:$0xff] %v8447_v22  ;;  %v4130_v22 = vmul.f32 %v8374_v60, %v4128_v21 }
 0x496   :  { %10509 = vst [vmem:[#allocation68_spill] sm:$0xff] %v8449_v59  ;;  %v4129_v59 = vmul.f32 %v8367_v13, %v4128_v21 }
 0x499   :  { %3353 = vrot.lane.b32.xlu1 %v3347_v44, %s5563_s2  ;;  %4119 = vrot.lane.b32.xlu0 %v4111_v61, %s10447_s24  ;;  %v3366_v44 = vstv %s5317_s25  ;;  %s5391_s25 = sld [smem:[#allocation2 + $0x295]] }
 0x49a   :  { %3355 = vrot.lane.b32.xlu2 %v3348_v57, %s5563_s2  ;;  %v3368_v2 = vmul.f32 %v8374_v60, %v3366_v44 }
 0x49b   :  { %v8457_v46 = vpop.permute.xlu1 %3207  ;;  %v8459_v31 = vpop.permute.xlu0 %3973 }
 0x49c   :  { %10510 = vst [vmem:[#allocation69_spill] sm:$0xff] %v8457_v46  ;;  %v8461_v30 = vpop.permute.xlu2 %4017  ;;  %v4131_v46 = vmul.f32 %v8390_v62, %v4128_v21  ;;  %v3369_v21 = vmul.f32 %v8390_v62, %v3366_v44 }
 0x49d   :  { %10511 = vst [vmem:[#allocation70_spill] sm:$0xff] %v8459_v31 }
 0x49e   :  { %10512 = vst [vmem:[#allocation71_spill] sm:$0xff] %v8461_v30  ;;  %v3367_v30 = vmul.f32 %v8367_v13, %v3366_v44 }
 0x4a1   :  { %4135 = vrot.lane.b32.xlu1 %v4129_v59, %s10448_s19  ;;  %3357 = vrot.lane.b32.xlu0 %v3349_v1, %s5563_s2 }
 0x4a2   :  { %4137 = vrot.lane.b32.xlu2 %v4130_v22, %s10448_s19 }
 0x4a3   :  { %v8469_v57 = vpop.permute.xlu1 %3227  ;;  %v8471_v61 = vpop.permute.xlu0 %3211 }
 0x4a4   :  { %10513 = vst [vmem:[#allocation72_spill] sm:$0xff] %v8471_v61  ;;  %v8473_v31 = vpop.permute.xlu2 %3255  ;;  %v2753_v61 = vmul.f32 %v8034_v43, %v8075_v35 }
 0x4a5   :  { %10514 = vst [vmem:[#allocation73_spill] sm:$0xff] %v8473_v31  ;;  %v2752_v31 = vmul.f32 %v8022_v50, %v8075_v35 }
 0x4a9   :  { %3373 = vrot.lane.b32.xlu1 %v3367_v30, %s10447_s24  ;;  %4139 = vrot.lane.b32.xlu0 %v4131_v46, %s10448_s19  ;;  %v3386_v30 = vstv %s5318_s29  ;;  %s5258_s29 = sld [smem:[#allocation2 + $0x19a]] }
 0x4aa   :  { %3375 = vrot.lane.b32.xlu2 %v3368_v2, %s10447_s24  ;;  %v3387_v44 = vmul.f32 %v8367_v13, %v3386_v30  ;;  %v3389_v35 = vmul.f32 %v8390_v62, %v3386_v30 }
 0x4ab   :  { %v8481_v59 = vpop.permute.xlu1 %3995  ;;  %v8483_v22 = vpop.permute.xlu0 %3231 }
 0x4ac   :  { %10515 = vst [vmem:[#allocation74_spill] sm:$0xff] %v8481_v59  ;;  %v8485_v1 = vpop.permute.xlu2 %4037 }
 0x4ad   :  { %10516 = vst [vmem:[#allocation75_spill] sm:$0xff] %v8483_v22 }
 0x4ae   :  { %10517 = vst [vmem:[#allocation76_spill] sm:$0xff] %v8485_v1  ;;  %v3388_v1 = vmul.f32 %v8374_v60, %v3386_v30 }
 0x4b1   :  { %2759 = vrot.lane.b32.xlu1 %v2752_v31, %s5562_s21  ;;  %3377 = vrot.lane.b32.xlu0 %v3369_v21, %s10447_s24  ;;  %v4154_v31 = vstv %s5389_s27  ;;  %s8599_s27 = sld [smem:[#allocation2 + $0x189]] }
 0x4b2   :  { %2761 = vrot.lane.b32.xlu2 %v2753_v61, %s5562_s21  ;;  %v4155_v22 = vmul.f32 %v8028_v28, %v4154_v31  ;;  %v4157_v62 = vmul.f32 %v8034_v43, %v4154_v31 }
 0x4b3   :  { %v8495_v46 = vpop.permute.xlu1 %4015  ;;  %v8497_v2 = vpop.permute.xlu0 %3999 }
 0x4b4   :  { %10518 = vst [vmem:[#allocation77_spill] sm:$0xff] %v8495_v46  ;;  %v8499_v59 = vpop.permute.xlu2 %3275 }
 0x4b5   :  { %10519 = vst [vmem:[#allocation78_spill] sm:$0xff] %v8497_v2 }
 0x4b6   :  { %10520 = vst [vmem:[#allocation79_spill] sm:$0xff] %v8499_v59  ;;  %v4156_v59 = vmul.f32 %v8022_v50, %v4154_v31 }
 0x4b9   :  { %3395 = vrot.lane.b32.xlu1 %v3388_v1, %s10448_s19  ;;  %3393 = vrot.lane.b32.xlu0 %v3387_v44, %s10448_s19  ;;  %v2770_v1 = vstv %s5256_s5  ;;  %s5321_s5 = sld [smem:[#allocation2 + $0x214]] }
 0x4ba   :  { %3397 = vrot.lane.b32.xlu2 %v3389_v35, %s10448_s19  ;;  %v2773_v31 = vmul.f32 %v8034_v43, %v2770_v1 }
 0x4bb   :  { %v8507_v61 = vpop.permute.xlu1 %3253  ;;  %v8509_v21 = vpop.permute.xlu0 %4019 }
 0x4bc   :  { %10521 = vst [vmem:[#allocation80_spill] sm:$0xff] %v8507_v61  ;;  %v8511_v46 = vpop.permute.xlu2 %4057  ;;  %v2334_v61 = vstv %s5232_s22  ;;  %s8755_s22 = sld [smem:[#allocation2 + $0x209]] }
 0x4bd   :  { %10522 = vst [vmem:[#allocation81_spill] sm:$0xff] %v8509_v21  ;;  %v2771_v21 = vmul.f32 %v8028_v28, %v2770_v1 }
 0x4be   :  { %10523 = vst [vmem:[#allocation82_spill] sm:$0xff] %v8511_v46  ;;  %v2772_v46 = vmul.f32 %v8022_v50, %v2770_v1 }
 0x4c1   :  { %4163 = vrot.lane.b32.xlu1 %v4156_v59, %s10396_s30  ;;  %4161 = vrot.lane.b32.xlu0 %v4155_v22, %s10396_s30  ;;  %v4174_v59 = vstv %s5390_s26  ;;  %s8620_s26 = sld [smem:[#allocation2 + $0x280]] }
 0x4c2   :  { %4165 = vrot.lane.b32.xlu2 %v4157_v62, %s10396_s30  ;;  %v4177_v1 = vmul.f32 %v8034_v43, %v4174_v59 }
 0x4c3   :  { %v8519_v30 = vpop.permute.xlu1 %4035  ;;  %v8521_v44 = vpop.permute.xlu0 %3257 }
 0x4c4   :  { %10524 = vst [vmem:[#allocation83_spill] sm:$0xff] %v8519_v30  ;;  %v8523_v35 = vpop.permute.xlu2 %3295 }
 0x4c5   :  { %10525 = vst [vmem:[#allocation84_spill] sm:$0xff] %v8521_v44  ;;  %v4176_v44 = vmul.f32 %v8022_v50, %v4174_v59 }
 0x4c6   :  { %10526 = vst [vmem:[#allocation85_spill] sm:$0xff] %v8523_v35  ;;  %v4175_v35 = vmul.f32 %v8028_v28, %v4174_v59 }
 0x4c9   :  { %2779 = vrot.lane.b32.xlu1 %v2772_v46, %s5563_s2  ;;  %2777 = vrot.lane.b32.xlu0 %v2771_v21, %s5563_s2  ;;  %v2790_v46 = vstv %s5257_s20  ;;  %s8627_s20 = sld [smem:[#allocation2 + $0x200]] }
 0x4ca   :  { %2781 = vrot.lane.b32.xlu2 %v2773_v31, %s5563_s2  ;;  %v2793_v59 = vmul.f32 %v8034_v43, %v2790_v46 }
 0x4cb   :  { %v8531_v22 = vpop.permute.xlu1 %3273  ;;  %v8533_v62 = vpop.permute.xlu0 %4039 }
 0x4cc   :  { %10527 = vst [vmem:[#allocation86_spill] sm:$0xff] %v8531_v22  ;;  %v8535_v30 = vpop.permute.xlu2 %4077  ;;  %v2791_v22 = vmul.f32 %v8028_v28, %v2790_v46 }
 0x4cd   :  { %10528 = vst [vmem:[#allocation87_spill] sm:$0xff] %v8533_v62 }
 0x4ce   :  { %10529 = vst [vmem:[#allocation88_spill] sm:$0xff] %v8535_v30  ;;  %v2792_v30 = vmul.f32 %v8022_v50, %v2790_v46 }
 0x4d1   :  { %4183 = vrot.lane.b32.xlu1 %v4176_v44, %s10341_s4  ;;  %4181 = vrot.lane.b32.xlu0 %v4175_v35, %s10341_s4  ;;  %v3412_v44 = vstv %s5320_s28  ;;  %s8647_s28 = sld [smem:[#allocation2 + $0x296]] }
 0x4d2   :  { %4185 = vrot.lane.b32.xlu2 %v4177_v1, %s10341_s4  ;;  %v3415_v46 = vmul.f32 %v8034_v43, %v3412_v44 }
 0x4d3   :  { %v8543_v21 = vpop.permute.xlu1 %4055  ;;  %v8545_v31 = vpop.permute.xlu0 %3277 }
 0x4d4   :  { %10530 = vst [vmem:[#allocation89_spill] sm:$0xff] %v8543_v21  ;;  %v8547_v62 = vpop.permute.xlu2 %3315 }
 0x4d5   :  { %10531 = vst [vmem:[#allocation90_spill] sm:$0xff] %v8545_v31  ;;  %v3414_v31 = vmul.f32 %v8022_v50, %v3412_v44 }
 0x4d6   :  { %10532 = vst [vmem:[#allocation91_spill] sm:$0xff] %v8547_v62  ;;  %v3413_v62 = vmul.f32 %v8028_v28, %v3412_v44  ;;  %v2351_v44 = vsel %vm115_vm0, %v8003_v20, %v8001_v33  ;;  %v2392_v20 = vsel %vm157_vm2, %v8040_v6, %v7993_v37 }
 0x4d9   :  { %2799 = vrot.lane.b32.xlu1 %v2792_v30, %s10447_s24  ;;  %2797 = vrot.lane.b32.xlu0 %v2791_v22, %s10447_s24  ;;  %v2336_v30 = vmul.f32 %v8162_v3, %v2334_v61  ;;  %v2352_v22 = vsel %vm115_vm0, %v8001_v33, %v7944_v39 }
 0x4da   :  { %2801 = vrot.lane.b32.xlu2 %v2793_v59, %s10447_s24  ;;  %v2335_v59 = vmul.f32 %v8177_v53, %v2334_v61  ;;  %v2371_v61 = vsel %vm136_vm1, %v8015_v9, %v8013_v38 }
 0x4db   :  { %v8555_v35 = vpop.permute.xlu1 %3293  ;;  %v8557_v1 = vpop.permute.xlu0 %4059  ;;  %v2356_v39 = vadd.f32 %v2352_v22, %v2336_v30  ;;  %v2411_v22 = vsel %vm178_vm3, %v8054_v45, %v8052_v4 }
 0x4dc   :  { %10533 = vst [vmem:[#allocation92_spill] sm:$0xff] %v8555_v35  ;;  %v8559_v21 = vpop.permute.xlu2 %4097  ;;  %v2355_v33 = vadd.f32 %v2351_v44, %v2335_v59  ;;  %v2451_v59 = vsel %vm220_vm5, %v8080_v12, %v8078_v56  ;;  %v3432_v12 = vstv %s5321_s5  ;;  %s8951_s5 = sld [smem:[#allocation2 + $0x298]] }
 0x4dd   :  { %10534 = vst [vmem:[#allocation93_spill] sm:$0xff] %v8557_v1 }
 0x4de   :  { %10535 = vst [vmem:[#allocation94_spill] sm:$0xff] %v8559_v21  ;;  %v4194_v21 = vstv %s5391_s25  ;;  %v2375_v30 = vadd.f32 %v2371_v61, %v2355_v33  ;;  %v2471_v61 = vsel %vm241_vm6, %v8093_v7, %v8091_v40  ;;  %s8769_s25 = sld [smem:[#allocation2 + $0x297]] }
 0x4df   :  { %v4195_v2 = vmul.f32 %v8028_v28, %v4194_v21 }
 0x4e1   :  { %3421 = vrot.lane.b32.xlu1 %v3414_v31, %s10396_s30  ;;  %3419 = vrot.lane.b32.xlu0 %v3413_v62, %s10396_s30  ;;  %v2372_v62 = vsel %vm136_vm1, %v8013_v38, %v7975_v0  ;;  %v2391_v0 = vsel %vm157_vm2, %v8042_v55, %v8040_v6  ;;  %v2412_v38 = vsel %vm178_vm3, %v8052_v4, %v8005_v11  ;;  %v2810_v55 = vstv %s5258_s29  ;;  %s8826_s29 = sld [smem:[#allocation2 + $0x19c]] }
 0x4e2   :  { %3423 = vrot.lane.b32.xlu2 %v3415_v46, %s10396_s30  ;;  %v4196_v46 = vmul.f32 %v8022_v50, %v4194_v21  ;;  %v2395_v37 = vadd.f32 %v2391_v0, %v2375_v30  ;;  %v2432_v6 = vsel %vm199_vm4, %v8064_v8, %v8017_v51  ;;  %v3818_v0 = vstv %s8620_s26  ;;  %s9025_s26 = sld [smem:[#allocation2 + $0x292]] }
 0x4e3   :  { %v8575_v1 = vpop.permute.xlu1 %4075  ;;  %v8577_v35 = vpop.permute.xlu0 %3297  ;;  %v3076_v30 = vstv %s8627_s20  ;;  %s8705_s20 = sld [smem:[#allocation2 + $0x215]] }
 0x4e4   :  { %10536 = vst [vmem:[#allocation95_spill] sm:$0xff] %v8575_v1  ;;  %v8582_v31 = vpop.permute.xlu2 %3335  ;;  %v4197_v1 = vmul.f32 %v8034_v43, %v4194_v21  ;;  %v2431_v21 = vsel %vm199_vm4, %v8066_v16, %v8064_v8  ;;  %v2415_v45 = vadd.f32 %v2411_v22, %v2395_v37  ;;  %v2812_v8 = vmul.f32 %v8022_v50, %v2810_v55  ;;  %v8669_v22 = vld [vmem:[%s10286_s23 + $0x30] sm:$0xff] }
 0x4e5   :  { %10537 = vst [vmem:[#allocation96_spill] sm:$0xff] %v8577_v35  ;;  %v2376_v35 = vadd.f32 %v2372_v62, %v2356_v39  ;;  %v2811_v16 = vmul.f32 %v8028_v28, %v2810_v55  ;;  %v2813_v62 = vmul.f32 %v8034_v43, %v2810_v55  ;;  %v2498_v50 = vstv %s8599_s27  ;;  %v8678_v55 = vld [vmem:[%s10286_s23 + $0x40] sm:$0xff]  ;;  %s8881_s27 = sld [smem:[#allocation2 + $0x216]] }
 0x4e6   :  { %v2435_v44 = vadd.f32 %v2431_v21, %v2415_v45  ;;  %v3433_v37 = vmul.f32 %v8669_v22, %v3432_v12  ;;  %v2517_v45 = vsel %vm115_vm0, %v8117_v10, %v8115_v34 }
 0x4e7   :  { %v2396_v9 = vadd.f32 %v2392_v20, %v2376_v35 }
 0x4e9   :  { %4203 = vrot.lane.b32.xlu1 %v4196_v46, %s5560_s0  ;;  %4201 = vrot.lane.b32.xlu0 %v4195_v2, %s5560_s0  ;;  %v2416_v11 = vadd.f32 %v2412_v38, %v2396_v9  ;;  %v2452_v2 = vsel %vm220_vm5, %v8078_v56, %v8044_v32  ;;  %v2472_v32 = vsel %vm241_vm6, %v8091_v40, %v8056_v47  ;;  %v8663_v38 = vld [vmem:[%s10286_s23 + $0x38] sm:$0xff] }
 0x4ea   :  { %4205 = vrot.lane.b32.xlu2 %v4197_v1, %s5560_s0  ;;  %v2455_v46 = vadd.f32 %v2451_v59, %v2435_v44  ;;  %v2492_v56 = vsel %vm262_vm7, %v8103_v42, %v8068_v48  ;;  %v2491_v47 = vsel %vm262_vm7, %v8105_v5, %v8103_v42  ;;  %v2500_v48 = vmul.f32 %v8374_v60, %v2498_v50 }
 0x4eb   :  { %v8613_v35 = vpop.permute.xlu1 %3313  ;;  %v8615_v4 = vpop.permute.xlu0 %4079  ;;  %v2436_v1 = vadd.f32 %v2432_v6, %v2416_v11  ;;  %v2499_v42 = vmul.f32 %v8367_v13, %v2498_v50  ;;  %v3434_v9 = vmul.f32 %v8663_v38, %v3432_v12  ;;  %v2518_v6 = vsel %vm115_vm0, %v8115_v34, %v8082_v27 }
 0x4ec   :  { %v8622_v51 = vpop.permute.xlu2 %4117  ;;  %v2475_v43 = vadd.f32 %v2471_v61, %v2455_v46  ;;  %v3435_v11 = vmul.f32 %v8678_v55, %v3432_v12  ;;  %v3819_v59 = vmul.f32 %v8177_v53, %v3818_v0  ;;  %v3836_v27 = vsel %vm115_vm0, %v8242_v18, %v8288_v49 }
 0x4ed   :  { %v2456_v39 = vadd.f32 %v2452_v2, %v2436_v1  ;;  %v3820_v2 = vmul.f32 %v8162_v3, %v3818_v0  ;;  %v3835_v44 = vsel %vm115_vm0, %v8274_v29, %v8242_v18  ;;  %v3093_v34 = vsel %vm115_vm0, %v8298_v58, %v8266_v14  ;;  %v10542_v0 = vld [vmem:[#allocation42_spill] sm:$0xff] }
 0x4ee   :  { %v2495_v20 = vadd.f32 %v2491_v47, %v2475_v43  ;;  %v2538_v49 = vsel %vm136_vm1, %v8127_v36, %v8095_v17  ;;  %v2537_v18 = vsel %vm136_vm1, %v8129_v54, %v8127_v36  ;;  %v3855_v29 = vsel %vm136_vm1, %v8286_v15, %v8254_v24  ;;  %v10539_v47 = vld [vmem:[#allocation46_spill] sm:$0xff]  ;;  %v10540_v43 = vld [vmem:[#allocation39_spill] sm:$0xff] }
 0x4ef   :  { %v2476_v28 = vadd.f32 %v2472_v32, %v2456_v39  ;;  %v4214_v32 = vstv %s8647_s28  ;;  %v3840_v58 = vadd.f32 %v3836_v27, %v3820_v2  ;;  %v3078_v17 = vmul.f32 %v8162_v3, %v3076_v30  ;;  %s8744_s28 = sld [smem:[#allocation2 + $0x289]] }
 0x4f0   :  { %v2501_v1 = vadd.f32 %v2499_v42, %v2495_v20  ;;  %v3113_v46 = vsel %vm136_vm1, %v8322_v19, %v8290_v25  ;;  %v3876_v36 = vsel %vm157_vm2, %v8278_v41, %v8324_v23  ;;  %v3875_v3 = vsel %vm157_vm2, %v8310_v26, %v8278_v41 }
 0x4f1   :  { %2819 = vrot.lane.b32.xlu1 %v2812_v8, %s10448_s19  ;;  %2817 = vrot.lane.b32.xlu0 %v2811_v16, %s10448_s19  ;;  %v2496_v40 = vadd.f32 %v2492_v56, %v2476_v28  ;;  %v3077_v8 = vmul.f32 %v8177_v53, %v3076_v30  ;;  %v3856_v53 = vsel %vm136_vm1, %v8254_v24, %v8300_v63  ;;  %v10538_v28 = vld [vmem:[#allocation45_spill] sm:$0xff] }
 0x4f2   :  { %2821 = vrot.lane.b32.xlu2 %v2813_v62, %s10448_s19  ;;  %v2521_v10 = vadd.f32 %v2517_v45, %v2501_v1  ;;  %v3839_v63 = vadd.f32 %v3835_v44, %v3819_v59  ;;  %v3860_v24 = vadd.f32 %v3856_v53, %v3840_v58  ;;  %v4216_v15 = vmul.f32 %v8663_v38, %v4214_v32 }
 0x4f3   :  { %v8651_v7 = vpop.permute.xlu1 %4095  ;;  %v8653_v33 = vpop.permute.xlu0 %3317  ;;  %v2502_v21 = vadd.f32 %v2500_v48, %v2496_v40  ;;  %v3097_v61 = vadd.f32 %v3093_v34, %v3077_v8  ;;  %v4215_v56 = vmul.f32 %v8669_v22, %v4214_v32  ;;  %v3133_v19 = vsel %vm157_vm2, %v10538_v28, %v8314_v52  ;;  %v10541_v48 = vld [vmem:[#allocation40_spill] sm:$0xff]  ;;  %v10548_v8 = vld [vmem:[#allocation50_spill] sm:$0xff] }
 0x4f4   :  { %v8656_v5 = vpop.permute.xlu2 %3355  ;;  %v3859_v50 = vadd.f32 %v3855_v29, %v3839_v63  ;;  %v3896_v23 = vsel %vm178_vm3, %v10540_v43, %v10539_v47  ;;  %v4217_v12 = vmul.f32 %v8678_v55, %v4214_v32  ;;  %v3094_v41 = vsel %vm115_vm0, %v8266_v14, %v10541_v48  ;;  %v10547_v14 = vld [vmem:[#allocation43_spill] sm:$0xff]  ;;  %v10550_v34 = vld [vmem:[#allocation58_spill] sm:$0xff] }
 0x4f5   :  { %v2522_v16 = vadd.f32 %v2518_v6, %v2502_v21  ;;  %v3117_v26 = vadd.f32 %v3113_v46, %v3097_v61  ;;  %v3880_v20 = vadd.f32 %v3876_v36, %v3860_v24  ;;  %v3895_v30 = vsel %vm178_vm3, %v10542_v0, %v10540_v43  ;;  %v10546_v21 = vld [vmem:[#allocation41_spill] sm:$0xff]  ;;  %v10558_v48 = vld [vmem:[#allocation62_spill] sm:$0xff] }
 0x4f6   :  { %v3879_v42 = vadd.f32 %v3875_v3, %v3859_v50  ;;  %v3114_v2 = vsel %vm136_vm1, %v8290_v25, %v10547_v14  ;;  %v3098_v27 = vadd.f32 %v3094_v41, %v3078_v17  ;;  %v3452_v32 = vstv %s8705_s20  ;;  %v10552_v36 = vld [vmem:[#allocation49_spill] sm:$0xff]  ;;  %v10553_v3 = vld [vmem:[#allocation56_spill] sm:$0xff]  ;;  %s5324_s20 = sld [smem:[#allocation2 + $0x217]] }
 0x4f7   :  { %v8739_v40 = vadd.f32 %v2538_v49, %v2522_v16  ;;  %v3137_v1 = vadd.f32 %v3133_v19, %v3117_v26  ;;  %v3900_v59 = vadd.f32 %v3896_v23, %v3880_v20  ;;  %v10549_v16 = vld [vmem:[#allocation57_spill] sm:$0xff]  ;;  %v10551_v49 = vld [vmem:[#allocation47_spill] sm:$0xff]  ;;  %v8772_v25 = vadd.f32 %v2537_v18, %v2521_v10  ;;  %v10555_v50 = vld [vmem:[#allocation64_spill] sm:$0xff] }
 0x4f8   :  { %v3173_v44 = vsel %vm199_vm4, %v10549_v16, %v10548_v8  ;;  %v3936_v53 = vsel %vm220_vm5, %v10551_v49, %v10550_v34  ;;  %v3899_v29 = vadd.f32 %v3895_v30, %v3879_v42  ;;  %v3118_v46 = vadd.f32 %v3114_v2, %v3098_v27  ;;  %v10556_v10 = vld [vmem:[#allocation53_spill] sm:$0xff]  ;;  %v10560_v20 = vld [vmem:[#allocation70_spill] sm:$0xff]  ;;  %v10561_v42 = vld [vmem:[#allocation59_spill] sm:$0xff] }
 0x4f9   :  { %3441 = vrot.lane.b32.xlu1 %v3434_v9, %s10341_s4  ;;  %3439 = vrot.lane.b32.xlu0 %v3433_v37, %s10341_s4  ;;  %v10543_v9 = vld [vmem:[#allocation44_spill] sm:$0xff]  ;;  %v10544_v37 = vld [vmem:[#allocation51_spill] sm:$0xff]  ;;  %v3134_v24 = vsel %vm157_vm2, %v8314_v52, %v10552_v36  ;;  %v3956_v18 = vsel %vm241_vm6, %v10556_v10, %v10555_v50  ;;  %v3454_v43 = vmul.f32 %v8663_v38, %v3452_v32  ;;  %v10559_v41 = vld [vmem:[#allocation69_spill] sm:$0xff]  ;;  %v3982_v14 = vstv %s8744_s28  ;;  %s8988_s28 = sld [smem:[#allocation2 + $0x192]] }
 0x4fa   :  { %3443 = vrot.lane.b32.xlu2 %v3435_v11, %s10341_s4  ;;  %v3153_v6 = vsel %vm178_vm3, %v10544_v37, %v10543_v9  ;;  %v10545_v11 = vld [vmem:[#allocation52_spill] sm:$0xff]  ;;  %v3453_v23 = vmul.f32 %v8669_v22, %v3452_v32  ;;  %v3213_v26 = vsel %vm241_vm6, %v10559_v41, %v10558_v48  ;;  %v3976_v0 = vsel %vm262_vm7, %v10561_v42, %v10560_v20  ;;  %v10562_v37 = vld [vmem:[#allocation55_spill] sm:$0xff]  ;;  %v10564_v16 = vld [vmem:[#allocation61_spill] sm:$0xff] }
 0x4fb   :  { %v8715_v62 = vpop.permute.xlu1 %3333  ;;  %v8717_v39 = vpop.permute.xlu0 %4099  ;;  %v3916_v45 = vsel %vm199_vm4, %v10546_v21, %v10545_v11  ;;  %v3157_v58 = vadd.f32 %v3153_v6, %v3137_v1  ;;  %v10557_v52 = vld [vmem:[#allocation48_spill] sm:$0xff]  ;;  %v3455_v30 = vmul.f32 %v8678_v55, %v3452_v32  ;;  %v3154_v6 = vsel %vm178_vm3, %v10543_v9, %v10562_v37  ;;  %v10565_v9 = vld [vmem:[#allocation34_spill] sm:$0xff] }
 0x4fc   :  { %v8725_v54 = vpop.permute.xlu2 %4137  ;;  %v3920_v63 = vadd.f32 %v3916_v45, %v3900_v59  ;;  %v3138_v2 = vadd.f32 %v3134_v24, %v3118_v46  ;;  %v3984_v59 = vmul.f32 %v8374_v60, %v3982_v14  ;;  %v3240_v27 = vstv %s8755_s22  ;;  %v10566_v32 = vld [vmem:[#allocation14_spill] sm:$0xff]  ;;  %v10568_v24 = vld [vmem:[#allocation67_spill] sm:$0xff]  ;;  %v10571_v41 = vld [vmem:[#allocation68_spill] sm:$0xff]  ;;  %s5395_s22 = sld [smem:[#allocation2 + $0x299]] }
 0x4fd   :  { %v3177_v19 = vadd.f32 %v3173_v44, %v3157_v58  ;;  %v3174_v44 = vsel %vm199_vm4, %v10548_v8, %v10564_v16  ;;  %v2558_v58 = vsel %vm157_vm2, %v10566_v32, %v10565_v9  ;;  %v4234_v36 = vstv %s8769_s25  ;;  %s5262_s25 = sld [smem:[#allocation2 + $0x19e]] }
 0x4fe   :  { %v3940_v47 = vadd.f32 %v3936_v53, %v3920_v63  ;;  %v3158_v46 = vadd.f32 %v3154_v6, %v3138_v2  ;;  %v3241_v50 = vmul.f32 %v8367_v13, %v3240_v27  ;;  %v10573_v6 = vld [vmem:[#allocation73_spill] sm:$0xff] }
 0x4ff   :  { %v10575_v2 = vld [vmem:[#allocation81_spill] sm:$0xff] }
 0x500   :  { %v3960_v45 = vadd.f32 %v3956_v18, %v3940_v47  ;;  %v10569_v47 = vld [vmem:[#allocation54_spill] sm:$0xff] }
 0x501   :  { %4223 = vrot.lane.b32.xlu1 %v4216_v15, %s5561_s1  ;;  %4221 = vrot.lane.b32.xlu0 %v4215_v56, %s5561_s1  ;;  %v10554_v15 = vld [vmem:[#allocation63_spill] sm:$0xff] }
 0x502   :  { %4225 = vrot.lane.b32.xlu2 %v4217_v12, %s5561_s1  ;;  %v3193_v56 = vsel %vm220_vm5, %v10554_v15, %v10553_v3  ;;  %v3915_v12 = vsel %vm199_vm4, %v10557_v52, %v10546_v21  ;;  %v10563_v21 = vld [vmem:[#allocation65_spill] sm:$0xff]  ;;  %v3980_v53 = vadd.f32 %v3976_v0, %v3960_v45  ;;  %v3194_v15 = vsel %vm220_vm5, %v10553_v3, %v10568_v24  ;;  %v10570_v52 = vld [vmem:[#allocation78_spill] sm:$0xff] }
 0x503   :  { %v8774_v61 = vpop.permute.xlu1 %4115  ;;  %v8776_v17 = vpop.permute.xlu0 %3337  ;;  %v3197_v11 = vadd.f32 %v3193_v56, %v3177_v19  ;;  %v3233_v1 = vsel %vm262_vm7, %v8469_v57, %v10563_v21  ;;  %v10567_v57 = vld [vmem:[#allocation9_spill] sm:$0xff]  ;;  %v3919_v8 = vadd.f32 %v3915_v12, %v3899_v29  ;;  %v10572_v12 = vld [vmem:[#allocation72_spill] sm:$0xff]  ;;  %v10579_v24 = vld [vmem:[#allocation86_spill] sm:$0xff] }
 0x504   :  { %v8787_v28 = vpop.permute.xlu2 %3375  ;;  %v8823_v63 = vsel %vm157_vm2, %v10567_v57, %v10566_v32  ;;  %v3214_v20 = vsel %vm241_vm6, %v10558_v48, %v10572_v12  ;;  %v3986_v0 = vadd.f32 %v3984_v59, %v3980_v53  ;;  %v10577_v48 = vld [vmem:[#allocation75_spill] sm:$0xff]  ;;  %v2836_v12 = vstv %s8826_s29  ;;  %s5325_s29 = sld [smem:[#allocation2 + $0x218]] }
 0x505   :  { %v3217_v34 = vadd.f32 %v3213_v26, %v3197_v11  ;;  %v4002_v26 = vsel %vm115_vm0, %v10571_v41, %v10570_v52  ;;  %v10574_v11 = vld [vmem:[#allocation80_spill] sm:$0xff]  ;;  %v3234_v59 = vsel %vm262_vm7, %v10563_v21, %v10577_v48  ;;  %v10585_v52 = vld [vmem:[#allocation82_spill] sm:$0xff] }
 0x506   :  { %v3259_v45 = vsel %vm115_vm0, %v10574_v11, %v10573_v6  ;;  %v4006_v53 = vadd.f32 %v4002_v26, %v3986_v0 }
 0x507   :  { %v3237_v56 = vadd.f32 %v3233_v1, %v3217_v34  ;;  %v10576_v1 = vld [vmem:[#allocation71_spill] sm:$0xff]  ;;  %v8860_v34 = vadd.f32 %v2558_v58, %v8739_v40  ;;  %v3242_v58 = vmul.f32 %v8374_v60, %v3240_v27  ;;  %v10586_v60 = vld [vmem:[#allocation60_spill] sm:$0xff] }
 0x508   :  { %v4022_v16 = vsel %vm136_vm1, %v10576_v1, %v10575_v2  ;;  %v3955_v27 = vsel %vm241_vm6, %v10586_v60, %v10556_v10 }
 0x509   :  { %3461 = vrot.lane.b32.xlu1 %v3454_v43, %s5560_s0  ;;  %3459 = vrot.lane.b32.xlu0 %v3453_v23, %s5560_s0  ;;  %v3935_v43 = vsel %vm220_vm5, %v10569_v47, %v10551_v49  ;;  %v3178_v23 = vadd.f32 %v3174_v44, %v3158_v46  ;;  %v4235_v49 = vmul.f32 %v8669_v22, %v4234_v36  ;;  %v10578_v46 = vld [vmem:[#allocation79_spill] sm:$0xff]  ;;  %v10581_v47 = vld [vmem:[#allocation76_spill] sm:$0xff] }
 0x50a   :  { %3463 = vrot.lane.b32.xlu2 %v3455_v30, %s5560_s0  ;;  %v4236_v30 = vmul.f32 %v8663_v38, %v4234_v36  ;;  %v4237_v44 = vmul.f32 %v8678_v55, %v4234_v36  ;;  %v3243_v9 = vadd.f32 %v3241_v50, %v3237_v56  ;;  %v3939_v32 = vadd.f32 %v3935_v43, %v3919_v8  ;;  %v10582_v56 = vld [vmem:[#allocation85_spill] sm:$0xff]  ;;  %v10583_v8 = vld [vmem:[#allocation92_spill] sm:$0xff] }
 0x50b   :  { %v3354_v18 = vpop.permute.xlu1 %3353  ;;  %v8833_v19 = vpop.permute.xlu0 %4119  ;;  %v3198_v37 = vadd.f32 %v3194_v15, %v3178_v23  ;;  %v3279_v15 = vsel %vm136_vm1, %v10579_v24, %v10578_v46  ;;  %v4026_v40 = vadd.f32 %v4022_v16, %v4006_v53  ;;  %v3299_v50 = vsel %vm157_vm2, %v10583_v8, %v10582_v56  ;;  %v10584_v43 = vld [vmem:[#allocation93_spill] sm:$0xff]  ;;  %v10589_v16 = vld [vmem:[#allocation88_spill] sm:$0xff] }
 0x50c   :  { %v8843_v29 = vsel %vm220_vm5, %v3354_v18, %v8656_v5  ;;  %v8845_v3 = vpop.permute.xlu2 %2761  ;;  %v10580_v18 = vld [vmem:[#allocation87_spill] sm:$0xff]  ;;  %v3263_v23 = vadd.f32 %v3259_v45, %v3243_v9  ;;  %v4062_v26 = vsel %vm178_vm3, %v10585_v52, %v10584_v43  ;;  %v3339_v24 = vsel %vm199_vm4, %v8715_v62, %v8582_v31  ;;  %v10594_v43 = vld [vmem:[#allocation25_spill] sm:$0xff] }
 0x50d   :  { %v3218_v57 = vadd.f32 %v3214_v20, %v3198_v37  ;;  %v4042_v36 = vsel %vm157_vm2, %v10581_v47, %v10580_v18  ;;  %v10587_v20 = vld [vmem:[#allocation84_spill] sm:$0xff]  ;;  %v10588_v45 = vld [vmem:[#allocation91_spill] sm:$0xff]  ;;  %v3959_v60 = vadd.f32 %v3955_v27, %v3939_v32  ;;  %v3472_v27 = vstv %s8881_s27  ;;  %s9000_s27 = sld [smem:[#allocation2 + $0x19d]] }
 0x50e   :  { %v3260_v0 = vsel %vm115_vm0, %v10573_v6, %v10587_v20  ;;  %v3319_v2 = vsel %vm178_vm3, %v8613_v35, %v10588_v45  ;;  %v8909_v35 = vld [vmem:[%s10286_s23 + $0x50] sm:$0xff] }
 0x50f   :  { %v3238_v21 = vadd.f32 %v3234_v59, %v3218_v57  ;;  %v2838_v9 = vmul.f32 %v8909_v35, %v2836_v12 }
 0x511   :  { %4243 = vrot.lane.b32.xlu1 %v4236_v30, %s5562_s21  ;;  %4241 = vrot.lane.b32.xlu0 %v4235_v49, %s5562_s21  ;;  %v3283_v30 = vadd.f32 %v3279_v15, %v3263_v23  ;;  %v4046_v49 = vadd.f32 %v4042_v36, %v4026_v40  ;;  %v10590_v15 = vld [vmem:[#allocation94_spill] sm:$0xff]  ;;  %v8927_v36 = vld [vmem:[%s10286_s23 + $0x58] sm:$0xff] }
 0x512   :  { %4245 = vrot.lane.b32.xlu2 %v4237_v44, %s5562_s21  ;;  %v4082_v44 = vsel %vm199_vm4, %v10589_v16, %v8615_v4  ;;  %v8915_v4 = vld [vmem:[%s10286_s23 + $0x48] sm:$0xff]  ;;  %v4102_v18 = vsel %vm220_vm5, %v10590_v15, %v8717_v39  ;;  %v2839_v23 = vmul.f32 %v8927_v36, %v2836_v12  ;;  %v10591_v40 = vld [vmem:[#allocation66_spill] sm:$0xff] }
 0x513   :  { %v4136_v37 = vpop.permute.xlu1 %4135  ;;  %v3358_v11 = vpop.permute.xlu0 %3357  ;;  %v3303_v59 = vadd.f32 %v3299_v50, %v3283_v30  ;;  %v4066_v53 = vadd.f32 %v4062_v26, %v4046_v49  ;;  %v2837_v57 = vmul.f32 %v8915_v4, %v2836_v12  ;;  %v10593_v39 = vld [vmem:[#allocation22_spill] sm:$0xff]  ;;  %v4122_v12 = vsel %vm241_vm6, %v8622_v51, %v8833_v19  ;;  %v10595_v30 = vld [vmem:[#allocation96_spill] sm:$0xff]  ;;  %v10596_v19 = vld [vmem:[#allocation17_spill] sm:$0xff] }
 0x514   :  { %v8898_v48 = vsel %vm262_vm7, %v4136_v37, %v8725_v54  ;;  %v8902_v10 = vsel %vm220_vm5, %v8656_v5, %v3358_v11  ;;  %v8904_v6 = vpop.permute.xlu2 %3397  ;;  %v3244_v5 = vadd.f32 %v3242_v58, %v3238_v21  ;;  %v3975_v58 = vsel %vm262_vm7, %v10591_v40, %v10561_v42  ;;  %v10592_v21 = vld [vmem:[#allocation90_spill] sm:$0xff] }
 0x515   :  { %v3280_v62 = vsel %vm136_vm1, %v10578_v46, %v10592_v21  ;;  %v3323_v8 = vadd.f32 %v3319_v2, %v3303_v59  ;;  %v4086_v50 = vadd.f32 %v4082_v44, %v4066_v53  ;;  %v2578_v26 = vsel %vm178_vm3, %v10594_v43, %v10593_v39  ;;  %v10599_v21 = vld [vmem:[#allocation28_spill] sm:$0xff] }
 0x516   :  { %v3264_v20 = vadd.f32 %v3260_v0, %v3244_v5  ;;  %v3300_v42 = vsel %vm157_vm2, %v10582_v56, %v10595_v30  ;;  %v3979_v46 = vadd.f32 %v3975_v58, %v3959_v60  ;;  %v3983_v11 = vmul.f32 %v8367_v13, %v3982_v14  ;;  %v10597_v0 = vld [vmem:[#allocation74_spill] sm:$0xff]  ;;  %v10602_v60 = vld [vmem:[#allocation83_spill] sm:$0xff] }
 0x517   :  { %v3343_v49 = vadd.f32 %v3339_v24, %v3323_v8  ;;  %v4106_v37 = vadd.f32 %v4102_v18, %v4086_v50  ;;  %v2577_v56 = vsel %vm178_vm3, %v10596_v19, %v10594_v43  ;;  %v4001_v2 = vsel %vm115_vm0, %v10597_v0, %v10571_v41  ;;  %v10598_v58 = vld [vmem:[#allocation18_spill] sm:$0xff]  ;;  %v10600_v8 = vld [vmem:[#allocation13_spill] sm:$0xff] }
 0x518   :  { %v3284_v32 = vadd.f32 %v3280_v62, %v3264_v20  ;;  %v3320_v14 = vsel %vm178_vm3, %v10588_v45, %v8653_v33  ;;  %v2561_v40 = vadd.f32 %v8823_v63, %v8772_v25  ;;  %v3985_v33 = vadd.f32 %v3983_v11, %v3979_v46  ;;  %v10601_v25 = vld [vmem:[#allocation77_spill] sm:$0xff]  ;;  %v10605_v46 = vld [vmem:[#allocation20_spill] sm:$0xff] }
 0x519   :  { %2845 = vrot.lane.b32.xlu1 %v2838_v9, %s10396_s30  ;;  %2843 = vrot.lane.b32.xlu0 %v2837_v57, %s10396_s30  ;;  %v3363_v44 = vadd.f32 %v8843_v29, %v3343_v49  ;;  %v4126_v59 = vadd.f32 %v4122_v12, %v4106_v37  ;;  %v3474_v29 = vmul.f32 %v8663_v38, %v3472_v27  ;;  %v4254_v37 = vstv %s8951_s5  ;;  %v10606_v11 = vld [vmem:[#allocation89_spill] sm:$0xff]  ;;  %s5319_s5 = sld [smem:[#allocation2 + $0x212]] }
 0x51a   :  { %2847 = vrot.lane.b32.xlu2 %v2839_v23, %s10396_s30  ;;  %v3304_v13 = vadd.f32 %v3300_v42, %v3284_v32  ;;  %v3473_v23 = vmul.f32 %v8669_v22, %v3472_v27  ;;  %v3340_v45 = vsel %vm199_vm4, %v8582_v31, %v8776_v17  ;;  %v2598_v62 = vsel %vm199_vm4, %v10599_v21, %v10598_v58  ;;  %v10607_v0 = vld [vmem:[#allocation21_spill] sm:$0xff] }
 0x51b   :  { %v3374_v53 = vpop.permute.xlu1 %3373  ;;  %v4140_v9 = vpop.permute.xlu0 %4139  ;;  %v2597_v50 = vsel %vm199_vm4, %v10600_v8, %v10599_v21  ;;  %v4021_v63 = vsel %vm136_vm1, %v10601_v25, %v10576_v1  ;;  %v2582_v31 = vadd.f32 %v2578_v26, %v8860_v34  ;;  %v2581_v17 = vadd.f32 %v2577_v56, %v2561_v40  ;;  %v10603_v1 = vld [vmem:[#allocation19_spill] sm:$0xff]  ;;  %v10613_v8 = vld [vmem:[#allocation26_spill] sm:$0xff] }
 0x51c   :  { %v3379_v57 = vsel %vm241_vm6, %v3374_v53, %v8787_v28  ;;  %v4142_v5 = vsel %vm262_vm7, %v8725_v54, %v4140_v9  ;;  %v8968_v24 = vpop.permute.xlu2 %4165  ;;  %v3475_v54 = vmul.f32 %v8678_v55, %v3472_v27  ;;  %v3324_v39 = vadd.f32 %v3320_v14, %v3304_v13  ;;  %v10604_v34 = vld [vmem:[#allocation31_spill] sm:$0xff] }
 0x51d   :  { %v8970_v18 = vadd.f32 %v3379_v57, %v3363_v44  ;;  %v8972_v41 = vadd.f32 %v4142_v5, %v4126_v59  ;;  %v4005_v43 = vadd.f32 %v4001_v2, %v3985_v33  ;;  %v4041_v20 = vsel %vm157_vm2, %v10602_v60, %v10581_v47  ;;  %v10608_v2 = vld [vmem:[#allocation30_spill] sm:$0xff] }
 0x51e   :  { %v3344_v12 = vadd.f32 %v3340_v45, %v3324_v39  ;;  %v2602_v30 = vadd.f32 %v2598_v62, %v2582_v31  ;;  %v2601_v42 = vadd.f32 %v2597_v50, %v2581_v17  ;;  %v2618_v26 = vsel %vm220_vm5, %v10604_v34, %v10603_v1  ;;  %v10611_v45 = vld [vmem:[#allocation24_spill] sm:$0xff] }
 0x51f   :  { %v4025_v49 = vadd.f32 %v4021_v63, %v4005_v43  ;;  %v2617_v47 = vsel %vm220_vm5, %v10605_v46, %v10604_v34  ;;  %v4061_v32 = vsel %vm178_vm3, %v10606_v11, %v10585_v52  ;;  %v2638_v44 = vsel %vm241_vm6, %v10608_v2, %v10607_v0  ;;  %v10615_v11 = vld [vmem:[#allocation16_spill] sm:$0xff] }
 0x520   :  { %v3364_v27 = vadd.f32 %v8902_v10, %v3344_v12  ;;  %v10609_v10 = vld [vmem:[#allocation95_spill] sm:$0xff]  ;;  %v4256_v57 = vmul.f32 %v8663_v38, %v4254_v37  ;;  %v4255_v5 = vmul.f32 %v8669_v22, %v4254_v37  ;;  %v2621_v33 = vadd.f32 %v2617_v47, %v2601_v42 }
 0x521   :  { %3481 = vrot.lane.b32.xlu1 %v3474_v29, %s5561_s1  ;;  %3479 = vrot.lane.b32.xlu0 %v3473_v23, %s5561_s1  ;;  %v4045_v59 = vadd.f32 %v4041_v20, %v4025_v49  ;;  %v4081_v13 = vsel %vm199_vm4, %v10609_v10, %v10589_v16  ;;  %v2622_v29 = vadd.f32 %v2618_v26, %v2602_v30  ;;  %v2664_v16 = vstv %s8988_s28  ;;  %v10614_v47 = vld [vmem:[#allocation27_spill] sm:$0xff]  ;;  %s5396_s28 = sld [smem:[#allocation2 + $0x29a]] }
 0x522   :  { %3483 = vrot.lane.b32.xlu2 %v3475_v54, %s5561_s1  ;;  %v10612_v54 = vld [vmem:[#allocation33_spill] sm:$0xff]  ;;  %v4101_v21 = vsel %vm220_vm5, %v8651_v7, %v10590_v15  ;;  %v4121_v39 = vsel %vm241_vm6, %v8774_v61, %v8622_v51  ;;  %v2666_v17 = vmul.f32 %v8663_v38, %v2664_v16  ;;  %v2856_v15 = vstv %s9000_s27  ;;  %s5263_s27 = sld [smem:[#allocation2 + $0x19f]] }
 0x523   :  { %v9013_v19 = vpop.permute.xlu1 %2759  ;;  %v3378_v56 = vpop.permute.xlu0 %3377  ;;  %v4065_v40 = vadd.f32 %v4061_v32, %v4045_v59  ;;  %v2658_v58 = vsel %vm262_vm7, %v10612_v54, %v10611_v45  ;;  %v2642_v62 = vadd.f32 %v2638_v44, %v2622_v29  ;;  %v2657_v50 = vsel %vm262_vm7, %v10613_v8, %v10612_v54  ;;  %v10617_v59 = vld [vmem:[#allocation11_spill] sm:$0xff]  ;;  %v10620_v45 = vld [vmem:[#allocation10_spill] sm:$0xff]  ;;  %v10621_v54 = vld [vmem:[#allocation8_spill] sm:$0xff] }
 0x524   :  { %v9021_v53 = vsel %vm199_vm4, %v9013_v19, %v8845_v3  ;;  %v3380_v9 = vsel %vm241_vm6, %v8787_v28, %v3378_v56  ;;  %v9027_v52 = vpop.permute.xlu2 %2781  ;;  %v10610_v3 = vld [vmem:[#allocation23_spill] sm:$0xff]  ;;  %v4257_v28 = vmul.f32 %v8678_v55, %v4254_v37  ;;  %v2665_v60 = vmul.f32 %v8669_v22, %v2664_v16 }
 0x525   :  { %v3384_v14 = vadd.f32 %v3380_v9, %v3364_v27  ;;  %v2637_v23 = vsel %vm241_vm6, %v10610_v3, %v10608_v2  ;;  %v4085_v25 = vadd.f32 %v4081_v13, %v4065_v40  ;;  %v2662_v31 = vadd.f32 %v2658_v58, %v2642_v62  ;;  %v10618_v9 = vld [vmem:[#allocation12_spill] sm:$0xff]  ;;  %v10619_v13 = vld [vmem:[#allocation15_spill] sm:$0xff] }
 0x526   :  { %v2641_v63 = vadd.f32 %v2637_v23, %v2621_v33  ;;  %v4148_v42 = vstv %s9025_s26  ;;  %v2858_v34 = vmul.f32 %v8909_v35, %v2856_v15  ;;  %v2857_v26 = vmul.f32 %v8915_v4, %v2856_v15  ;;  %v10622_v16 = vld [vmem:[#allocation35_spill] sm:$0xff]  ;;  %s5326_s26 = sld [smem:[#allocation2 + $0x219]] }
 0x527   :  { %v4105_v7 = vadd.f32 %v4101_v21, %v4085_v25  ;;  %v2668_v46 = vadd.f32 %v2666_v17, %v2662_v31  ;;  %v2684_v32 = vsel %vm115_vm0, %v10615_v11, %v10614_v47  ;;  %v2859_v56 = vmul.f32 %v8927_v36, %v2856_v15  ;;  %v10623_v31 = vld [vmem:[#allocation32_spill] sm:$0xff]  ;;  %v10625_v15 = vld [vmem:[#allocation37_spill] sm:$0xff] }
 0x528   :  { %v2661_v43 = vadd.f32 %v2657_v50, %v2641_v63  ;;  %v4149_v44 = vmul.f32 %v8669_v22, %v4148_v42  ;;  %v2704_v10 = vsel %vm136_vm1, %v10618_v9, %v10617_v59  ;;  %v3492_v29 = vstv %s5324_s20  ;;  %v10624_v17 = vld [vmem:[#allocation36_spill] sm:$0xff]  ;;  %s5264_s20 = sld [smem:[#allocation2 + $0x1a0]] }
 0x529   :  { %4263 = vrot.lane.b32.xlu1 %v4256_v57, %s5563_s2  ;;  %4261 = vrot.lane.b32.xlu0 %v4255_v5, %s5563_s2  ;;  %v4125_v30 = vadd.f32 %v4121_v39, %v4105_v7  ;;  %v2688_v57 = vadd.f32 %v2684_v32, %v2668_v46  ;;  %v2724_v58 = vsel %vm157_vm2, %v10621_v54, %v10620_v45 }
 0x52a   :  { %4265 = vrot.lane.b32.xlu2 %v4257_v28, %s5563_s2  ;;  %v2667_v0 = vadd.f32 %v2665_v60, %v2661_v43  ;;  %v2723_v21 = vsel %vm157_vm2, %v10622_v16, %v10621_v54  ;;  %v3493_v39 = vmul.f32 %v8669_v22, %v3492_v29  ;;  %v2744_v7 = vsel %vm178_vm3, %v10624_v17, %v10623_v31 }
 0x52b   :  { %v3396_v20 = vpop.permute.xlu1 %3395  ;;  %v3394_v12 = vpop.permute.xlu0 %3393  ;;  %v4145_v2 = vadd.f32 %v8898_v48, %v4125_v30  ;;  %v2708_v48 = vadd.f32 %v2704_v10, %v2688_v57  ;;  %v2743_v43 = vsel %vm178_vm3, %v10625_v15, %v10624_v17  ;;  %v3495_v60 = vmul.f32 %v8678_v55, %v3492_v29 }
 0x52c   :  { %v3400_v51 = vsel %vm262_vm7, %v3396_v20, %v8904_v6  ;;  %v3399_v61 = vsel %vm262_vm7, %v3394_v12, %v3396_v20  ;;  %v9061_v49 = vpop.permute.xlu2 %4185  ;;  %v10616_v6 = vld [vmem:[#allocation29_spill] sm:$0xff]  ;;  %v10626_v12 = vld [vmem:[#allocation38_spill] sm:$0xff] }
 0x52d   :  { %v9063_v37 = vadd.f32 %v3400_v51, %v3384_v14  ;;  %v9066_v1 = vadd.f32 %v3399_v61, %v8970_v18  ;;  %v2683_v27 = vsel %vm115_vm0, %v10616_v6, %v10615_v11  ;;  %v4150_v18 = vmul.f32 %v8663_v38, %v4148_v42 }
 0x52e   :  { %v2703_v14 = vsel %vm136_vm1, %v10619_v13, %v10618_v9  ;;  %v2687_v5 = vadd.f32 %v2683_v27, %v2667_v0  ;;  %v4151_v28 = vadd.f32 %v4149_v44, %v4145_v2  ;;  %v2763_v30 = vsel %vm199_vm4, %v10626_v12, %v9013_v19 }
 0x52f   :  { %v4152_v40 = vadd.f32 %v4150_v18, %v8972_v41  ;;  %v3494_v41 = vmul.f32 %v8663_v38, %v3492_v29  ;;  %v4274_v42 = vstv %s5395_s22  ;;  %v3512_v29 = vstv %s5325_s29  ;;  %s5327_s22 = sld [smem:[#allocation2 + $0x21a]] }
 0x530   :  { %v2707_v3 = vadd.f32 %v2703_v14, %v2687_v5  ;;  %v4275_v0 = vmul.f32 %v8669_v22, %v4274_v42  ;;  %v4277_v2 = vmul.f32 %v8678_v55, %v4274_v42  ;;  %v3514_v54 = vmul.f32 %v8663_v38, %v3512_v29  ;;  %s5265_s29 = sld [smem:[#allocation2 + $0x1a1]] }
 0x531   :  { %2865 = vrot.lane.b32.xlu1 %v2858_v34, %s10341_s4  ;;  %2863 = vrot.lane.b32.xlu0 %v2857_v26, %s10341_s4  ;;  %v3515_v16 = vmul.f32 %v8678_v55, %v3512_v29 }
 0x532   :  { %2867 = vrot.lane.b32.xlu2 %v2859_v56, %s10341_s4  ;;  %v2727_v20 = vadd.f32 %v2723_v21, %v2707_v3  ;;  %v4276_v56 = vmul.f32 %v8663_v38, %v4274_v42 }
 0x533   :  { %v4164_v23 = vpop.permute.xlu1 %4163  ;;  %v4162_v33 = vpop.permute.xlu0 %4161 }
 0x534   :  { %v4168_v62 = vsel %vm115_vm0, %v4164_v23, %v8968_v24  ;;  %v4167_v8 = vsel %vm115_vm0, %v4162_v33, %v4164_v23  ;;  %v2802_v50 = vpop.permute.xlu2 %2801  ;;  %v2728_v24 = vadd.f32 %v2724_v58, %v2708_v48  ;;  %v2747_v61 = vadd.f32 %v2743_v43, %v2727_v20 }
 0x535   :  { %v4172_v25 = vadd.f32 %v4168_v62, %v4152_v40  ;;  %v4171_v63 = vadd.f32 %v4167_v8, %v4151_v28  ;;  %v3406_v40 = vstv %s5319_s5  ;;  %v3513_v58 = vmul.f32 %v8669_v22, %v3512_v29  ;;  %s5259_s5 = sld [smem:[#allocation2 + $0x19b]] }
 0x536   :  { %v2748_v51 = vadd.f32 %v2744_v7, %v2728_v24  ;;  %v2767_v34 = vadd.f32 %v2763_v30, %v2747_v61  ;;  %v3408_v21 = vmul.f32 %v8663_v38, %v3406_v40  ;;  %v3407_v62 = vmul.f32 %v8669_v22, %v3406_v40 }
 0x537   :  { %v4294_v8 = vstv %s5396_s28  ;;  %s5399_s28 = sld [smem:[#allocation2 + $0x29d]] }
 0x538   :  { %v2768_v26 = vadd.f32 %v9021_v53, %v2748_v51  ;;  %v2876_v53 = vstv %s5262_s25  ;;  %v4296_v43 = vmul.f32 %v8663_v38, %v4294_v8  ;;  %v4297_v24 = vmul.f32 %v8678_v55, %v4294_v8  ;;  %s5398_s25 = sld [smem:[#allocation2 + $0x29c]] }
 0x539   :  { %3501 = vrot.lane.b32.xlu1 %v3494_v41, %s5562_s21  ;;  %3499 = vrot.lane.b32.xlu0 %v3493_v39, %s5562_s21  ;;  %v2878_v14 = vmul.f32 %v8909_v35, %v2876_v53  ;;  %v2877_v57 = vmul.f32 %v8915_v4, %v2876_v53  ;;  %v2879_v5 = vmul.f32 %v8927_v36, %v2876_v53 }
 0x53a   :  { %3503 = vrot.lane.b32.xlu2 %v3495_v60, %s5562_s21  ;;  %v4295_v60 = vmul.f32 %v8669_v22, %v4294_v8 }
 0x53b   :  { %v2780_v46 = vpop.permute.xlu1 %2779  ;;  %v2778_v47 = vpop.permute.xlu0 %2777 }
 0x53c   :  { %v2784_v11 = vsel %vm220_vm5, %v2780_v46, %v9027_v52  ;;  %v2783_v19 = vsel %vm220_vm5, %v2778_v47, %v2780_v46  ;;  %v3424_v32 = vpop.permute.xlu2 %3423  ;;  %v3532_v47 = vstv %s5326_s26  ;;  %s5329_s26 = sld [smem:[#allocation2 + $0x21c]] }
 0x53d   :  { %v2788_v6 = vadd.f32 %v2784_v11, %v2768_v26  ;;  %v2787_v27 = vadd.f32 %v2783_v19, %v2767_v34  ;;  %v3533_v53 = vmul.f32 %v8669_v22, %v3532_v47 }
 0x541   :  { %4283 = vrot.lane.b32.xlu1 %v4276_v56, %s10447_s24  ;;  %4281 = vrot.lane.b32.xlu0 %v4275_v0, %s10447_s24 }
 0x542   :  { %4285 = vrot.lane.b32.xlu2 %v4277_v2, %s10447_s24  ;;  %v3534_v2 = vmul.f32 %v8663_v38, %v3532_v47 }
 0x543   :  { %v4184_v52 = vpop.permute.xlu1 %4183  ;;  %v4182_v18 = vpop.permute.xlu0 %4181 }
 0x544   :  { %v4188_v44 = vsel %vm136_vm1, %v4184_v52, %v9061_v49  ;;  %v4187_v59 = vsel %vm136_vm1, %v4182_v18, %v4184_v52  ;;  %v4206_v9 = vpop.permute.xlu2 %4205  ;;  %v3535_v52 = vmul.f32 %v8678_v55, %v3532_v47  ;;  %v2916_v18 = vstv %s5264_s20  ;;  %s5400_s20 = sld [smem:[#allocation2 + $0x29e]] }
 0x545   :  { %v4192_v10 = vadd.f32 %v4188_v44, %v4172_v25  ;;  %v4191_v13 = vadd.f32 %v4187_v59, %v4171_v63  ;;  %v3410_v25 = vadd.f32 %v3408_v21, %v9063_v37  ;;  %v3409_v63 = vadd.f32 %v3407_v62, %v9066_v1 }
 0x546   :  { %v2896_v37 = vstv %s5263_s27  ;;  %v2917_v29 = vmul.f32 %v8915_v4, %v2916_v18  ;;  %v4320_v62 = vstv %s5398_s25  ;;  %s5266_s27 = sld [smem:[#allocation2 + $0x1a2]] }
 0x547   :  { %v2898_v34 = vmul.f32 %v8909_v35, %v2896_v37  ;;  %v2897_v26 = vmul.f32 %v8915_v4, %v2896_v37  ;;  %v2899_v46 = vmul.f32 %v8927_v36, %v2896_v37  ;;  %s5401_s25 = sld [smem:[#allocation2 + $0x29f]] }
 0x549   :  { %2885 = vrot.lane.b32.xlu1 %v2878_v14, %s5560_s0  ;;  %2883 = vrot.lane.b32.xlu0 %v2877_v57, %s5560_s0 }
 0x54a   :  { %2887 = vrot.lane.b32.xlu2 %v2879_v5, %s5560_s0  ;;  %v2918_v5 = vmul.f32 %v8909_v35, %v2916_v18 }
 0x54b   :  { %v2800_v49 = vpop.permute.xlu1 %2799  ;;  %v2798_v48 = vpop.permute.xlu0 %2797 }
 0x54c   :  { %v2804_v3 = vsel %vm241_vm6, %v2800_v49, %v2802_v50  ;;  %v2803_v23 = vsel %vm241_vm6, %v2798_v48, %v2800_v49  ;;  %v2822_v28 = vpop.permute.xlu2 %2821  ;;  %v2919_v49 = vmul.f32 %v8927_v36, %v2916_v18  ;;  %v3552_v48 = vstv %s5327_s22  ;;  %s5267_s22 = sld [smem:[#allocation2 + $0x1a3]] }
 0x54d   :  { %v2808_v33 = vadd.f32 %v2804_v3, %v2788_v6  ;;  %v2807_v45 = vadd.f32 %v2803_v23, %v2787_v27  ;;  %v3555_v21 = vmul.f32 %v8678_v55, %v3552_v48  ;;  %v4322_v55 = vmul.f32 %v8909_v35, %v4320_v62 }
 0x551   :  { %3521 = vrot.lane.b32.xlu1 %v3514_v54, %s5563_s2  ;;  %3519 = vrot.lane.b32.xlu0 %v3513_v58, %s5563_s2  ;;  %v3554_v58 = vmul.f32 %v8663_v38, %v3552_v48 }
 0x552   :  { %3523 = vrot.lane.b32.xlu2 %v3515_v16, %s5563_s2  ;;  %v3553_v16 = vmul.f32 %v8669_v22, %v3552_v48 }
 0x553   :  { %v3422_v50 = vpop.permute.xlu1 %3421  ;;  %v3420_v41 = vpop.permute.xlu0 %3419 }
 0x554   :  { %v3426_v39 = vsel %vm115_vm0, %v3422_v50, %v3424_v32  ;;  %v3425_v31 = vsel %vm115_vm0, %v3420_v41, %v3422_v50  ;;  %v3444_v17 = vpop.permute.xlu2 %3443 }
 0x555   :  { %v3430_v7 = vadd.f32 %v3426_v39, %v3410_v25  ;;  %v3429_v15 = vadd.f32 %v3425_v31, %v3409_v63  ;;  %v4321_v39 = vmul.f32 %v8915_v4, %v4320_v62  ;;  %v4323_v31 = vmul.f32 %v8927_v36, %v4320_v62 }
 0x559   :  { %4303 = vrot.lane.b32.xlu1 %v4296_v43, %s10448_s19  ;;  %4301 = vrot.lane.b32.xlu0 %v4295_v60, %s10448_s19 }
 0x55a   :  { %4305 = vrot.lane.b32.xlu2 %v4297_v24, %s10448_s19  ;;  %v2830_v24 = vstv %s5259_s5  ;;  %s5332_s5 = sld [smem:[#allocation2 + $0x21f]] }
 0x55b   :  { %v4204_v1 = vpop.permute.xlu1 %4203  ;;  %v4202_v20 = vpop.permute.xlu0 %4201 }
 0x55c   :  { %v4208_v12 = vsel %vm157_vm2, %v4204_v1, %v4206_v9  ;;  %v4207_v30 = vsel %vm157_vm2, %v4202_v20, %v4204_v1  ;;  %v4226_v51 = vpop.permute.xlu2 %4225 }
 0x55d   :  { %v4212_v61 = vadd.f32 %v4208_v12, %v4192_v10  ;;  %v4211_v42 = vadd.f32 %v4207_v30, %v4191_v13 }
 0x561   :  { %2905 = vrot.lane.b32.xlu1 %v2898_v34, %s5561_s1  ;;  %2903 = vrot.lane.b32.xlu0 %v2897_v26, %s5561_s1  ;;  %v4340_v34 = vstv %s5399_s28  ;;  %s5333_s28 = sld [smem:[#allocation2 + $0x220]] }
 0x562   :  { %2907 = vrot.lane.b32.xlu2 %v2899_v46, %s5561_s1  ;;  %v4343_v18 = vmul.f32 %v8927_v36, %v4340_v34 }
 0x563   :  { %v2820_v11 = vpop.permute.xlu1 %2819  ;;  %v2818_v19 = vpop.permute.xlu0 %2817 }
 0x564   :  { %v2824_v32 = vsel %vm262_vm7, %v2820_v11, %v2822_v28  ;;  %v2823_v6 = vsel %vm262_vm7, %v2818_v19, %v2820_v11  ;;  %v3464_v27 = vpop.permute.xlu2 %3463 }
 0x565   :  { %v9163_v56 = vadd.f32 %v2824_v32, %v2808_v33  ;;  %v9165_v0 = vadd.f32 %v2823_v6, %v2807_v45 }
 0x569   :  { %3541 = vrot.lane.b32.xlu1 %v3534_v2, %s10447_s24  ;;  %3539 = vrot.lane.b32.xlu0 %v3533_v53, %s10447_s24  ;;  %v4342_v53 = vmul.f32 %v8909_v35, %v4340_v34 }
 0x56a   :  { %3543 = vrot.lane.b32.xlu2 %v3535_v52, %s10447_s24  ;;  %v4341_v52 = vmul.f32 %v8915_v4, %v4340_v34 }
 0x56b   :  { %v3442_v44 = vpop.permute.xlu1 %3441  ;;  %v3440_v59 = vpop.permute.xlu0 %3439 }
 0x56c   :  { %v3446_v9 = vsel %vm136_vm1, %v3442_v44, %v3444_v17  ;;  %v3445_v10 = vsel %vm136_vm1, %v3440_v59, %v3442_v44  ;;  %v4246_v13 = vpop.permute.xlu2 %4245  ;;  %v2936_v17 = vstv %s5265_s29  ;;  %s5331_s29 = sld [smem:[#allocation2 + $0x21e]] }
 0x56d   :  { %v3450_v14 = vadd.f32 %v3446_v9, %v3430_v7  ;;  %v3449_v57 = vadd.f32 %v3445_v10, %v3429_v15  ;;  %v2938_v12 = vmul.f32 %v8909_v35, %v2936_v17  ;;  %v2937_v30 = vmul.f32 %v8915_v4, %v2936_v17 }
 0x571   :  { %2925 = vrot.lane.b32.xlu1 %v2918_v5, %s5562_s21  ;;  %2923 = vrot.lane.b32.xlu0 %v2917_v29, %s5562_s21 }
 0x572   :  { %2927 = vrot.lane.b32.xlu2 %v2919_v49, %s5562_s21  ;;  %v3578_v49 = vstv %s5329_s26  ;;  %s9322_s26 = sld [smem:[#allocation2 + $0x221]] }
 0x573   :  { %v4224_v3 = vpop.permute.xlu1 %4223  ;;  %v4222_v23 = vpop.permute.xlu0 %4221 }
 0x574   :  { %v4228_v40 = vsel %vm178_vm3, %v4224_v3, %v4226_v51  ;;  %v4227_v28 = vsel %vm178_vm3, %v4222_v23, %v4224_v3  ;;  %v2848_v33 = vpop.permute.xlu2 %2847  ;;  %v2939_v51 = vmul.f32 %v8927_v36, %v2936_v17 }
 0x575   :  { %v4232_v45 = vadd.f32 %v4228_v40, %v4212_v61  ;;  %v4231_v54 = vadd.f32 %v4227_v28, %v4211_v42  ;;  %v2832_v61 = vmul.f32 %v8909_v35, %v2830_v24  ;;  %v2831_v42 = vmul.f32 %v8915_v4, %v2830_v24 }
 0x577   :  { %v2834_v26 = vadd.f32 %v2832_v61, %v9163_v56  ;;  %v2833_v47 = vadd.f32 %v2831_v42, %v9165_v0  ;;  %v2956_v56 = vstv %s5266_s27  ;;  %s9313_s27 = sld [smem:[#allocation2 + $0x29b]] }
 0x578   :  { %v2957_v5 = vmul.f32 %v8915_v4, %v2956_v56  ;;  %v2959_v29 = vmul.f32 %v8927_v36, %v2956_v56 }
 0x579   :  { %3561 = vrot.lane.b32.xlu1 %v3554_v58, %s10448_s19  ;;  %3559 = vrot.lane.b32.xlu0 %v3553_v16, %s10448_s19  ;;  %v3579_v58 = vmul.f32 %v8915_v4, %v3578_v49  ;;  %v3581_v16 = vmul.f32 %v8927_v36, %v3578_v49 }
 0x57a   :  { %3563 = vrot.lane.b32.xlu2 %v3555_v21, %s10448_s19  ;;  %v4360_v21 = vstv %s5400_s20 }
 0x57b   :  { %v3462_v8 = vpop.permute.xlu1 %3461  ;;  %v3460_v50 = vpop.permute.xlu0 %3459 }
 0x57c   :  { %v3466_v25 = vsel %vm157_vm2, %v3462_v8, %v3464_v27  ;;  %v3465_v63 = vsel %vm157_vm2, %v3460_v50, %v3462_v8  ;;  %v3484_v38 = vpop.permute.xlu2 %3483 }
 0x57d   :  { %v3470_v41 = vadd.f32 %v3466_v25, %v3450_v14  ;;  %v3469_v22 = vadd.f32 %v3465_v63, %v3449_v57  ;;  %v2958_v57 = vmul.f32 %v8909_v35, %v2956_v56 }
 0x581   :  { %4329 = vrot.lane.b32.xlu1 %v4322_v55, %s10396_s30  ;;  %4327 = vrot.lane.b32.xlu0 %v4321_v39, %s10396_s30  ;;  %v4361_v55 = vmul.f32 %v8915_v4, %v4360_v21  ;;  %v4363_v39 = vmul.f32 %v8927_v36, %v4360_v21 }
 0x582   :  { %4331 = vrot.lane.b32.xlu2 %v4323_v31, %s10396_s30  ;;  %v2976_v31 = vstv %s5267_s22  ;;  %s5335_s22 = sld [smem:[#allocation2 + $0x222]] }
 0x583   :  { %v4244_v7 = vpop.permute.xlu1 %4243  ;;  %v4242_v15 = vpop.permute.xlu0 %4241 }
 0x584   :  { %v4248_v43 = vsel %vm199_vm4, %v4244_v7, %v4246_v13  ;;  %v4247_v60 = vsel %vm199_vm4, %v4242_v15, %v4244_v7  ;;  %v4266_v37 = vpop.permute.xlu2 %4265 }
 0x585   :  { %v4252_v1 = vadd.f32 %v4248_v43, %v4232_v45  ;;  %v4251_v20 = vadd.f32 %v4247_v60, %v4231_v54  ;;  %v3580_v54 = vmul.f32 %v8909_v35, %v3578_v49 }
 0x589   :  { %2945 = vrot.lane.b32.xlu1 %v2938_v12, %s5563_s2  ;;  %2943 = vrot.lane.b32.xlu0 %v2937_v30, %s5563_s2  ;;  %v2979_v12 = vmul.f32 %v8927_v36, %v2976_v31 }
 0x58a   :  { %2947 = vrot.lane.b32.xlu2 %v2939_v51, %s5563_s2 }
 0x58b   :  { %v2846_v46 = vpop.permute.xlu1 %2845  ;;  %v2844_v11 = vpop.permute.xlu0 %2843 }
 0x58c   :  { %v2850_v19 = vsel %vm115_vm0, %v2846_v46, %v2848_v33  ;;  %v2849_v32 = vsel %vm115_vm0, %v2844_v11, %v2846_v46  ;;  %v2868_v6 = vpop.permute.xlu2 %2867 }
 0x58d   :  { %v2854_v27 = vadd.f32 %v2850_v19, %v2834_v26  ;;  %v2853_v2 = vadd.f32 %v2849_v32, %v2833_v47 }
 0x591   :  { %4349 = vrot.lane.b32.xlu1 %v4342_v53, %s10341_s4  ;;  %4347 = vrot.lane.b32.xlu0 %v4341_v52, %s10341_s4 }
 0x592   :  { %4351 = vrot.lane.b32.xlu2 %v4343_v18, %s10341_s4 }
 0x593   :  { %v3482_v0 = vpop.permute.xlu1 %3481  ;;  %v3480_v44 = vpop.permute.xlu0 %3479 }
 0x594   :  { %v3486_v59 = vsel %vm178_vm3, %v3482_v0, %v3484_v38  ;;  %v3485_v9 = vsel %vm178_vm3, %v3480_v44, %v3482_v0  ;;  %v3504_v10 = vpop.permute.xlu2 %3503 }
 0x595   :  { %v3490_v13 = vadd.f32 %v3486_v59, %v3470_v41  ;;  %v3489_v14 = vadd.f32 %v3485_v9, %v3469_v22  ;;  %v4362_v22 = vmul.f32 %v8909_v35, %v4360_v21 }
 0x599   :  { %2965 = vrot.lane.b32.xlu1 %v2958_v57, %s10447_s24  ;;  %2963 = vrot.lane.b32.xlu0 %v2957_v5, %s10447_s24 }
 0x59a   :  { %2967 = vrot.lane.b32.xlu2 %v2959_v29, %s10447_s24 }
 0x59b   :  { %v4264_v48 = vpop.permute.xlu1 %4263  ;;  %v4262_v3 = vpop.permute.xlu0 %4261 }
 0x59c   :  { %v4268_v23 = vsel %vm220_vm5, %v4264_v48, %v4266_v37  ;;  %v4267_v40 = vsel %vm220_vm5, %v4262_v3, %v4264_v48  ;;  %v4286_v28 = vpop.permute.xlu2 %4285 }
 0x59d   :  { %v4272_v33 = vadd.f32 %v4268_v23, %v4252_v1  ;;  %v4271_v45 = vadd.f32 %v4267_v40, %v4251_v20  ;;  %v2978_v1 = vmul.f32 %v8909_v35, %v2976_v31  ;;  %v2977_v20 = vmul.f32 %v8915_v4, %v2976_v31 }
 0x5a1   :  { %3587 = vrot.lane.b32.xlu1 %v3580_v54, %s10396_s30  ;;  %3585 = vrot.lane.b32.xlu0 %v3579_v58, %s10396_s30 }
 0x5a2   :  { %3589 = vrot.lane.b32.xlu2 %v3581_v16, %s10396_s30  ;;  %s5330_s30 = sld [smem:[#allocation2 + $0x21d]] }
 0x5a3   :  { %v2866_v62 = vpop.permute.xlu1 %2865  ;;  %v2864_v8 = vpop.permute.xlu0 %2863 }
 0x5a4   :  { %v2870_v50 = vsel %vm136_vm1, %v2866_v62, %v2868_v6  ;;  %v2869_v25 = vsel %vm136_vm1, %v2864_v8, %v2866_v62  ;;  %v2888_v63 = vpop.permute.xlu2 %2887  ;;  %v4380_v6 = vstv %s5401_s25 }
 0x5a5   :  { %v2874_v38 = vadd.f32 %v2870_v50, %v2854_v27  ;;  %v2873_v41 = vadd.f32 %v2869_v25, %v2853_v2  ;;  %v4382_v44 = vmul.f32 %v8909_v35, %v4380_v6  ;;  %v4381_v59 = vmul.f32 %v8915_v4, %v4380_v6 }
 0x5a6   :  { %v4383_v9 = vmul.f32 %v8927_v36, %v4380_v6 }
 0x5a8   :  { %v3598_v30 = vstv %s5330_s30  ;;  %s5336_s30 = sld [smem:[#allocation2 + $0x223]] }
 0x5a9   :  { %4369 = vrot.lane.b32.xlu1 %v4362_v22, %s5560_s0  ;;  %4367 = vrot.lane.b32.xlu0 %v4361_v55, %s5560_s0  ;;  %v3600_v11 = vmul.f32 %v8909_v35, %v3598_v30  ;;  %v3599_v19 = vmul.f32 %v8915_v4, %v3598_v30  ;;  %v3601_v32 = vmul.f32 %v8927_v36, %v3598_v30 }
 0x5aa   :  { %4371 = vrot.lane.b32.xlu2 %v4363_v39, %s5560_s0 }
 0x5ab   :  { %v3502_v17 = vpop.permute.xlu1 %3501  ;;  %v3500_v7 = vpop.permute.xlu0 %3499 }
 0x5ac   :  { %v3506_v15 = vsel %vm199_vm4, %v3502_v17, %v3504_v10  ;;  %v3505_v43 = vsel %vm199_vm4, %v3500_v7, %v3502_v17  ;;  %v3524_v60 = vpop.permute.xlu2 %3523  ;;  %v3618_v10 = vstv %s5331_s29 }
 0x5ad   :  { %v3510_v24 = vadd.f32 %v3506_v15, %v3490_v13  ;;  %v3509_v37 = vadd.f32 %v3505_v43, %v3489_v14  ;;  %v3620_v3 = vmul.f32 %v8909_v35, %v3618_v10  ;;  %v3619_v23 = vmul.f32 %v8915_v4, %v3618_v10 }
 0x5ae   :  { %v3621_v40 = vmul.f32 %v8927_v36, %v3618_v10 }
 0x5b1   :  { %2985 = vrot.lane.b32.xlu1 %v2978_v1, %s10448_s19  ;;  %2983 = vrot.lane.b32.xlu0 %v2977_v20, %s10448_s19 }
 0x5b2   :  { %2987 = vrot.lane.b32.xlu2 %v2979_v12, %s10448_s19 }
 0x5b3   :  { %v4284_v51 = vpop.permute.xlu1 %4283  ;;  %v4282_v61 = vpop.permute.xlu0 %4281 }
 0x5b4   :  { %v4288_v42 = vsel %vm241_vm6, %v4284_v51, %v4286_v28  ;;  %v4287_v34 = vsel %vm241_vm6, %v4282_v61, %v4284_v51  ;;  %v4306_v26 = vpop.permute.xlu2 %4305 }
 0x5b5   :  { %v4292_v46 = vadd.f32 %v4288_v42, %v4272_v33  ;;  %v4291_v47 = vadd.f32 %v4287_v34, %v4271_v45 }
 0x5b9   :  { %3607 = vrot.lane.b32.xlu1 %v3600_v11, %s10341_s4  ;;  %3605 = vrot.lane.b32.xlu0 %v3599_v19, %s10341_s4 }
 0x5ba   :  { %3609 = vrot.lane.b32.xlu2 %v3601_v32, %s10341_s4  ;;  %s5402_s4 = sld [smem:[#allocation2 + $0x2a0]] }
 0x5bb   :  { %v2886_v27 = vpop.permute.xlu1 %2885  ;;  %v2884_v2 = vpop.permute.xlu0 %2883 }
 0x5bc   :  { %v2890_v53 = vsel %vm157_vm2, %v2886_v27, %v2888_v63  ;;  %v2889_v52 = vsel %vm157_vm2, %v2884_v2, %v2886_v27  ;;  %v2908_v18 = vpop.permute.xlu2 %2907  ;;  %v3638_v63 = vstv %s5332_s5 }
 0x5bd   :  { %v2894_v56 = vadd.f32 %v2890_v53, %v2874_v38  ;;  %v2893_v0 = vadd.f32 %v2889_v52, %v2873_v41  ;;  %v3640_v7 = vmul.f32 %v8909_v35, %v3638_v63  ;;  %v3639_v15 = vmul.f32 %v8915_v4, %v3638_v63  ;;  %v5284_v52 = vld [vmem:[%s10201_s6 + $0x378] sm:$0xff] }
 0x5be   :  { %v3641_v43 = vmul.f32 %v8927_v36, %v3638_v63  ;;  %3034 = vmatpush.msrb.mxu2 %v5284_v52  ;;  %v5289_v52 = vld [vmem:[%s10201_s6 + $0x3a0] sm:$0xff] }
 0x5c0   :  { %v4400_v28 = vstv %s5402_s4 }
 0x5c1   :  { %4389 = vrot.lane.b32.xlu1 %v4382_v44, %s5561_s1  ;;  %4387 = vrot.lane.b32.xlu0 %v4381_v59, %s5561_s1  ;;  %v4402_v8 = vmul.f32 %v8909_v35, %v4400_v28  ;;  %v4401_v50 = vmul.f32 %v8915_v4, %v4400_v28  ;;  %v4403_v25 = vmul.f32 %v8927_v36, %v4400_v28  ;;  %v4314_v44 = vstv %s9313_s27 }
 0x5c2   :  { %4391 = vrot.lane.b32.xlu2 %v4383_v9, %s5561_s1  ;;  %v3678_v28 = vstv %s9322_s26  ;;  %s5337_s26 = sld [smem:[#allocation4 + $0x4]] }
 0x5c3   :  { %v3522_v13 = vpop.permute.xlu1 %3521  ;;  %v3520_v14 = vpop.permute.xlu0 %3519 }
 0x5c4   :  { %v3526_v57 = vsel %vm220_vm5, %v3522_v13, %v3524_v60  ;;  %v3525_v5 = vsel %vm220_vm5, %v3520_v14, %v3522_v13  ;;  %v3544_v29 = vpop.permute.xlu2 %3543 }
 0x5c5   :  { %v3530_v49 = vadd.f32 %v3526_v57, %v3510_v24  ;;  %v3529_v48 = vadd.f32 %v3525_v5, %v3509_v37  ;;  %v5283_v57 = vld [vmem:[%s10201_s6 + $0x370] sm:$0xff] }
 0x5c6   :  { %v5299_v5 = vld [vmem:[%s10201_s6 + $0x3f0] sm:$0xff]  ;;  %3035 = vmatpush.msrb.mxu2 %v5283_v57  ;;  %v5288_v57 = vld [vmem:[%s10201_s6 + $0x398] sm:$0xff] }
 0x5c9   :  { %3627 = vrot.lane.b32.xlu1 %v3620_v3, %s5560_s0  ;;  %3625 = vrot.lane.b32.xlu0 %v3619_v23, %s5560_s0  ;;  %v9364_v3 = vld [vmem:[%s10286_s23 + $0x48] sm:$0xff]  ;;  %v5281_v23 = vld [vmem:[%s10201_s6 + $0x360] sm:$0xff] }
 0x5ca   :  { %3629 = vrot.lane.b32.xlu2 %v3621_v40, %s5560_s0  ;;  %s5403_s0 = sld [smem:[#allocation2 + $0x2a1]]  ;;  %v5297_v40 = vld [vmem:[%s10201_s6 + $0x3e0] sm:$0xff] }
 0x5cb   :  { %v4304_v33 = vpop.permute.xlu1 %4303  ;;  %v4302_v45 = vpop.permute.xlu0 %4301 }
 0x5cc   :  { %v4308_v54 = vsel %vm262_vm7, %v4304_v33, %v4306_v26  ;;  %v4307_v58 = vsel %vm262_vm7, %v4302_v45, %v4304_v33  ;;  %v9275_v16 = vpop.permute.xlu2 %2927  ;;  %v3658_v26 = vstv %s5333_s28 }
 0x5cd   :  { %v9277_v21 = vadd.f32 %v4308_v54, %v4292_v46  ;;  %v9279_v62 = vadd.f32 %v4307_v58, %v4291_v47  ;;  %v3660_v19 = vmul.f32 %v8909_v35, %v3658_v26  ;;  %v3659_v32 = vmul.f32 %v8915_v4, %v3658_v26 }
 0x5ce   :  { %v3661_v6 = vmul.f32 %v8927_v36, %v3658_v26  ;;  %v5275_v26 = vld [vmem:[%s10201_s6 + $0x330] sm:$0xff] }
 0x5d0   :  { %v4420_v60 = vstv %s5403_s0  ;;  %s9376_s0 = sld [smem:[#allocation2 + $0x2a3]] }
 0x5d1   :  { %4409 = vrot.lane.b32.xlu1 %v4402_v8, %s5562_s21  ;;  %4407 = vrot.lane.b32.xlu0 %v4401_v50, %s5562_s21  ;;  %v4422_v61 = vmul.f32 %v8909_v35, %v4420_v60  ;;  %v4421_v42 = vmul.f32 %v8915_v4, %v4420_v60  ;;  %v4423_v34 = vmul.f32 %v8927_v36, %v4420_v60  ;;  %v5280_v8 = vld [vmem:[%s10201_s6 + $0x358] sm:$0xff]  ;;  %v5294_v60 = vld [vmem:[%s10201_s6 + $0x3c8] sm:$0xff] }
 0x5d2   :  { %4411 = vrot.lane.b32.xlu2 %v4403_v25, %s5562_s21  ;;  %v5296_v50 = vld [vmem:[%s10201_s6 + $0x3d8] sm:$0xff] }
 0x5d3   :  { %v2906_v38 = vpop.permute.xlu1 %2905  ;;  %v2904_v41 = vpop.permute.xlu0 %2903 }
 0x5d4   :  { %v2910_v22 = vsel %vm178_vm3, %v2906_v38, %v2908_v18  ;;  %v2909_v55 = vsel %vm178_vm3, %v2904_v41, %v2906_v38  ;;  %v3564_v39 = vpop.permute.xlu2 %3563  ;;  %v5300_v18 = vld [vmem:[%s10201_s6 + $0x3f8] sm:$0xff] }
 0x5d5   :  { %v9289_v31 = vadd.f32 %v2910_v22, %v2894_v56  ;;  %v9291_v17 = vadd.f32 %v2909_v55, %v2893_v0  ;;  %3054 = vmatpush.msrb.mxu3 %v5300_v18  ;;  %v3679_v22 = vmul.f32 %v9364_v3, %v3678_v28  ;;  %v5279_v55 = vld [vmem:[%s10201_s6 + $0x350] sm:$0xff] }
 0x5d7   :  { %3055 = vmatpush.msrb.mxu3 %v5299_v5 }
 0x5d9   :  { %3647 = vrot.lane.b32.xlu1 %v3640_v7, %s5561_s1  ;;  %3645 = vrot.lane.b32.xlu0 %v3639_v15, %s5561_s1  ;;  %v5278_v7 = vld [vmem:[%s10201_s6 + $0x348] sm:$0xff]  ;;  %v9406_v15 = vld [vmem:[%s10286_s23 + $0x58] sm:$0xff] }
 0x5da   :  { %3649 = vrot.lane.b32.xlu2 %v3641_v43, %s5561_s1  ;;  %s5404_s1 = sld [smem:[#allocation2 + $0x2a2]]  ;;  %v3681_v43 = vmul.f32 %v9406_v15, %v3678_v28 }
 0x5db   :  { %v3542_v24 = vpop.permute.xlu1 %3541  ;;  %v3540_v37 = vpop.permute.xlu0 %3539 }
 0x5dc   :  { %v3546_v1 = vsel %vm241_vm6, %v3542_v24, %v3544_v29  ;;  %v3545_v20 = vsel %vm241_vm6, %v3540_v37, %v3542_v24  ;;  %v9301_v12 = vpop.permute.xlu2 %4331  ;;  %v5282_v29 = vld [vmem:[%s10201_s6 + $0x368] sm:$0xff]  ;;  %v5277_v24 = vld [vmem:[%s10201_s6 + $0x340] sm:$0xff] }
 0x5dd   :  { %v3550_v30 = vadd.f32 %v3546_v1, %v3530_v49  ;;  %v3549_v51 = vadd.f32 %v3545_v20, %v3529_v48  ;;  %3036 = vmatpush.msrb.mxu2 %v5282_v29  ;;  %v5293_v37 = vld [vmem:[%s10201_s6 + $0x3c0] sm:$0xff]  ;;  %v4460_v1 = vstv %s9376_s0 }
 0x5df   :  { %3037 = vmatpush.msrb.mxu2 %v5281_v23  ;;  %v5270_v23 = vld [vmem:[%s10201_s6 + $0x308] sm:$0xff] }
 0x5e0   :  { %v4440_v27 = vstv %s5404_s1 }
 0x5e1   :  { %4429 = vrot.lane.b32.xlu1 %v4422_v61, %s5563_s2  ;;  %4427 = vrot.lane.b32.xlu0 %v4421_v42, %s5563_s2  ;;  %v4442_v13 = vmul.f32 %v8909_v35, %v4440_v27  ;;  %v4441_v14 = vmul.f32 %v8915_v4, %v4440_v27  ;;  %v4443_v49 = vmul.f32 %v8927_v36, %v4440_v27  ;;  %v5298_v35 = vld [vmem:[%s10201_s6 + $0x3e8] sm:$0xff]  ;;  %v9358_v4 = vld [vmem:[%s10286_s23 + $0x50] sm:$0xff] }
 0x5e2   :  { %4431 = vrot.lane.b32.xlu2 %v4423_v34, %s5563_s2  ;;  %v4316_v48 = vmul.f32 %v9358_v4, %v4314_v44  ;;  %v4315_v36 = vmul.f32 %v9364_v3, %v4314_v44  ;;  %3056 = vmatpush.msrb.mxu3 %v5298_v35  ;;  %v3680_v41 = vmul.f32 %v9358_v4, %v3678_v28  ;;  %v5290_v27 = vld [vmem:[%s10201_s6 + $0x3a8] sm:$0xff]  ;;  %v3718_v28 = vstv %s5336_s30 }
 0x5e3   :  { %v9309_v46 = vpop.permute.xlu1 %2925  ;;  %v9311_v47 = vpop.permute.xlu0 %2923  ;;  %3038 = vmatpush.msrb.mxu2 %v5280_v8  ;;  %v4462_v42 = vmul.f32 %v9358_v4, %v4460_v1  ;;  %v4461_v34 = vmul.f32 %v9364_v3, %v4460_v1 }
 0x5e4   :  { %v9315_v11 = vpop.permute.xlu2 %2947  ;;  %v4318_v45 = vadd.f32 %v4316_v48, %v9277_v21  ;;  %v4317_v54 = vadd.f32 %v4315_v36, %v9279_v62  ;;  %3057 = vmatpush.msrb.mxu3 %v5297_v40  ;;  %v5287_v36 = vld [vmem:[%s10201_s6 + $0x390] sm:$0xff]  ;;  %v5286_v40 = vld [vmem:[%s10201_s6 + $0x388] sm:$0xff] }
 0x5e5   :  { %3039 = vmatpush.msrb.mxu2 %v5279_v55 }
 0x5e6   :  { %3058 = vmatpush.msrb.mxu3 %v5296_v50 }
 0x5e7   :  { %3040 = vmatpush.msrb.mxu2 %v5278_v7 }
 0x5e9   :  { %3667 = vrot.lane.b32.xlu1 %v3660_v19, %s5562_s21  ;;  %3665 = vrot.lane.b32.xlu0 %v3659_v32, %s5562_s21  ;;  %v5291_v19 = vld [vmem:[%s10201_s6 + $0x3b0] sm:$0xff]  ;;  %v4463_v32 = vmul.f32 %v9406_v15, %v4460_v1  ;;  %v2930_v1 = vsel %vm199_vm4, %v9309_v46, %v9275_v16 }
 0x5ea   :  { %3669 = vrot.lane.b32.xlu2 %v3661_v6, %s5562_s21  ;;  %3041 = vmatpush.msrb.mxu2 %v5277_v24  ;;  %v5274_v6 = vld [vmem:[%s10201_s6 + $0x328] sm:$0xff] }
 0x5eb   :  { %v3562_v2 = vpop.permute.xlu1 %3561  ;;  %v3560_v53 = vpop.permute.xlu0 %3559 }
 0x5ec   :  { %v3566_v56 = vsel %vm262_vm7, %v3562_v2, %v3564_v39  ;;  %v3565_v0 = vsel %vm262_vm7, %v3560_v53, %v3562_v2  ;;  %v9334_v59 = vpop.permute.xlu2 %4351  ;;  %v5295_v39 = vld [vmem:[%s10201_s6 + $0x3d0] sm:$0xff]  ;;  %v5273_v2 = vld [vmem:[%s10201_s6 + $0x320] sm:$0xff]  ;;  %v3698_v53 = vstv %s5335_s22  ;;  %s9464_s22 = sld [smem:[#allocation2 + $0x21b]] }
 0x5ed   :  { %v9336_v9 = vadd.f32 %v3566_v56, %v3550_v30  ;;  %v9338_v10 = vadd.f32 %v3565_v0, %v3549_v51  ;;  %3059 = vmatpush.msrb.mxu3 %v5295_v39  ;;  %v5276_v30 = vld [vmem:[%s10201_s6 + $0x338] sm:$0xff]  ;;  %v3699_v35 = vmul.f32 %v9364_v3, %v3698_v53  ;;  %v3701_v48 = vmul.f32 %v9406_v15, %v3698_v53 }
 0x5ee   :  { %v5292_v51 = vld [vmem:[%s10201_s6 + $0x3b8] sm:$0xff]  ;;  %3042 = vmatpush.msrb.mxu2 %v5276_v30 }
 0x5ef   :  { %3060 = vmatpush.msrb.mxu3 %v5294_v60  ;;  %v5272_v0 = vld [vmem:[%s10201_s6 + $0x318] sm:$0xff] }
 0x5f0   :  { %3043 = vmatpush.msrb.mxu2 %v5275_v26 }
 0x5f1   :  { %4449 = vrot.lane.b32.xlu1 %v4442_v13, %s10447_s24  ;;  %4447 = vrot.lane.b32.xlu0 %v4441_v14, %s10447_s24 }
 0x5f2   :  { %4451 = vrot.lane.b32.xlu2 %v4443_v49, %s10447_s24  ;;  %3061 = vmatpush.msrb.mxu3 %v5293_v37  ;;  %v3700_v49 = vmul.f32 %v9358_v4, %v3698_v53  ;;  %v3572_v8 = vstv %s9464_s22  ;;  %s10627_s22 = sld [smem:[#allocation99_spill]] }
 0x5f3   :  { %v4330_v33 = vpop.permute.xlu1 %4329  ;;  %v4328_v58 = vpop.permute.xlu0 %4327  ;;  %3044 = vmatpush.msrb.mxu2 %v5274_v6 }
 0x5f4   :  { %v4334_v25 = vsel %vm115_vm0, %v4330_v33, %v9301_v12  ;;  %v4333_v63 = vsel %vm115_vm0, %v4328_v58, %v4330_v33  ;;  %v9390_v38 = vpop.permute.xlu2 %2967  ;;  %3062 = vmatpush.msrb.mxu3 %v5292_v51  ;;  %v5269_v33 = vld [vmem:[%s10201_s6 + $0x300] sm:$0xff] }
 0x5f5   :  { %v4338_v21 = vadd.f32 %v4334_v25, %v4318_v45  ;;  %v4337_v62 = vadd.f32 %v4333_v63, %v4317_v54  ;;  %3045 = vmatpush.msrb.mxu2 %v5273_v2  ;;  %v5285_v58 = vld [vmem:[%s10201_s6 + $0x380] sm:$0xff]  ;;  %v3720_v25 = vmul.f32 %v9358_v4, %v3718_v28  ;;  %v3719_v63 = vmul.f32 %v9364_v3, %v3718_v28 }
 0x5f6   :  { %3063 = vmatpush.msrb.mxu3 %v5291_v19 }
 0x5f7   :  { %3046 = vmatpush.msrb.mxu2 %v5272_v0 }
 0x5f8   :  { %3064 = vmatpush.msrb.mxu3 %v5290_v27 }
 0x5f9   :  { %3687 = vrot.lane.b32.xlu1 %v3680_v41, %s5563_s2  ;;  %3685 = vrot.lane.b32.xlu0 %v3679_v22, %s5563_s2  ;;  %v3573_v41 = vmul.f32 %v9364_v3, %v3572_v8 }
 0x5fa   :  { %3689 = vrot.lane.b32.xlu2 %v3681_v43, %s5563_s2  ;;  %3065 = vmatpush.msrb.mxu3 %v5289_v52 }
 0x5fb   :  { %v9422_v20 = vpop.permute.xlu1 %2945  ;;  %v9424_v12 = vpop.permute.xlu0 %2943  ;;  %v3575_v39 = vadd.f32 %v3573_v41, %v9338_v10  ;;  %v5434_v41 = vld [vmem:[%s10201_s6 + $0x5d8] sm:$0xff] }
 0x5fc   :  { %v9432_v61 = vpop.permute.xlu2 %3589  ;;  %3066 = vmatpush.msrb.mxu3 %v5288_v57  ;;  %v2949_v16 = vsel %vm220_vm5, %v9424_v12, %v9422_v20 }
 0x5fe   :  { %3067 = vmatpush.msrb.mxu3 %v5287_v36 }
 0x600   :  { %3068 = vmatpush.msrb.mxu3 %v5286_v40 }
 0x601   :  { %4469 = vrot.lane.b32.xlu1 %v4462_v42, %s10448_s19  ;;  %4467 = vrot.lane.b32.xlu0 %v4461_v34, %s10448_s19  ;;  %v2950_v34 = vsel %vm220_vm5, %v9422_v20, %v9315_v11 }
 0x602   :  { %4471 = vrot.lane.b32.xlu2 %v4463_v32, %s10448_s19  ;;  %3069 = vmatpush.msrb.mxu3 %v5285_v58  ;;  %v5420_v58 = vld [vmem:[%s10201_s6 + $0x568] sm:$0xff] }
 0x603   :  { %v4350_v18 = vpop.permute.xlu1 %4349  ;;  %v4348_v56 = vpop.permute.xlu0 %4347 }
 0x604   :  { %v4354_v44 = vsel %vm136_vm1, %v4350_v18, %v9334_v59  ;;  %v4353_v13 = vsel %vm136_vm1, %v4348_v56, %v4350_v18  ;;  %v4372_v14 = vpop.permute.xlu2 %4371  ;;  %v5271_v59 = vld [vmem:[%s10201_s6 + $0x310] sm:$0xff] }
 0x605   :  { %v4358_v5 = vadd.f32 %v4354_v44, %v4338_v21  ;;  %v4357_v29 = vadd.f32 %v4353_v13, %v4337_v62  ;;  %3047 = vmatpush.msrb.mxu2 %v5271_v59  ;;  %v3721_v21 = vmul.f32 %v9406_v15, %v3718_v28  ;;  %v3574_v62 = vmul.f32 %v9358_v4, %v3572_v8  ;;  %v5422_v28 = vld [vmem:[%s10201_s6 + $0x578] sm:$0xff]  ;;  %v5436_v8 = vld [vmem:[%s10201_s6 + $0x5e8] sm:$0xff] }
 0x607   :  { %3048 = vmatpush.msrb.mxu2 %v5270_v23  ;;  %v3576_v55 = vadd.f32 %v3574_v62, %v9336_v9  ;;  %v2929_v9 = vsel %vm199_vm4, %v9311_v47, %v9309_v46  ;;  %v2934_v46 = vadd.f32 %v2930_v1, %v9289_v31  ;;  %v5418_v62 = vld [vmem:[%s10201_s6 + $0x558] sm:$0xff] }
 0x608   :  { %v2933_v47 = vadd.f32 %v2929_v9, %v9291_v17  ;;  %v5414_v1 = vld [vmem:[%s10201_s6 + $0x538] sm:$0xff] }
 0x609   :  { %3707 = vrot.lane.b32.xlu1 %v3700_v49, %s10447_s24  ;;  %3705 = vrot.lane.b32.xlu0 %v3699_v35, %s10447_s24  ;;  %v2954_v32 = vadd.f32 %v2950_v34, %v2934_v46  ;;  %v5430_v9 = vld [vmem:[%s10201_s6 + $0x5b8] sm:$0xff]  ;;  %v5413_v34 = vld [vmem:[%s10201_s6 + $0x530] sm:$0xff] }
 0x60a   :  { %3709 = vrot.lane.b32.xlu2 %v3701_v48, %s10447_s24  ;;  %3049 = vmatpush.msrb.mxu2 %v5269_v33  ;;  %s5268_s24 = sld [smem:[#allocation4 + $0x3]]  ;;  %v2953_v6 = vadd.f32 %v2949_v16, %v2933_v47  ;;  %v5438_v33 = vld [vmem:[%s10201_s6 + $0x5f8] sm:$0xff]  ;;  %v5429_v46 = vld [vmem:[%s10201_s6 + $0x5b0] sm:$0xff]  ;;  %v5351_v47 = vld [vmem:[%s10201_s6 + $0x468] sm:$0xff] }
 0x60b   :  { %v2966_v45 = vpop.permute.xlu1 %2965  ;;  %v2964_v54 = vpop.permute.xlu0 %2963  ;;  %4538 = vmatpush.msra.mxu3 %v5438_v33  ;;  %v5346_v33 = vld [vmem:[%s10201_s6 + $0x440] sm:$0xff] }
 0x60c   :  { %v2988_v50 = vpop.permute.xlu2 %2987  ;;  %v2970_v26 = vsel %vm241_vm6, %v2966_v45, %v9390_v38  ;;  %v2969_v19 = vsel %vm241_vm6, %v2964_v54, %v2966_v45  ;;  %4518 = vmatpush.msra.mxu2 %v5422_v28  ;;  %v5421_v45 = vld [vmem:[%s10201_s6 + $0x570] sm:$0xff]  ;;  %v5424_v28 = vld [vmem:[%s10201_s6 + $0x588] sm:$0xff] }
 0x60d   :  { %v2974_v27 = vadd.f32 %v2970_v26, %v2954_v32  ;;  %v2973_v2 = vadd.f32 %v2969_v19, %v2953_v6  ;;  %v5437_v54 = vld [vmem:[%s10201_s6 + $0x5f0] sm:$0xff]  ;;  %v5367_v26 = vld [vmem:[%s10201_s6 + $0x4e8] sm:$0xff]  ;;  %v5350_v6 = vld [vmem:[%s10201_s6 + $0x460] sm:$0xff] }
 0x60e   :  { %4519 = vmatpush.msra.mxu2 %v5421_v45  ;;  %4539 = vmatpush.msra.mxu3 %v5437_v54  ;;  %v5412_v19 = vld [vmem:[%s10201_s6 + $0x528] sm:$0xff]  ;;  %v5362_v45 = vld [vmem:[%s10201_s6 + $0x4c0] sm:$0xff] }
 0x60f   :  { %v5428_v32 = vld [vmem:[%s10201_s6 + $0x5a8] sm:$0xff]  ;;  %v5407_v54 = vld [vmem:[%s10201_s6 + $0x500] sm:$0xff] }
 0x610   :  { %v2996_v20 = vstv %s5268_s24  ;;  %4520 = vmatpush.msra.mxu2 %v5420_v58  ;;  %4540 = vmatpush.msra.mxu3 %v5436_v8  ;;  %v5423_v58 = vld [vmem:[%s10201_s6 + $0x580] sm:$0xff] }
 0x611   :  { %3727 = vrot.lane.b32.xlu1 %v3720_v25, %s10448_s19  ;;  %3725 = vrot.lane.b32.xlu0 %v3719_v63, %s10448_s19  ;;  %v5435_v25 = vld [vmem:[%s10201_s6 + $0x5e0] sm:$0xff] }
 0x612   :  { %3729 = vrot.lane.b32.xlu2 %v3721_v21, %s10448_s19  ;;  %4541 = vmatpush.msra.mxu3 %v5435_v25  ;;  %v5345_v25 = vld [vmem:[%s10201_s6 + $0x438] sm:$0xff] }
 0x613   :  { %v3588_v22 = vpop.permute.xlu1 %3587  ;;  %v3586_v7 = vpop.permute.xlu0 %3585 }
 0x614   :  { %v3592_v15 = vsel %vm115_vm0, %v3588_v22, %v9432_v61  ;;  %v3591_v43 = vsel %vm115_vm0, %v3586_v7, %v3588_v22  ;;  %v3610_v4 = vpop.permute.xlu2 %3609  ;;  %4542 = vmatpush.msra.mxu3 %v5434_v41  ;;  %v5416_v7 = vld [vmem:[%s10201_s6 + $0x548] sm:$0xff]  ;;  %v5344_v41 = vld [vmem:[%s10201_s6 + $0x430] sm:$0xff] }
 0x615   :  { %v3596_v60 = vadd.f32 %v3592_v15, %v3576_v55  ;;  %v3595_v3 = vadd.f32 %v3591_v43, %v3575_v39  ;;  %v5417_v55 = vld [vmem:[%s10201_s6 + $0x550] sm:$0xff]  ;;  %v5432_v15 = vld [vmem:[%s10201_s6 + $0x5c8] sm:$0xff]  ;;  %v5415_v43 = vld [vmem:[%s10201_s6 + $0x540] sm:$0xff] }
 0x616   :  { %v5433_v39 = vld [vmem:[%s10201_s6 + $0x5d0] sm:$0xff] }
 0x617   :  { %4543 = vmatpush.msra.mxu3 %v5433_v39  ;;  %v5343_v39 = vld [vmem:[%s10201_s6 + $0x428] sm:$0xff] }
 0x619   :  { %4544 = vmatpush.msra.mxu3 %v5432_v15  ;;  %v5342_v15 = vld [vmem:[%s10201_s6 + $0x420] sm:$0xff] }
 0x61b   :  { %v4370_v24 = vpop.permute.xlu1 %4369  ;;  %v4368_v37 = vpop.permute.xlu0 %4367 }
 0x61c   :  { %v4374_v10 = vsel %vm157_vm2, %v4370_v24, %v4372_v14  ;;  %v4373_v30 = vsel %vm157_vm2, %v4368_v37, %v4370_v24  ;;  %v9515_v51 = vpop.permute.xlu2 %4391  ;;  %v5353_v24 = vld [vmem:[%s10201_s6 + $0x478] sm:$0xff] }
 0x61d   :  { %v9517_v61 = vadd.f32 %v4374_v10, %v4358_v5  ;;  %v9519_v42 = vadd.f32 %v4373_v30, %v4357_v29  ;;  %v5369_v37 = vld [vmem:[%s10201_s6 + $0x4f8] sm:$0xff]  ;;  %3776 = vmatpush.msra.mxu0 %v5353_v24  ;;  %v5352_v10 = vld [vmem:[%s10201_s6 + $0x470] sm:$0xff] }
 0x61e   :  { %3796 = vmatpush.msra.mxu1 %v5369_v37  ;;  %v5368_v30 = vld [vmem:[%s10201_s6 + $0x4f0] sm:$0xff] }
 0x61f   :  { %3777 = vmatpush.msra.mxu0 %v5352_v10  ;;  %v5340_v10 = vld [vmem:[%s10201_s6 + $0x410] sm:$0xff] }
 0x620   :  { %3797 = vmatpush.msra.mxu1 %v5368_v30  ;;  %v5356_v30 = vld [vmem:[%s10201_s6 + $0x490] sm:$0xff] }
 0x621   :  { %3778 = vmatpush.msra.mxu0 %v5351_v47  ;;  %v5338_v47 = vld [vmem:[%s10201_s6 + $0x400] sm:$0xff] }
 0x622   :  { %3798 = vmatpush.msra.mxu1 %v5367_v26  ;;  %v5354_v26 = vld [vmem:[%s10201_s6 + $0x480] sm:$0xff] }
 0x623   :  { %v2986_v53 = vpop.permute.xlu1 %2985  ;;  %v2984_v52 = vpop.permute.xlu0 %2983  ;;  %3779 = vmatpush.msra.mxu0 %v5350_v6 }
 0x624   :  { %v2990_v11 = vsel %vm262_vm7, %v2986_v53, %v2988_v50  ;;  %v2989_v18 = vsel %vm262_vm7, %v2984_v52, %v2986_v53  ;;  %v9534_v56 = vpop.permute.xlu2 %3629  ;;  %v5419_v50 = vld [vmem:[%s10201_s6 + $0x560] sm:$0xff] }
 0x625   :  { %v2994_v12 = vadd.f32 %v2990_v11, %v2974_v27  ;;  %v2993_v31 = vadd.f32 %v2989_v18, %v2973_v2  ;;  %4521 = vmatpush.msra.mxu2 %v5419_v50  ;;  %v5366_v27 = vld [vmem:[%s10201_s6 + $0x4e0] sm:$0xff]  ;;  %v5349_v18 = vld [vmem:[%s10201_s6 + $0x458] sm:$0xff] }
 0x626   :  { %v5411_v2 = vld [vmem:[%s10201_s6 + $0x520] sm:$0xff]  ;;  %3799 = vmatpush.msra.mxu1 %v5366_v27  ;;  %3780 = vmatpush.msra.mxu0 %v5349_v18 }
 0x627   :  { %v2998_v17 = vadd.f32 %v2996_v20, %v2994_v12  ;;  %v2997_v0 = vadd.f32 %v2996_v20, %v2993_v31  ;;  %4522 = vmatpush.msra.mxu2 %v5418_v62  ;;  %v5427_v53 = vld [vmem:[%s10201_s6 + $0x5a0] sm:$0xff]  ;;  %v5365_v20 = vld [vmem:[%s10201_s6 + $0x4d8] sm:$0xff] }
 0x628   :  { %v5410_v12 = vld [vmem:[%s10201_s6 + $0x518] sm:$0xff]  ;;  %3800 = vmatpush.msra.mxu1 %v5365_v20 }
 0x629   :  { %v3000_v38 = vmax.f32 %v2998_v17, 0.0  ;;  %v2999_v44 = vmax.f32 %v2997_v0, 0.0  ;;  %4523 = vmatpush.msra.mxu2 %v5417_v55  ;;  %v5426_v31 = vld [vmem:[%s10201_s6 + $0x598] sm:$0xff]  ;;  %v5348_v17 = vld [vmem:[%s10201_s6 + $0x450] sm:$0xff] }
 0x62a   :  { %v5364_v0 = vld [vmem:[%s10201_s6 + $0x4d0] sm:$0xff]  ;;  %3781 = vmatpush.msra.mxu0 %v5348_v17  ;;  %v5361_v62 = vld [vmem:[%s10201_s6 + $0x4b8] sm:$0xff] }
 0x62b   :  { %3070 = vmatmul.f32.vlgmr.msrb.gmra.mxu3 %v3000_v38  ;;  %v3608_v13 = vpop.permute.xlu1 %3607  ;;  %3050 = vmatmul.f32.vlgmr.msrb.gmra.mxu2 %v2999_v44  ;;  %v3606_v14 = vpop.permute.xlu0 %3605  ;;  %v5409_v38 = vld [vmem:[%s10201_s6 + $0x510] sm:$0xff] }
 0x62c   :  { %v3612_v57 = vsel %vm136_vm1, %v3608_v13, %v3610_v4  ;;  %v3611_v5 = vsel %vm136_vm1, %v3606_v14, %v3608_v13  ;;  %v9542_v35 = vpop.permute.xlu2 %4411  ;;  %v5431_v4 = vld [vmem:[%s10201_s6 + $0x5c0] sm:$0xff]  ;;  %4524 = vmatpush.msra.mxu2 %v5416_v7  ;;  %3801 = vmatpush.msra.mxu1 %v5364_v0  ;;  %v5425_v44 = vld [vmem:[%s10201_s6 + $0x590] sm:$0xff]  ;;  %v5347_v13 = vld [vmem:[%s10201_s6 + $0x448] sm:$0xff] }
 0x62d   :  { %v9538_v29 = vadd.f32 %v3612_v57, %v3596_v60  ;;  %v9540_v49 = vadd.f32 %v3611_v5, %v3595_v3  ;;  %4545 = vmatpush.msra.mxu3 %v5431_v4  ;;  %v5363_v14 = vld [vmem:[%s10201_s6 + $0x4c8] sm:$0xff]  ;;  %3782 = vmatpush.msra.mxu0 %v5347_v13  ;;  %v5360_v55 = vld [vmem:[%s10201_s6 + $0x4b0] sm:$0xff] }
 0x62e   :  { %4525 = vmatpush.msra.mxu2 %v5415_v43  ;;  %v5408_v57 = vld [vmem:[%s10201_s6 + $0x508] sm:$0xff]  ;;  %3802 = vmatpush.msra.mxu1 %v5363_v14  ;;  %v5358_v43 = vld [vmem:[%s10201_s6 + $0x4a0] sm:$0xff] }
 0x62f   :  { %4546 = vmatpush.msra.mxu3 %v5430_v9  ;;  %3783 = vmatpush.msra.mxu0 %v5346_v33  ;;  %v5359_v7 = vld [vmem:[%s10201_s6 + $0x4a8] sm:$0xff]  ;;  %v5357_v9 = vld [vmem:[%s10201_s6 + $0x498] sm:$0xff] }
 0x630   :  { %4526 = vmatpush.msra.mxu2 %v5414_v1  ;;  %3803 = vmatpush.msra.mxu1 %v5362_v45  ;;  %v5341_v1 = vld [vmem:[%s10201_s6 + $0x418] sm:$0xff] }
 0x631   :  { %4547 = vmatpush.msra.mxu3 %v5429_v46  ;;  %3784 = vmatpush.msra.mxu0 %v5345_v25  ;;  %v5355_v46 = vld [vmem:[%s10201_s6 + $0x488] sm:$0xff] }
 0x632   :  { %4527 = vmatpush.msra.mxu2 %v5413_v34  ;;  %3804 = vmatpush.msra.mxu1 %v5361_v62  ;;  %v5339_v34 = vld [vmem:[%s10201_s6 + $0x408] sm:$0xff]  ;;  %s5406_s6 = sld [smem:[#allocation4 + $0x5]] }
 0x633   :  { %v9544_v59 = vpop.permute.xlu1 %4389  ;;  %v9546_v48 = vpop.permute.xlu0 %4387  ;;  %4548 = vmatpush.msra.mxu3 %v5428_v32  ;;  %3785 = vmatpush.msra.mxu0 %v5344_v41 }
 0x634   :  { %v9548_v36 = vpop.permute.xlu2 %3649  ;;  %4528 = vmatpush.msra.mxu2 %v5412_v19  ;;  %3805 = vmatpush.msra.mxu1 %v5360_v55  ;;  %v4394_v19 = vsel %vm178_vm3, %v9544_v59, %v9515_v51  ;;  %v4393_v32 = vsel %vm178_vm3, %v9546_v48, %v9544_v59 }
 0x635   :  { %4549 = vmatpush.msra.mxu3 %v5427_v53  ;;  %3786 = vmatpush.msra.mxu0 %v5343_v39  ;;  %v4398_v18 = vadd.f32 %v4394_v19, %v9517_v61  ;;  %v4397_v51 = vadd.f32 %v4393_v32, %v9519_v42  ;;  %v4563_v32 = vld [vmem:[%s10203_s8 + $0x18] sm:$0xff] }
 0x636   :  { %4529 = vmatpush.msra.mxu2 %v5411_v2  ;;  %3806 = vmatpush.msra.mxu1 %v5359_v7 }
 0x637   :  { %4550 = vmatpush.msra.mxu3 %v5426_v31  ;;  %3787 = vmatpush.msra.mxu0 %v5342_v15 }
 0x638   :  { %4530 = vmatpush.msra.mxu2 %v5410_v12  ;;  %3807 = vmatpush.msra.mxu1 %v5358_v43 }
 0x639   :  { %4551 = vmatpush.msra.mxu3 %v5425_v44  ;;  %3788 = vmatpush.msra.mxu0 %v5341_v1  ;;  %v4480_v44 = vstv %s5406_s6  ;;  %s10628_s6 = sld [smem:[#allocation98_spill]] }
 0x63a   :  { %4531 = vmatpush.msra.mxu2 %v5409_v38  ;;  %3808 = vmatpush.msra.mxu1 %v5357_v9  ;;  %v3738_v9 = vstv %s5337_s26 }
 0x63b   :  { %v9550_v23 = vpop.permute.xlu1 %3627  ;;  %v9552_v40 = vpop.permute.xlu0 %3625  ;;  %4552 = vmatpush.msra.mxu3 %v5424_v28  ;;  %3789 = vmatpush.msra.mxu0 %v5340_v10 }
 0x63c   :  { %v9588_v22 = vpop.permute.xlu2 %4431  ;;  %4532 = vmatpush.msra.mxu2 %v5408_v57  ;;  %3809 = vmatpush.msra.mxu1 %v5356_v30  ;;  %v3631_v33 = vsel %vm157_vm2, %v9552_v40, %v9550_v23 }
 0x63d   :  { %4553 = vmatpush.msra.mxu3 %v5423_v58  ;;  %3790 = vmatpush.msra.mxu0 %v5339_v34  ;;  %v3635_v41 = vadd.f32 %v3631_v33, %v9540_v49  ;;  %v4647_v33 = vld [vmem:[%s10208_s13 + $0x128] sm:$0xff] }
 0x63e   :  { %4533 = vmatpush.msra.mxu2 %v5407_v54  ;;  %3810 = vmatpush.msra.mxu1 %v5355_v46 }
 0x63f   :  { %3791 = vmatpush.msra.mxu0 %v5338_v47 }
 0x640   :  { %3811 = vmatpush.msra.mxu1 %v5354_v26 }
 0x641   :  { %4584 = vmatpush.msrb.mxu0 %v4563_v32 }
 0x643   :  { %v9578_v63 = vpop.permute.xlu1 %4409  ;;  %v9580_v21 = vpop.permute.xlu0 %4407 }
 0x644   :  { %v9633_v16 = vpop.permute.xlu2 %3669  ;;  %v4414_v2 = vsel %vm199_vm4, %v9578_v63, %v9542_v35  ;;  %v4413_v53 = vsel %vm199_vm4, %v9580_v21, %v9578_v63 }
 0x645   :  { %v4418_v12 = vadd.f32 %v4414_v2, %v4398_v18  ;;  %v4417_v35 = vadd.f32 %v4413_v53, %v4397_v51  ;;  %v4560_v2 = vld [vmem:[%s10203_s8] sm:$0xff]  ;;  %v4671_v53 = vld [vmem:[%s10208_s13 + $0x1e8] sm:$0xff]  ;;  %v4672_v18 = vld [vmem:[%s10208_s13 + $0x1f0] sm:$0xff] }
 0x646   :  { %v4673_v51 = vld [vmem:[%s10208_s13 + $0x1f8] sm:$0xff]  ;;  %4694 = vmatpush.msrb.mxu2 %v4671_v53  ;;  %4714 = vmatpush.msrb.mxu3 %v4672_v18  ;;  %v4624_v53 = vld [vmem:[%s10208_s13 + $0x70] sm:$0xff] }
 0x64b   :  { %v9608_v60 = vpop.permute.xlu1 %3647  ;;  %v9610_v3 = vpop.permute.xlu0 %3645 }
 0x64c   :  { %v9699_v5 = vpop.permute.xlu2 %4451  ;;  %v3652_v58 = vsel %vm178_vm3, %v9608_v60, %v9548_v36  ;;  %v3651_v25 = vsel %vm178_vm3, %v9610_v3, %v9608_v60 }
 0x64d   :  { %v3655_v39 = vadd.f32 %v3651_v25, %v3635_v41  ;;  %v4643_v25 = vld [vmem:[%s10208_s13 + $0x108] sm:$0xff]  ;;  %v4645_v41 = vld [vmem:[%s10208_s13 + $0x118] sm:$0xff] }
 0x653   :  { %v9662_v52 = vpop.permute.xlu1 %4429  ;;  %v9664_v11 = vpop.permute.xlu0 %4427 }
 0x654   :  { %v9744_v4 = vpop.permute.xlu2 %3689  ;;  %v4434_v59 = vsel %vm220_vm5, %v9662_v52, %v9588_v22  ;;  %v4433_v48 = vsel %vm220_vm5, %v9664_v11, %v9662_v52 }
 0x655   :  { %v4438_v21 = vadd.f32 %v4434_v59, %v4418_v12  ;;  %v4437_v61 = vadd.f32 %v4433_v48, %v4417_v35  ;;  %v4668_v59 = vld [vmem:[%s10208_s13 + $0x1d0] sm:$0xff]  ;;  %v4669_v48 = vld [vmem:[%s10208_s13 + $0x1d8] sm:$0xff]  ;;  %v4663_v12 = vld [vmem:[%s10208_s13 + $0x1a8] sm:$0xff] }
 0x656   :  { %v4664_v35 = vld [vmem:[%s10208_s13 + $0x1b0] sm:$0xff]  ;;  %4715 = vmatpush.msrb.mxu3 %v4668_v59  ;;  %v4634_v59 = vld [vmem:[%s10208_s13 + $0xc0] sm:$0xff] }
 0x658   :  { %4716 = vmatpush.msrb.mxu3 %v4664_v35  ;;  %v4619_v35 = vld [vmem:[%s10208_s13 + $0x48] sm:$0xff] }
 0x65b   :  { %v9716_v8 = vpop.permute.xlu1 %3667  ;;  %v9718_v50 = vpop.permute.xlu0 %3665 }
 0x65c   :  { %v4472_v20 = vpop.permute.xlu2 %4471  ;;  %v3671_v36 = vsel %vm199_vm4, %v9718_v50, %v9716_v8 }
 0x65d   :  { %v3675_v3 = vadd.f32 %v3671_v36, %v3655_v39  ;;  %v4639_v39 = vld [vmem:[%s10208_s13 + $0xe8] sm:$0xff] }
 0x663   :  { %v4450_v24 = vpop.permute.xlu1 %4449  ;;  %v4448_v37 = vpop.permute.xlu0 %4447 }
 0x664   :  { %v4454_v31 = vsel %vm241_vm6, %v4450_v24, %v9699_v5  ;;  %v4453_v63 = vsel %vm241_vm6, %v4448_v37, %v4450_v24  ;;  %v3710_v28 = vpop.permute.xlu2 %3709  ;;  %v3632_v5 = vsel %vm157_vm2, %v9550_v23, %v9534_v56  ;;  %v3672_v23 = vsel %vm199_vm4, %v9716_v8, %v9633_v16 }
 0x665   :  { %v4458_v17 = vadd.f32 %v4454_v31, %v4438_v21  ;;  %v4457_v42 = vadd.f32 %v4453_v63, %v4437_v61  ;;  %v3636_v62 = vadd.f32 %v3632_v5, %v9538_v29  ;;  %v4665_v31 = vld [vmem:[%s10208_s13 + $0x1b8] sm:$0xff]  ;;  %v4659_v63 = vld [vmem:[%s10208_s13 + $0x188] sm:$0xff]  ;;  %v4660_v21 = vld [vmem:[%s10208_s13 + $0x190] sm:$0xff] }
 0x666   :  { %v4661_v61 = vld [vmem:[%s10208_s13 + $0x198] sm:$0xff]  ;;  %4717 = vmatpush.msrb.mxu3 %v4660_v21  ;;  %v4662_v5 = vld [vmem:[%s10208_s13 + $0x1a0] sm:$0xff] }
 0x667   :  { %v3656_v40 = vadd.f32 %v3652_v58, %v3636_v62  ;;  %v4658_v58 = vld [vmem:[%s10208_s13 + $0x180] sm:$0xff]  ;;  %v4644_v62 = vld [vmem:[%s10208_s13 + $0x110] sm:$0xff] }
 0x669   :  { %v3676_v60 = vadd.f32 %v3672_v23, %v3656_v40  ;;  %v5464_v23 = vld [vmem:[%s10202_s7] ss:$0 sm:$0xff] }
 0x66b   :  { %v3688_v6 = vpop.permute.xlu1 %3687  ;;  %v3686_v27 = vpop.permute.xlu0 %3685 }
 0x66c   :  { %v3692_v29 = vsel %vm220_vm5, %v3688_v6, %v9744_v4  ;;  %v3691_v49 = vsel %vm220_vm5, %v3686_v27, %v3688_v6  ;;  %v3730_v24 = vpop.permute.xlu2 %3729  ;;  %v4562_v6 = vld [vmem:[%s10203_s8 + $0x10] sm:$0xff]  ;;  %v4561_v27 = vld [vmem:[%s10203_s8 + $0x8] sm:$0xff] }
 0x66d   :  { %v3696_v43 = vadd.f32 %v3692_v29, %v3676_v60  ;;  %v3695_v16 = vadd.f32 %v3691_v49, %v3675_v3  ;;  %4585 = vmatpush.msrb.mxu0 %v4562_v6  ;;  %v4640_v29 = vld [vmem:[%s10208_s13 + $0xf0] sm:$0xff]  ;;  %v4641_v3 = vld [vmem:[%s10208_s13 + $0xf8] sm:$0xff] }
 0x66f   :  { %4586 = vmatpush.msrb.mxu0 %v4561_v27 }
 0x671   :  { %4587 = vmatpush.msrb.mxu0 %v4560_v2  ;;  %v4623_v2 = vld [vmem:[%s10208_s13 + $0x68] sm:$0xff] }
 0x673   :  { %v4470_v0 = vpop.permute.xlu1 %4469  ;;  %v4468_v38 = vpop.permute.xlu0 %4467 }
 0x674   :  { %v4474_v22 = vsel %vm262_vm7, %v4470_v0, %v4472_v20  ;;  %v4473_v13 = vsel %vm262_vm7, %v4468_v38, %v4470_v0  ;;  %v4667_v20 = vld [vmem:[%s10208_s13 + $0x1c8] sm:$0xff]  ;;  %v4656_v38 = vld [vmem:[%s10208_s13 + $0x170] sm:$0xff] }
 0x675   :  { %v4478_v14 = vadd.f32 %v4474_v22, %v4458_v17  ;;  %v4477_v52 = vadd.f32 %v4473_v13, %v4457_v42  ;;  %4695 = vmatpush.msrb.mxu2 %v4667_v20  ;;  %v1567_v17 = vpop.f32.mrf.mxu2  ;;  %v1587_v42 = vpop.f32.mrf.mxu3  ;;  %v4655_v0 = vld [vmem:[%s10208_s13 + $0x168] sm:$0xff]  ;;  %v4657_v13 = vld [vmem:[%s10208_s13 + $0x178] sm:$0xff]  ;;  %4718 = vmatpush.msrb.mxu3 %v4656_v38 }
 0x676   :  { %v842_v22 = vpop.f32.mrf.mxu1  ;;  %v4625_v20 = vld [vmem:[%s10208_s13 + $0x78] sm:$0xff] }
 0x677   :  { %v4482_v11 = vadd.f32 %v4480_v44, %v4478_v14  ;;  %v4481_v57 = vadd.f32 %v4480_v44, %v4477_v52  ;;  %4696 = vmatpush.msrb.mxu2 %v4663_v12  ;;  %v822_v44 = vpop.f32.mrf.mxu0  ;;  %v4670_v14 = vld [vmem:[%s10208_s13 + $0x1e0] sm:$0xff]  ;;  %v4651_v52 = vld [vmem:[%s10208_s13 + $0x148] sm:$0xff] }
 0x678   :  { %4674 = vmatpush.msrb.mxu1 %v4670_v14 }
 0x679   :  { %v4484_v45 = vmax.f32 %v4482_v11, 0.0  ;;  %v4483_v54 = vmax.f32 %v4481_v57, 0.0  ;;  %4697 = vmatpush.msrb.mxu2 %v4659_v63  ;;  %v4652_v11 = vld [vmem:[%s10208_s13 + $0x150] sm:$0xff]  ;;  %v4666_v57 = vld [vmem:[%s10208_s13 + $0x1c0] sm:$0xff]  ;;  %v4621_v63 = vld [vmem:[%s10208_s13 + $0x58] sm:$0xff] }
 0x67a   :  { %4675 = vmatpush.msrb.mxu1 %v4666_v57  ;;  %4719 = vmatpush.msrb.mxu3 %v4652_v11  ;;  %v4605_v11 = vld [vmem:[%s10205_s10 + $0x60] sm:$0xff]  ;;  %v4607_v57 = vld [vmem:[%s10205_s10 + $0x70] sm:$0xff] }
 0x67b   :  { %v3708_v55 = vpop.permute.xlu1 %3707  ;;  %4534 = vmatmul.f32.vlgmr.msra.gmra.mxu2 %v4483_v54  ;;  %4554 = vmatmul.f32.vlgmr.msra.gmra.mxu3 %v4484_v45  ;;  %v3706_v56 = vpop.permute.xlu0 %3705  ;;  %v4648_v45 = vld [vmem:[%s10208_s13 + $0x130] sm:$0xff]  ;;  %v4649_v54 = vld [vmem:[%s10208_s13 + $0x138] sm:$0xff] }
 0x67c   :  { %v3712_v7 = vsel %vm241_vm6, %v3708_v55, %v3710_v28  ;;  %v3711_v15 = vsel %vm241_vm6, %v3706_v56, %v3708_v55  ;;  %4698 = vmatpush.msrb.mxu2 %v4655_v0  ;;  %v4653_v28 = vld [vmem:[%s10208_s13 + $0x158] sm:$0xff]  ;;  %4676 = vmatpush.msrb.mxu1 %v4662_v5  ;;  %v4654_v55 = vld [vmem:[%s10208_s13 + $0x160] sm:$0xff]  ;;  %v843_v56 = vadd.f32 %v842_v22, %v822_v44  ;;  %v4611_v44 = vld [vmem:[%s10208_s13 + $0x8] sm:$0xff] }
 0x67d   :  { %v3716_v37 = vadd.f32 %v3712_v7, %v3696_v43  ;;  %v3715_v1 = vadd.f32 %v3711_v15, %v3695_v16  ;;  %4720 = vmatpush.msrb.mxu3 %v4648_v45  ;;  %v4650_v7 = vld [vmem:[%s10208_s13 + $0x140] sm:$0xff]  ;;  %v1588_v15 = vadd.f32 %v1587_v42, %v1567_v17  ;;  %v4635_v43 = vld [vmem:[%s10208_s13 + $0xc8] sm:$0xff]  ;;  %v4636_v16 = vld [vmem:[%s10208_s13 + $0xd0] sm:$0xff] }
 0x67e   :  { %4699 = vmatpush.msrb.mxu2 %v4651_v52  ;;  %4677 = vmatpush.msrb.mxu1 %v4658_v58  ;;  %v2329_v60 = vpop.f32.mrf.mxu1  ;;  %v4615_v17 = vld [vmem:[%s10208_s13 + $0x28] sm:$0xff]  ;;  %v4616_v42 = vld [vmem:[%s10208_s13 + $0x30] sm:$0xff]  ;;  %v4617_v0 = vld [vmem:[%s10208_s13 + $0x38] sm:$0xff] }
 0x67f   :  { %v2309_v49 = vpop.f32.mrf.mxu0  ;;  %4721 = vmatpush.msrb.mxu3 %v4644_v62  ;;  %v4612_v22 = vld [vmem:[%s10208_s13 + $0x10] sm:$0xff]  ;;  %v4613_v52 = vld [vmem:[%s10208_s13 + $0x18] sm:$0xff]  ;;  %v4601_v5 = vld [vmem:[%s10205_s10 + $0x40] sm:$0xff] }
 0x680   :  { %4700 = vmatpush.msrb.mxu2 %v4647_v33  ;;  %4678 = vmatpush.msrb.mxu1 %v4654_v55  ;;  %v4630_v33 = vld [vmem:[%s10208_s13 + $0xa0] sm:$0xff]  ;;  %v4603_v45 = vld [vmem:[%s10205_s10 + $0x50] sm:$0xff] }
 0x681   :  { %4722 = vmatpush.msrb.mxu3 %v4640_v29  ;;  %v4597_v58 = vld [vmem:[%s10205_s10 + $0x20] sm:$0xff]  ;;  %v4599_v62 = vld [vmem:[%s10205_s10 + $0x30] sm:$0xff]  ;;  %v4602_v29 = vld [vmem:[%s10205_s10 + $0x48] sm:$0xff] }
 0x682   :  { %4701 = vmatpush.msrb.mxu2 %v4643_v25  ;;  %4679 = vmatpush.msrb.mxu1 %v4650_v7  ;;  %v4626_v25 = vld [vmem:[%s10208_s13 + $0x80] sm:$0xff]  ;;  %v4594_v7 = vld [vmem:[%s10205_s10 + $0x8] sm:$0xff] }
 0x683   :  { %v3728_v8 = vpop.permute.xlu1 %3727  ;;  %v3726_v50 = vpop.permute.xlu0 %3725  ;;  %4723 = vmatpush.msrb.mxu3 %v4636_v16  ;;  %v4593_v55 = vld [vmem:[%s10205_s10] sm:$0xff]  ;;  %v5567_v16 = vmov 1  }
 0x684   :  { %v3732_v10 = vsel %vm262_vm7, %v3728_v8, %v3730_v24  ;;  %v3731_v4 = vsel %vm262_vm7, %v3726_v50, %v3728_v8  ;;  %4702 = vmatpush.msrb.mxu2 %v4639_v39  ;;  %v4637_v24 = vld [vmem:[%s10208_s13 + $0xd8] sm:$0xff]  ;;  %v2330_v8 = vadd.f32 %v2329_v60, %v2309_v49  ;;  %v4631_v50 = vld [vmem:[%s10208_s13 + $0xa8] sm:$0xff]  ;;  %v4618_v39 = vld [vmem:[%s10208_s13 + $0x40] sm:$0xff]  ;;  %5461 = vset.pattern.permute.xlu1 %v5567_v16 }
 0x685   :  { %v3736_v30 = vadd.f32 %v3732_v10, %v3716_v37  ;;  %v3735_v34 = vadd.f32 %v3731_v4, %v3715_v1  ;;  %v4646_v37 = vld [vmem:[%s10208_s13 + $0x120] sm:$0xff]  ;;  %v848_v1 = vadd.f32 %v5464_v23, %v843_v56  ;;  %v4633_v10 = vld [vmem:[%s10208_s13 + $0xb8] sm:$0xff]  ;;  %v4595_v23 = vld [vmem:[%s10205_s10 + $0x10] sm:$0xff] }
 0x686   :  { %4703 = vmatpush.msrb.mxu2 %v4635_v43  ;;  %v4642_v4 = vld [vmem:[%s10208_s13 + $0x100] sm:$0xff]  ;;  %4680 = vmatpush.msrb.mxu1 %v4646_v37  ;;  %v4598_v60 = vld [vmem:[%s10205_s10 + $0x28] sm:$0xff]  ;;  %v5566_v43 = vmov 0  }
 0x687   :  { %v3740_v46 = vadd.f32 %v3738_v9, %v3736_v30  ;;  %v3739_v47 = vadd.f32 %v3738_v9, %v3735_v34  ;;  %v4632_v9 = vld [vmem:[%s10208_s13 + $0xb0] sm:$0xff]  ;;  %v1590_v30 = vadd.f32 %v1588_v15, %v848_v1  ;;  %v4622_v56 = vld [vmem:[%s10208_s13 + $0x60] sm:$0xff]  ;;  %5460 = vset.pattern.permute.xlu0 %v5566_v43  ;;  %v5002_v16 = vld [vmem:[%s10209_s14 + $0x48] sm:$0xff] }
 0x688   :  { %4704 = vmatpush.msrb.mxu2 %v4631_v50  ;;  %4724 = vmatpush.msrb.mxu3 %v4632_v9  ;;  %v4614_v49 = vld [vmem:[%s10208_s13 + $0x20] sm:$0xff] }
 0x689   :  { %v3742_v26 = vmax.f32 %v3740_v46, 0.0  ;;  %v3741_v19 = vmax.f32 %v3739_v47, 0.0  ;;  %v4627_v46 = vld [vmem:[%s10208_s13 + $0x88] sm:$0xff]  ;;  %v4628_v47 = vld [vmem:[%s10208_s13 + $0x90] sm:$0xff]  ;;  %v2332_v32 = vadd.f32 %v2330_v8, %v1590_v30  ;;  %4681 = vmatpush.msrb.mxu1 %v4642_v4  ;;  %v4851_v15 = vld [vmem:[%s10628_s6] sm:$0xff] }
 0x68a   :  { %4705 = vmatpush.msrb.mxu2 %v4627_v46  ;;  %4725 = vmatpush.msrb.mxu3 %v4628_v47  ;;  %v5465_v37 = vld [vmem:[%s10204_s9] ss:$0 sm:$0xff] }
 0x68b   :  { %3792 = vmatmul.f32.vlgmr.msra.gmra.mxu0 %v3741_v19  ;;  %3812 = vmatmul.f32.vlgmr.msra.gmra.mxu1 %v3742_v26  ;;  %v4629_v26 = vld [vmem:[%s10208_s13 + $0x98] sm:$0xff]  ;;  %v4638_v19 = vld [vmem:[%s10208_s13 + $0xe0] sm:$0xff] }
 0x68c   :  { %4734 = vmatpush.msra.mxu0 %v4673_v51  ;;  %4682 = vmatpush.msrb.mxu1 %v4638_v19  ;;  %v10103_v46 = vld [vmem:[%s10207_s12] sm:$0xf] }
 0x68d   :  { %4706 = vmatpush.msrb.mxu2 %v4623_v2  ;;  %4726 = vmatpush.msrb.mxu3 %v4624_v53 }
 0x68e   :  { %4735 = vmatpush.msra.mxu0 %v4669_v48  ;;  %4683 = vmatpush.msrb.mxu1 %v4634_v59 }
 0x68f   :  { %4707 = vmatpush.msrb.mxu2 %v4619_v35  ;;  %4856 = vperm.xlu0 %5460, %v4851_v15   ;;  %v5008_v35 = vld [vmem:[%s10209_s14 + $0x78] sm:$0xff] }
 0x690   :  { %4736 = vmatpush.msra.mxu0 %v4665_v31  ;;  %v4620_v31 = vld [vmem:[%s10208_s13 + $0x50] sm:$0xff]  ;;  %4684 = vmatpush.msrb.mxu1 %v4630_v33 }
 0x691   :  { %4727 = vmatpush.msrb.mxu3 %v4620_v31  ;;  %4708 = vmatpush.msrb.mxu2 %v4615_v17  ;;  %v5007_v17 = vld [vmem:[%s10209_s14 + $0x70] sm:$0xff] }
 0x692   :  { %4737 = vmatpush.msra.mxu0 %v4661_v61  ;;  %4685 = vmatpush.msrb.mxu1 %v4626_v25 }
 0x693   :  { %4728 = vmatpush.msrb.mxu3 %v4616_v42  ;;  %4709 = vmatpush.msrb.mxu2 %v4611_v44 }
 0x694   :  { %4738 = vmatpush.msra.mxu0 %v4657_v13  ;;  %v4609_v13 = vld [vmem:[%s10627_s22] sm:$0xff]  ;;  %4686 = vmatpush.msrb.mxu1 %v4622_v56  ;;  %v5004_v56 = vld [vmem:[%s10209_s14 + $0x58] sm:$0xff] }
 0x695   :  { %4729 = vmatpush.msrb.mxu3 %v4612_v22  ;;  %4710 = vmatmul.f32.vlgmr.msrb.gmra.mxu2 %v4609_v13 }
 0x696   :  { %4739 = vmatpush.msra.mxu0 %v4653_v28  ;;  %v4608_v28 = vld [vmem:[%s10205_s10 + $0x78] sm:$0xff]  ;;  %4730 = vmatmul.f32.vlgmr.msrb.gmra.mxu3 %v4609_v13 }
 0x697   :  { %4769 = vmatpush.msra.mxu2 %v4605_v11  ;;  %4809 = vmatpush.msra.mxu3 %v4607_v57  ;;  %v5006_v57 = vld [vmem:[%s10209_s14 + $0x68] sm:$0xff] }
 0x698   :  { %4740 = vmatpush.msra.mxu0 %v4649_v54  ;;  %v4604_v54 = vld [vmem:[%s10205_s10 + $0x58] sm:$0xff]  ;;  %4687 = vmatpush.msrb.mxu1 %v4618_v39  ;;  %v4840_v39 = vperm.slane %v10103_v46, 1 }
 0x699   :  { %4770 = vmatpush.msra.mxu2 %v4601_v5  ;;  %4810 = vmatpush.msra.mxu3 %v4603_v45  ;;  %v5005_v45 = vld [vmem:[%s10209_s14 + $0x60] sm:$0xff] }
 0x69a   :  { %4741 = vmatpush.msra.mxu0 %v4645_v41  ;;  %v4600_v41 = vld [vmem:[%s10205_s10 + $0x38] sm:$0xff]  ;;  %4688 = vmatpush.msrb.mxu1 %v4614_v49 }
 0x69b   :  { %4771 = vmatpush.msra.mxu2 %v4597_v58  ;;  %4811 = vmatpush.msra.mxu3 %v4599_v62 }
 0x69c   :  { %4742 = vmatpush.msra.mxu0 %v4641_v3  ;;  %v4610_v3 = vld [vmem:[%s10208_s13] sm:$0xff]  ;;  %4882 = vperm.xlu1 %5461, %v4851_v15  }
 0x69d   :  { %4772 = vmatpush.msra.mxu2 %v4593_v55  ;;  %4812 = vmatpush.msra.mxu3 %v4595_v23 }
 0x69e   :  { %4743 = vmatpush.msra.mxu0 %v4637_v24  ;;  %4689 = vmatpush.msrb.mxu1 %v4610_v3  ;;  %v5568_v24 = vmov 2  }
 0x69f   :  { %4690 = vmatmul.f32.vlgmr.msrb.gmra.mxu1 %v4609_v13  ;;  %5462 = vset.pattern.permute.xlu2 %v5568_v24 }
 0x6a0   :  { %4744 = vmatpush.msra.mxu0 %v4633_v10  ;;  %4906 = vperm.xlu2 %5462, %v4851_v15   ;;  %v10094_v10 = vld [vmem:[%s10206_s11 + $0x8] sm:$0x77] }
 0x6a1   :  { %5463 = vset.pattern.permute.xlu0 %v5568_v24  ;;  %v4864_v4 = vperm.slane %v10094_v10, 4  ;;  %5013 = vmatpush.msra.mxu1 %v5008_v35  ;;  %v5001_v24 = vld [vmem:[%s10209_s14 + $0x40] sm:$0xff] }
 0x6a2   :  { %4745 = vmatpush.msra.mxu0 %v4629_v26  ;;  %v4888_v26 = vperm.slane %v10094_v10, 5 }
 0x6a3   :  { %v4872_v47 = vperm.slane %v4864_v4, 0  ;;  %5014 = vmatpush.msra.mxu1 %v5007_v17 }
 0x6a4   :  { %4746 = vmatpush.msra.mxu0 %v4625_v20  ;;  %v4912_v20 = vperm.slane %v10094_v10, 6 }
 0x6a5   :  { %5015 = vmatpush.msra.mxu1 %v5006_v57 }
 0x6a6   :  { %4747 = vmatpush.msra.mxu0 %v4621_v63 }
 0x6a7   :  { %5016 = vmatpush.msra.mxu1 %v5005_v45 }
 0x6a8   :  { %4748 = vmatpush.msra.mxu0 %v4617_v0 }
 0x6a9   :  { %5017 = vmatpush.msra.mxu1 %v5004_v56 }
 0x6aa   :  { %4749 = vmatpush.msra.mxu0 %v4613_v52 }
 0x6ae   :  { %v3051_v36 = vpop.f32.mrf.mxu2  ;;  %v3071_v40 = vpop.f32.mrf.mxu3 }
 0x6af   :  { %v3072_v34 = vadd.f32 %v3071_v40, %v3051_v36  ;;  %v4596_v36 = vld [vmem:[%s10205_s10 + $0x18] sm:$0xff]  ;;  %v4606_v40 = vld [vmem:[%s10205_s10 + $0x68] sm:$0xff] }
 0x6b0   :  { %4789 = vmatpush.msrb.mxu2 %v4606_v40 }
 0x6b1   :  { %v3074_v48 = vadd.f32 %v3072_v34, %v2332_v32  ;;  %v4852_v34 = vld [vmem:[%s10206_s11] sm:$0x77] }
 0x6b2   :  { %4790 = vmatpush.msrb.mxu2 %v4602_v29  ;;  %v4861_v19 = vperm.slane %v4852_v34, 0  ;;  %v4885_v2 = vperm.slane %v4852_v34, 1  ;;  %v4862_v22 = vperm.slane %v4852_v34, 4  ;;  %v4910_v62 = vperm.slane %v4852_v34, 6  ;;  %v5003_v29 = vld [vmem:[%s10209_s14 + $0x50] sm:$0xff] }
 0x6b3   :  { %5018 = vmatpush.msra.mxu1 %v5003_v29 }
 0x6b4   :  { %4791 = vmatpush.msrb.mxu2 %v4598_v60  ;;  %v4869_v59 = vperm.slane %v4861_v19, 0  ;;  %v4870_v25 = vperm.slane %v4862_v22, 0  ;;  %v4998_v19 = vld [vmem:[%s10209_s14 + $0x28] sm:$0xff] }
 0x6b5   :  { %5019 = vmatpush.msra.mxu1 %v5002_v16 }
 0x6b6   :  { %4792 = vmatpush.msrb.mxu2 %v4594_v7  ;;  %v4918_v7 = vperm.slane %v4910_v62, 2 }
 0x6b7   :  { %5020 = vmatpush.msra.mxu1 %v5001_v24 }
 0x6fa   :  { %v10122_v52 = vpop.permute.xlu2 %4906 }
 0x6fb   :  { %v4922_v4 = vmul.f32 %v4918_v7, %v10122_v52 }
 0x6fe   :  { %v4535_v6 = vpop.f32.mrf.mxu2  ;;  %v4555_v27 = vpop.f32.mrf.mxu3 }
 0x6ff   :  { %v4556_v21 = vadd.f32 %v4555_v27, %v4535_v6  ;;  %v4842_v6 = vperm.slane %v10103_v46, 3 }
 0x701   :  { %v10106_v32 = vpop.permute.xlu0 %4856 }
 0x702   :  { %v4874_v3 = vmul.f32 %v4870_v25, %v10106_v32 }
 0x708   :  { %v3793_v18 = vpop.f32.mrf.mxu0  ;;  %v3813_v51 = vpop.f32.mrf.mxu1 }
 0x709   :  { %v3814_v12 = vadd.f32 %v3813_v51, %v3793_v18  ;;  %v4876_v18 = vmul.f32 %v4872_v47, %v10106_v32  ;;  %v4896_v51 = vperm.slane %v4888_v26, 1  ;;  %v4863_v47 = vperm.slane %v10094_v10, 0 }
 0x70b   :  { %v3816_v61 = vadd.f32 %v3814_v12, %v3074_v48  ;;  %v4909_v12 = vperm.slane %v4852_v34, 2 }
 0x70d   :  { %v4558_v38 = vadd.f32 %v4556_v21, %v3816_v61  ;;  %v4893_v21 = vperm.slane %v4885_v2, 1  ;;  %v4839_v61 = vperm.slane %v10103_v46, 0  ;;  %v4997_v2 = vld [vmem:[%s10209_s14 + $0x20] sm:$0xff] }
 0x70e   :  { %v10111_v48 = vpop.permute.xlu1 %4882 }
 0x70f   :  { %v4559_v14 = vmax.f32 %v4558_v38, 0.0  ;;  %v4900_v0 = vmul.f32 %v4896_v51, %v10111_v48  ;;  %v4920_v38 = vperm.slane %v4912_v20, 2  ;;  %v4897_v5 = vmul.f32 %v4893_v21, %v10111_v48  ;;  %v4996_v20 = vld [vmem:[%s10209_s14 + $0x18] sm:$0xff] }
 0x711   :  { %5439 = vmatmul.msk.f32.vlgmr.msrb.gmra.mxu0 %vm4568_vm8, %v4559_v14  ;;  %v4917_v14 = vperm.slane %v4909_v12, 2  ;;  %v4924_v58 = vmul.f32 %v4920_v38, %v10122_v52 }
 0x712   :  { %4829 = vmatpush.msrb.mxu0 %v4608_v28  ;;  %v4886_v28 = vperm.slane %v4852_v34, 5  ;;  %v4999_v34 = vld [vmem:[%s10209_s14 + $0x30] sm:$0xff] }
 0x714   :  { %4830 = vmatpush.msrb.mxu0 %v4604_v54 }
 0x716   :  { %4831 = vmatpush.msrb.mxu0 %v4600_v41  ;;  %v4921_v41 = vmul.f32 %v4917_v14, %v10122_v52 }
 0x718   :  { %4832 = vmatpush.msrb.mxu0 %v4596_v36  ;;  %v4711_v30 = vpop.f32.mrf.mxu2  ;;  %v4894_v36 = vperm.slane %v4886_v28, 1 }
 0x719   :  { %4750 = vmatmul.f32.vlgmr.msra.gmra.mxu0 %v4609_v13  ;;  %v4873_v13 = vmul.f32 %v4869_v59, %v10106_v32  ;;  %v4731_v23 = vpop.f32.mrf.mxu3  ;;  %v4887_v59 = vperm.slane %v10094_v10, 1 }
 0x71c   :  { %v4691_v63 = vpop.f32.mrf.mxu1 }
 0x78e   :  { %v4589_v1 = vpop.f32.mrf.mxu0 }
 0x78f   :  { %v4590_v8 = vadd.f32 %v5465_v37, %v4589_v1  ;;  %v4898_v37 = vmul.f32 %v4894_v36, %v10111_v48 }
 0x791   :  { %v4592_v50 = vmax.f32 %v4590_v8, 0.0 }
 0x793   :  { %5440 = vmatmul.msk.f32.vlgmr.msra.gmra.mxu2 %vm4568_vm8, %v4592_v50  ;;  %5442 = vmatmul.msk.f32.vlgmr.msra.gmra.mxu3 %vm4568_vm8, %v4592_v50 }
 0x794   :  { %5443 = vmatmul.msk.f32.vlgmr.msrb.gmra.mxu0 %vm4568_vm8, %v4592_v50 }
 0x796   :  { %v4751_v9 = vpop.f32.mrf.mxu0 }
 0x79b   :  { %5441 = vmatmul.msk.f32.vlgmr.msrb.gmra.mxu2 %vm4568_vm8, %v4592_v50  ;;  %v5000_v50 = vld [vmem:[%s10209_s14 + $0x38] sm:$0xff] }
 0x79c   :  { %5021 = vmatpush.msra.mxu1 %v5000_v50 }
 0x79e   :  { %5022 = vmatpush.msra.mxu1 %v4999_v34 }
 0x7a0   :  { %5023 = vmatpush.msra.mxu1 %v4998_v19 }
 0x7a2   :  { %5024 = vmatpush.msra.mxu1 %v4997_v2 }
 0x7a4   :  { %5025 = vmatpush.msra.mxu1 %v4996_v20 }
 0x811   :  { %v4834_v27 = vpop.f32.mrf.mxu0 }
 0x812   :  { %v4835_v53 = vadd.f32 %v4834_v27, %v4751_v9 }
 0x814   :  { %v4850_v31 = vadd.f32 %v4842_v6, %v4835_v53 }
 0x816   :  { %v4880_v42 = vadd.f32 %v4876_v18, %v4850_v31  ;;  %v4774_v44 = vpop.f32.mrf.mxu2  ;;  %v4814_v6 = vpop.f32.mrf.mxu3  ;;  %v4871_v18 = vperm.slane %v4863_v47, 0  ;;  %v4841_v31 = vperm.slane %v10103_v46, 2 }
 0x817   :  { %v4775_v11 = vadd.f32 %v4774_v44, %v4691_v63  ;;  %v4815_v35 = vadd.f32 %v4814_v6, %v4731_v23  ;;  %v4995_v63 = vld [vmem:[%s10209_s14 + $0x10] sm:$0xff]  ;;  %v4993_v44 = vld [vmem:[%s10209_s14] sm:$0xff] }
 0x818   :  { %v4904_v54 = vadd.f32 %v4900_v0, %v4880_v42  ;;  %v4875_v17 = vmul.f32 %v4871_v18, %v10106_v32  ;;  %v4895_v42 = vperm.slane %v4887_v59, 1  ;;  %v4911_v0 = vperm.slane %v10094_v10, 2  ;;  %5026 = vmatpush.msra.mxu1 %v4995_v63 }
 0x819   :  { %v4847_v33 = vadd.f32 %v4839_v61, %v4775_v11  ;;  %v4994_v61 = vld [vmem:[%s10209_s14 + $0x8] sm:$0xff]  ;;  %v4849_v38 = vadd.f32 %v4841_v31, %v4815_v35 }
 0x81a   :  { %v4928_v49 = vadd.f32 %v4924_v58, %v4904_v54  ;;  %5027 = vmatpush.msra.mxu1 %v4994_v61  ;;  %v4899_v14 = vmul.f32 %v4895_v42, %v10111_v48  ;;  %v4919_v11 = vperm.slane %v4911_v0, 2 }
 0x81b   :  { %v4877_v55 = vadd.f32 %v4873_v13, %v4847_v33  ;;  %v4879_v57 = vadd.f32 %v4875_v17, %v4849_v38 }
 0x81c   :  { %v5446_v9 = vmul.f32 -1.442695, %v4928_v49  ;;  %5028 = vmatpush.msra.mxu1 %v4993_v44 }
 0x81d   :  { %v4901_v40 = vadd.f32 %v4897_v5, %v4877_v55  ;;  %v4923_v5 = vmul.f32 %v4919_v11, %v10122_v52  ;;  %v4903_v33 = vadd.f32 %v4899_v14, %v4879_v57 }
 0x81e   :  { %v4794_v60 = vpop.f32.mrf.mxu2 }
 0x81f   :  { %v4925_v15 = vadd.f32 %v4921_v41, %v4901_v40  ;;  %v4795_v43 = vadd.f32 %v4794_v60, %v4711_v30  ;;  %v4927_v25 = vadd.f32 %v4923_v5, %v4903_v33 }
 0x821   :  { %v5444_v1 = vmul.f32 -1.442695, %v4925_v15  ;;  %v4848_v8 = vadd.f32 %v4840_v39, %v4795_v43  ;;  %v4987_v15 = vld [vmem:[%s10198_s3] sm:$0xff] }
 0x823   :  { %5467 = vpow2.f32 %v5444_v1  ;;  %v4878_v30 = vadd.f32 %v4874_v3, %v4848_v8 }
 0x824   :  { %5469 = vpow2.f32 %v5446_v9 }
 0x825   :  { %v4902_v26 = vadd.f32 %v4898_v37, %v4878_v30 }
 0x827   :  { %v4926_v27 = vadd.f32 %v4922_v4, %v4902_v26 }
 0x829   :  { %v5468_v53 = vpop.eup %5467  ;;  %v5445_v51 = vmul.f32 -1.442695, %v4926_v27  ;;  %v5466_v27 = vld [vmem:[%s10210_s15] ss:$0 sm:$0xff] }
 0x82a   :  { %v4932_v12 = vadd.f32 1.0, %v5468_v53  ;;  %v5470_v21 = vpop.eup %5469 }
 0x82b   :  { %5471 = vpow2.f32 %v5445_v51  ;;  %v4971_v46 = vadd.f32 1.0, %v5470_v21 }
 0x82c   :  { %5473 = vrcp.f32 %v4932_v12  ;;  %v4944_v55 = vand.u32 2147483648, %v4932_v12  ;;  %vm4938_vm10 = vweird.f32 %v4932_v12  ;;  %v4942_v56 = vand.u32 2147483647, %v4932_v12 }
 0x82d   :  { %5475 = vrcp.f32 %v4971_v46  ;;  %v4983_v4 = vand.u32 2147483648, %v4971_v46  ;;  %vm4977_vm2 = vweird.f32 %v4971_v46  ;;  %v4981_v30 = vand.u32 2147483647, %v4971_v46 }
 0x82e   :  { %v4945_v29 = vor.u32 1.1754944e-38, %v4944_v55  ;;  %vm4943_vm13 = vcmp.eq.f32.partialorder %v4942_v56, 8.507059e+37 }
 0x82f   :  { %v4984_v47 = vor.u32 1.1754944e-38, %v4983_v4  ;;  %vm4982_vm4 = vcmp.eq.f32.partialorder %v4981_v30, 8.507059e+37 }
 0x831   :  { %v5472_v22 = vpop.eup %5471 }
 0x832   :  { %v5474_v13 = vpop.eup %5473  ;;  %v4951_v28 = vadd.f32 1.0, %v5472_v22 }
 0x833   :  { %v4934_v32 = vmul.f32 %v5474_v13, %v4932_v12  ;;  %v5476_v54 = vpop.eup %5475  ;;  %vm4939_vm9 = vweird.f32 %v5474_v13 }
 0x834   :  { %5477 = vrcp.f32 %v4951_v28  ;;  %v4973_v48 = vmul.f32 %v5476_v54, %v4971_v46  ;;  %vm4940_vm11 = vmor %vm4938_vm10, %vm4939_vm9  ;;  %v4963_v36 = vand.u32 2147483648, %v4951_v28  ;;  %v4961_v52 = vand.u32 2147483647, %v4951_v28 }
 0x835   :  { %v4935_v10 = vsub.f32 1.0, %v4934_v32  ;;  %5479 = vtanh.f32 %v4927_v25  ;;  %vm4957_vm14 = vweird.f32 %v4951_v28  ;;  %vm4978_vm1 = vweird.f32 %v5476_v54 }
 0x836   :  { %v4974_v49 = vsub.f32 1.0, %v4973_v48  ;;  %v4964_v7 = vor.u32 1.1754944e-38, %v4963_v36  ;;  %vm4962_vm0 = vcmp.eq.f32.partialorder %v4961_v52, 8.507059e+37  ;;  %vm4979_vm3 = vmor %vm4977_vm2, %vm4978_vm1 }
 0x837   :  { %v4936_v45 = vmul.f32 %v5474_v13, %v4935_v10 }
 0x838   :  { %v4975_v37 = vmul.f32 %v5476_v54, %v4974_v49 }
 0x839   :  { %v4937_v62 = vadd.f32 %v5474_v13, %v4936_v45 }
 0x83a   :  { %v5478_v58 = vpop.eup %5477  ;;  %v4976_v9 = vadd.f32 %v5476_v54, %v4975_v37 }
 0x83b   :  { %v4953_v41 = vmul.f32 %v5478_v58, %v4951_v28  ;;  %v4941_v40 = vsel %vm4940_vm11, %v5474_v13, %v4937_v62  ;;  %vm4958_vm12 = vweird.f32 %v5478_v58  ;;  %v5480_v16 = vpop.eup %5479 }
 0x83c   :  { %v4946_v3 = vsel %vm4943_vm13, %v4945_v29, %v4941_v40  ;;  %vm4959_vm15 = vmor %vm4957_vm14, %vm4958_vm12  ;;  %v4980_v34 = vsel %vm4979_vm3, %v5476_v54, %v4976_v9 }
 0x83d   :  { %v4954_v23 = vsub.f32 1.0, %v4953_v41  ;;  %v4989_v1 = vmul.f32 %v5480_v16, %v4946_v3  ;;  %v4985_v19 = vsel %vm4982_vm4, %v4984_v47, %v4980_v34 }
 0x83f   :  { %v4955_v39 = vmul.f32 %v5478_v58, %v4954_v23 }
 0x841   :  { %v4956_v60 = vadd.f32 %v5478_v58, %v4955_v39 }
 0x843   :  { %v4960_v43 = vsel %vm4959_vm15, %v5478_v58, %v4956_v60 }
 0x844   :  { %v4965_v24 = vsel %vm4962_vm0, %v4964_v7, %v4960_v43 }
 0x845   :  { %v4988_v8 = vmul.f32 %v4987_v15, %v4965_v24 }
 0x847   :  { %v4990_v50 = vadd.f32 %v4989_v1, %v4988_v8 }
 0x849   :  { %5481 = vtanh.f32 %v4990_v50  ;;  %5035 = vst [vmem:[%s10213_s18] sm:$0xff] %v4990_v50 }
 0x84f   :  { %v5482_v26 = vpop.eup %5481 }
 0x850   :  { %v4992_v6 = vmul.f32 %v5482_v26, %v4985_v19 }
 0x852   :  { %5029 = vmatmul.f32.vlgmr.msra.gmra.mxu1 %v4992_v6  ;;  %5034 = vst [vmem:[%s10212_s17] sm:$0xff] %v4992_v6 }
 0x8cf   :  { %v5030_v2 = vpop.f32.mrf.mxu1 }
 0x8d0   :  { %v5031_v53 = vadd.f32 %v5466_v27, %v5030_v2 }
 0x8d2   :  { %5033 = vst [vmem:[%s10211_s16] sm:$0xff] %v5031_v53 }
 0x8d3   :  { %5048 = vsyncpa [#allocation3], 1 }
 0x8d4   :  { %5049 = vsyncpa [#allocation5], 1 }

</bundles_post_ra>
